<compile_context>
chip_gen: v7x
topology: tpu7x:2x2x1
jax: 0.10.0
libtpu: 0.0.40
codegen_flags: <defaults>
</compile_context>

<pallas_src>
import functools

import jax
import jax.numpy as jnp
from jax.experimental import pallas as pl
from jax.experimental.pallas import tpu as pltpu


def _sigmoid(x):
    # exact sigmoid via one EUP tanh (no VPU divide on the serial LSTM path)
    return 0.5 * jnp.tanh(0.5 * x) + 0.5


def _elu(x):
    return jnp.where(x > 0.0, x, jnp.exp(jnp.minimum(x, 0.0)) - 1.0)


# ---------------------------------------------------------------------------
# Fused whole-network kernel
# ---------------------------------------------------------------------------
def _cnn_lstm_kernel(
    B,
    # --- inputs ---
    x_ref,                                               # (C0, B*L0) f32
    w1_ref, cb1_ref, cs1_ref, cd1_ref, sel1_ref,
    w2_ref, cb2_ref, cs2_ref, cd2_ref, sel2_ref,
    w3_ref, cb3_ref, cs3_ref, cd3_ref, sel3_ref,
    wih0_ref, whh0_ref, bg0_ref,
    wih1_ref, whh1_ref, bg1_ref,
    wih2_ref, whh2_ref, bg2_ref,
    wfc_ref, bfc_ref,
    # --- output ---
    out_ref,                                             # (B, 4) f32
    # --- VMEM scratch ---
    p1_ref, p2_ref, p3_ref, seq_ref,
):
    f32 = jnp.float32
    bf16 = jnp.bfloat16

    # ---- Conv1d(valid) + ELU + MaxPool1d(3,3) + BatchNorm1d (inference) ----
    def conv_block(x, w_ref, b_ref, sc_ref, sh_ref, sel_ref, patch_ref):
        # x: (Cin, B*L) f32, columns ordered (batch, position)
        Cin = x.shape[0]
        L = x.shape[1] // B
        K = w_ref.shape[1] // Cin
        Lout = L - K + 1
        # im2col into VMEM scratch: row = k*Cin + cin, col = b*Lout + l
        for b in range(B):
            for k in range(K):
                patch_ref[k * Cin:(k + 1) * Cin, b * Lout:(b + 1) * Lout] = (
                    x[:, b * L + k: b * L + k + Lout])
        patches = patch_ref[...].astype(bf16)                        # (K*Cin, B*Lout)
        acc = jnp.dot(w_ref[...], patches,
                      preferred_element_type=f32) + b_ref[...]       # (Cout, B*Lout)
        acc = _elu(acc)
        n = B * Lout
        m = jnp.maximum(jnp.maximum(acc[:, 0:n - 2], acc[:, 1:n - 1]),
                        acc[:, 2:n])                                 # sliding max
        pooled = jnp.dot(m, sel_ref[...],
                         preferred_element_type=f32)                 # (Cout, B*Lp)
        return pooled * sc_ref[...] + sh_ref[...]                    # folded BN

    x0 = x_ref[...].astype(f32)
    a1 = conv_block(x0, w1_ref, cb1_ref, cs1_ref, cd1_ref, sel1_ref, p1_ref)
    a2 = conv_block(a1, w2_ref, cb2_ref, cs2_ref, cd2_ref, sel2_ref, p2_ref)
    # block 3's selection matrix emits columns in (time, batch) order
    a3 = conv_block(a2, w3_ref, cb3_ref, cs3_ref, cd3_ref, sel3_ref, p3_ref)

    # ---- 3-layer LSTM (PyTorch gate order i|f|g|o) + fused final Linear ----
    H = whh0_ref.shape[0]
    TB = a3.shape[1]
    T = TB // B

    def lstm_layer(xs, wih_ref, whh_ref, bg_ref, out_seq_ref):
        # xs: (T*B, Din) f32, rows ordered (time, batch)
        # hoisted input projection: one matmul for all timesteps
        xg = jnp.dot(xs.astype(bf16), wih_ref[...],
                     preferred_element_type=f32) + bg_ref[...]       # (T*B, 4H)
        whh = whh_ref[...]
        h = jnp.zeros((B, H), f32)
        c = jnp.zeros((B, H), f32)
        for t in range(T):
            g = xg[t * B:(t + 1) * B, :] + jnp.dot(
                h.astype(bf16), whh, preferred_element_type=f32)     # (B, 4H)
            i = _sigmoid(g[:, 0:H])
            f = _sigmoid(g[:, H:2 * H])
            gg = jnp.tanh(g[:, 2 * H:3 * H])
            o = _sigmoid(g[:, 3 * H:4 * H])
            c = f * c + i * gg
            h = o * jnp.tanh(c)
            if out_seq_ref is not None:
                out_seq_ref[t * B:(t + 1) * B, :] = h
        return h

    xs0 = jnp.transpose(a3)                                          # (T*B, 50)
    lstm_layer(xs0, wih0_ref, whh0_ref, bg0_ref, seq_ref)
    xs1 = seq_ref[...]
    lstm_layer(xs1, wih1_ref, whh1_ref, bg1_ref, seq_ref)
    xs2 = seq_ref[...]
    h_last = lstm_layer(xs2, wih2_ref, whh2_ref, bg2_ref, None)      # (B, H)

    out_ref[...] = (jnp.dot(h_last, wfc_ref[...],
                            preferred_element_type=f32) + bfc_ref[...])


# ---------------------------------------------------------------------------
# Wrapper: parameter layout plumbing + single pallas_call
# ---------------------------------------------------------------------------
def _make_sel(B, Lout, Lp, time_major):
    # 0/1 matrix picking the stride-3 window starts out of the sliding max.
    cols = jnp.arange(B * Lp)
    if time_major:                     # output column order (time, batch)
        b = cols % B
        j = cols // B
    else:                              # output column order (batch, position)
        b = cols // Lp
        j = cols % Lp
    rows = jnp.arange(B * Lout - 2)[:, None]
    return (rows == (b * Lout + 3 * j)[None, :]).astype(jnp.float32)


def cnn_lstm_forward(x, p, eps=1e-5):
    # x: (B, 1, 22, L)
    B = x.shape[0]
    x = jnp.squeeze(x, axis=1).astype(jnp.float32)                   # (B, C0, L0)
    C0, L0 = x.shape[1], x.shape[2]
    # channel-major, batch folded into the length (lane) axis
    x_cf = jnp.transpose(x, (1, 0, 2)).reshape(C0, B * L0)           # (C0, B*L0)

    H = p["whh"][0].shape[1]

    conv_args = []
    scratch = []
    conv_w = [p["w1"], p["w2"], p["w3"]]
    conv_b = [p["b1"], p["b2"], p["b3"]]
    conv_g = [p["g1"], p["g2"], p["g3"]]
    conv_be = [p["be1"], p["be2"], p["be3"]]
    conv_m = [p["m1"], p["m2"], p["m3"]]
    conv_v = [p["v1"], p["v2"], p["v3"]]
    L = L0
    for i in range(3):
        w = conv_w[i]
        Cout, Cin, K = w.shape
        Lout = L - K + 1
        Lp = Lout // 3
        # weight rows reordered to match im2col patch rows (k*Cin + cin)
        w_flat = (jnp.transpose(w, (0, 2, 1))
                  .reshape(Cout, K * Cin).astype(jnp.bfloat16))
        inv = 1.0 / jnp.sqrt(conv_v[i] + eps)
        scale = (conv_g[i] * inv).reshape(Cout, 1).astype(jnp.float32)
        shift = (conv_be[i] - conv_m[i] * conv_g[i] * inv).reshape(Cout, 1).astype(jnp.float32)
        bias = conv_b[i].reshape(Cout, 1).astype(jnp.float32)
        sel = _make_sel(B, Lout, Lp, time_major=(i == 2))
        conv_args += [w_flat, bias, scale, shift, sel]
        scratch.append(pltpu.VMEM((K * Cin, B * Lout), jnp.float32))  # im2col buffer
        L = Lp
    T = L                                                             # LSTM seq length

    lstm_args = []
    for l in range(3):
        lstm_args += [
            jnp.transpose(p["wih"][l]).astype(jnp.bfloat16),          # (Din, 4H)
            jnp.transpose(p["whh"][l]).astype(jnp.bfloat16),          # (H, 4H)
            (p["bih"][l] + p["bhh"][l]).reshape(1, 4 * H).astype(jnp.float32),
        ]

    nout = p["wfc"].shape[0]
    wfc_t = jnp.transpose(p["wfc"]).astype(jnp.float32)               # (H, nout)
    bfc = p["bfc"].reshape(1, nout).astype(jnp.float32)

    scratch.append(pltpu.VMEM((T * B, H), jnp.float32))               # LSTM sequence buffer

    return pl.pallas_call(
        functools.partial(_cnn_lstm_kernel, B),
        out_shape=jax.ShapeDtypeStruct((B, nout), jnp.float32),
        scratch_shapes=scratch,
    )(x_cf, *conv_args, *lstm_args, wfc_t, bfc)


# ---------------------------------------------------------------------------
if __name__ == "__main__":
    key = jax.random.PRNGKey(0)
    keys = iter(jax.random.split(key, 64))

    def nrm(shape, s=0.1):
        return (s * jax.random.normal(next(keys), shape)).astype(jnp.float32)

    # Input: (B=2, 1, 22 channels, L=250) -> LSTM sequence length T=4.
    x = jax.random.normal(next(keys), (2, 1, 22, 250), dtype=jnp.float32)

    H = 64
    params = {
        # Conv block 1: Conv1d(22, 25, k=10) + BN(25)
        "w1": nrm((25, 22, 10)), "b1": nrm((25,)),
        "g1": 1.0 + nrm((25,)), "be1": nrm((25,)),
        "m1": nrm((25,)), "v1": 0.5 + jnp.abs(nrm((25,))),
        # Conv block 2: Conv1d(25, 30, k=12) + BN(30)
        "w2": nrm((30, 25, 12)), "b2": nrm((30,)),
        "g2": 1.0 + nrm((30,)), "be2": nrm((30,)),
        "m2": nrm((30,)), "v2": 0.5 + jnp.abs(nrm((30,))),
        # Conv block 3: Conv1d(30, 50, k=12) + BN(50)
        "w3": nrm((50, 30, 12)), "b3": nrm((50,)),
        "g3": 1.0 + nrm((50,)), "be3": nrm((50,)),
        "m3": nrm((50,)), "v3": 0.5 + jnp.abs(nrm((50,))),
        # 3-layer LSTM(50 -> 64), PyTorch gate order i|f|g|o
        "wih": [nrm((4 * H, 50)), nrm((4 * H, H)), nrm((4 * H, H))],
        "whh": [nrm((4 * H, H)), nrm((4 * H, H)), nrm((4 * H, H))],
        "bih": [nrm((4 * H,)), nrm((4 * H,)), nrm((4 * H,))],
        "bhh": [nrm((4 * H,)), nrm((4 * H,)), nrm((4 * H,))],
        # LazyLinear(4) resolved to Linear(64 -> 4)
        "wfc": nrm((4, H)), "bfc": nrm((4,)),
    }

    out = jax.jit(cnn_lstm_forward)(x, params)
    out = jax.block_until_ready(out)
    assert out.shape == (2, 4) and out.dtype == jnp.float32
    print("KERNEL_OK")
</pallas_src>

<mosaic_0001>
module attributes {stable_mosaic.version = 11 : i64} {
  func.func @_cnn_lstm_kernel(%arg0: memref<22x500xf32, #tpu.memory_space<vmem>>, %arg1: memref<25x220xbf16, #tpu.memory_space<vmem>>, %arg2: memref<25x1xf32, #tpu.memory_space<vmem>>, %arg3: memref<25x1xf32, #tpu.memory_space<vmem>>, %arg4: memref<25x1xf32, #tpu.memory_space<vmem>>, %arg5: memref<480x160xf32, #tpu.memory_space<vmem>>, %arg6: memref<30x300xbf16, #tpu.memory_space<vmem>>, %arg7: memref<30x1xf32, #tpu.memory_space<vmem>>, %arg8: memref<30x1xf32, #tpu.memory_space<vmem>>, %arg9: memref<30x1xf32, #tpu.memory_space<vmem>>, %arg10: memref<136x46xf32, #tpu.memory_space<vmem>>, %arg11: memref<50x360xbf16, #tpu.memory_space<vmem>>, %arg12: memref<50x1xf32, #tpu.memory_space<vmem>>, %arg13: memref<50x1xf32, #tpu.memory_space<vmem>>, %arg14: memref<50x1xf32, #tpu.memory_space<vmem>>, %arg15: memref<22x8xf32, #tpu.memory_space<vmem>>, %arg16: memref<50x256xbf16, #tpu.memory_space<vmem>>, %arg17: memref<64x256xbf16, #tpu.memory_space<vmem>>, %arg18: memref<1x256xf32, #tpu.memory_space<vmem>>, %arg19: memref<64x256xbf16, #tpu.memory_space<vmem>>, %arg20: memref<64x256xbf16, #tpu.memory_space<vmem>>, %arg21: memref<1x256xf32, #tpu.memory_space<vmem>>, %arg22: memref<64x256xbf16, #tpu.memory_space<vmem>>, %arg23: memref<64x256xbf16, #tpu.memory_space<vmem>>, %arg24: memref<1x256xf32, #tpu.memory_space<vmem>>, %arg25: memref<64x4xf32, #tpu.memory_space<vmem>>, %arg26: memref<1x4xf32, #tpu.memory_space<vmem>>, %arg27: memref<2x4xf32, #tpu.memory_space<vmem>>, %arg28: memref<220x482xf32, #tpu.memory_space<vmem>>, %arg29: memref<300x138xf32, #tpu.memory_space<vmem>>, %arg30: memref<360x24xf32, #tpu.memory_space<vmem>>, %arg31: memref<8x64xf32, #tpu.memory_space<vmem>>) attributes {dimension_semantics = [], scalar_prefetch = 0 : i64, scratch_operands = 4 : i64, tpu.core_type = #tpu.core_type<tc>} {
    %c0 = arith.constant 0 : index
    %c0_0 = arith.constant 0 : index
    %0 = vector.load %arg0[%c0, %c0_0] : memref<22x500xf32, #tpu.memory_space<vmem>>, vector<22x500xf32>
    %1 = vector.extract_strided_slice %0 {offsets = [0, 0], sizes = [22, 241], strides = [1, 1]} : vector<22x500xf32> to vector<22x241xf32>
    %c0_1 = arith.constant 0 : index
    %c0_2 = arith.constant 0 : index
    %2 = vector.load %arg28[%c0_1, %c0_2] : memref<220x482xf32, #tpu.memory_space<vmem>>, vector<22x241xf32>
    tpu.vector_store %arg28[%c0_1, %c0_2], %1 {strides = array<i32>} : memref<220x482xf32, #tpu.memory_space<vmem>>, vector<22x241xf32>,
    %3 = vector.extract_strided_slice %0 {offsets = [0, 1], sizes = [22, 241], strides = [1, 1]} : vector<22x500xf32> to vector<22x241xf32>
    %c22 = arith.constant 22 : index
    %c0_3 = arith.constant 0 : index
    %4 = vector.load %arg28[%c22, %c0_3] : memref<220x482xf32, #tpu.memory_space<vmem>>, vector<22x241xf32>
    tpu.vector_store %arg28[%c22, %c0_3], %3 {strides = array<i32>} : memref<220x482xf32, #tpu.memory_space<vmem>>, vector<22x241xf32>,
    %5 = vector.extract_strided_slice %0 {offsets = [0, 2], sizes = [22, 241], strides = [1, 1]} : vector<22x500xf32> to vector<22x241xf32>
    %c44 = arith.constant 44 : index
    %c0_4 = arith.constant 0 : index
    %6 = vector.load %arg28[%c44, %c0_4] : memref<220x482xf32, #tpu.memory_space<vmem>>, vector<22x241xf32>
    tpu.vector_store %arg28[%c44, %c0_4], %5 {strides = array<i32>} : memref<220x482xf32, #tpu.memory_space<vmem>>, vector<22x241xf32>,
    %7 = vector.extract_strided_slice %0 {offsets = [0, 3], sizes = [22, 241], strides = [1, 1]} : vector<22x500xf32> to vector<22x241xf32>
    %c66 = arith.constant 66 : index
    %c0_5 = arith.constant 0 : index
    %8 = vector.load %arg28[%c66, %c0_5] : memref<220x482xf32, #tpu.memory_space<vmem>>, vector<22x241xf32>
    tpu.vector_store %arg28[%c66, %c0_5], %7 {strides = array<i32>} : memref<220x482xf32, #tpu.memory_space<vmem>>, vector<22x241xf32>,
    %9 = vector.extract_strided_slice %0 {offsets = [0, 4], sizes = [22, 241], strides = [1, 1]} : vector<22x500xf32> to vector<22x241xf32>
    %c88 = arith.constant 88 : index
    %c0_6 = arith.constant 0 : index
    %10 = vector.load %arg28[%c88, %c0_6] : memref<220x482xf32, #tpu.memory_space<vmem>>, vector<22x241xf32>
    tpu.vector_store %arg28[%c88, %c0_6], %9 {strides = array<i32>} : memref<220x482xf32, #tpu.memory_space<vmem>>, vector<22x241xf32>,
    %11 = vector.extract_strided_slice %0 {offsets = [0, 5], sizes = [22, 241], strides = [1, 1]} : vector<22x500xf32> to vector<22x241xf32>
    %c110 = arith.constant 110 : index
    %c0_7 = arith.constant 0 : index
    %12 = vector.load %arg28[%c110, %c0_7] : memref<220x482xf32, #tpu.memory_space<vmem>>, vector<22x241xf32>
    tpu.vector_store %arg28[%c110, %c0_7], %11 {strides = array<i32>} : memref<220x482xf32, #tpu.memory_space<vmem>>, vector<22x241xf32>,
    %13 = vector.extract_strided_slice %0 {offsets = [0, 6], sizes = [22, 241], strides = [1, 1]} : vector<22x500xf32> to vector<22x241xf32>
    %c132 = arith.constant 132 : index
    %c0_8 = arith.constant 0 : index
    %14 = vector.load %arg28[%c132, %c0_8] : memref<220x482xf32, #tpu.memory_space<vmem>>, vector<22x241xf32>
    tpu.vector_store %arg28[%c132, %c0_8], %13 {strides = array<i32>} : memref<220x482xf32, #tpu.memory_space<vmem>>, vector<22x241xf32>,
    %15 = vector.extract_strided_slice %0 {offsets = [0, 7], sizes = [22, 241], strides = [1, 1]} : vector<22x500xf32> to vector<22x241xf32>
    %c154 = arith.constant 154 : index
    %c0_9 = arith.constant 0 : index
    %16 = vector.load %arg28[%c154, %c0_9] : memref<220x482xf32, #tpu.memory_space<vmem>>, vector<22x241xf32>
    tpu.vector_store %arg28[%c154, %c0_9], %15 {strides = array<i32>} : memref<220x482xf32, #tpu.memory_space<vmem>>, vector<22x241xf32>,
    %17 = vector.extract_strided_slice %0 {offsets = [0, 8], sizes = [22, 241], strides = [1, 1]} : vector<22x500xf32> to vector<22x241xf32>
    %c176 = arith.constant 176 : index
    %c0_10 = arith.constant 0 : index
    %18 = vector.load %arg28[%c176, %c0_10] : memref<220x482xf32, #tpu.memory_space<vmem>>, vector<22x241xf32>
    tpu.vector_store %arg28[%c176, %c0_10], %17 {strides = array<i32>} : memref<220x482xf32, #tpu.memory_space<vmem>>, vector<22x241xf32>,
    %19 = vector.extract_strided_slice %0 {offsets = [0, 9], sizes = [22, 241], strides = [1, 1]} : vector<22x500xf32> to vector<22x241xf32>
    %c198 = arith.constant 198 : index
    %c0_11 = arith.constant 0 : index
    %20 = vector.load %arg28[%c198, %c0_11] : memref<220x482xf32, #tpu.memory_space<vmem>>, vector<22x241xf32>
    tpu.vector_store %arg28[%c198, %c0_11], %19 {strides = array<i32>} : memref<220x482xf32, #tpu.memory_space<vmem>>, vector<22x241xf32>,
    %21 = vector.extract_strided_slice %0 {offsets = [0, 250], sizes = [22, 241], strides = [1, 1]} : vector<22x500xf32> to vector<22x241xf32>
    %c0_12 = arith.constant 0 : index
    %c241 = arith.constant 241 : index
    %22 = vector.load %arg28[%c0_12, %c241] : memref<220x482xf32, #tpu.memory_space<vmem>>, vector<22x241xf32>
    tpu.vector_store %arg28[%c0_12, %c241], %21 {strides = array<i32>} : memref<220x482xf32, #tpu.memory_space<vmem>>, vector<22x241xf32>,
    %23 = vector.extract_strided_slice %0 {offsets = [0, 251], sizes = [22, 241], strides = [1, 1]} : vector<22x500xf32> to vector<22x241xf32>
    %c22_13 = arith.constant 22 : index
    %c241_14 = arith.constant 241 : index
    %24 = vector.load %arg28[%c22_13, %c241_14] : memref<220x482xf32, #tpu.memory_space<vmem>>, vector<22x241xf32>
    tpu.vector_store %arg28[%c22_13, %c241_14], %23 {strides = array<i32>} : memref<220x482xf32, #tpu.memory_space<vmem>>, vector<22x241xf32>,
    %25 = vector.extract_strided_slice %0 {offsets = [0, 252], sizes = [22, 241], strides = [1, 1]} : vector<22x500xf32> to vector<22x241xf32>
    %c44_15 = arith.constant 44 : index
    %c241_16 = arith.constant 241 : index
    %26 = vector.load %arg28[%c44_15, %c241_16] : memref<220x482xf32, #tpu.memory_space<vmem>>, vector<22x241xf32>
    tpu.vector_store %arg28[%c44_15, %c241_16], %25 {strides = array<i32>} : memref<220x482xf32, #tpu.memory_space<vmem>>, vector<22x241xf32>,
    %27 = vector.extract_strided_slice %0 {offsets = [0, 253], sizes = [22, 241], strides = [1, 1]} : vector<22x500xf32> to vector<22x241xf32>
    %c66_17 = arith.constant 66 : index
    %c241_18 = arith.constant 241 : index
    %28 = vector.load %arg28[%c66_17, %c241_18] : memref<220x482xf32, #tpu.memory_space<vmem>>, vector<22x241xf32>
    tpu.vector_store %arg28[%c66_17, %c241_18], %27 {strides = array<i32>} : memref<220x482xf32, #tpu.memory_space<vmem>>, vector<22x241xf32>,
    %29 = vector.extract_strided_slice %0 {offsets = [0, 254], sizes = [22, 241], strides = [1, 1]} : vector<22x500xf32> to vector<22x241xf32>
    %c88_19 = arith.constant 88 : index
    %c241_20 = arith.constant 241 : index
    %30 = vector.load %arg28[%c88_19, %c241_20] : memref<220x482xf32, #tpu.memory_space<vmem>>, vector<22x241xf32>
    tpu.vector_store %arg28[%c88_19, %c241_20], %29 {strides = array<i32>} : memref<220x482xf32, #tpu.memory_space<vmem>>, vector<22x241xf32>,
    %31 = vector.extract_strided_slice %0 {offsets = [0, 255], sizes = [22, 241], strides = [1, 1]} : vector<22x500xf32> to vector<22x241xf32>
    %c110_21 = arith.constant 110 : index
    %c241_22 = arith.constant 241 : index
    %32 = vector.load %arg28[%c110_21, %c241_22] : memref<220x482xf32, #tpu.memory_space<vmem>>, vector<22x241xf32>
    tpu.vector_store %arg28[%c110_21, %c241_22], %31 {strides = array<i32>} : memref<220x482xf32, #tpu.memory_space<vmem>>, vector<22x241xf32>,
    %33 = vector.extract_strided_slice %0 {offsets = [0, 256], sizes = [22, 241], strides = [1, 1]} : vector<22x500xf32> to vector<22x241xf32>
    %c132_23 = arith.constant 132 : index
    %c241_24 = arith.constant 241 : index
    %34 = vector.load %arg28[%c132_23, %c241_24] : memref<220x482xf32, #tpu.memory_space<vmem>>, vector<22x241xf32>
    tpu.vector_store %arg28[%c132_23, %c241_24], %33 {strides = array<i32>} : memref<220x482xf32, #tpu.memory_space<vmem>>, vector<22x241xf32>,
    %35 = vector.extract_strided_slice %0 {offsets = [0, 257], sizes = [22, 241], strides = [1, 1]} : vector<22x500xf32> to vector<22x241xf32>
    %c154_25 = arith.constant 154 : index
    %c241_26 = arith.constant 241 : index
    %36 = vector.load %arg28[%c154_25, %c241_26] : memref<220x482xf32, #tpu.memory_space<vmem>>, vector<22x241xf32>
    tpu.vector_store %arg28[%c154_25, %c241_26], %35 {strides = array<i32>} : memref<220x482xf32, #tpu.memory_space<vmem>>, vector<22x241xf32>,
    %37 = vector.extract_strided_slice %0 {offsets = [0, 258], sizes = [22, 241], strides = [1, 1]} : vector<22x500xf32> to vector<22x241xf32>
    %c176_27 = arith.constant 176 : index
    %c241_28 = arith.constant 241 : index
    %38 = vector.load %arg28[%c176_27, %c241_28] : memref<220x482xf32, #tpu.memory_space<vmem>>, vector<22x241xf32>
    tpu.vector_store %arg28[%c176_27, %c241_28], %37 {strides = array<i32>} : memref<220x482xf32, #tpu.memory_space<vmem>>, vector<22x241xf32>,
    %39 = vector.extract_strided_slice %0 {offsets = [0, 259], sizes = [22, 241], strides = [1, 1]} : vector<22x500xf32> to vector<22x241xf32>
    %c198_29 = arith.constant 198 : index
    %c241_30 = arith.constant 241 : index
    %40 = vector.load %arg28[%c198_29, %c241_30] : memref<220x482xf32, #tpu.memory_space<vmem>>, vector<22x241xf32>
    tpu.vector_store %arg28[%c198_29, %c241_30], %39 {strides = array<i32>} : memref<220x482xf32, #tpu.memory_space<vmem>>, vector<22x241xf32>,
    %c0_31 = arith.constant 0 : index
    %c0_32 = arith.constant 0 : index
    %41 = vector.load %arg28[%c0_31, %c0_32] : memref<220x482xf32, #tpu.memory_space<vmem>>, vector<220x482xf32>
    %42 = arith.truncf %41 : vector<220x482xf32> to vector<220x482xbf16>
    %c0_33 = arith.constant 0 : index
    %c0_34 = arith.constant 0 : index
    %43 = vector.load %arg1[%c0_33, %c0_34] : memref<25x220xbf16, #tpu.memory_space<vmem>>, vector<25x220xbf16>
    %cst = arith.constant dense<0.000000e+00> : vector<25x482xf32>
    %44 = tpu.matmul %43, %42, %cst {dimension_numbers = #tpu.dot_dimension_numbers<[1], [0], [0], [1], [0, 0, 1, 1], [], []>} : vector<25x220xbf16>, vector<220x482xbf16>, vector<25x482xf32> -> vector<25x482xf32>
    %c0_35 = arith.constant 0 : index
    %c0_36 = arith.constant 0 : index
    %45 = vector.load %arg2[%c0_35, %c0_36] : memref<25x1xf32, #tpu.memory_space<vmem>>, vector<25x1xf32>
    %46 = vector.broadcast %45 : vector<25x1xf32> to vector<25x482xf32>
    %47 = arith.addf %44, %46 : vector<25x482xf32>
    %cst_37 = arith.constant 0.000000e+00 : f32
    %48 = vector.broadcast %cst_37 : f32 to vector<25x482xf32>
    %49 = arith.cmpf ogt, %47, %48 : vector<25x482xf32>
    %cst_38 = arith.constant 0.000000e+00 : f32
    %50 = vector.broadcast %cst_38 : f32 to vector<25x482xf32>
    %51 = arith.minimumf %47, %50 : vector<25x482xf32>
    %52 = math.exp %51 : vector<25x482xf32>
    %cst_39 = arith.constant 1.000000e+00 : f32
    %53 = vector.broadcast %cst_39 : f32 to vector<25x482xf32>
    %54 = arith.subf %52, %53 : vector<25x482xf32>
    %55 = arith.select %49, %47, %54 : vector<25x482xi1>, vector<25x482xf32>
    %56 = vector.extract_strided_slice %55 {offsets = [0, 0], sizes = [25, 480], strides = [1, 1]} : vector<25x482xf32> to vector<25x480xf32>
    %57 = vector.extract_strided_slice %55 {offsets = [0, 1], sizes = [25, 480], strides = [1, 1]} : vector<25x482xf32> to vector<25x480xf32>
    %58 = arith.maximumf %56, %57 : vector<25x480xf32>
    %59 = vector.extract_strided_slice %55 {offsets = [0, 2], sizes = [25, 480], strides = [1, 1]} : vector<25x482xf32> to vector<25x480xf32>
    %60 = arith.maximumf %58, %59 : vector<25x480xf32>
    %c0_40 = arith.constant 0 : index
    %c0_41 = arith.constant 0 : index
    %61 = vector.load %arg5[%c0_40, %c0_41] : memref<480x160xf32, #tpu.memory_space<vmem>>, vector<480x160xf32>
    %cst_42 = arith.constant dense<0.000000e+00> : vector<25x160xf32>
    %62 = tpu.matmul %60, %61, %cst_42 {dimension_numbers = #tpu.dot_dimension_numbers<[1], [0], [0], [1], [0, 0, 1, 1], [], []>} : vector<25x480xf32>, vector<480x160xf32>, vector<25x160xf32> -> vector<25x160xf32>
    %c0_43 = arith.constant 0 : index
    %c0_44 = arith.constant 0 : index
    %63 = vector.load %arg3[%c0_43, %c0_44] : memref<25x1xf32, #tpu.memory_space<vmem>>, vector<25x1xf32>
    %64 = vector.broadcast %63 : vector<25x1xf32> to vector<25x160xf32>
    %65 = arith.mulf %62, %64 : vector<25x160xf32>
    %c0_45 = arith.constant 0 : index
    %c0_46 = arith.constant 0 : index
    %66 = vector.load %arg4[%c0_45, %c0_46] : memref<25x1xf32, #tpu.memory_space<vmem>>, vector<25x1xf32>
    %67 = vector.broadcast %66 : vector<25x1xf32> to vector<25x160xf32>
    %68 = arith.addf %65, %67 : vector<25x160xf32>
    %69 = vector.extract_strided_slice %68 {offsets = [0, 0], sizes = [25, 69], strides = [1, 1]} : vector<25x160xf32> to vector<25x69xf32>
    %c0_47 = arith.constant 0 : index
    %c0_48 = arith.constant 0 : index
    %70 = vector.load %arg29[%c0_47, %c0_48] : memref<300x138xf32, #tpu.memory_space<vmem>>, vector<25x69xf32>
    tpu.vector_store %arg29[%c0_47, %c0_48], %69 {strides = array<i32>} : memref<300x138xf32, #tpu.memory_space<vmem>>, vector<25x69xf32>,
    %71 = vector.extract_strided_slice %68 {offsets = [0, 1], sizes = [25, 69], strides = [1, 1]} : vector<25x160xf32> to vector<25x69xf32>
    %c25 = arith.constant 25 : index
    %c0_49 = arith.constant 0 : index
    %72 = vector.load %arg29[%c25, %c0_49] : memref<300x138xf32, #tpu.memory_space<vmem>>, vector<25x69xf32>
    tpu.vector_store %arg29[%c25, %c0_49], %71 {strides = array<i32>} : memref<300x138xf32, #tpu.memory_space<vmem>>, vector<25x69xf32>,
    %73 = vector.extract_strided_slice %68 {offsets = [0, 2], sizes = [25, 69], strides = [1, 1]} : vector<25x160xf32> to vector<25x69xf32>
    %c50 = arith.constant 50 : index
    %c0_50 = arith.constant 0 : index
    %74 = vector.load %arg29[%c50, %c0_50] : memref<300x138xf32, #tpu.memory_space<vmem>>, vector<25x69xf32>
    tpu.vector_store %arg29[%c50, %c0_50], %73 {strides = array<i32>} : memref<300x138xf32, #tpu.memory_space<vmem>>, vector<25x69xf32>,
    %75 = vector.extract_strided_slice %68 {offsets = [0, 3], sizes = [25, 69], strides = [1, 1]} : vector<25x160xf32> to vector<25x69xf32>
    %c75 = arith.constant 75 : index
    %c0_51 = arith.constant 0 : index
    %76 = vector.load %arg29[%c75, %c0_51] : memref<300x138xf32, #tpu.memory_space<vmem>>, vector<25x69xf32>
    tpu.vector_store %arg29[%c75, %c0_51], %75 {strides = array<i32>} : memref<300x138xf32, #tpu.memory_space<vmem>>, vector<25x69xf32>,
    %77 = vector.extract_strided_slice %68 {offsets = [0, 4], sizes = [25, 69], strides = [1, 1]} : vector<25x160xf32> to vector<25x69xf32>
    %c100 = arith.constant 100 : index
    %c0_52 = arith.constant 0 : index
    %78 = vector.load %arg29[%c100, %c0_52] : memref<300x138xf32, #tpu.memory_space<vmem>>, vector<25x69xf32>
    tpu.vector_store %arg29[%c100, %c0_52], %77 {strides = array<i32>} : memref<300x138xf32, #tpu.memory_space<vmem>>, vector<25x69xf32>,
    %79 = vector.extract_strided_slice %68 {offsets = [0, 5], sizes = [25, 69], strides = [1, 1]} : vector<25x160xf32> to vector<25x69xf32>
    %c125 = arith.constant 125 : index
    %c0_53 = arith.constant 0 : index
    %80 = vector.load %arg29[%c125, %c0_53] : memref<300x138xf32, #tpu.memory_space<vmem>>, vector<25x69xf32>
    tpu.vector_store %arg29[%c125, %c0_53], %79 {strides = array<i32>} : memref<300x138xf32, #tpu.memory_space<vmem>>, vector<25x69xf32>,
    %81 = vector.extract_strided_slice %68 {offsets = [0, 6], sizes = [25, 69], strides = [1, 1]} : vector<25x160xf32> to vector<25x69xf32>
    %c150 = arith.constant 150 : index
    %c0_54 = arith.constant 0 : index
    %82 = vector.load %arg29[%c150, %c0_54] : memref<300x138xf32, #tpu.memory_space<vmem>>, vector<25x69xf32>
    tpu.vector_store %arg29[%c150, %c0_54], %81 {strides = array<i32>} : memref<300x138xf32, #tpu.memory_space<vmem>>, vector<25x69xf32>,
    %83 = vector.extract_strided_slice %68 {offsets = [0, 7], sizes = [25, 69], strides = [1, 1]} : vector<25x160xf32> to vector<25x69xf32>
    %c175 = arith.constant 175 : index
    %c0_55 = arith.constant 0 : index
    %84 = vector.load %arg29[%c175, %c0_55] : memref<300x138xf32, #tpu.memory_space<vmem>>, vector<25x69xf32>
    tpu.vector_store %arg29[%c175, %c0_55], %83 {strides = array<i32>} : memref<300x138xf32, #tpu.memory_space<vmem>>, vector<25x69xf32>,
    %85 = vector.extract_strided_slice %68 {offsets = [0, 8], sizes = [25, 69], strides = [1, 1]} : vector<25x160xf32> to vector<25x69xf32>
    %c200 = arith.constant 200 : index
    %c0_56 = arith.constant 0 : index
    %86 = vector.load %arg29[%c200, %c0_56] : memref<300x138xf32, #tpu.memory_space<vmem>>, vector<25x69xf32>
    tpu.vector_store %arg29[%c200, %c0_56], %85 {strides = array<i32>} : memref<300x138xf32, #tpu.memory_space<vmem>>, vector<25x69xf32>,
    %87 = vector.extract_strided_slice %68 {offsets = [0, 9], sizes = [25, 69], strides = [1, 1]} : vector<25x160xf32> to vector<25x69xf32>
    %c225 = arith.constant 225 : index
    %c0_57 = arith.constant 0 : index
    %88 = vector.load %arg29[%c225, %c0_57] : memref<300x138xf32, #tpu.memory_space<vmem>>, vector<25x69xf32>
    tpu.vector_store %arg29[%c225, %c0_57], %87 {strides = array<i32>} : memref<300x138xf32, #tpu.memory_space<vmem>>, vector<25x69xf32>,
    %89 = vector.extract_strided_slice %68 {offsets = [0, 10], sizes = [25, 69], strides = [1, 1]} : vector<25x160xf32> to vector<25x69xf32>
    %c250 = arith.constant 250 : index
    %c0_58 = arith.constant 0 : index
    %90 = vector.load %arg29[%c250, %c0_58] : memref<300x138xf32, #tpu.memory_space<vmem>>, vector<25x69xf32>
    tpu.vector_store %arg29[%c250, %c0_58], %89 {strides = array<i32>} : memref<300x138xf32, #tpu.memory_space<vmem>>, vector<25x69xf32>,
    %91 = vector.extract_strided_slice %68 {offsets = [0, 11], sizes = [25, 69], strides = [1, 1]} : vector<25x160xf32> to vector<25x69xf32>
    %c275 = arith.constant 275 : index
    %c0_59 = arith.constant 0 : index
    %92 = vector.load %arg29[%c275, %c0_59] : memref<300x138xf32, #tpu.memory_space<vmem>>, vector<25x69xf32>
    tpu.vector_store %arg29[%c275, %c0_59], %91 {strides = array<i32>} : memref<300x138xf32, #tpu.memory_space<vmem>>, vector<25x69xf32>,
    %93 = vector.extract_strided_slice %68 {offsets = [0, 80], sizes = [25, 69], strides = [1, 1]} : vector<25x160xf32> to vector<25x69xf32>
    %c0_60 = arith.constant 0 : index
    %c69 = arith.constant 69 : index
    %94 = vector.load %arg29[%c0_60, %c69] : memref<300x138xf32, #tpu.memory_space<vmem>>, vector<25x69xf32>
    tpu.vector_store %arg29[%c0_60, %c69], %93 {strides = array<i32>} : memref<300x138xf32, #tpu.memory_space<vmem>>, vector<25x69xf32>,
    %95 = vector.extract_strided_slice %68 {offsets = [0, 81], sizes = [25, 69], strides = [1, 1]} : vector<25x160xf32> to vector<25x69xf32>
    %c25_61 = arith.constant 25 : index
    %c69_62 = arith.constant 69 : index
    %96 = vector.load %arg29[%c25_61, %c69_62] : memref<300x138xf32, #tpu.memory_space<vmem>>, vector<25x69xf32>
    tpu.vector_store %arg29[%c25_61, %c69_62], %95 {strides = array<i32>} : memref<300x138xf32, #tpu.memory_space<vmem>>, vector<25x69xf32>,
    %97 = vector.extract_strided_slice %68 {offsets = [0, 82], sizes = [25, 69], strides = [1, 1]} : vector<25x160xf32> to vector<25x69xf32>
    %c50_63 = arith.constant 50 : index
    %c69_64 = arith.constant 69 : index
    %98 = vector.load %arg29[%c50_63, %c69_64] : memref<300x138xf32, #tpu.memory_space<vmem>>, vector<25x69xf32>
    tpu.vector_store %arg29[%c50_63, %c69_64], %97 {strides = array<i32>} : memref<300x138xf32, #tpu.memory_space<vmem>>, vector<25x69xf32>,
    %99 = vector.extract_strided_slice %68 {offsets = [0, 83], sizes = [25, 69], strides = [1, 1]} : vector<25x160xf32> to vector<25x69xf32>
    %c75_65 = arith.constant 75 : index
    %c69_66 = arith.constant 69 : index
    %100 = vector.load %arg29[%c75_65, %c69_66] : memref<300x138xf32, #tpu.memory_space<vmem>>, vector<25x69xf32>
    tpu.vector_store %arg29[%c75_65, %c69_66], %99 {strides = array<i32>} : memref<300x138xf32, #tpu.memory_space<vmem>>, vector<25x69xf32>,
    %101 = vector.extract_strided_slice %68 {offsets = [0, 84], sizes = [25, 69], strides = [1, 1]} : vector<25x160xf32> to vector<25x69xf32>
    %c100_67 = arith.constant 100 : index
    %c69_68 = arith.constant 69 : index
    %102 = vector.load %arg29[%c100_67, %c69_68] : memref<300x138xf32, #tpu.memory_space<vmem>>, vector<25x69xf32>
    tpu.vector_store %arg29[%c100_67, %c69_68], %101 {strides = array<i32>} : memref<300x138xf32, #tpu.memory_space<vmem>>, vector<25x69xf32>,
    %103 = vector.extract_strided_slice %68 {offsets = [0, 85], sizes = [25, 69], strides = [1, 1]} : vector<25x160xf32> to vector<25x69xf32>
    %c125_69 = arith.constant 125 : index
    %c69_70 = arith.constant 69 : index
    %104 = vector.load %arg29[%c125_69, %c69_70] : memref<300x138xf32, #tpu.memory_space<vmem>>, vector<25x69xf32>
    tpu.vector_store %arg29[%c125_69, %c69_70], %103 {strides = array<i32>} : memref<300x138xf32, #tpu.memory_space<vmem>>, vector<25x69xf32>,
    %105 = vector.extract_strided_slice %68 {offsets = [0, 86], sizes = [25, 69], strides = [1, 1]} : vector<25x160xf32> to vector<25x69xf32>
    %c150_71 = arith.constant 150 : index
    %c69_72 = arith.constant 69 : index
    %106 = vector.load %arg29[%c150_71, %c69_72] : memref<300x138xf32, #tpu.memory_space<vmem>>, vector<25x69xf32>
    tpu.vector_store %arg29[%c150_71, %c69_72], %105 {strides = array<i32>} : memref<300x138xf32, #tpu.memory_space<vmem>>, vector<25x69xf32>,
    %107 = vector.extract_strided_slice %68 {offsets = [0, 87], sizes = [25, 69], strides = [1, 1]} : vector<25x160xf32> to vector<25x69xf32>
    %c175_73 = arith.constant 175 : index
    %c69_74 = arith.constant 69 : index
    %108 = vector.load %arg29[%c175_73, %c69_74] : memref<300x138xf32, #tpu.memory_space<vmem>>, vector<25x69xf32>
    tpu.vector_store %arg29[%c175_73, %c69_74], %107 {strides = array<i32>} : memref<300x138xf32, #tpu.memory_space<vmem>>, vector<25x69xf32>,
    %109 = vector.extract_strided_slice %68 {offsets = [0, 88], sizes = [25, 69], strides = [1, 1]} : vector<25x160xf32> to vector<25x69xf32>
    %c200_75 = arith.constant 200 : index
    %c69_76 = arith.constant 69 : index
    %110 = vector.load %arg29[%c200_75, %c69_76] : memref<300x138xf32, #tpu.memory_space<vmem>>, vector<25x69xf32>
    tpu.vector_store %arg29[%c200_75, %c69_76], %109 {strides = array<i32>} : memref<300x138xf32, #tpu.memory_space<vmem>>, vector<25x69xf32>,
    %111 = vector.extract_strided_slice %68 {offsets = [0, 89], sizes = [25, 69], strides = [1, 1]} : vector<25x160xf32> to vector<25x69xf32>
    %c225_77 = arith.constant 225 : index
    %c69_78 = arith.constant 69 : index
    %112 = vector.load %arg29[%c225_77, %c69_78] : memref<300x138xf32, #tpu.memory_space<vmem>>, vector<25x69xf32>
    tpu.vector_store %arg29[%c225_77, %c69_78], %111 {strides = array<i32>} : memref<300x138xf32, #tpu.memory_space<vmem>>, vector<25x69xf32>,
    %113 = vector.extract_strided_slice %68 {offsets = [0, 90], sizes = [25, 69], strides = [1, 1]} : vector<25x160xf32> to vector<25x69xf32>
    %c250_79 = arith.constant 250 : index
    %c69_80 = arith.constant 69 : index
    %114 = vector.load %arg29[%c250_79, %c69_80] : memref<300x138xf32, #tpu.memory_space<vmem>>, vector<25x69xf32>
    tpu.vector_store %arg29[%c250_79, %c69_80], %113 {strides = array<i32>} : memref<300x138xf32, #tpu.memory_space<vmem>>, vector<25x69xf32>,
    %115 = vector.extract_strided_slice %68 {offsets = [0, 91], sizes = [25, 69], strides = [1, 1]} : vector<25x160xf32> to vector<25x69xf32>
    %c275_81 = arith.constant 275 : index
    %c69_82 = arith.constant 69 : index
    %116 = vector.load %arg29[%c275_81, %c69_82] : memref<300x138xf32, #tpu.memory_space<vmem>>, vector<25x69xf32>
    tpu.vector_store %arg29[%c275_81, %c69_82], %115 {strides = array<i32>} : memref<300x138xf32, #tpu.memory_space<vmem>>, vector<25x69xf32>,
    %c0_83 = arith.constant 0 : index
    %c0_84 = arith.constant 0 : index
    %117 = vector.load %arg29[%c0_83, %c0_84] : memref<300x138xf32, #tpu.memory_space<vmem>>, vector<300x138xf32>
    %118 = arith.truncf %117 : vector<300x138xf32> to vector<300x138xbf16>
    %c0_85 = arith.constant 0 : index
    %c0_86 = arith.constant 0 : index
    %119 = vector.load %arg6[%c0_85, %c0_86] : memref<30x300xbf16, #tpu.memory_space<vmem>>, vector<30x300xbf16>
    %cst_87 = arith.constant dense<0.000000e+00> : vector<30x138xf32>
    %120 = tpu.matmul %119, %118, %cst_87 {dimension_numbers = #tpu.dot_dimension_numbers<[1], [0], [0], [1], [0, 0, 1, 1], [], []>} : vector<30x300xbf16>, vector<300x138xbf16>, vector<30x138xf32> -> vector<30x138xf32>
    %c0_88 = arith.constant 0 : index
    %c0_89 = arith.constant 0 : index
    %121 = vector.load %arg7[%c0_88, %c0_89] : memref<30x1xf32, #tpu.memory_space<vmem>>, vector<30x1xf32>
    %122 = vector.broadcast %121 : vector<30x1xf32> to vector<30x138xf32>
    %123 = arith.addf %120, %122 : vector<30x138xf32>
    %cst_90 = arith.constant 0.000000e+00 : f32
    %124 = vector.broadcast %cst_90 : f32 to vector<30x138xf32>
    %125 = arith.cmpf ogt, %123, %124 : vector<30x138xf32>
    %cst_91 = arith.constant 0.000000e+00 : f32
    %126 = vector.broadcast %cst_91 : f32 to vector<30x138xf32>
    %127 = arith.minimumf %123, %126 : vector<30x138xf32>
    %128 = math.exp %127 : vector<30x138xf32>
    %cst_92 = arith.constant 1.000000e+00 : f32
    %129 = vector.broadcast %cst_92 : f32 to vector<30x138xf32>
    %130 = arith.subf %128, %129 : vector<30x138xf32>
    %131 = arith.select %125, %123, %130 : vector<30x138xi1>, vector<30x138xf32>
    %132 = vector.extract_strided_slice %131 {offsets = [0, 0], sizes = [30, 136], strides = [1, 1]} : vector<30x138xf32> to vector<30x136xf32>
    %133 = vector.extract_strided_slice %131 {offsets = [0, 1], sizes = [30, 136], strides = [1, 1]} : vector<30x138xf32> to vector<30x136xf32>
    %134 = arith.maximumf %132, %133 : vector<30x136xf32>
    %135 = vector.extract_strided_slice %131 {offsets = [0, 2], sizes = [30, 136], strides = [1, 1]} : vector<30x138xf32> to vector<30x136xf32>
    %136 = arith.maximumf %134, %135 : vector<30x136xf32>
    %c0_93 = arith.constant 0 : index
    %c0_94 = arith.constant 0 : index
    %137 = vector.load %arg10[%c0_93, %c0_94] : memref<136x46xf32, #tpu.memory_space<vmem>>, vector<136x46xf32>
    %cst_95 = arith.constant dense<0.000000e+00> : vector<30x46xf32>
    %138 = tpu.matmul %136, %137, %cst_95 {dimension_numbers = #tpu.dot_dimension_numbers<[1], [0], [0], [1], [0, 0, 1, 1], [], []>} : vector<30x136xf32>, vector<136x46xf32>, vector<30x46xf32> -> vector<30x46xf32>
    %c0_96 = arith.constant 0 : index
    %c0_97 = arith.constant 0 : index
    %139 = vector.load %arg8[%c0_96, %c0_97] : memref<30x1xf32, #tpu.memory_space<vmem>>, vector<30x1xf32>
    %140 = vector.broadcast %139 : vector<30x1xf32> to vector<30x46xf32>
    %141 = arith.mulf %138, %140 : vector<30x46xf32>
    %c0_98 = arith.constant 0 : index
    %c0_99 = arith.constant 0 : index
    %142 = vector.load %arg9[%c0_98, %c0_99] : memref<30x1xf32, #tpu.memory_space<vmem>>, vector<30x1xf32>
    %143 = vector.broadcast %142 : vector<30x1xf32> to vector<30x46xf32>
    %144 = arith.addf %141, %143 : vector<30x46xf32>
    %145 = vector.extract_strided_slice %144 {offsets = [0, 0], sizes = [30, 12], strides = [1, 1]} : vector<30x46xf32> to vector<30x12xf32>
    %c0_100 = arith.constant 0 : index
    %c0_101 = arith.constant 0 : index
    %146 = vector.load %arg30[%c0_100, %c0_101] : memref<360x24xf32, #tpu.memory_space<vmem>>, vector<30x12xf32>
    tpu.vector_store %arg30[%c0_100, %c0_101], %145 {strides = array<i32>} : memref<360x24xf32, #tpu.memory_space<vmem>>, vector<30x12xf32>,
    %147 = vector.extract_strided_slice %144 {offsets = [0, 1], sizes = [30, 12], strides = [1, 1]} : vector<30x46xf32> to vector<30x12xf32>
    %c30 = arith.constant 30 : index
    %c0_102 = arith.constant 0 : index
    %148 = vector.load %arg30[%c30, %c0_102] : memref<360x24xf32, #tpu.memory_space<vmem>>, vector<30x12xf32>
    tpu.vector_store %arg30[%c30, %c0_102], %147 {strides = array<i32>} : memref<360x24xf32, #tpu.memory_space<vmem>>, vector<30x12xf32>,
    %149 = vector.extract_strided_slice %144 {offsets = [0, 2], sizes = [30, 12], strides = [1, 1]} : vector<30x46xf32> to vector<30x12xf32>
    %c60 = arith.constant 60 : index
    %c0_103 = arith.constant 0 : index
    %150 = vector.load %arg30[%c60, %c0_103] : memref<360x24xf32, #tpu.memory_space<vmem>>, vector<30x12xf32>
    tpu.vector_store %arg30[%c60, %c0_103], %149 {strides = array<i32>} : memref<360x24xf32, #tpu.memory_space<vmem>>, vector<30x12xf32>,
    %151 = vector.extract_strided_slice %144 {offsets = [0, 3], sizes = [30, 12], strides = [1, 1]} : vector<30x46xf32> to vector<30x12xf32>
    %c90 = arith.constant 90 : index
    %c0_104 = arith.constant 0 : index
    %152 = vector.load %arg30[%c90, %c0_104] : memref<360x24xf32, #tpu.memory_space<vmem>>, vector<30x12xf32>
    tpu.vector_store %arg30[%c90, %c0_104], %151 {strides = array<i32>} : memref<360x24xf32, #tpu.memory_space<vmem>>, vector<30x12xf32>,
    %153 = vector.extract_strided_slice %144 {offsets = [0, 4], sizes = [30, 12], strides = [1, 1]} : vector<30x46xf32> to vector<30x12xf32>
    %c120 = arith.constant 120 : index
    %c0_105 = arith.constant 0 : index
    %154 = vector.load %arg30[%c120, %c0_105] : memref<360x24xf32, #tpu.memory_space<vmem>>, vector<30x12xf32>
    tpu.vector_store %arg30[%c120, %c0_105], %153 {strides = array<i32>} : memref<360x24xf32, #tpu.memory_space<vmem>>, vector<30x12xf32>,
    %155 = vector.extract_strided_slice %144 {offsets = [0, 5], sizes = [30, 12], strides = [1, 1]} : vector<30x46xf32> to vector<30x12xf32>
    %c150_106 = arith.constant 150 : index
    %c0_107 = arith.constant 0 : index
    %156 = vector.load %arg30[%c150_106, %c0_107] : memref<360x24xf32, #tpu.memory_space<vmem>>, vector<30x12xf32>
    tpu.vector_store %arg30[%c150_106, %c0_107], %155 {strides = array<i32>} : memref<360x24xf32, #tpu.memory_space<vmem>>, vector<30x12xf32>,
    %157 = vector.extract_strided_slice %144 {offsets = [0, 6], sizes = [30, 12], strides = [1, 1]} : vector<30x46xf32> to vector<30x12xf32>
    %c180 = arith.constant 180 : index
    %c0_108 = arith.constant 0 : index
    %158 = vector.load %arg30[%c180, %c0_108] : memref<360x24xf32, #tpu.memory_space<vmem>>, vector<30x12xf32>
    tpu.vector_store %arg30[%c180, %c0_108], %157 {strides = array<i32>} : memref<360x24xf32, #tpu.memory_space<vmem>>, vector<30x12xf32>,
    %159 = vector.extract_strided_slice %144 {offsets = [0, 7], sizes = [30, 12], strides = [1, 1]} : vector<30x46xf32> to vector<30x12xf32>
    %c210 = arith.constant 210 : index
    %c0_109 = arith.constant 0 : index
    %160 = vector.load %arg30[%c210, %c0_109] : memref<360x24xf32, #tpu.memory_space<vmem>>, vector<30x12xf32>
    tpu.vector_store %arg30[%c210, %c0_109], %159 {strides = array<i32>} : memref<360x24xf32, #tpu.memory_space<vmem>>, vector<30x12xf32>,
    %161 = vector.extract_strided_slice %144 {offsets = [0, 8], sizes = [30, 12], strides = [1, 1]} : vector<30x46xf32> to vector<30x12xf32>
    %c240 = arith.constant 240 : index
    %c0_110 = arith.constant 0 : index
    %162 = vector.load %arg30[%c240, %c0_110] : memref<360x24xf32, #tpu.memory_space<vmem>>, vector<30x12xf32>
    tpu.vector_store %arg30[%c240, %c0_110], %161 {strides = array<i32>} : memref<360x24xf32, #tpu.memory_space<vmem>>, vector<30x12xf32>,
    %163 = vector.extract_strided_slice %144 {offsets = [0, 9], sizes = [30, 12], strides = [1, 1]} : vector<30x46xf32> to vector<30x12xf32>
    %c270 = arith.constant 270 : index
    %c0_111 = arith.constant 0 : index
    %164 = vector.load %arg30[%c270, %c0_111] : memref<360x24xf32, #tpu.memory_space<vmem>>, vector<30x12xf32>
    tpu.vector_store %arg30[%c270, %c0_111], %163 {strides = array<i32>} : memref<360x24xf32, #tpu.memory_space<vmem>>, vector<30x12xf32>,
    %165 = vector.extract_strided_slice %144 {offsets = [0, 10], sizes = [30, 12], strides = [1, 1]} : vector<30x46xf32> to vector<30x12xf32>
    %c300 = arith.constant 300 : index
    %c0_112 = arith.constant 0 : index
    %166 = vector.load %arg30[%c300, %c0_112] : memref<360x24xf32, #tpu.memory_space<vmem>>, vector<30x12xf32>
    tpu.vector_store %arg30[%c300, %c0_112], %165 {strides = array<i32>} : memref<360x24xf32, #tpu.memory_space<vmem>>, vector<30x12xf32>,
    %167 = vector.extract_strided_slice %144 {offsets = [0, 11], sizes = [30, 12], strides = [1, 1]} : vector<30x46xf32> to vector<30x12xf32>
    %c330 = arith.constant 330 : index
    %c0_113 = arith.constant 0 : index
    %168 = vector.load %arg30[%c330, %c0_113] : memref<360x24xf32, #tpu.memory_space<vmem>>, vector<30x12xf32>
    tpu.vector_store %arg30[%c330, %c0_113], %167 {strides = array<i32>} : memref<360x24xf32, #tpu.memory_space<vmem>>, vector<30x12xf32>,
    %169 = vector.extract_strided_slice %144 {offsets = [0, 23], sizes = [30, 12], strides = [1, 1]} : vector<30x46xf32> to vector<30x12xf32>
    %c0_114 = arith.constant 0 : index
    %c12 = arith.constant 12 : index
    %170 = vector.load %arg30[%c0_114, %c12] : memref<360x24xf32, #tpu.memory_space<vmem>>, vector<30x12xf32>
    tpu.vector_store %arg30[%c0_114, %c12], %169 {strides = array<i32>} : memref<360x24xf32, #tpu.memory_space<vmem>>, vector<30x12xf32>,
    %171 = vector.extract_strided_slice %144 {offsets = [0, 24], sizes = [30, 12], strides = [1, 1]} : vector<30x46xf32> to vector<30x12xf32>
    %c30_115 = arith.constant 30 : index
    %c12_116 = arith.constant 12 : index
    %172 = vector.load %arg30[%c30_115, %c12_116] : memref<360x24xf32, #tpu.memory_space<vmem>>, vector<30x12xf32>
    tpu.vector_store %arg30[%c30_115, %c12_116], %171 {strides = array<i32>} : memref<360x24xf32, #tpu.memory_space<vmem>>, vector<30x12xf32>,
    %173 = vector.extract_strided_slice %144 {offsets = [0, 25], sizes = [30, 12], strides = [1, 1]} : vector<30x46xf32> to vector<30x12xf32>
    %c60_117 = arith.constant 60 : index
    %c12_118 = arith.constant 12 : index
    %174 = vector.load %arg30[%c60_117, %c12_118] : memref<360x24xf32, #tpu.memory_space<vmem>>, vector<30x12xf32>
    tpu.vector_store %arg30[%c60_117, %c12_118], %173 {strides = array<i32>} : memref<360x24xf32, #tpu.memory_space<vmem>>, vector<30x12xf32>,
    %175 = vector.extract_strided_slice %144 {offsets = [0, 26], sizes = [30, 12], strides = [1, 1]} : vector<30x46xf32> to vector<30x12xf32>
    %c90_119 = arith.constant 90 : index
    %c12_120 = arith.constant 12 : index
    %176 = vector.load %arg30[%c90_119, %c12_120] : memref<360x24xf32, #tpu.memory_space<vmem>>, vector<30x12xf32>
    tpu.vector_store %arg30[%c90_119, %c12_120], %175 {strides = array<i32>} : memref<360x24xf32, #tpu.memory_space<vmem>>, vector<30x12xf32>,
    %177 = vector.extract_strided_slice %144 {offsets = [0, 27], sizes = [30, 12], strides = [1, 1]} : vector<30x46xf32> to vector<30x12xf32>
    %c120_121 = arith.constant 120 : index
    %c12_122 = arith.constant 12 : index
    %178 = vector.load %arg30[%c120_121, %c12_122] : memref<360x24xf32, #tpu.memory_space<vmem>>, vector<30x12xf32>
    tpu.vector_store %arg30[%c120_121, %c12_122], %177 {strides = array<i32>} : memref<360x24xf32, #tpu.memory_space<vmem>>, vector<30x12xf32>,
    %179 = vector.extract_strided_slice %144 {offsets = [0, 28], sizes = [30, 12], strides = [1, 1]} : vector<30x46xf32> to vector<30x12xf32>
    %c150_123 = arith.constant 150 : index
    %c12_124 = arith.constant 12 : index
    %180 = vector.load %arg30[%c150_123, %c12_124] : memref<360x24xf32, #tpu.memory_space<vmem>>, vector<30x12xf32>
    tpu.vector_store %arg30[%c150_123, %c12_124], %179 {strides = array<i32>} : memref<360x24xf32, #tpu.memory_space<vmem>>, vector<30x12xf32>,
    %181 = vector.extract_strided_slice %144 {offsets = [0, 29], sizes = [30, 12], strides = [1, 1]} : vector<30x46xf32> to vector<30x12xf32>
    %c180_125 = arith.constant 180 : index
    %c12_126 = arith.constant 12 : index
    %182 = vector.load %arg30[%c180_125, %c12_126] : memref<360x24xf32, #tpu.memory_space<vmem>>, vector<30x12xf32>
    tpu.vector_store %arg30[%c180_125, %c12_126], %181 {strides = array<i32>} : memref<360x24xf32, #tpu.memory_space<vmem>>, vector<30x12xf32>,
    %183 = vector.extract_strided_slice %144 {offsets = [0, 30], sizes = [30, 12], strides = [1, 1]} : vector<30x46xf32> to vector<30x12xf32>
    %c210_127 = arith.constant 210 : index
    %c12_128 = arith.constant 12 : index
    %184 = vector.load %arg30[%c210_127, %c12_128] : memref<360x24xf32, #tpu.memory_space<vmem>>, vector<30x12xf32>
    tpu.vector_store %arg30[%c210_127, %c12_128], %183 {strides = array<i32>} : memref<360x24xf32, #tpu.memory_space<vmem>>, vector<30x12xf32>,
    %185 = vector.extract_strided_slice %144 {offsets = [0, 31], sizes = [30, 12], strides = [1, 1]} : vector<30x46xf32> to vector<30x12xf32>
    %c240_129 = arith.constant 240 : index
    %c12_130 = arith.constant 12 : index
    %186 = vector.load %arg30[%c240_129, %c12_130] : memref<360x24xf32, #tpu.memory_space<vmem>>, vector<30x12xf32>
    tpu.vector_store %arg30[%c240_129, %c12_130], %185 {strides = array<i32>} : memref<360x24xf32, #tpu.memory_space<vmem>>, vector<30x12xf32>,
    %187 = vector.extract_strided_slice %144 {offsets = [0, 32], sizes = [30, 12], strides = [1, 1]} : vector<30x46xf32> to vector<30x12xf32>
    %c270_131 = arith.constant 270 : index
    %c12_132 = arith.constant 12 : index
    %188 = vector.load %arg30[%c270_131, %c12_132] : memref<360x24xf32, #tpu.memory_space<vmem>>, vector<30x12xf32>
    tpu.vector_store %arg30[%c270_131, %c12_132], %187 {strides = array<i32>} : memref<360x24xf32, #tpu.memory_space<vmem>>, vector<30x12xf32>,
    %189 = vector.extract_strided_slice %144 {offsets = [0, 33], sizes = [30, 12], strides = [1, 1]} : vector<30x46xf32> to vector<30x12xf32>
    %c300_133 = arith.constant 300 : index
    %c12_134 = arith.constant 12 : index
    %190 = vector.load %arg30[%c300_133, %c12_134] : memref<360x24xf32, #tpu.memory_space<vmem>>, vector<30x12xf32>
    tpu.vector_store %arg30[%c300_133, %c12_134], %189 {strides = array<i32>} : memref<360x24xf32, #tpu.memory_space<vmem>>, vector<30x12xf32>,
    %191 = vector.extract_strided_slice %144 {offsets = [0, 34], sizes = [30, 12], strides = [1, 1]} : vector<30x46xf32> to vector<30x12xf32>
    %c330_135 = arith.constant 330 : index
    %c12_136 = arith.constant 12 : index
    %192 = vector.load %arg30[%c330_135, %c12_136] : memref<360x24xf32, #tpu.memory_space<vmem>>, vector<30x12xf32>
    tpu.vector_store %arg30[%c330_135, %c12_136], %191 {strides = array<i32>} : memref<360x24xf32, #tpu.memory_space<vmem>>, vector<30x12xf32>,
    %c0_137 = arith.constant 0 : index
    %c0_138 = arith.constant 0 : index
    %193 = vector.load %arg30[%c0_137, %c0_138] : memref<360x24xf32, #tpu.memory_space<vmem>>, vector<360x24xf32>
    %194 = arith.truncf %193 : vector<360x24xf32> to vector<360x24xbf16>
    %c0_139 = arith.constant 0 : index
    %c0_140 = arith.constant 0 : index
    %195 = vector.load %arg11[%c0_139, %c0_140] : memref<50x360xbf16, #tpu.memory_space<vmem>>, vector<50x360xbf16>
    %cst_141 = arith.constant dense<0.000000e+00> : vector<50x24xf32>
    %196 = tpu.matmul %195, %194, %cst_141 {dimension_numbers = #tpu.dot_dimension_numbers<[1], [0], [0], [1], [0, 0, 1, 1], [], []>} : vector<50x360xbf16>, vector<360x24xbf16>, vector<50x24xf32> -> vector<50x24xf32>
    %c0_142 = arith.constant 0 : index
    %c0_143 = arith.constant 0 : index
    %197 = vector.load %arg12[%c0_142, %c0_143] : memref<50x1xf32, #tpu.memory_space<vmem>>, vector<50x1xf32>
    %198 = vector.broadcast %197 : vector<50x1xf32> to vector<50x24xf32>
    %199 = arith.addf %196, %198 : vector<50x24xf32>
    %cst_144 = arith.constant 0.000000e+00 : f32
    %200 = vector.broadcast %cst_144 : f32 to vector<50x24xf32>
    %201 = arith.cmpf ogt, %199, %200 : vector<50x24xf32>
    %cst_145 = arith.constant 0.000000e+00 : f32
    %202 = vector.broadcast %cst_145 : f32 to vector<50x24xf32>
    %203 = arith.minimumf %199, %202 : vector<50x24xf32>
    %204 = math.exp %203 : vector<50x24xf32>
    %cst_146 = arith.constant 1.000000e+00 : f32
    %205 = vector.broadcast %cst_146 : f32 to vector<50x24xf32>
    %206 = arith.subf %204, %205 : vector<50x24xf32>
    %207 = arith.select %201, %199, %206 : vector<50x24xi1>, vector<50x24xf32>
    %208 = vector.extract_strided_slice %207 {offsets = [0, 0], sizes = [50, 22], strides = [1, 1]} : vector<50x24xf32> to vector<50x22xf32>
    %209 = vector.extract_strided_slice %207 {offsets = [0, 1], sizes = [50, 22], strides = [1, 1]} : vector<50x24xf32> to vector<50x22xf32>
    %210 = arith.maximumf %208, %209 : vector<50x22xf32>
    %211 = vector.extract_strided_slice %207 {offsets = [0, 2], sizes = [50, 22], strides = [1, 1]} : vector<50x24xf32> to vector<50x22xf32>
    %212 = arith.maximumf %210, %211 : vector<50x22xf32>
    %c0_147 = arith.constant 0 : index
    %c0_148 = arith.constant 0 : index
    %213 = vector.load %arg15[%c0_147, %c0_148] : memref<22x8xf32, #tpu.memory_space<vmem>>, vector<22x8xf32>
    %cst_149 = arith.constant dense<0.000000e+00> : vector<50x8xf32>
    %214 = tpu.matmul %212, %213, %cst_149 {dimension_numbers = #tpu.dot_dimension_numbers<[1], [0], [0], [1], [0, 0, 1, 1], [], []>} : vector<50x22xf32>, vector<22x8xf32>, vector<50x8xf32> -> vector<50x8xf32>
    %c0_150 = arith.constant 0 : index
    %c0_151 = arith.constant 0 : index
    %215 = vector.load %arg13[%c0_150, %c0_151] : memref<50x1xf32, #tpu.memory_space<vmem>>, vector<50x1xf32>
    %216 = vector.broadcast %215 : vector<50x1xf32> to vector<50x8xf32>
    %217 = arith.mulf %214, %216 : vector<50x8xf32>
    %c0_152 = arith.constant 0 : index
    %c0_153 = arith.constant 0 : index
    %218 = vector.load %arg14[%c0_152, %c0_153] : memref<50x1xf32, #tpu.memory_space<vmem>>, vector<50x1xf32>
    %219 = vector.broadcast %218 : vector<50x1xf32> to vector<50x8xf32>
    %220 = arith.addf %217, %219 : vector<50x8xf32>
    %221 = tpu.transpose %220, [1, 0] : vector<50x8xf32> -> vector<8x50xf32>
    %222 = arith.truncf %221 : vector<8x50xf32> to vector<8x50xbf16>
    %c0_154 = arith.constant 0 : index
    %c0_155 = arith.constant 0 : index
    %223 = vector.load %arg16[%c0_154, %c0_155] : memref<50x256xbf16, #tpu.memory_space<vmem>>, vector<50x256xbf16>
    %cst_156 = arith.constant dense<0.000000e+00> : vector<8x256xf32>
    %224 = tpu.matmul %222, %223, %cst_156 {dimension_numbers = #tpu.dot_dimension_numbers<[1], [0], [0], [1], [0, 0, 1, 1], [], []>} : vector<8x50xbf16>, vector<50x256xbf16>, vector<8x256xf32> -> vector<8x256xf32>
    %c0_157 = arith.constant 0 : index
    %c0_158 = arith.constant 0 : index
    %225 = vector.load %arg18[%c0_157, %c0_158] : memref<1x256xf32, #tpu.memory_space<vmem>>, vector<1x256xf32>
    %226 = vector.broadcast %225 : vector<1x256xf32> to vector<8x256xf32>
    %227 = arith.addf %224, %226 : vector<8x256xf32>
    %c0_159 = arith.constant 0 : index
    %c0_160 = arith.constant 0 : index
    %228 = vector.load %arg17[%c0_159, %c0_160] : memref<64x256xbf16, #tpu.memory_space<vmem>>, vector<64x256xbf16>
    %cst_161 = arith.constant 0.000000e+00 : f32
    %229 = vector.broadcast %cst_161 : f32 to vector<2x64xf32>
    %cst_162 = arith.constant 0.000000e+00 : f32
    %230 = vector.broadcast %cst_162 : f32 to vector<2x64xf32>
    %231 = vector.extract_strided_slice %227 {offsets = [0, 0], sizes = [2, 256], strides = [1, 1]} : vector<8x256xf32> to vector<2x256xf32>
    %232 = arith.truncf %229 : vector<2x64xf32> to vector<2x64xbf16>
    %cst_163 = arith.constant dense<0.000000e+00> : vector<2x256xf32>
    %233 = tpu.matmul %232, %228, %cst_163 {dimension_numbers = #tpu.dot_dimension_numbers<[1], [0], [0], [1], [0, 0, 1, 1], [], []>} : vector<2x64xbf16>, vector<64x256xbf16>, vector<2x256xf32> -> vector<2x256xf32>
    %234 = arith.addf %231, %233 : vector<2x256xf32>
    %235 = vector.extract_strided_slice %234 {offsets = [0, 0], sizes = [2, 64], strides = [1, 1]} : vector<2x256xf32> to vector<2x64xf32>
    %cst_164 = arith.constant 5.000000e-01 : f32
    %236 = vector.broadcast %cst_164 : f32 to vector<2x64xf32>
    %237 = arith.mulf %236, %235 : vector<2x64xf32>
    %238 = math.tanh %237 : vector<2x64xf32>
    %cst_165 = arith.constant 5.000000e-01 : f32
    %239 = vector.broadcast %cst_165 : f32 to vector<2x64xf32>
    %240 = arith.mulf %239, %238 : vector<2x64xf32>
    %cst_166 = arith.constant 5.000000e-01 : f32
    %241 = vector.broadcast %cst_166 : f32 to vector<2x64xf32>
    %242 = arith.addf %240, %241 : vector<2x64xf32>
    %243 = vector.extract_strided_slice %234 {offsets = [0, 64], sizes = [2, 64], strides = [1, 1]} : vector<2x256xf32> to vector<2x64xf32>
    %cst_167 = arith.constant 5.000000e-01 : f32
    %244 = vector.broadcast %cst_167 : f32 to vector<2x64xf32>
    %245 = arith.mulf %244, %243 : vector<2x64xf32>
    %246 = math.tanh %245 : vector<2x64xf32>
    %cst_168 = arith.constant 5.000000e-01 : f32
    %247 = vector.broadcast %cst_168 : f32 to vector<2x64xf32>
    %248 = arith.mulf %247, %246 : vector<2x64xf32>
    %cst_169 = arith.constant 5.000000e-01 : f32
    %249 = vector.broadcast %cst_169 : f32 to vector<2x64xf32>
    %250 = arith.addf %248, %249 : vector<2x64xf32>
    %251 = vector.extract_strided_slice %234 {offsets = [0, 128], sizes = [2, 64], strides = [1, 1]} : vector<2x256xf32> to vector<2x64xf32>
    %252 = math.tanh %251 : vector<2x64xf32>
    %253 = vector.extract_strided_slice %234 {offsets = [0, 192], sizes = [2, 64], strides = [1, 1]} : vector<2x256xf32> to vector<2x64xf32>
    %cst_170 = arith.constant 5.000000e-01 : f32
    %254 = vector.broadcast %cst_170 : f32 to vector<2x64xf32>
    %255 = arith.mulf %254, %253 : vector<2x64xf32>
    %256 = math.tanh %255 : vector<2x64xf32>
    %cst_171 = arith.constant 5.000000e-01 : f32
    %257 = vector.broadcast %cst_171 : f32 to vector<2x64xf32>
    %258 = arith.mulf %257, %256 : vector<2x64xf32>
    %cst_172 = arith.constant 5.000000e-01 : f32
    %259 = vector.broadcast %cst_172 : f32 to vector<2x64xf32>
    %260 = arith.addf %258, %259 : vector<2x64xf32>
    %261 = arith.mulf %250, %230 : vector<2x64xf32>
    %262 = arith.mulf %242, %252 : vector<2x64xf32>
    %263 = arith.addf %261, %262 : vector<2x64xf32>
    %264 = math.tanh %263 : vector<2x64xf32>
    %265 = arith.mulf %260, %264 : vector<2x64xf32>
    %c0_173 = arith.constant 0 : index
    %c0_174 = arith.constant 0 : index
    %266 = vector.load %arg31[%c0_173, %c0_174] : memref<8x64xf32, #tpu.memory_space<vmem>>, vector<2x64xf32>
    tpu.vector_store %arg31[%c0_173, %c0_174], %265 {strides = array<i32>} : memref<8x64xf32, #tpu.memory_space<vmem>>, vector<2x64xf32>,
    %267 = vector.extract_strided_slice %227 {offsets = [2, 0], sizes = [2, 256], strides = [1, 1]} : vector<8x256xf32> to vector<2x256xf32>
    %268 = arith.truncf %265 : vector<2x64xf32> to vector<2x64xbf16>
    %cst_175 = arith.constant dense<0.000000e+00> : vector<2x256xf32>
    %269 = tpu.matmul %268, %228, %cst_175 {dimension_numbers = #tpu.dot_dimension_numbers<[1], [0], [0], [1], [0, 0, 1, 1], [], []>} : vector<2x64xbf16>, vector<64x256xbf16>, vector<2x256xf32> -> vector<2x256xf32>
    %270 = arith.addf %267, %269 : vector<2x256xf32>
    %271 = vector.extract_strided_slice %270 {offsets = [0, 0], sizes = [2, 64], strides = [1, 1]} : vector<2x256xf32> to vector<2x64xf32>
    %cst_176 = arith.constant 5.000000e-01 : f32
    %272 = vector.broadcast %cst_176 : f32 to vector<2x64xf32>
    %273 = arith.mulf %272, %271 : vector<2x64xf32>
    %274 = math.tanh %273 : vector<2x64xf32>
    %cst_177 = arith.constant 5.000000e-01 : f32
    %275 = vector.broadcast %cst_177 : f32 to vector<2x64xf32>
    %276 = arith.mulf %275, %274 : vector<2x64xf32>
    %cst_178 = arith.constant 5.000000e-01 : f32
    %277 = vector.broadcast %cst_178 : f32 to vector<2x64xf32>
    %278 = arith.addf %276, %277 : vector<2x64xf32>
    %279 = vector.extract_strided_slice %270 {offsets = [0, 64], sizes = [2, 64], strides = [1, 1]} : vector<2x256xf32> to vector<2x64xf32>
    %cst_179 = arith.constant 5.000000e-01 : f32
    %280 = vector.broadcast %cst_179 : f32 to vector<2x64xf32>
    %281 = arith.mulf %280, %279 : vector<2x64xf32>
    %282 = math.tanh %281 : vector<2x64xf32>
    %cst_180 = arith.constant 5.000000e-01 : f32
    %283 = vector.broadcast %cst_180 : f32 to vector<2x64xf32>
    %284 = arith.mulf %283, %282 : vector<2x64xf32>
    %cst_181 = arith.constant 5.000000e-01 : f32
    %285 = vector.broadcast %cst_181 : f32 to vector<2x64xf32>
    %286 = arith.addf %284, %285 : vector<2x64xf32>
    %287 = vector.extract_strided_slice %270 {offsets = [0, 128], sizes = [2, 64], strides = [1, 1]} : vector<2x256xf32> to vector<2x64xf32>
    %288 = math.tanh %287 : vector<2x64xf32>
    %289 = vector.extract_strided_slice %270 {offsets = [0, 192], sizes = [2, 64], strides = [1, 1]} : vector<2x256xf32> to vector<2x64xf32>
    %cst_182 = arith.constant 5.000000e-01 : f32
    %290 = vector.broadcast %cst_182 : f32 to vector<2x64xf32>
    %291 = arith.mulf %290, %289 : vector<2x64xf32>
    %292 = math.tanh %291 : vector<2x64xf32>
    %cst_183 = arith.constant 5.000000e-01 : f32
    %293 = vector.broadcast %cst_183 : f32 to vector<2x64xf32>
    %294 = arith.mulf %293, %292 : vector<2x64xf32>
    %cst_184 = arith.constant 5.000000e-01 : f32
    %295 = vector.broadcast %cst_184 : f32 to vector<2x64xf32>
    %296 = arith.addf %294, %295 : vector<2x64xf32>
    %297 = arith.mulf %286, %263 : vector<2x64xf32>
    %298 = arith.mulf %278, %288 : vector<2x64xf32>
    %299 = arith.addf %297, %298 : vector<2x64xf32>
    %300 = math.tanh %299 : vector<2x64xf32>
    %301 = arith.mulf %296, %300 : vector<2x64xf32>
    %c2 = arith.constant 2 : index
    %c0_185 = arith.constant 0 : index
    %302 = vector.load %arg31[%c2, %c0_185] : memref<8x64xf32, #tpu.memory_space<vmem>>, vector<2x64xf32>
    tpu.vector_store %arg31[%c2, %c0_185], %301 {strides = array<i32>} : memref<8x64xf32, #tpu.memory_space<vmem>>, vector<2x64xf32>,
    %303 = vector.extract_strided_slice %227 {offsets = [4, 0], sizes = [2, 256], strides = [1, 1]} : vector<8x256xf32> to vector<2x256xf32>
    %304 = arith.truncf %301 : vector<2x64xf32> to vector<2x64xbf16>
    %cst_186 = arith.constant dense<0.000000e+00> : vector<2x256xf32>
    %305 = tpu.matmul %304, %228, %cst_186 {dimension_numbers = #tpu.dot_dimension_numbers<[1], [0], [0], [1], [0, 0, 1, 1], [], []>} : vector<2x64xbf16>, vector<64x256xbf16>, vector<2x256xf32> -> vector<2x256xf32>
    %306 = arith.addf %303, %305 : vector<2x256xf32>
    %307 = vector.extract_strided_slice %306 {offsets = [0, 0], sizes = [2, 64], strides = [1, 1]} : vector<2x256xf32> to vector<2x64xf32>
    %cst_187 = arith.constant 5.000000e-01 : f32
    %308 = vector.broadcast %cst_187 : f32 to vector<2x64xf32>
    %309 = arith.mulf %308, %307 : vector<2x64xf32>
    %310 = math.tanh %309 : vector<2x64xf32>
    %cst_188 = arith.constant 5.000000e-01 : f32
    %311 = vector.broadcast %cst_188 : f32 to vector<2x64xf32>
    %312 = arith.mulf %311, %310 : vector<2x64xf32>
    %cst_189 = arith.constant 5.000000e-01 : f32
    %313 = vector.broadcast %cst_189 : f32 to vector<2x64xf32>
    %314 = arith.addf %312, %313 : vector<2x64xf32>
    %315 = vector.extract_strided_slice %306 {offsets = [0, 64], sizes = [2, 64], strides = [1, 1]} : vector<2x256xf32> to vector<2x64xf32>
    %cst_190 = arith.constant 5.000000e-01 : f32
    %316 = vector.broadcast %cst_190 : f32 to vector<2x64xf32>
    %317 = arith.mulf %316, %315 : vector<2x64xf32>
    %318 = math.tanh %317 : vector<2x64xf32>
    %cst_191 = arith.constant 5.000000e-01 : f32
    %319 = vector.broadcast %cst_191 : f32 to vector<2x64xf32>
    %320 = arith.mulf %319, %318 : vector<2x64xf32>
    %cst_192 = arith.constant 5.000000e-01 : f32
    %321 = vector.broadcast %cst_192 : f32 to vector<2x64xf32>
    %322 = arith.addf %320, %321 : vector<2x64xf32>
    %323 = vector.extract_strided_slice %306 {offsets = [0, 128], sizes = [2, 64], strides = [1, 1]} : vector<2x256xf32> to vector<2x64xf32>
    %324 = math.tanh %323 : vector<2x64xf32>
    %325 = vector.extract_strided_slice %306 {offsets = [0, 192], sizes = [2, 64], strides = [1, 1]} : vector<2x256xf32> to vector<2x64xf32>
    %cst_193 = arith.constant 5.000000e-01 : f32
    %326 = vector.broadcast %cst_193 : f32 to vector<2x64xf32>
    %327 = arith.mulf %326, %325 : vector<2x64xf32>
    %328 = math.tanh %327 : vector<2x64xf32>
    %cst_194 = arith.constant 5.000000e-01 : f32
    %329 = vector.broadcast %cst_194 : f32 to vector<2x64xf32>
    %330 = arith.mulf %329, %328 : vector<2x64xf32>
    %cst_195 = arith.constant 5.000000e-01 : f32
    %331 = vector.broadcast %cst_195 : f32 to vector<2x64xf32>
    %332 = arith.addf %330, %331 : vector<2x64xf32>
    %333 = arith.mulf %322, %299 : vector<2x64xf32>
    %334 = arith.mulf %314, %324 : vector<2x64xf32>
    %335 = arith.addf %333, %334 : vector<2x64xf32>
    %336 = math.tanh %335 : vector<2x64xf32>
    %337 = arith.mulf %332, %336 : vector<2x64xf32>
    %c4 = arith.constant 4 : index
    %c0_196 = arith.constant 0 : index
    %338 = vector.load %arg31[%c4, %c0_196] : memref<8x64xf32, #tpu.memory_space<vmem>>, vector<2x64xf32>
    tpu.vector_store %arg31[%c4, %c0_196], %337 {strides = array<i32>} : memref<8x64xf32, #tpu.memory_space<vmem>>, vector<2x64xf32>,
    %339 = vector.extract_strided_slice %227 {offsets = [6, 0], sizes = [2, 256], strides = [1, 1]} : vector<8x256xf32> to vector<2x256xf32>
    %340 = arith.truncf %337 : vector<2x64xf32> to vector<2x64xbf16>
    %cst_197 = arith.constant dense<0.000000e+00> : vector<2x256xf32>
    %341 = tpu.matmul %340, %228, %cst_197 {dimension_numbers = #tpu.dot_dimension_numbers<[1], [0], [0], [1], [0, 0, 1, 1], [], []>} : vector<2x64xbf16>, vector<64x256xbf16>, vector<2x256xf32> -> vector<2x256xf32>
    %342 = arith.addf %339, %341 : vector<2x256xf32>
    %343 = vector.extract_strided_slice %342 {offsets = [0, 0], sizes = [2, 64], strides = [1, 1]} : vector<2x256xf32> to vector<2x64xf32>
    %cst_198 = arith.constant 5.000000e-01 : f32
    %344 = vector.broadcast %cst_198 : f32 to vector<2x64xf32>
    %345 = arith.mulf %344, %343 : vector<2x64xf32>
    %346 = math.tanh %345 : vector<2x64xf32>
    %cst_199 = arith.constant 5.000000e-01 : f32
    %347 = vector.broadcast %cst_199 : f32 to vector<2x64xf32>
    %348 = arith.mulf %347, %346 : vector<2x64xf32>
    %cst_200 = arith.constant 5.000000e-01 : f32
    %349 = vector.broadcast %cst_200 : f32 to vector<2x64xf32>
    %350 = arith.addf %348, %349 : vector<2x64xf32>
    %351 = vector.extract_strided_slice %342 {offsets = [0, 64], sizes = [2, 64], strides = [1, 1]} : vector<2x256xf32> to vector<2x64xf32>
    %cst_201 = arith.constant 5.000000e-01 : f32
    %352 = vector.broadcast %cst_201 : f32 to vector<2x64xf32>
    %353 = arith.mulf %352, %351 : vector<2x64xf32>
    %354 = math.tanh %353 : vector<2x64xf32>
    %cst_202 = arith.constant 5.000000e-01 : f32
    %355 = vector.broadcast %cst_202 : f32 to vector<2x64xf32>
    %356 = arith.mulf %355, %354 : vector<2x64xf32>
    %cst_203 = arith.constant 5.000000e-01 : f32
    %357 = vector.broadcast %cst_203 : f32 to vector<2x64xf32>
    %358 = arith.addf %356, %357 : vector<2x64xf32>
    %359 = vector.extract_strided_slice %342 {offsets = [0, 128], sizes = [2, 64], strides = [1, 1]} : vector<2x256xf32> to vector<2x64xf32>
    %360 = math.tanh %359 : vector<2x64xf32>
    %361 = vector.extract_strided_slice %342 {offsets = [0, 192], sizes = [2, 64], strides = [1, 1]} : vector<2x256xf32> to vector<2x64xf32>
    %cst_204 = arith.constant 5.000000e-01 : f32
    %362 = vector.broadcast %cst_204 : f32 to vector<2x64xf32>
    %363 = arith.mulf %362, %361 : vector<2x64xf32>
    %364 = math.tanh %363 : vector<2x64xf32>
    %cst_205 = arith.constant 5.000000e-01 : f32
    %365 = vector.broadcast %cst_205 : f32 to vector<2x64xf32>
    %366 = arith.mulf %365, %364 : vector<2x64xf32>
    %cst_206 = arith.constant 5.000000e-01 : f32
    %367 = vector.broadcast %cst_206 : f32 to vector<2x64xf32>
    %368 = arith.addf %366, %367 : vector<2x64xf32>
    %369 = arith.mulf %358, %335 : vector<2x64xf32>
    %370 = arith.mulf %350, %360 : vector<2x64xf32>
    %371 = arith.addf %369, %370 : vector<2x64xf32>
    %372 = math.tanh %371 : vector<2x64xf32>
    %373 = arith.mulf %368, %372 : vector<2x64xf32>
    %c6 = arith.constant 6 : index
    %c0_207 = arith.constant 0 : index
    %374 = vector.load %arg31[%c6, %c0_207] : memref<8x64xf32, #tpu.memory_space<vmem>>, vector<2x64xf32>
    tpu.vector_store %arg31[%c6, %c0_207], %373 {strides = array<i32>} : memref<8x64xf32, #tpu.memory_space<vmem>>, vector<2x64xf32>,
    %c0_208 = arith.constant 0 : index
    %c0_209 = arith.constant 0 : index
    %375 = vector.load %arg31[%c0_208, %c0_209] : memref<8x64xf32, #tpu.memory_space<vmem>>, vector<8x64xf32>
    %376 = arith.truncf %375 : vector<8x64xf32> to vector<8x64xbf16>
    %c0_210 = arith.constant 0 : index
    %c0_211 = arith.constant 0 : index
    %377 = vector.load %arg19[%c0_210, %c0_211] : memref<64x256xbf16, #tpu.memory_space<vmem>>, vector<64x256xbf16>
    %cst_212 = arith.constant dense<0.000000e+00> : vector<8x256xf32>
    %378 = tpu.matmul %376, %377, %cst_212 {dimension_numbers = #tpu.dot_dimension_numbers<[1], [0], [0], [1], [0, 0, 1, 1], [], []>} : vector<8x64xbf16>, vector<64x256xbf16>, vector<8x256xf32> -> vector<8x256xf32>
    %c0_213 = arith.constant 0 : index
    %c0_214 = arith.constant 0 : index
    %379 = vector.load %arg21[%c0_213, %c0_214] : memref<1x256xf32, #tpu.memory_space<vmem>>, vector<1x256xf32>
    %380 = vector.broadcast %379 : vector<1x256xf32> to vector<8x256xf32>
    %381 = arith.addf %378, %380 : vector<8x256xf32>
    %c0_215 = arith.constant 0 : index
    %c0_216 = arith.constant 0 : index
    %382 = vector.load %arg20[%c0_215, %c0_216] : memref<64x256xbf16, #tpu.memory_space<vmem>>, vector<64x256xbf16>
    %cst_217 = arith.constant 0.000000e+00 : f32
    %383 = vector.broadcast %cst_217 : f32 to vector<2x64xf32>
    %cst_218 = arith.constant 0.000000e+00 : f32
    %384 = vector.broadcast %cst_218 : f32 to vector<2x64xf32>
    %385 = vector.extract_strided_slice %381 {offsets = [0, 0], sizes = [2, 256], strides = [1, 1]} : vector<8x256xf32> to vector<2x256xf32>
    %386 = arith.truncf %383 : vector<2x64xf32> to vector<2x64xbf16>
    %cst_219 = arith.constant dense<0.000000e+00> : vector<2x256xf32>
    %387 = tpu.matmul %386, %382, %cst_219 {dimension_numbers = #tpu.dot_dimension_numbers<[1], [0], [0], [1], [0, 0, 1, 1], [], []>} : vector<2x64xbf16>, vector<64x256xbf16>, vector<2x256xf32> -> vector<2x256xf32>
    %388 = arith.addf %385, %387 : vector<2x256xf32>
    %389 = vector.extract_strided_slice %388 {offsets = [0, 0], sizes = [2, 64], strides = [1, 1]} : vector<2x256xf32> to vector<2x64xf32>
    %cst_220 = arith.constant 5.000000e-01 : f32
    %390 = vector.broadcast %cst_220 : f32 to vector<2x64xf32>
    %391 = arith.mulf %390, %389 : vector<2x64xf32>
    %392 = math.tanh %391 : vector<2x64xf32>
    %cst_221 = arith.constant 5.000000e-01 : f32
    %393 = vector.broadcast %cst_221 : f32 to vector<2x64xf32>
    %394 = arith.mulf %393, %392 : vector<2x64xf32>
    %cst_222 = arith.constant 5.000000e-01 : f32
    %395 = vector.broadcast %cst_222 : f32 to vector<2x64xf32>
    %396 = arith.addf %394, %395 : vector<2x64xf32>
    %397 = vector.extract_strided_slice %388 {offsets = [0, 64], sizes = [2, 64], strides = [1, 1]} : vector<2x256xf32> to vector<2x64xf32>
    %cst_223 = arith.constant 5.000000e-01 : f32
    %398 = vector.broadcast %cst_223 : f32 to vector<2x64xf32>
    %399 = arith.mulf %398, %397 : vector<2x64xf32>
    %400 = math.tanh %399 : vector<2x64xf32>
    %cst_224 = arith.constant 5.000000e-01 : f32
    %401 = vector.broadcast %cst_224 : f32 to vector<2x64xf32>
    %402 = arith.mulf %401, %400 : vector<2x64xf32>
    %cst_225 = arith.constant 5.000000e-01 : f32
    %403 = vector.broadcast %cst_225 : f32 to vector<2x64xf32>
    %404 = arith.addf %402, %403 : vector<2x64xf32>
    %405 = vector.extract_strided_slice %388 {offsets = [0, 128], sizes = [2, 64], strides = [1, 1]} : vector<2x256xf32> to vector<2x64xf32>
    %406 = math.tanh %405 : vector<2x64xf32>
    %407 = vector.extract_strided_slice %388 {offsets = [0, 192], sizes = [2, 64], strides = [1, 1]} : vector<2x256xf32> to vector<2x64xf32>
    %cst_226 = arith.constant 5.000000e-01 : f32
    %408 = vector.broadcast %cst_226 : f32 to vector<2x64xf32>
    %409 = arith.mulf %408, %407 : vector<2x64xf32>
    %410 = math.tanh %409 : vector<2x64xf32>
    %cst_227 = arith.constant 5.000000e-01 : f32
    %411 = vector.broadcast %cst_227 : f32 to vector<2x64xf32>
    %412 = arith.mulf %411, %410 : vector<2x64xf32>
    %cst_228 = arith.constant 5.000000e-01 : f32
    %413 = vector.broadcast %cst_228 : f32 to vector<2x64xf32>
    %414 = arith.addf %412, %413 : vector<2x64xf32>
    %415 = arith.mulf %404, %384 : vector<2x64xf32>
    %416 = arith.mulf %396, %406 : vector<2x64xf32>
    %417 = arith.addf %415, %416 : vector<2x64xf32>
    %418 = math.tanh %417 : vector<2x64xf32>
    %419 = arith.mulf %414, %418 : vector<2x64xf32>
    %c0_229 = arith.constant 0 : index
    %c0_230 = arith.constant 0 : index
    %420 = vector.load %arg31[%c0_229, %c0_230] : memref<8x64xf32, #tpu.memory_space<vmem>>, vector<2x64xf32>
    tpu.vector_store %arg31[%c0_229, %c0_230], %419 {strides = array<i32>} : memref<8x64xf32, #tpu.memory_space<vmem>>, vector<2x64xf32>,
    %421 = vector.extract_strided_slice %381 {offsets = [2, 0], sizes = [2, 256], strides = [1, 1]} : vector<8x256xf32> to vector<2x256xf32>
    %422 = arith.truncf %419 : vector<2x64xf32> to vector<2x64xbf16>
    %cst_231 = arith.constant dense<0.000000e+00> : vector<2x256xf32>
    %423 = tpu.matmul %422, %382, %cst_231 {dimension_numbers = #tpu.dot_dimension_numbers<[1], [0], [0], [1], [0, 0, 1, 1], [], []>} : vector<2x64xbf16>, vector<64x256xbf16>, vector<2x256xf32> -> vector<2x256xf32>
    %424 = arith.addf %421, %423 : vector<2x256xf32>
    %425 = vector.extract_strided_slice %424 {offsets = [0, 0], sizes = [2, 64], strides = [1, 1]} : vector<2x256xf32> to vector<2x64xf32>
    %cst_232 = arith.constant 5.000000e-01 : f32
    %426 = vector.broadcast %cst_232 : f32 to vector<2x64xf32>
    %427 = arith.mulf %426, %425 : vector<2x64xf32>
    %428 = math.tanh %427 : vector<2x64xf32>
    %cst_233 = arith.constant 5.000000e-01 : f32
    %429 = vector.broadcast %cst_233 : f32 to vector<2x64xf32>
    %430 = arith.mulf %429, %428 : vector<2x64xf32>
    %cst_234 = arith.constant 5.000000e-01 : f32
    %431 = vector.broadcast %cst_234 : f32 to vector<2x64xf32>
    %432 = arith.addf %430, %431 : vector<2x64xf32>
    %433 = vector.extract_strided_slice %424 {offsets = [0, 64], sizes = [2, 64], strides = [1, 1]} : vector<2x256xf32> to vector<2x64xf32>
    %cst_235 = arith.constant 5.000000e-01 : f32
    %434 = vector.broadcast %cst_235 : f32 to vector<2x64xf32>
    %435 = arith.mulf %434, %433 : vector<2x64xf32>
    %436 = math.tanh %435 : vector<2x64xf32>
    %cst_236 = arith.constant 5.000000e-01 : f32
    %437 = vector.broadcast %cst_236 : f32 to vector<2x64xf32>
    %438 = arith.mulf %437, %436 : vector<2x64xf32>
    %cst_237 = arith.constant 5.000000e-01 : f32
    %439 = vector.broadcast %cst_237 : f32 to vector<2x64xf32>
    %440 = arith.addf %438, %439 : vector<2x64xf32>
    %441 = vector.extract_strided_slice %424 {offsets = [0, 128], sizes = [2, 64], strides = [1, 1]} : vector<2x256xf32> to vector<2x64xf32>
    %442 = math.tanh %441 : vector<2x64xf32>
    %443 = vector.extract_strided_slice %424 {offsets = [0, 192], sizes = [2, 64], strides = [1, 1]} : vector<2x256xf32> to vector<2x64xf32>
    %cst_238 = arith.constant 5.000000e-01 : f32
    %444 = vector.broadcast %cst_238 : f32 to vector<2x64xf32>
    %445 = arith.mulf %444, %443 : vector<2x64xf32>
    %446 = math.tanh %445 : vector<2x64xf32>
    %cst_239 = arith.constant 5.000000e-01 : f32
    %447 = vector.broadcast %cst_239 : f32 to vector<2x64xf32>
    %448 = arith.mulf %447, %446 : vector<2x64xf32>
    %cst_240 = arith.constant 5.000000e-01 : f32
    %449 = vector.broadcast %cst_240 : f32 to vector<2x64xf32>
    %450 = arith.addf %448, %449 : vector<2x64xf32>
    %451 = arith.mulf %440, %417 : vector<2x64xf32>
    %452 = arith.mulf %432, %442 : vector<2x64xf32>
    %453 = arith.addf %451, %452 : vector<2x64xf32>
    %454 = math.tanh %453 : vector<2x64xf32>
    %455 = arith.mulf %450, %454 : vector<2x64xf32>
    %c2_241 = arith.constant 2 : index
    %c0_242 = arith.constant 0 : index
    %456 = vector.load %arg31[%c2_241, %c0_242] : memref<8x64xf32, #tpu.memory_space<vmem>>, vector<2x64xf32>
    tpu.vector_store %arg31[%c2_241, %c0_242], %455 {strides = array<i32>} : memref<8x64xf32, #tpu.memory_space<vmem>>, vector<2x64xf32>,
    %457 = vector.extract_strided_slice %381 {offsets = [4, 0], sizes = [2, 256], strides = [1, 1]} : vector<8x256xf32> to vector<2x256xf32>
    %458 = arith.truncf %455 : vector<2x64xf32> to vector<2x64xbf16>
    %cst_243 = arith.constant dense<0.000000e+00> : vector<2x256xf32>
    %459 = tpu.matmul %458, %382, %cst_243 {dimension_numbers = #tpu.dot_dimension_numbers<[1], [0], [0], [1], [0, 0, 1, 1], [], []>} : vector<2x64xbf16>, vector<64x256xbf16>, vector<2x256xf32> -> vector<2x256xf32>
    %460 = arith.addf %457, %459 : vector<2x256xf32>
    %461 = vector.extract_strided_slice %460 {offsets = [0, 0], sizes = [2, 64], strides = [1, 1]} : vector<2x256xf32> to vector<2x64xf32>
    %cst_244 = arith.constant 5.000000e-01 : f32
    %462 = vector.broadcast %cst_244 : f32 to vector<2x64xf32>
    %463 = arith.mulf %462, %461 : vector<2x64xf32>
    %464 = math.tanh %463 : vector<2x64xf32>
    %cst_245 = arith.constant 5.000000e-01 : f32
    %465 = vector.broadcast %cst_245 : f32 to vector<2x64xf32>
    %466 = arith.mulf %465, %464 : vector<2x64xf32>
    %cst_246 = arith.constant 5.000000e-01 : f32
    %467 = vector.broadcast %cst_246 : f32 to vector<2x64xf32>
    %468 = arith.addf %466, %467 : vector<2x64xf32>
    %469 = vector.extract_strided_slice %460 {offsets = [0, 64], sizes = [2, 64], strides = [1, 1]} : vector<2x256xf32> to vector<2x64xf32>
    %cst_247 = arith.constant 5.000000e-01 : f32
    %470 = vector.broadcast %cst_247 : f32 to vector<2x64xf32>
    %471 = arith.mulf %470, %469 : vector<2x64xf32>
    %472 = math.tanh %471 : vector<2x64xf32>
    %cst_248 = arith.constant 5.000000e-01 : f32
    %473 = vector.broadcast %cst_248 : f32 to vector<2x64xf32>
    %474 = arith.mulf %473, %472 : vector<2x64xf32>
    %cst_249 = arith.constant 5.000000e-01 : f32
    %475 = vector.broadcast %cst_249 : f32 to vector<2x64xf32>
    %476 = arith.addf %474, %475 : vector<2x64xf32>
    %477 = vector.extract_strided_slice %460 {offsets = [0, 128], sizes = [2, 64], strides = [1, 1]} : vector<2x256xf32> to vector<2x64xf32>
    %478 = math.tanh %477 : vector<2x64xf32>
    %479 = vector.extract_strided_slice %460 {offsets = [0, 192], sizes = [2, 64], strides = [1, 1]} : vector<2x256xf32> to vector<2x64xf32>
    %cst_250 = arith.constant 5.000000e-01 : f32
    %480 = vector.broadcast %cst_250 : f32 to vector<2x64xf32>
    %481 = arith.mulf %480, %479 : vector<2x64xf32>
    %482 = math.tanh %481 : vector<2x64xf32>
    %cst_251 = arith.constant 5.000000e-01 : f32
    %483 = vector.broadcast %cst_251 : f32 to vector<2x64xf32>
    %484 = arith.mulf %483, %482 : vector<2x64xf32>
    %cst_252 = arith.constant 5.000000e-01 : f32
    %485 = vector.broadcast %cst_252 : f32 to vector<2x64xf32>
    %486 = arith.addf %484, %485 : vector<2x64xf32>
    %487 = arith.mulf %476, %453 : vector<2x64xf32>
    %488 = arith.mulf %468, %478 : vector<2x64xf32>
    %489 = arith.addf %487, %488 : vector<2x64xf32>
    %490 = math.tanh %489 : vector<2x64xf32>
    %491 = arith.mulf %486, %490 : vector<2x64xf32>
    %c4_253 = arith.constant 4 : index
    %c0_254 = arith.constant 0 : index
    %492 = vector.load %arg31[%c4_253, %c0_254] : memref<8x64xf32, #tpu.memory_space<vmem>>, vector<2x64xf32>
    tpu.vector_store %arg31[%c4_253, %c0_254], %491 {strides = array<i32>} : memref<8x64xf32, #tpu.memory_space<vmem>>, vector<2x64xf32>,
    %493 = vector.extract_strided_slice %381 {offsets = [6, 0], sizes = [2, 256], strides = [1, 1]} : vector<8x256xf32> to vector<2x256xf32>
    %494 = arith.truncf %491 : vector<2x64xf32> to vector<2x64xbf16>
    %cst_255 = arith.constant dense<0.000000e+00> : vector<2x256xf32>
    %495 = tpu.matmul %494, %382, %cst_255 {dimension_numbers = #tpu.dot_dimension_numbers<[1], [0], [0], [1], [0, 0, 1, 1], [], []>} : vector<2x64xbf16>, vector<64x256xbf16>, vector<2x256xf32> -> vector<2x256xf32>
    %496 = arith.addf %493, %495 : vector<2x256xf32>
    %497 = vector.extract_strided_slice %496 {offsets = [0, 0], sizes = [2, 64], strides = [1, 1]} : vector<2x256xf32> to vector<2x64xf32>
    %cst_256 = arith.constant 5.000000e-01 : f32
    %498 = vector.broadcast %cst_256 : f32 to vector<2x64xf32>
    %499 = arith.mulf %498, %497 : vector<2x64xf32>
    %500 = math.tanh %499 : vector<2x64xf32>
    %cst_257 = arith.constant 5.000000e-01 : f32
    %501 = vector.broadcast %cst_257 : f32 to vector<2x64xf32>
    %502 = arith.mulf %501, %500 : vector<2x64xf32>
    %cst_258 = arith.constant 5.000000e-01 : f32
    %503 = vector.broadcast %cst_258 : f32 to vector<2x64xf32>
    %504 = arith.addf %502, %503 : vector<2x64xf32>
    %505 = vector.extract_strided_slice %496 {offsets = [0, 64], sizes = [2, 64], strides = [1, 1]} : vector<2x256xf32> to vector<2x64xf32>
    %cst_259 = arith.constant 5.000000e-01 : f32
    %506 = vector.broadcast %cst_259 : f32 to vector<2x64xf32>
    %507 = arith.mulf %506, %505 : vector<2x64xf32>
    %508 = math.tanh %507 : vector<2x64xf32>
    %cst_260 = arith.constant 5.000000e-01 : f32
    %509 = vector.broadcast %cst_260 : f32 to vector<2x64xf32>
    %510 = arith.mulf %509, %508 : vector<2x64xf32>
    %cst_261 = arith.constant 5.000000e-01 : f32
    %511 = vector.broadcast %cst_261 : f32 to vector<2x64xf32>
    %512 = arith.addf %510, %511 : vector<2x64xf32>
    %513 = vector.extract_strided_slice %496 {offsets = [0, 128], sizes = [2, 64], strides = [1, 1]} : vector<2x256xf32> to vector<2x64xf32>
    %514 = math.tanh %513 : vector<2x64xf32>
    %515 = vector.extract_strided_slice %496 {offsets = [0, 192], sizes = [2, 64], strides = [1, 1]} : vector<2x256xf32> to vector<2x64xf32>
    %cst_262 = arith.constant 5.000000e-01 : f32
    %516 = vector.broadcast %cst_262 : f32 to vector<2x64xf32>
    %517 = arith.mulf %516, %515 : vector<2x64xf32>
    %518 = math.tanh %517 : vector<2x64xf32>
    %cst_263 = arith.constant 5.000000e-01 : f32
    %519 = vector.broadcast %cst_263 : f32 to vector<2x64xf32>
    %520 = arith.mulf %519, %518 : vector<2x64xf32>
    %cst_264 = arith.constant 5.000000e-01 : f32
    %521 = vector.broadcast %cst_264 : f32 to vector<2x64xf32>
    %522 = arith.addf %520, %521 : vector<2x64xf32>
    %523 = arith.mulf %512, %489 : vector<2x64xf32>
    %524 = arith.mulf %504, %514 : vector<2x64xf32>
    %525 = arith.addf %523, %524 : vector<2x64xf32>
    %526 = math.tanh %525 : vector<2x64xf32>
    %527 = arith.mulf %522, %526 : vector<2x64xf32>
    %c6_265 = arith.constant 6 : index
    %c0_266 = arith.constant 0 : index
    %528 = vector.load %arg31[%c6_265, %c0_266] : memref<8x64xf32, #tpu.memory_space<vmem>>, vector<2x64xf32>
    tpu.vector_store %arg31[%c6_265, %c0_266], %527 {strides = array<i32>} : memref<8x64xf32, #tpu.memory_space<vmem>>, vector<2x64xf32>,
    %c0_267 = arith.constant 0 : index
    %c0_268 = arith.constant 0 : index
    %529 = vector.load %arg31[%c0_267, %c0_268] : memref<8x64xf32, #tpu.memory_space<vmem>>, vector<8x64xf32>
    %530 = arith.truncf %529 : vector<8x64xf32> to vector<8x64xbf16>
    %c0_269 = arith.constant 0 : index
    %c0_270 = arith.constant 0 : index
    %531 = vector.load %arg22[%c0_269, %c0_270] : memref<64x256xbf16, #tpu.memory_space<vmem>>, vector<64x256xbf16>
    %cst_271 = arith.constant dense<0.000000e+00> : vector<8x256xf32>
    %532 = tpu.matmul %530, %531, %cst_271 {dimension_numbers = #tpu.dot_dimension_numbers<[1], [0], [0], [1], [0, 0, 1, 1], [], []>} : vector<8x64xbf16>, vector<64x256xbf16>, vector<8x256xf32> -> vector<8x256xf32>
    %c0_272 = arith.constant 0 : index
    %c0_273 = arith.constant 0 : index
    %533 = vector.load %arg24[%c0_272, %c0_273] : memref<1x256xf32, #tpu.memory_space<vmem>>, vector<1x256xf32>
    %534 = vector.broadcast %533 : vector<1x256xf32> to vector<8x256xf32>
    %535 = arith.addf %532, %534 : vector<8x256xf32>
    %c0_274 = arith.constant 0 : index
    %c0_275 = arith.constant 0 : index
    %536 = vector.load %arg23[%c0_274, %c0_275] : memref<64x256xbf16, #tpu.memory_space<vmem>>, vector<64x256xbf16>
    %cst_276 = arith.constant 0.000000e+00 : f32
    %537 = vector.broadcast %cst_276 : f32 to vector<2x64xf32>
    %cst_277 = arith.constant 0.000000e+00 : f32
    %538 = vector.broadcast %cst_277 : f32 to vector<2x64xf32>
    %539 = vector.extract_strided_slice %535 {offsets = [0, 0], sizes = [2, 256], strides = [1, 1]} : vector<8x256xf32> to vector<2x256xf32>
    %540 = arith.truncf %537 : vector<2x64xf32> to vector<2x64xbf16>
    %cst_278 = arith.constant dense<0.000000e+00> : vector<2x256xf32>
    %541 = tpu.matmul %540, %536, %cst_278 {dimension_numbers = #tpu.dot_dimension_numbers<[1], [0], [0], [1], [0, 0, 1, 1], [], []>} : vector<2x64xbf16>, vector<64x256xbf16>, vector<2x256xf32> -> vector<2x256xf32>
    %542 = arith.addf %539, %541 : vector<2x256xf32>
    %543 = vector.extract_strided_slice %542 {offsets = [0, 0], sizes = [2, 64], strides = [1, 1]} : vector<2x256xf32> to vector<2x64xf32>
    %cst_279 = arith.constant 5.000000e-01 : f32
    %544 = vector.broadcast %cst_279 : f32 to vector<2x64xf32>
    %545 = arith.mulf %544, %543 : vector<2x64xf32>
    %546 = math.tanh %545 : vector<2x64xf32>
    %cst_280 = arith.constant 5.000000e-01 : f32
    %547 = vector.broadcast %cst_280 : f32 to vector<2x64xf32>
    %548 = arith.mulf %547, %546 : vector<2x64xf32>
    %cst_281 = arith.constant 5.000000e-01 : f32
    %549 = vector.broadcast %cst_281 : f32 to vector<2x64xf32>
    %550 = arith.addf %548, %549 : vector<2x64xf32>
    %551 = vector.extract_strided_slice %542 {offsets = [0, 64], sizes = [2, 64], strides = [1, 1]} : vector<2x256xf32> to vector<2x64xf32>
    %cst_282 = arith.constant 5.000000e-01 : f32
    %552 = vector.broadcast %cst_282 : f32 to vector<2x64xf32>
    %553 = arith.mulf %552, %551 : vector<2x64xf32>
    %554 = math.tanh %553 : vector<2x64xf32>
    %cst_283 = arith.constant 5.000000e-01 : f32
    %555 = vector.broadcast %cst_283 : f32 to vector<2x64xf32>
    %556 = arith.mulf %555, %554 : vector<2x64xf32>
    %cst_284 = arith.constant 5.000000e-01 : f32
    %557 = vector.broadcast %cst_284 : f32 to vector<2x64xf32>
    %558 = arith.addf %556, %557 : vector<2x64xf32>
    %559 = vector.extract_strided_slice %542 {offsets = [0, 128], sizes = [2, 64], strides = [1, 1]} : vector<2x256xf32> to vector<2x64xf32>
    %560 = math.tanh %559 : vector<2x64xf32>
    %561 = vector.extract_strided_slice %542 {offsets = [0, 192], sizes = [2, 64], strides = [1, 1]} : vector<2x256xf32> to vector<2x64xf32>
    %cst_285 = arith.constant 5.000000e-01 : f32
    %562 = vector.broadcast %cst_285 : f32 to vector<2x64xf32>
    %563 = arith.mulf %562, %561 : vector<2x64xf32>
    %564 = math.tanh %563 : vector<2x64xf32>
    %cst_286 = arith.constant 5.000000e-01 : f32
    %565 = vector.broadcast %cst_286 : f32 to vector<2x64xf32>
    %566 = arith.mulf %565, %564 : vector<2x64xf32>
    %cst_287 = arith.constant 5.000000e-01 : f32
    %567 = vector.broadcast %cst_287 : f32 to vector<2x64xf32>
    %568 = arith.addf %566, %567 : vector<2x64xf32>
    %569 = arith.mulf %558, %538 : vector<2x64xf32>
    %570 = arith.mulf %550, %560 : vector<2x64xf32>
    %571 = arith.addf %569, %570 : vector<2x64xf32>
    %572 = math.tanh %571 : vector<2x64xf32>
    %573 = arith.mulf %568, %572 : vector<2x64xf32>
    %574 = vector.extract_strided_slice %535 {offsets = [2, 0], sizes = [2, 256], strides = [1, 1]} : vector<8x256xf32> to vector<2x256xf32>
    %575 = arith.truncf %573 : vector<2x64xf32> to vector<2x64xbf16>
    %cst_288 = arith.constant dense<0.000000e+00> : vector<2x256xf32>
    %576 = tpu.matmul %575, %536, %cst_288 {dimension_numbers = #tpu.dot_dimension_numbers<[1], [0], [0], [1], [0, 0, 1, 1], [], []>} : vector<2x64xbf16>, vector<64x256xbf16>, vector<2x256xf32> -> vector<2x256xf32>
    %577 = arith.addf %574, %576 : vector<2x256xf32>
    %578 = vector.extract_strided_slice %577 {offsets = [0, 0], sizes = [2, 64], strides = [1, 1]} : vector<2x256xf32> to vector<2x64xf32>
    %cst_289 = arith.constant 5.000000e-01 : f32
    %579 = vector.broadcast %cst_289 : f32 to vector<2x64xf32>
    %580 = arith.mulf %579, %578 : vector<2x64xf32>
    %581 = math.tanh %580 : vector<2x64xf32>
    %cst_290 = arith.constant 5.000000e-01 : f32
    %582 = vector.broadcast %cst_290 : f32 to vector<2x64xf32>
    %583 = arith.mulf %582, %581 : vector<2x64xf32>
    %cst_291 = arith.constant 5.000000e-01 : f32
    %584 = vector.broadcast %cst_291 : f32 to vector<2x64xf32>
    %585 = arith.addf %583, %584 : vector<2x64xf32>
    %586 = vector.extract_strided_slice %577 {offsets = [0, 64], sizes = [2, 64], strides = [1, 1]} : vector<2x256xf32> to vector<2x64xf32>
    %cst_292 = arith.constant 5.000000e-01 : f32
    %587 = vector.broadcast %cst_292 : f32 to vector<2x64xf32>
    %588 = arith.mulf %587, %586 : vector<2x64xf32>
    %589 = math.tanh %588 : vector<2x64xf32>
    %cst_293 = arith.constant 5.000000e-01 : f32
    %590 = vector.broadcast %cst_293 : f32 to vector<2x64xf32>
    %591 = arith.mulf %590, %589 : vector<2x64xf32>
    %cst_294 = arith.constant 5.000000e-01 : f32
    %592 = vector.broadcast %cst_294 : f32 to vector<2x64xf32>
    %593 = arith.addf %591, %592 : vector<2x64xf32>
    %594 = vector.extract_strided_slice %577 {offsets = [0, 128], sizes = [2, 64], strides = [1, 1]} : vector<2x256xf32> to vector<2x64xf32>
    %595 = math.tanh %594 : vector<2x64xf32>
    %596 = vector.extract_strided_slice %577 {offsets = [0, 192], sizes = [2, 64], strides = [1, 1]} : vector<2x256xf32> to vector<2x64xf32>
    %cst_295 = arith.constant 5.000000e-01 : f32
    %597 = vector.broadcast %cst_295 : f32 to vector<2x64xf32>
    %598 = arith.mulf %597, %596 : vector<2x64xf32>
    %599 = math.tanh %598 : vector<2x64xf32>
    %cst_296 = arith.constant 5.000000e-01 : f32
    %600 = vector.broadcast %cst_296 : f32 to vector<2x64xf32>
    %601 = arith.mulf %600, %599 : vector<2x64xf32>
    %cst_297 = arith.constant 5.000000e-01 : f32
    %602 = vector.broadcast %cst_297 : f32 to vector<2x64xf32>
    %603 = arith.addf %601, %602 : vector<2x64xf32>
    %604 = arith.mulf %593, %571 : vector<2x64xf32>
    %605 = arith.mulf %585, %595 : vector<2x64xf32>
    %606 = arith.addf %604, %605 : vector<2x64xf32>
    %607 = math.tanh %606 : vector<2x64xf32>
    %608 = arith.mulf %603, %607 : vector<2x64xf32>
    %609 = vector.extract_strided_slice %535 {offsets = [4, 0], sizes = [2, 256], strides = [1, 1]} : vector<8x256xf32> to vector<2x256xf32>
    %610 = arith.truncf %608 : vector<2x64xf32> to vector<2x64xbf16>
    %cst_298 = arith.constant dense<0.000000e+00> : vector<2x256xf32>
    %611 = tpu.matmul %610, %536, %cst_298 {dimension_numbers = #tpu.dot_dimension_numbers<[1], [0], [0], [1], [0, 0, 1, 1], [], []>} : vector<2x64xbf16>, vector<64x256xbf16>, vector<2x256xf32> -> vector<2x256xf32>
    %612 = arith.addf %609, %611 : vector<2x256xf32>
    %613 = vector.extract_strided_slice %612 {offsets = [0, 0], sizes = [2, 64], strides = [1, 1]} : vector<2x256xf32> to vector<2x64xf32>
    %cst_299 = arith.constant 5.000000e-01 : f32
    %614 = vector.broadcast %cst_299 : f32 to vector<2x64xf32>
    %615 = arith.mulf %614, %613 : vector<2x64xf32>
    %616 = math.tanh %615 : vector<2x64xf32>
    %cst_300 = arith.constant 5.000000e-01 : f32
    %617 = vector.broadcast %cst_300 : f32 to vector<2x64xf32>
    %618 = arith.mulf %617, %616 : vector<2x64xf32>
    %cst_301 = arith.constant 5.000000e-01 : f32
    %619 = vector.broadcast %cst_301 : f32 to vector<2x64xf32>
    %620 = arith.addf %618, %619 : vector<2x64xf32>
    %621 = vector.extract_strided_slice %612 {offsets = [0, 64], sizes = [2, 64], strides = [1, 1]} : vector<2x256xf32> to vector<2x64xf32>
    %cst_302 = arith.constant 5.000000e-01 : f32
    %622 = vector.broadcast %cst_302 : f32 to vector<2x64xf32>
    %623 = arith.mulf %622, %621 : vector<2x64xf32>
    %624 = math.tanh %623 : vector<2x64xf32>
    %cst_303 = arith.constant 5.000000e-01 : f32
    %625 = vector.broadcast %cst_303 : f32 to vector<2x64xf32>
    %626 = arith.mulf %625, %624 : vector<2x64xf32>
    %cst_304 = arith.constant 5.000000e-01 : f32
    %627 = vector.broadcast %cst_304 : f32 to vector<2x64xf32>
    %628 = arith.addf %626, %627 : vector<2x64xf32>
    %629 = vector.extract_strided_slice %612 {offsets = [0, 128], sizes = [2, 64], strides = [1, 1]} : vector<2x256xf32> to vector<2x64xf32>
    %630 = math.tanh %629 : vector<2x64xf32>
    %631 = vector.extract_strided_slice %612 {offsets = [0, 192], sizes = [2, 64], strides = [1, 1]} : vector<2x256xf32> to vector<2x64xf32>
    %cst_305 = arith.constant 5.000000e-01 : f32
    %632 = vector.broadcast %cst_305 : f32 to vector<2x64xf32>
    %633 = arith.mulf %632, %631 : vector<2x64xf32>
    %634 = math.tanh %633 : vector<2x64xf32>
    %cst_306 = arith.constant 5.000000e-01 : f32
    %635 = vector.broadcast %cst_306 : f32 to vector<2x64xf32>
    %636 = arith.mulf %635, %634 : vector<2x64xf32>
    %cst_307 = arith.constant 5.000000e-01 : f32
    %637 = vector.broadcast %cst_307 : f32 to vector<2x64xf32>
    %638 = arith.addf %636, %637 : vector<2x64xf32>
    %639 = arith.mulf %628, %606 : vector<2x64xf32>
    %640 = arith.mulf %620, %630 : vector<2x64xf32>
    %641 = arith.addf %639, %640 : vector<2x64xf32>
    %642 = math.tanh %641 : vector<2x64xf32>
    %643 = arith.mulf %638, %642 : vector<2x64xf32>
    %644 = vector.extract_strided_slice %535 {offsets = [6, 0], sizes = [2, 256], strides = [1, 1]} : vector<8x256xf32> to vector<2x256xf32>
    %645 = arith.truncf %643 : vector<2x64xf32> to vector<2x64xbf16>
    %cst_308 = arith.constant dense<0.000000e+00> : vector<2x256xf32>
    %646 = tpu.matmul %645, %536, %cst_308 {dimension_numbers = #tpu.dot_dimension_numbers<[1], [0], [0], [1], [0, 0, 1, 1], [], []>} : vector<2x64xbf16>, vector<64x256xbf16>, vector<2x256xf32> -> vector<2x256xf32>
    %647 = arith.addf %644, %646 : vector<2x256xf32>
    %648 = vector.extract_strided_slice %647 {offsets = [0, 0], sizes = [2, 64], strides = [1, 1]} : vector<2x256xf32> to vector<2x64xf32>
    %cst_309 = arith.constant 5.000000e-01 : f32
    %649 = vector.broadcast %cst_309 : f32 to vector<2x64xf32>
    %650 = arith.mulf %649, %648 : vector<2x64xf32>
    %651 = math.tanh %650 : vector<2x64xf32>
    %cst_310 = arith.constant 5.000000e-01 : f32
    %652 = vector.broadcast %cst_310 : f32 to vector<2x64xf32>
    %653 = arith.mulf %652, %651 : vector<2x64xf32>
    %cst_311 = arith.constant 5.000000e-01 : f32
    %654 = vector.broadcast %cst_311 : f32 to vector<2x64xf32>
    %655 = arith.addf %653, %654 : vector<2x64xf32>
    %656 = vector.extract_strided_slice %647 {offsets = [0, 64], sizes = [2, 64], strides = [1, 1]} : vector<2x256xf32> to vector<2x64xf32>
    %cst_312 = arith.constant 5.000000e-01 : f32
    %657 = vector.broadcast %cst_312 : f32 to vector<2x64xf32>
    %658 = arith.mulf %657, %656 : vector<2x64xf32>
    %659 = math.tanh %658 : vector<2x64xf32>
    %cst_313 = arith.constant 5.000000e-01 : f32
    %660 = vector.broadcast %cst_313 : f32 to vector<2x64xf32>
    %661 = arith.mulf %660, %659 : vector<2x64xf32>
    %cst_314 = arith.constant 5.000000e-01 : f32
    %662 = vector.broadcast %cst_314 : f32 to vector<2x64xf32>
    %663 = arith.addf %661, %662 : vector<2x64xf32>
    %664 = vector.extract_strided_slice %647 {offsets = [0, 128], sizes = [2, 64], strides = [1, 1]} : vector<2x256xf32> to vector<2x64xf32>
    %665 = math.tanh %664 : vector<2x64xf32>
    %666 = vector.extract_strided_slice %647 {offsets = [0, 192], sizes = [2, 64], strides = [1, 1]} : vector<2x256xf32> to vector<2x64xf32>
    %cst_315 = arith.constant 5.000000e-01 : f32
    %667 = vector.broadcast %cst_315 : f32 to vector<2x64xf32>
    %668 = arith.mulf %667, %666 : vector<2x64xf32>
    %669 = math.tanh %668 : vector<2x64xf32>
    %cst_316 = arith.constant 5.000000e-01 : f32
    %670 = vector.broadcast %cst_316 : f32 to vector<2x64xf32>
    %671 = arith.mulf %670, %669 : vector<2x64xf32>
    %cst_317 = arith.constant 5.000000e-01 : f32
    %672 = vector.broadcast %cst_317 : f32 to vector<2x64xf32>
    %673 = arith.addf %671, %672 : vector<2x64xf32>
    %674 = arith.mulf %663, %641 : vector<2x64xf32>
    %675 = arith.mulf %655, %665 : vector<2x64xf32>
    %676 = arith.addf %674, %675 : vector<2x64xf32>
    %677 = math.tanh %676 : vector<2x64xf32>
    %678 = arith.mulf %673, %677 : vector<2x64xf32>
    %c0_318 = arith.constant 0 : index
    %c0_319 = arith.constant 0 : index
    %679 = vector.load %arg25[%c0_318, %c0_319] : memref<64x4xf32, #tpu.memory_space<vmem>>, vector<64x4xf32>
    %cst_320 = arith.constant dense<0.000000e+00> : vector<2x4xf32>
    %680 = tpu.matmul %678, %679, %cst_320 {dimension_numbers = #tpu.dot_dimension_numbers<[1], [0], [0], [1], [0, 0, 1, 1], [], []>} : vector<2x64xf32>, vector<64x4xf32>, vector<2x4xf32> -> vector<2x4xf32>
    %c0_321 = arith.constant 0 : index
    %c0_322 = arith.constant 0 : index
    %681 = vector.load %arg26[%c0_321, %c0_322] : memref<1x4xf32, #tpu.memory_space<vmem>>, vector<1x4xf32>
    %682 = vector.broadcast %681 : vector<1x4xf32> to vector<2x4xf32>
    %683 = arith.addf %680, %682 : vector<2x4xf32>
    %c0_323 = arith.constant 0 : index
    %c0_324 = arith.constant 0 : index
    %684 = vector.load %arg27[%c0_323, %c0_324] : memref<2x4xf32, #tpu.memory_space<vmem>>, vector<2x4xf32>
    tpu.vector_store %arg27[%c0_323, %c0_324], %683 {strides = array<i32>} : memref<2x4xf32, #tpu.memory_space<vmem>>, vector<2x4xf32>,
    return
  }
}

</mosaic_0001>

<bundles_post_ra>
// kernel: cnn_lstm_forward.1
= control target key start
LH: loop header
LB: loop body
LE: loop exit
PB: predicated region body
PF: predicated region fallthrough
CT: control target
= control target key end

     0   :  { %s10243_s0 = inlined_call_operand.vmem [shape: f32[22,500], index: 0, kind: input, shape index: {}]   ;;  %s10244_s1 = inlined_call_operand.vmem [shape: bf16[25,220], index: 1, kind: input, shape index: {}]   ;;  %s10245_s2 = inlined_call_operand.vmem [shape: f32[25,1], index: 2, kind: input, shape index: {}]   ;;  %s10246_s3 = inlined_call_operand.vmem [shape: f32[25,1], index: 3, kind: input, shape index: {}]   ;;  %s10247_s4 = inlined_call_operand.vmem [shape: f32[25,1], index: 4, kind: input, shape index: {}]   ;;  %s10248_s5 = inlined_call_operand.vmem [shape: f32[480,160], index: 5, kind: input, shape index: {}]   ;;  %s10249_s6 = inlined_call_operand.vmem [shape: bf16[30,300], index: 6, kind: input, shape index: {}]   ;;  %s10250_s7 = inlined_call_operand.vmem [shape: f32[30,1], index: 7, kind: input, shape index: {}]   ;;  %s10251_s8 = inlined_call_operand.vmem [shape: f32[30,1], index: 8, kind: input, shape index: {}]   ;;  %s10252_s9 = inlined_call_operand.vmem [shape: f32[30,1], index: 9, kind: input, shape index: {}]   ;;  %s10253_s10 = inlined_call_operand.vmem [shape: f32[136,46], index: 10, kind: input, shape index: {}]   ;;  %s10254_s11 = inlined_call_operand.vmem [shape: bf16[50,360], index: 11, kind: input, shape index: {}]   ;;  %s10255_s12 = inlined_call_operand.vmem [shape: f32[50,1], index: 12, kind: input, shape index: {}]   ;;  %s10256_s13 = inlined_call_operand.vmem [shape: f32[50,1], index: 13, kind: input, shape index: {}]   ;;  %s10257_s14 = inlined_call_operand.vmem [shape: f32[50,1], index: 14, kind: input, shape index: {}]   ;;  %s10258_s15 = inlined_call_operand.vmem [shape: f32[22,8], index: 15, kind: input, shape index: {}]   ;;  %s10259_s16 = inlined_call_operand.vmem [shape: bf16[50,256], index: 16, kind: input, shape index: {}]   ;;  %s10260_s17 = inlined_call_operand.vmem [shape: bf16[64,256], index: 17, kind: input, shape index: {}]   ;;  %s10261_s18 = inlined_call_operand.vmem [shape: f32[1,256], index: 18, kind: input, shape index: {}]   ;;  %s10262_s19 = inlined_call_operand.vmem [shape: bf16[64,256], index: 19, kind: input, shape index: {}]   ;;  %s10263_s20 = inlined_call_operand.vmem [shape: bf16[64,256], index: 20, kind: input, shape index: {}]   ;;  %s10264_s21 = inlined_call_operand.vmem [shape: f32[1,256], index: 21, kind: input, shape index: {}]   ;;  %s10265_s22 = inlined_call_operand.vmem [shape: bf16[64,256], index: 22, kind: input, shape index: {}]   ;;  %s10266_s23 = inlined_call_operand.vmem [shape: bf16[64,256], index: 23, kind: input, shape index: {}]   ;;  %s10267_s24 = inlined_call_operand.vmem [shape: f32[1,256], index: 24, kind: input, shape index: {}]   ;;  %s10268_s25 = inlined_call_operand.vmem [shape: f32[64,4], index: 25, kind: input, shape index: {}]   ;;  %s10269_s26 = inlined_call_operand.vmem [shape: f32[1,4], index: 26, kind: input, shape index: {}]   ;;  %s10270_s27 = inlined_call_operand.hbm [shape: f32[2,4], index: 27, kind: output, shape index: {}]  }
   0x1   :  { %10380 = sst [smem:[#allocation17_spill]] %s10243_s0 }
   0x2   :  { %10381 = sst [smem:[#allocation18_spill]] %s10244_s1 }
   0x3   :  { %10382 = sst [smem:[#allocation19_spill]] %s10245_s2 }
   0x4   :  { %10383 = sst [smem:[#allocation20_spill]] %s10246_s3 }
   0x5   :  { %10384 = sst [smem:[#allocation21_spill]] %s10247_s4 }
   0x6   :  { %10385 = sst [smem:[#allocation22_spill]] %s10248_s5 }
   0x7   :  { %10386 = sst [smem:[#allocation23_spill]] %s10249_s6 }
   0x8   :  { %10387 = sst [smem:[#allocation24_spill]] %s10250_s7 }
   0x9   :  { %10388 = sst [smem:[#allocation25_spill]] %s10251_s8 }
   0xa   :  { %10389 = sst [smem:[#allocation26_spill]] %s10252_s9 }
   0xb   :  { %10390 = sst [smem:[#allocation27_spill]] %s10253_s10 }
   0xc   :  { %10391 = sst [smem:[#allocation28_spill]] %s10254_s11 }
   0xd   :  { %10392 = sst [smem:[#allocation29_spill]] %s10255_s12 }
   0xe   :  { %10393 = sst [smem:[#allocation30_spill]] %s10256_s13 }
   0xf   :  { %10394 = sst [smem:[#allocation31_spill]] %s10257_s14 }
  0x10   :  { %10395 = sst [smem:[#allocation32_spill]] %s10258_s15 }
  0x11   :  { %10396 = sst [smem:[#allocation33_spill]] %s10259_s16 }
  0x12   :  { %10397 = sst [smem:[#allocation34_spill]] %s10260_s17 }
  0x13   :  { %10398 = sst [smem:[#allocation35_spill]] %s10261_s18 }
  0x14   :  { %10399 = sst [smem:[#allocation36_spill]] %s10262_s19 }
  0x15   :  { %10400 = sst [smem:[#allocation37_spill]] %s10263_s20 }
  0x16   :  { %10401 = sst [smem:[#allocation38_spill]] %s10264_s21 }
  0x17   :  { %10402 = sst [smem:[#allocation39_spill]] %s10265_s22 }
  0x18   :  { %10403 = sst [smem:[#allocation40_spill]] %s10266_s23 }
  0x19   :  { %10404 = sst [smem:[#allocation41_spill]] %s10267_s24 }
  0x1a   :  { %10405 = sst [smem:[#allocation42_spill]] %s10268_s25 }
  0x1b   :  { %10406 = sst [smem:[#allocation43_spill]] %s10269_s26 }
  0x1c   :  { %10407 = sst [smem:[#allocation44_spill]] %s10270_s27 }
  0x1d   :  { %s10408_s8 = sld [smem:[#allocation17_spill]]  ;;  %s10327_s5 = smov 119   ;;  %vm10293_vm0 = vcmask 1045504   ;;  %vm101_vm1 = vcmask 924672   ;;  %vm106_vm2 = vcmask 922624  }
  0x1e   :  { %s10342_s29 = smov 127   ;;  %s10305_s11 = smov 118  }
  0x23   :  { %v6872_v0 = vld [vmem:[%s10408_s8 + $0x28] sm:$0xff]  ;;  %v6886_v2 = vld [vmem:[%s10408_s8 + $0x30] sm:$0xff]  ;;  %v6896_v4 = vld [vmem:[%s10408_s8] sm:$0xff] }
  0x24   :  { %v6877_v1 = vld [vmem:[%s10408_s8 + $0x8] sm:$0xff]  ;;  %461 = vrot.lane.b32.xlu1 %v6872_v0, %s10327_s5  ;;  %v6891_v3 = vld [vmem:[%s10408_s8 + $0x10] sm:$0xff]  ;;  %v6901_v5 = vld [vmem:[%s10408_s8 + $0x20] sm:$0xff]  ;;  %100 = vst [vmem:[#allocation2] sm:$0xff] %v6896_v4  ;;  %v119_v10 = vrot.slane %v6872_v0, 2  ;;  %v503_v15 = vrot.slane %v6886_v2, 2 }
  0x25   :  { %10409 = vst [vmem:[#allocation9_spill] sm:$0xff] %v6877_v1  ;;  %455 = vrot.lane.b32.xlu0 %v6877_v1, %s10327_s5  ;;  %103 = vst [vmem:[#allocation2 + $0x20] sm:$0xff] %v6901_v5  ;;  %v6912_v6 = vld [vmem:[%s10408_s8 + $0x38] sm:$0xff]  ;;  %v6917_v7 = vld [vmem:[%s10408_s8 + $0x40] sm:$0x3f]  ;;  %v6925_v9 = vrot.slane %v6877_v1, 2 }
  0x26   :  { %v6922_v8 = vld [vmem:[%s10408_s8 + $0x18] sm:$0xff]  ;;  %105 = vst [vmem:[#allocation2 + $0x40] sm:$0x3f] %v6917_v7  ;;  %v6940_v12 = vld [vmem:[%s10408_s8 + $0x48] sm:$0x3f]  ;;  %104 = vst.msk [vmem:[#allocation2 + $0x28] sm:$0xff] %vm101_vm1, %v6872_v0 }
  0x27   :  { %v6935_v11 = vsel %vm10293_vm0, %v6925_v9, %v119_v10  ;;  %v6949_v13 = vld [vmem:[%s10408_s8 + $0x50] sm:$0x3f]  ;;  %102 = vst.msk [vmem:[#allocation2 + $0x8] sm:$0xff] %vm101_vm1, %v6877_v1  ;;  %v6960_v14 = vrot.slane %v6891_v3, 2  ;;  %v6974_v17 = vrot.slane %v6896_v4, 2  ;;  %v117_v18 = vrot.slane %v6901_v5, 2 }
  0x28   :  { %463 = vrot.lane.b32.xlu1 %v6886_v2, %s10327_s5  ;;  %107 = vst.msk [vmem:[#allocation2 + $0x48] sm:$0x3f] %vm106_vm2, %v6940_v12  ;;  %v6988_v20 = vld [vmem:[%s10408_s8 + $0x58] sm:$0x3f]  ;;  %v6995_v21 = vrot.slane %v6922_v8, 2  ;;  %v505_v22 = vrot.slane %v6912_v6, 2 }
  0x29   :  { %457 = vrot.lane.b32.xlu0 %v6891_v3, %s10327_s5  ;;  %v6971_v16 = vsel %vm10293_vm0, %v6960_v14, %v503_v15  ;;  %v6983_v19 = vsel %vm10293_vm0, %v6974_v17, %v117_v18  ;;  %v6999_v23 = vrot.slane %v6940_v12, 2 }
  0x2c   :  { %465 = vrot.lane.b32.xlu1 %v6912_v6, %s10327_s5 }
  0x2d   :  { %459 = vrot.lane.b32.xlu0 %v6922_v8, %s10327_s5 }
  0x30   :  { %131 = vrot.lane.b32.xlu1 %v6935_v11, %s10342_s29 }
  0x31   :  { %127 = vrot.lane.b32.xlu0 %v6925_v9, %s10342_s29 }
  0x34   :  { %469 = vrot.lane.b32.xlu1 %v6949_v13, %s10327_s5 }
  0x35   :  { %467 = vrot.lane.b32.xlu0 %v6940_v12, %s10327_s5 }
  0x38   :  { %513 = vrot.lane.b32.xlu1 %v6960_v14, %s10305_s11 }
  0x39   :  { %511 = vrot.lane.b32.xlu0 %v6925_v9, %s10305_s11 }
  0x3c   :  { %519 = vrot.lane.b32.xlu1 %v6971_v16, %s10305_s11 }
  0x3d   :  { %517 = vrot.lane.b32.xlu0 %v6935_v11, %s10305_s11 }
  0x40   :  { %129 = vrot.lane.b32.xlu1 %v6983_v19, %s10342_s29 }
  0x41   :  { %125 = vrot.lane.b32.xlu0 %v6974_v17, %s10342_s29 }
  0x44   :  { %515 = vrot.lane.b32.xlu1 %v6995_v21, %s10305_s11 }
  0x45   :  { %471 = vrot.lane.b32.xlu0 %v6988_v20, %s10327_s5 }
  0x46   :  { %32 = vsyncpa [#allocation7], 0  ;;  %v7007_v24 = vsel %vm10293_vm0, %v6995_v21, %v505_v22  ;;  %v7011_v25 = vsel %vm10293_vm0, %v119_v10, %v6999_v23  ;;  %v7018_v26 = vrot.slane %v6877_v1, 4  ;;  %v7021_v27 = vrot.slane %v6949_v13, 2  ;;  %s10340_s7 = smov 126   ;;  %s10344_s4 = smov 117  }
  0x47   :  { %v7040_v29 = vrot.slane %v6891_v3, 4  ;;  %v7043_v30 = vrot.slane %v6917_v7, 2  ;;  %v7054_v32 = vrot.slane %v6988_v20, 2  ;;  %v7061_v33 = vrot.slane %v6896_v4, 4  ;;  %s10319_s30 = smov 125   ;;  %s10336_s9 = smov 116  }
  0x48   :  { %135 = vrot.lane.b32.xlu1 %v7011_v25, %s10342_s29  ;;  %v7029_v28 = vsel %vm10293_vm0, %v503_v15, %v7021_v27  ;;  %v7072_v35 = vrot.slane %v6922_v8, 4  ;;  %v169_v36 = vrot.slane %v6872_v0, 4  ;;  %v7076_v37 = vrot.slane %v6940_v12, 4  ;;  %s10317_s28 = smov 124   ;;  %s10321_s0 = smov 115  }
  0x49   :  { %521 = vrot.lane.b32.xlu0 %v7007_v24, %s10305_s11  ;;  %v7051_v31 = vsel %vm10293_vm0, %v117_v18, %v7043_v30  ;;  %v7065_v34 = vsel %vm10293_vm0, %v505_v22, %v7054_v32  ;;  %vm10291_vm3 = vcmask 1043456   ;;  %v574_v40 = vrot.slane %v6886_v2, 4  ;;  %s10313_s10 = smov 123   ;;  %s10334_s1 = smov 114  }
  0x4a   :  { %v7084_v38 = vsel %vm10291_vm3, %v7018_v26, %v169_v36  ;;  %v7088_v39 = vsel %vm10291_vm3, %v169_v36, %v7076_v37  ;;  %v7100_v42 = vrot.slane %v6949_v13, 4  ;;  %v167_v44 = vrot.slane %v6901_v5, 4  ;;  %s10311_s6 = smov 122   ;;  %s10315_s2 = smov 113  }
  0x4b   :  { %v7097_v41 = vsel %vm10291_vm3, %v7040_v29, %v574_v40  ;;  %v7112_v45 = vrot.slane %v6917_v7, 4  ;;  %v576_v48 = vrot.slane %v6912_v6, 4  ;;  %v7128_v49 = vrot.slane %v6988_v20, 4  ;;  %s10309_s3 = smov 121   ;;  %s10489_s27 = smov 121  }
  0x4c   :  { %177 = vrot.lane.b32.xlu1 %v7018_v26, %s10340_s7  ;;  %v7108_v43 = vsel %vm10291_vm3, %v574_v40, %v7100_v42  ;;  %v7120_v46 = vsel %vm10291_vm3, %v7061_v33, %v167_v44  ;;  %v7147_v52 = vrot.slane %v6877_v1, 6  ;;  %v219_v53 = vrot.slane %v6872_v0, 6  ;;  %s10490_s26 = smov 117   ;;  %s10492_s25 = smov 127  }
  0x4d   :  { %139 = vrot.lane.b32.xlu0 %v6999_v23, %s10342_s29  ;;  %v7124_v47 = vsel %vm10291_vm3, %v167_v44, %v7112_v45  ;;  %v7136_v50 = vsel %vm10291_vm3, %v7072_v35, %v576_v48  ;;  %v7140_v51 = vsel %vm10291_vm3, %v576_v48, %v7128_v49  ;;  %vm10292_vm4 = vcmask 1041408   ;;  %s10495_s24 = smov 118   ;;  %s10498_s23 = smov 109  }
  0x4e   :  { %v7156_v54 = vsel %vm10292_vm4, %v7147_v52, %v219_v53  ;;  %v7167_v55 = vrot.slane %v6891_v3, 6  ;;  %v645_v56 = vrot.slane %v6886_v2, 6  ;;  %v7179_v58 = vrot.slane %v6896_v4, 6  ;;  %s10361_s22 = smov 107   ;;  %s10373_s21 = smov 106  }
  0x4f   :  { %10410 = vst [vmem:[#allocation10_spill] sm:$0xff] %v7156_v54  ;;  %v217_v59 = vrot.slane %v6901_v5, 6  ;;  %v7195_v61 = vrot.slane %v6922_v8, 6  ;;  %v647_v62 = vrot.slane %v6912_v6, 6  ;;  %v223_v63 = vrot.slane %v6940_v12, 6  ;;  %s10534_s19 = sld [smem:[#allocation23_spill]] }
  0x50   :  { %525 = vrot.lane.b32.xlu1 %v7029_v28, %s10305_s11  ;;  %v7176_v57 = vsel %vm10292_vm4, %v7167_v55, %v645_v56  ;;  %vm10294_vm5 = vcmask 973824   ;;  %vm488_vm6 = vcmask 1048456   ;;  %v649_v36 = vrot.slane %v6949_v13, 6  ;;  %s10536_s20 = smov 107   ;;  %s10537_s17 = sld [smem:[#allocation24_spill]] }
  0x51   :  { %523 = vrot.lane.b32.xlu0 %v7011_v25, %s10305_s11  ;;  %10411 = vst [vmem:[#allocation11_spill] sm:$0xff] %v7176_v57  ;;  %v7188_v60 = vsel %vm10292_vm4, %v7179_v58, %v217_v59  ;;  %10413 = vst [vmem:[#allocation13_spill] sm:$0xff] %v7195_v61  ;;  %v7205_v10 = vsel %vm10292_vm4, %v7195_v61, %v647_v62  ;;  %v7208_v15 = vsel %vm10292_vm4, %v219_v53, %v223_v63  ;;  %vm491_vm7 = vcmask 801792   ;;  %s10567_s13 = sld [smem:[#allocation27_spill]]  ;;  %s10568_s18 = sld [smem:[#allocation25_spill]] }
  0x52   :  { %10412 = vst [vmem:[#allocation12_spill] sm:$0xff] %v7188_v60  ;;  %10414 = vst [vmem:[#allocation14_spill] sm:$0xff] %v7205_v10  ;;  %v7224_v53 = vsel %vm10292_vm4, %v645_v56, %v649_v36  ;;  %v221_v63 = vrot.slane %v6917_v7, 6  ;;  %vm155_vm8 = vcmask 924678   ;;  %v651_v36 = vrot.slane %v6988_v20, 6  ;;  %s10569_s16 = sld [smem:[#allocation26_spill]] }
  0x53   :  { %10415 = vst [vmem:[#allocation15_spill] sm:$0xff] %v7208_v15  ;;  %10416 = vst [vmem:[#allocation16_spill] sm:$0xff] %v7224_v53  ;;  %vm496_vm9 = vcmask 1046408   ;;  %vm535_vm10 = vcmask 965632   ;;  %vm556_vm11 = vcmask 1048462   ;;  %vm10296_vm12 = vcmask 1039360  }
  0x54   :  { %531 = vrot.lane.b32.xlu1 %v7021_v27, %s10305_s11  ;;  %v7236_v56 = vsel %vm10292_vm4, %v217_v59, %v221_v63  ;;  %v7248_v63 = vsel %vm10292_vm4, %v647_v62, %v651_v36  ;;  %vm499_vm13 = vcmask 799744   ;;  %vm559_vm14 = vcmask 801798   ;;  %s10580_s12 = smov 109   ;;  %s10589_s15 = sld [smem:[#allocation33_spill]] }
  0x55   :  { %529 = vrot.lane.b32.xlu0 %v6999_v23, %s10305_s11  ;;  %vm162_vm15 = vcmask 920576   ;;  %vm205_vm3 = vcmask 924676   ;;  %vm10297_vm4 = vcmask 1044360   ;;  %vm10307_vm0 = vcmask 957440  }
  0x58   :  { %584 = vrot.lane.b32.xlu1 %v7040_v29, %s10344_s4 }
  0x59   :  { %582 = vrot.lane.b32.xlu0 %v7018_v26, %s10344_s4 }
  0x5c   :  { %137 = vrot.lane.b32.xlu1 %v7043_v30, %s10342_s29 }
  0x5d   :  { %133 = vrot.lane.b32.xlu0 %v7051_v31, %s10342_s29 }
  0x60   :  { %527 = vrot.lane.b32.xlu1 %v7065_v34, %s10305_s11 }
  0x61   :  { %175 = vrot.lane.b32.xlu0 %v7061_v33, %s10340_s7 }
  0x64   :  { %586 = vrot.lane.b32.xlu1 %v7072_v35, %s10344_s4 }
  0x65   :  { %533 = vrot.lane.b32.xlu0 %v7054_v32, %s10305_s11  ;;  %s10323_s11 = smov 112  }
  0x68   :  { %185 = vrot.lane.b32.xlu1 %v7088_v39, %s10340_s7 }
  0x69   :  { %181 = vrot.lane.b32.xlu0 %v7084_v38, %s10340_s7 }
  0x6c   :  { %590 = vrot.lane.b32.xlu1 %v7097_v41, %s10344_s4 }
  0x6d   :  { %588 = vrot.lane.b32.xlu0 %v7084_v38, %s10344_s4 }
  0x70   :  { %596 = vrot.lane.b32.xlu1 %v7108_v43, %s10344_s4 }
  0x71   :  { %594 = vrot.lane.b32.xlu0 %v7088_v39, %s10344_s4 }
  0x74   :  { %183 = vrot.lane.b32.xlu1 %v7124_v47, %s10340_s7 }
  0x75   :  { %179 = vrot.lane.b32.xlu0 %v7120_v46, %s10340_s7 }
  0x78   :  { %598 = vrot.lane.b32.xlu1 %v7140_v51, %s10344_s4 }
  0x79   :  { %592 = vrot.lane.b32.xlu0 %v7136_v50, %s10344_s4 }
  0x7c   :  { %227 = vrot.lane.b32.xlu1 %v7147_v52, %s10319_s30 }
  0x7d   :  { %189 = vrot.lane.b32.xlu0 %v7076_v37, %s10340_s7 }
  0x80   :  { %600 = vrot.lane.b32.xlu1 %v7076_v37, %s10344_s4 }
  0x81   :  { %231 = vrot.lane.b32.xlu0 %v7156_v54, %s10319_s30 }
  0x84   :  { %653 = vrot.lane.b32.xlu1 %v7147_v52, %s10336_s9 }
  0x85   :  { %602 = vrot.lane.b32.xlu0 %v7100_v42, %s10344_s4 }
  0x88   :  { %659 = vrot.lane.b32.xlu1 %v7156_v54, %s10336_s9 }
  0x89   :  { %655 = vrot.lane.b32.xlu0 %v7167_v55, %s10336_s9 }
  0x8c   :  { %187 = vrot.lane.b32.xlu1 %v7112_v45, %s10340_s7 }
  0x8d   :  { %661 = vrot.lane.b32.xlu0 %v7176_v57, %s10336_s9 }
  0x90   :  { %229 = vrot.lane.b32.xlu1 %v7188_v60, %s10319_s30 }
  0x91   :  { %225 = vrot.lane.b32.xlu0 %v7179_v58, %s10319_s30 }
  0x94   :  { %657 = vrot.lane.b32.xlu1 %v7195_v61, %s10336_s9 }
  0x95   :  { %604 = vrot.lane.b32.xlu0 %v7128_v49, %s10344_s4 }
  0x96   :  { %v462_v18 = vpop.permute.xlu1 %461 }
  0x97   :  { %v456_v22 = vpop.permute.xlu0 %455 }
  0x98   :  { %235 = vrot.lane.b32.xlu1 %v7208_v15, %s10319_s30 }
  0x99   :  { %663 = vrot.lane.b32.xlu0 %v7205_v10, %s10336_s9 }
  0x9a   :  { %v464_v40 = vpop.permute.xlu1 %463 }
  0x9b   :  { %v458_v44 = vpop.permute.xlu0 %457  ;;  %v475_v48 = vsel %vm10294_vm5, %v462_v18, %v464_v40 }
  0x9c   :  { %v473_v57 = vsel %vm10294_vm5, %v456_v22, %v458_v44  ;;  %493 = vst.msk [vmem:[#allocation2 + $0x28] sm:$0xff] %vm488_vm6, %v475_v48  ;;  %665 = vrot.lane.b32.xlu1 %v7208_v15, %s10336_s9 }
  0x9d   :  { %489 = vst.msk [vmem:[#allocation2 + $0x8] sm:$0xff] %vm488_vm6, %v473_v57  ;;  %256 = vrot.lane.b32.xlu0 %v6877_v1, %s10317_s28 }
  0x9e   :  { %v466_v18 = vpop.permute.xlu1 %465 }
  0x9f   :  { %v460_v10 = vpop.permute.xlu0 %459  ;;  %v476_v22 = vsel %vm10294_vm5, %v464_v40, %v466_v18  ;;  %495 = vst.msk [vmem:[#allocation2 + $0x38] sm:$0xff] %vm491_vm7, %v466_v18  ;;  %v1067_v18 = vpack.c.bf16 %v6901_v5, %v6896_v4 }
  0xa0   :  { %v474_v57 = vsel %vm10294_vm5, %v458_v44, %v460_v10  ;;  %492 = vst.msk [vmem:[#allocation2 + $0x18] sm:$0xff] %vm491_vm7, %v460_v10  ;;  %698 = vrot.lane.b32.xlu1 %v6877_v1, %s10321_s0 }
  0xa1   :  { %667 = vrot.lane.b32.xlu0 %v7224_v53, %s10336_s9 }
  0xa2   :  { %v132_v48 = vpop.permute.xlu1 %131 }
  0xa3   :  { %v128_v40 = vpop.permute.xlu0 %127  ;;  %158 = vst.msk [vmem:[#allocation2 + $0x68] sm:$0xff] %vm101_vm1, %v132_v48  ;;  %v960_v44 = vld [vmem:[#allocation2 + $0x28] sm:$0xff] }
  0xa4   :  { %156 = vst.msk [vmem:[#allocation2 + $0x48] sm:$0xc0] %vm155_vm8, %v128_v40  ;;  %v956_v10 = vld [vmem:[#allocation2 + $0x8] sm:$0xff]  ;;  %233 = vrot.lane.b32.xlu1 %v7236_v56, %s10319_s30  ;;  %s10478_s30 = smov 115  }
  0xa5   :  { %700 = vrot.lane.b32.xlu0 %v6891_v3, %s10321_s0  ;;  %v1068_v59 = vpack.c.bf16 %v960_v44, %v956_v10  ;;  %v1069_v3 = vpack.c.bf16 %v476_v22, %v474_v57 }
  0xa6   :  { %v470_v53 = vpop.permute.xlu1 %469  ;;  %v962_v15 = vld [vmem:[#allocation2 + $0x38] sm:$0xff] }
  0xa7   :  { %v468_v1 = vpop.permute.xlu0 %467  ;;  %1188 = vmatprep.subr.bf16.mxu0 %v1068_v59  ;;  %v958_v60 = vld [vmem:[#allocation2 + $0x18] sm:$0xff] }
  0xa8   :  { %v477_v54 = vsel %vm10294_vm5, %v468_v1, %v470_v53  ;;  %v1070_v61 = vpack.c.bf16 %v962_v15, %v958_v60  ;;  %1189 = vmatpush1.bf16.msra.mxu0 %v1067_v18  ;;  %669 = vrot.lane.b32.xlu1 %v7248_v63, %s10336_s9  ;;  %s10448_s9 = sld [smem:[#allocation21_spill]] }
  0xa9   :  { %497 = vst.msk [vmem:[#allocation2 + $0x48] sm:$0x3f] %vm496_vm9, %v477_v54  ;;  %254 = vrot.lane.b32.xlu0 %v6896_v4, %s10317_s28 }
  0xaa   :  { %1241 = vmatprep.subr.bf16.mxu1 %v1070_v61  ;;  %v514_v36 = vpop.permute.xlu1 %513 }
  0xab   :  { %1242 = vmatpush1.bf16.msra.mxu1 %v1069_v3  ;;  %v512_v62 = vpop.permute.xlu0 %511 }
  0xac   :  { %v536_v10 = vsel %vm535_vm10, %v512_v62, %v514_v36  ;;  %260 = vrot.lane.b32.xlu1 %v6872_v0, %s10317_s28 }
  0xad   :  { %557 = vst.msk [vmem:[#allocation2 + $0x48] sm:$0xc0] %vm556_vm11, %v536_v10  ;;  %702 = vrot.lane.b32.xlu0 %v6922_v8, %s10321_s0 }
  0xae   :  { %v520_v4 = vpop.permute.xlu1 %519 }
  0xaf   :  { %v518_v1 = vpop.permute.xlu0 %517 }
  0xb0   :  { %v538_v54 = vsel %vm535_vm10, %v518_v1, %v520_v4  ;;  %284 = vrot.lane.b32.xlu1 %v6925_v9, %s10313_s10 }
  0xb1   :  { %561 = vst.msk [vmem:[#allocation2 + $0x68] sm:$0xff] %vm488_vm6, %v538_v54  ;;  %264 = vrot.lane.b32.xlu0 %v6940_v12, %s10317_s28 }
  0xb2   :  { %v130_v61 = vpop.permute.xlu1 %129 }
  0xb3   :  { %v126_v60 = vpop.permute.xlu0 %125  ;;  %v143_v15 = vsel %vm10296_vm12, %v130_v61, %v132_v48 }
  0xb4   :  { %v142_v8 = vsel %vm10296_vm12, %v126_v60, %v128_v40  ;;  %706 = vrot.lane.b32.xlu1 %v6886_v2, %s10321_s0  ;;  %v964_v40 = vld [vmem:[#allocation2 + $0x48] sm:$0xff] }
  0xb5   :  { %154 = vst [vmem:[#allocation2 + $0x40] sm:$0xc0] %v142_v8  ;;  %704 = vrot.lane.b32.xlu0 %v6872_v0, %s10321_s0 }
  0xb6   :  { %v516_v57 = vpop.permute.xlu1 %515 }
  0xb7   :  { %v472_v22 = vpop.permute.xlu0 %471  ;;  %v537_v18 = vsel %vm535_vm10, %v514_v36, %v516_v57  ;;  %560 = vst.msk [vmem:[#allocation2 + $0x58] sm:$0xc0] %vm559_vm14, %v516_v57 }
  0xb8   :  { %v478_v44 = vsel %vm10294_vm5, %v470_v53, %v472_v22  ;;  %500 = vst.msk [vmem:[#allocation2 + $0x58] sm:$0x3f] %vm499_vm13, %v472_v22  ;;  %v968_v48 = vld [vmem:[#allocation2 + $0x68] sm:$0xff]  ;;  %558 = vst [vmem:[#allocation2 + $0x50] sm:$0xc0] %v537_v18  ;;  %712 = vrot.lane.b32.xlu1 %v6949_v13, %s10321_s0  ;;  %vm10295_vm5 = vcmask 1048460  }
  0xb9   :  { %498 = vst [vmem:[#allocation2 + $0x50] sm:$0x3f] %v478_v44  ;;  %710 = vrot.lane.b32.xlu0 %v6940_v12, %s10321_s0  ;;  %v1072_v2 = vpack.c.bf16 %v968_v48, %v964_v40 }
  0xba   :  { %v136_v3 = vpop.permute.xlu1 %135 }
  0xbb   :  { %v522_v59 = vpop.permute.xlu0 %521  ;;  %1190 = vmatprep.subr.bf16.mxu0 %v1072_v2  ;;  %160 = vst.msk [vmem:[#allocation2 + $0x88] sm:$0xff] %vm101_vm1, %v136_v3 }
  0xbc   :  { %v539_v53 = vsel %vm535_vm10, %v520_v4, %v522_v59  ;;  %563 = vst.msk [vmem:[#allocation2 + $0x78] sm:$0xff] %vm491_vm7, %v522_v59  ;;  %v963_v62 = vld [vmem:[#allocation2 + $0x40] sm:$0xff]  ;;  %743 = vrot.lane.b32.xlu1 %v6960_v14, %s10334_s1 }
  0xbd   :  { %741 = vrot.lane.b32.xlu0 %v6925_v9, %s10334_s1  ;;  %v1071_v13 = vpack.c.bf16 %v143_v15, %v963_v62 }
  0xbe   :  { %v178_v10 = vpop.permute.xlu1 %177 }
  0xbf   :  { %v140_v36 = vpop.permute.xlu0 %139  ;;  %1191 = vmatpush1.bf16.msra.mxu0 %v1071_v13  ;;  %206 = vst.msk [vmem:[#allocation2 + $0xa8] sm:$0xf0] %vm205_vm3, %v178_v10  ;;  %v966_v60 = vld [vmem:[#allocation2 + $0x58] sm:$0xff] }
  0xc0   :  { %163 = vst.msk [vmem:[#allocation2 + $0xa8] sm:$0xf] %vm162_vm15, %v140_v36  ;;  %262 = vrot.lane.b32.xlu1 %v6917_v7, %s10317_s28  ;;  %v965_v1 = vld [vmem:[#allocation2 + $0x50] sm:$0xff] }
  0xc1   :  { %258 = vrot.lane.b32.xlu0 %v6901_v5, %s10317_s28  ;;  %v1073_v5 = vpack.c.bf16 %v539_v53, %v965_v1  ;;  %s10332_s28 = smov 110  }
  0xc2   :  { %v526_v54 = vpop.permute.xlu1 %525 }
  0xc3   :  { %v524_v4 = vpop.permute.xlu0 %523  ;;  %v970_v61 = vld [vmem:[#allocation2 + $0x78] sm:$0xff] }
  0xc4   :  { %v540_v8 = vsel %vm535_vm10, %v524_v4, %v526_v54  ;;  %v1074_v15 = vpack.c.bf16 %v970_v61, %v966_v60  ;;  %708 = vrot.lane.b32.xlu1 %v6912_v6, %s10321_s0 }
  0xc5   :  { %564 = vst.msk [vmem:[#allocation2 + $0x88] sm:$0xff] %vm488_vm6, %v540_v8  ;;  %282 = vrot.lane.b32.xlu0 %v6974_v17, %s10313_s10 }
  0xc6   :  { %1243 = vmatprep.subr.bf16.mxu1 %v1074_v15  ;;  %v532_v57 = vpop.permute.xlu1 %531 }
  0xc7   :  { %v530_v22 = vpop.permute.xlu0 %529  ;;  %1244 = vmatpush1.bf16.msra.mxu1 %v1073_v5 }
  0xc8   :  { %v542_v44 = vsel %vm535_vm10, %v530_v22, %v532_v57  ;;  %745 = vrot.lane.b32.xlu1 %v6995_v21, %s10334_s1 }
  0xc9   :  { %568 = vst.msk [vmem:[#allocation2 + $0xa8] sm:$0xf] %vm10297_vm4, %v542_v44  ;;  %714 = vrot.lane.b32.xlu0 %v6988_v20, %s10321_s0  ;;  %vm10298_vm4 = vcmask 801796   ;;  %s10479_s0 = smov 110  }
  0xca   :  { %v585_v6 = vpop.permute.xlu1 %584 }
  0xcb   :  { %v583_v18 = vpop.permute.xlu0 %582 }
  0xcc   :  { %v607_v40 = vsel %vm10307_vm0, %v583_v18, %v585_v6  ;;  %292 = vrot.lane.b32.xlu1 %v7011_v25, %s10313_s10  ;;  %v972_v4 = vld [vmem:[#allocation2 + $0x88] sm:$0xff] }
  0xcd   :  { %628 = vst.msk [vmem:[#allocation2 + $0xa8] sm:$0xf0] %vm10295_vm5, %v607_v40  ;;  %288 = vrot.lane.b32.xlu0 %v6935_v11, %s10313_s10  ;;  %vm10303_vm5 = vcmask 1031168  }
  0xce   :  { %v138_v2 = vpop.permute.xlu1 %137 }
  0xcf   :  { %v134_v48 = vpop.permute.xlu0 %133  ;;  %v145_v59 = vsel %vm10296_vm12, %v138_v2, %v140_v36 }
  0xd0   :  { %v144_v20 = vsel %vm10296_vm12, %v134_v48, %v136_v3  ;;  %161 = vst [vmem:[#allocation2 + $0xa0] sm:$0xf] %v145_v59  ;;  %749 = vrot.lane.b32.xlu1 %v6971_v16, %s10334_s1  ;;  %vm10301_vm12 = vcmask 797696  }
  0xd1   :  { %747 = vrot.lane.b32.xlu0 %v6935_v11, %s10334_s1 }
  0xd2   :  { %v528_v62 = vpop.permute.xlu1 %527 }
  0xd3   :  { %v176_v53 = vpop.permute.xlu0 %175  ;;  %v541_v1 = vsel %vm535_vm10, %v526_v54, %v528_v62  ;;  %566 = vst.msk [vmem:[#allocation2 + $0x98] sm:$0xff] %vm491_vm7, %v528_v62 }
  0xd4   :  { %v192_v13 = vsel %vm10303_vm5, %v176_v53, %v178_v10  ;;  %v976_v3 = vld [vmem:[#allocation2 + $0xa8] sm:$0xff]  ;;  %755 = vrot.lane.b32.xlu1 %v7029_v28, %s10334_s1 }
  0xd5   :  { %204 = vst [vmem:[#allocation2 + $0xa0] sm:$0xf0] %v192_v13  ;;  %753 = vrot.lane.b32.xlu0 %v7011_v25, %s10334_s1  ;;  %v1076_v36 = vpack.c.bf16 %v976_v3, %v972_v4 }
  0xd6   :  { %v587_v61 = vpop.permute.xlu1 %586 }
  0xd7   :  { %v534_v60 = vpop.permute.xlu0 %533  ;;  %1192 = vmatprep.subr.bf16.mxu0 %v1076_v36  ;;  %v608_v54 = vsel %vm10307_vm0, %v585_v6, %v587_v61  ;;  %631 = vst.msk [vmem:[#allocation2 + $0xb8] sm:$0xf0] %vm10298_vm4, %v587_v61  ;;  %vm10299_vm4 = vcmask 924674  }
  0xd8   :  { %v543_v10 = vsel %vm535_vm10, %v532_v57, %v534_v60  ;;  %571 = vst.msk [vmem:[#allocation2 + $0xb8] sm:$0xf] %vm10301_vm12, %v534_v60  ;;  %629 = vst [vmem:[#allocation2 + $0xb0] sm:$0xf0] %v608_v54  ;;  %290 = vrot.lane.b32.xlu1 %v7051_v31, %s10313_s10  ;;  %vm10300_vm10 = vcmask 918528   ;;  %vm10302_vm12 = vcmask 1048458  }
  0xd9   :  { %569 = vst [vmem:[#allocation2 + $0xb0] sm:$0xf] %v543_v10  ;;  %286 = vrot.lane.b32.xlu0 %v6983_v19, %s10313_s10 }
  0xda   :  { %v186_v15 = vpop.permute.xlu1 %185  ;;  %v974_v57 = vld [vmem:[#allocation2 + $0x98] sm:$0xff] }
  0xdb   :  { %v182_v8 = vpop.permute.xlu0 %181  ;;  %210 = vst.msk [vmem:[#allocation2 + $0xe8] sm:$0xff] %vm101_vm1, %v186_v15 }
  0xdc   :  { %208 = vst.msk [vmem:[#allocation2 + $0xc8] sm:$0xff] %vm101_vm1, %v182_v8  ;;  %v975_v5 = vld [vmem:[#allocation2 + $0xa0] sm:$0xff]  ;;  %757 = vrot.lane.b32.xlu1 %v7065_v34, %s10334_s1 }
  0xdd   :  { %751 = vrot.lane.b32.xlu0 %v7007_v24, %s10334_s1  ;;  %v1075_v22 = vpack.c.bf16 %v975_v5, %v144_v20 }
  0xde   :  { %v591_v18 = vpop.permute.xlu1 %590 }
  0xdf   :  { %v589_v44 = vpop.permute.xlu0 %588  ;;  %1193 = vmatpush1.bf16.msra.mxu0 %v1075_v22  ;;  %v978_v6 = vld [vmem:[#allocation2 + $0xb8] sm:$0xff] }
  0xe0   :  { %v609_v40 = vsel %vm10307_vm0, %v589_v44, %v591_v18  ;;  %v1078_v48 = vpack.c.bf16 %v978_v6, %v974_v57  ;;  %v977_v2 = vld [vmem:[#allocation2 + $0xb0] sm:$0xff]  ;;  %321 = vrot.lane.b32.xlu1 %v7018_v26, %s10311_s6 }
  0xe1   :  { %632 = vst.msk [vmem:[#allocation2 + $0xc8] sm:$0xff] %vm488_vm6, %v609_v40  ;;  %296 = vrot.lane.b32.xlu0 %v6999_v23, %s10313_s10  ;;  %v1077_v59 = vpack.c.bf16 %v977_v2, %v541_v1 }
  0xe2   :  { %1245 = vmatprep.subr.bf16.mxu1 %v1078_v48  ;;  %v597_v53 = vpop.permute.xlu1 %596 }
  0xe3   :  { %v595_v20 = vpop.permute.xlu0 %594  ;;  %1246 = vmatpush1.bf16.msra.mxu1 %v1077_v59 }
  0xe4   :  { %v611_v62 = vsel %vm10307_vm0, %v595_v20, %v597_v53  ;;  %759 = vrot.lane.b32.xlu1 %v6999_v23, %s10334_s1 }
  0xe5   :  { %635 = vst.msk [vmem:[#allocation2 + $0xe8] sm:$0xff] %vm488_vm6, %v611_v62  ;;  %325 = vrot.lane.b32.xlu0 %v7084_v38, %s10311_s6 }
  0xe6   :  { %v184_v4 = vpop.permute.xlu1 %183 }
  0xe7   :  { %v180_v13 = vpop.permute.xlu0 %179  ;;  %v194_v26 = vsel %vm10303_vm5, %v184_v4, %v186_v15 }
  0xe8   :  { %v193_v3 = vsel %vm10303_vm5, %v180_v13, %v182_v8  ;;  %294 = vrot.lane.b32.xlu1 %v7043_v30, %s10313_s10  ;;  %v980_v61 = vld [vmem:[#allocation2 + $0xc8] sm:$0xff]  ;;  %s10427_s10 = sld [smem:[#allocation19_spill]] }
  0xe9   :  { %761 = vrot.lane.b32.xlu0 %v7021_v27, %s10334_s1  ;;  %v1079_v8 = vpack.c.bf16 %v194_v26, %v193_v3 }
  0xea   :  { %v599_v36 = vpop.permute.xlu1 %598 }
  0xeb   :  { %v593_v1 = vpop.permute.xlu0 %592  ;;  %v612_v38 = vsel %vm10307_vm0, %v597_v53, %v599_v36  ;;  %637 = vst.msk [vmem:[#allocation2 + $0xf8] sm:$0xff] %vm491_vm7, %v599_v36 }
  0xec   :  { %v610_v60 = vsel %vm10307_vm0, %v591_v18, %v593_v1  ;;  %634 = vst.msk [vmem:[#allocation2 + $0xd8] sm:$0xff] %vm491_vm7, %v593_v1  ;;  %v984_v10 = vld [vmem:[#allocation2 + $0xe8] sm:$0xff]  ;;  %323 = vrot.lane.b32.xlu1 %v7120_v46, %s10311_s6 }
  0xed   :  { %319 = vrot.lane.b32.xlu0 %v7061_v33, %s10311_s6  ;;  %v1080_v54 = vpack.c.bf16 %v984_v10, %v980_v61  ;;  %v1081_v18 = vpack.c.bf16 %v612_v38, %v610_v60  ;;  %v10417_v38 = vld [vmem:[#allocation13_spill] sm:$0xff]  ;;  %v10418_v61 = vld [vmem:[#allocation10_spill] sm:$0xff] }
  0xee   :  { %v228_v5 = vpop.permute.xlu1 %227 }
  0xef   :  { %v190_v15 = vpop.permute.xlu0 %189  ;;  %1194 = vmatprep.subr.bf16.mxu0 %v1080_v54  ;;  %249 = vst.msk [vmem:[#allocation2 + $0x108] sm:$0xfc] %vm10299_vm4, %v228_v5  ;;  %vm10304_vm4 = vcmask 1042312  }
  0xf0   :  { %213 = vst.msk [vmem:[#allocation2 + $0x108] sm:$0x3] %vm10300_vm10, %v190_v15  ;;  %1195 = vmatpush1.bf16.msra.mxu0 %v1079_v8  ;;  %802 = vrot.lane.b32.xlu1 %v7097_v41, %s10315_s2  ;;  %vm10325_vm10 = vcmask 949248  }
  0xf1   :  { %798 = vrot.lane.b32.xlu0 %v7040_v29, %s10315_s2 }
  0xf2   :  { %v601_v46 = vpop.permute.xlu1 %600  ;;  %v986_v57 = vld [vmem:[#allocation2 + $0xf8] sm:$0xff] }
  0xf3   :  { %v232_v33 = vpop.permute.xlu0 %231  ;;  %v982_v22 = vld [vmem:[#allocation2 + $0xd8] sm:$0xff] }
  0xf4   :  { %251 = vst.msk [vmem:[#allocation2 + $0x128] sm:$0xff] %vm101_vm1, %v232_v33  ;;  %v1082_v44 = vpack.c.bf16 %v986_v57, %v982_v22  ;;  %800 = vrot.lane.b32.xlu1 %v7072_v35, %s10315_s2 }
  0xf5   :  { %763 = vrot.lane.b32.xlu0 %v7054_v32, %s10334_s1  ;;  %s10484_s1 = smov 124  }
  0xf6   :  { %1247 = vmatprep.subr.bf16.mxu1 %v1082_v44  ;;  %v654_v6 = vpop.permute.xlu1 %653 }
  0xf7   :  { %v603_v29 = vpop.permute.xlu0 %602  ;;  %1248 = vmatpush1.bf16.msra.mxu1 %v1081_v18 }
  0xf8   :  { %v613_v41 = vsel %vm10307_vm0, %v601_v46, %v603_v29  ;;  %329 = vrot.lane.b32.xlu1 %v7088_v39, %s10311_s6  ;;  %v10420_v46 = vld [vmem:[#allocation12_spill] sm:$0xff] }
  0xf9   :  { %639 = vst.msk [vmem:[#allocation2 + $0x108] sm:$0x3] %vm10304_vm4, %v613_v41  ;;  %804 = vrot.lane.b32.xlu0 %v7136_v50, %s10315_s2  ;;  %vm10308_vm4 = vcmask 801794  }
  0xfa   :  { %v660_v35 = vpop.permute.xlu1 %659 }
  0xfb   :  { %v656_v40 = vpop.permute.xlu0 %655 }
  0xfc   :  { %v672_v48 = vsel %vm10325_vm10, %v654_v6, %v656_v40  ;;  %358 = vrot.lane.b32.xlu1 %v7147_v52, %s10309_s3  ;;  %v10421_v6 = vld [vmem:[#allocation11_spill] sm:$0xff] }
  0xfd   :  { %688 = vst.msk [vmem:[#allocation2 + $0x108] sm:$0xfc] %vm10302_vm12, %v672_v48  ;;  %333 = vrot.lane.b32.xlu0 %v7076_v37, %s10311_s6  ;;  %vm237_vm12 = vcmask 1022976  }
  0xfe   :  { %v188_v50 = vpop.permute.xlu1 %187 }
  0xff   :  { %v662_v2 = vpop.permute.xlu0 %661  ;;  %v195_v39 = vsel %vm10303_vm5, %v188_v50, %v190_v15  ;;  %vm641_vm5 = vcmask 795648   ;;  %v10423_v50 = vld [vmem:[#allocation14_spill] sm:$0xff] }
 0x100   :  { %v674_v59 = vsel %vm10325_vm10, %v660_v35, %v662_v2  ;;  %211 = vst [vmem:[#allocation2 + $0x100] sm:$0x3] %v195_v39  ;;  %331 = vrot.lane.b32.xlu1 %v7112_v45, %s10311_s6 }
 0x101   :  { %692 = vst.msk [vmem:[#allocation2 + $0x128] sm:$0xff] %vm488_vm6, %v674_v59  ;;  %327 = vrot.lane.b32.xlu0 %v7124_v47, %s10311_s6  ;;  %s10487_s6 = smov 123  }
 0x102   :  { %v230_v20 = vpop.permute.xlu1 %229 }
 0x103   :  { %v226_v37 = vpop.permute.xlu0 %225  ;;  %v239_v53 = vsel %vm237_vm12, %v230_v20, %v232_v33  ;;  %v10419_v33 = vld [vmem:[#allocation15_spill] sm:$0xff] }
 0x104   :  { %v238_v52 = vsel %vm237_vm12, %v226_v37, %v228_v5  ;;  %806 = vrot.lane.b32.xlu1 %v7108_v43, %s10315_s2  ;;  %v988_v4 = vld [vmem:[#allocation2 + $0x108] sm:$0xff] }
 0x105   :  { %247 = vst [vmem:[#allocation2 + $0x100] sm:$0xfc] %v238_v52  ;;  %356 = vrot.lane.b32.xlu0 %v7179_v58, %s10309_s3  ;;  %v10424_v52 = vld [vmem:[#allocation9_spill] sm:$0xff] }
 0x106   :  { %v658_v62 = vpop.permute.xlu1 %657 }
 0x107   :  { %v605_v47 = vpop.permute.xlu0 %604  ;;  %v673_v13 = vsel %vm10325_vm10, %v656_v40, %v658_v62  ;;  %691 = vst.msk [vmem:[#allocation2 + $0x118] sm:$0xfc] %vm10308_vm4, %v658_v62  ;;  %vm266_vm4 = vcmask 1014784  }
 0x108   :  { %v614_v45 = vsel %vm10307_vm0, %v603_v29, %v605_v47  ;;  %642 = vst.msk [vmem:[#allocation2 + $0x118] sm:$0x3] %vm641_vm5, %v605_v47  ;;  %v992_v3 = vld [vmem:[#allocation2 + $0x128] sm:$0xff]  ;;  %689 = vst [vmem:[#allocation2 + $0x110] sm:$0xfc] %v673_v13  ;;  %842 = vrot.lane.b32.xlu1 %v7167_v55, %s10323_s11  ;;  %vm10326_vm0 = vcmask 941056  }
 0x109   :  { %640 = vst [vmem:[#allocation2 + $0x110] sm:$0x3] %v614_v45  ;;  %810 = vrot.lane.b32.xlu0 %v7100_v42, %s10315_s2  ;;  %v1084_v43 = vpack.c.bf16 %v992_v3, %v988_v4  ;;  %v6669_v13 = vld [vmem:[#allocation2] sm:$0xff] }
 0x10a   :  { %v236_v26 = vpop.permute.xlu1 %235 }
 0x10b   :  { %v664_v58 = vpop.permute.xlu0 %663  ;;  %1196 = vmatprep.subr.bf16.mxu0 %v1084_v43  ;;  %253 = vst.msk [vmem:[#allocation2 + $0x148] sm:$0xff] %vm101_vm1, %v236_v26 }
 0x10c   :  { %v675_v1 = vsel %vm10325_vm10, %v662_v2, %v664_v58  ;;  %694 = vst.msk [vmem:[#allocation2 + $0x138] sm:$0xff] %vm491_vm7, %v664_v58  ;;  %v987_v36 = vld [vmem:[#allocation2 + $0x100] sm:$0xff]  ;;  %812 = vrot.lane.b32.xlu1 %v7128_v49, %s10315_s2  ;;  %v10422_v2 = vld [vmem:[#allocation16_spill] sm:$0xff] }
 0x10d   :  { %808 = vrot.lane.b32.xlu0 %v7140_v51, %s10315_s2  ;;  %v1083_v42 = vpack.c.bf16 %v239_v53, %v987_v36  ;;  %v6671_v36 = vld [vmem:[%s10408_s8 + $0x10] sm:$0xff]  ;;  %s10329_s2 = smov 111  }
 0x10e   :  { %v666_v55 = vpop.permute.xlu1 %665 }
 0x10f   :  { %v257_v60 = vpop.permute.xlu0 %256  ;;  %1197 = vmatpush1.bf16.msra.mxu0 %v1083_v42  ;;  %v990_v15 = vld [vmem:[#allocation2 + $0x118] sm:$0xff] }
 0x110   :  { %277 = vst.msk [vmem:[#allocation2 + $0x168] sm:$0xff] %vm101_vm1, %v257_v60  ;;  %362 = vrot.lane.b32.xlu1 %v10418_v61, %s10309_s3  ;;  %v989_v10 = vld [vmem:[#allocation2 + $0x110] sm:$0xff]  ;;  %v6673_v61 = vld [vmem:[%s10408_s8 + $0x18] sm:$0xff] }
 0x111   :  { %844 = vrot.lane.b32.xlu0 %v10417_v38, %s10323_s11  ;;  %v1085_v22 = vpack.c.bf16 %v675_v1, %v989_v10  ;;  %v6670_v1 = vld [vmem:[#allocation2 + $0x20] sm:$0xff]  ;;  %v6672_v38 = vld [vmem:[%s10408_s8 + $0x30] sm:$0xff] }
 0x112   :  { %v699_v8 = vpop.permute.xlu1 %698 }
 0x113   :  { %v668_v54 = vpop.permute.xlu0 %667  ;;  %v994_v51 = vld [vmem:[#allocation2 + $0x138] sm:$0xff] }
 0x114   :  { %v676_v5 = vsel %vm10325_vm10, %v666_v55, %v668_v54  ;;  %v1086_v49 = vpack.c.bf16 %v994_v51, %v990_v15  ;;  %360 = vrot.lane.b32.xlu1 %v10420_v46, %s10309_s3  ;;  %v6674_v15 = vld [vmem:[%s10408_s8 + $0x38] sm:$0xff] }
 0x115   :  { %695 = vst.msk [vmem:[#allocation2 + $0x148] sm:$0xff] %vm488_vm6, %v676_v5  ;;  %366 = vrot.lane.b32.xlu0 %v10419_v33, %s10309_s3 }
 0x116   :  { %1249 = vmatprep.subr.bf16.mxu1 %v1086_v49  ;;  %v234_v44 = vpop.permute.xlu1 %233 }
 0x117   :  { %v701_v57 = vpop.permute.xlu0 %700  ;;  %1250 = vmatpush1.bf16.msra.mxu1 %v1085_v22  ;;  %v240_v29 = vsel %vm237_vm12, %v234_v44, %v236_v26  ;;  %vm10331_vm12 = vcmask 932864  }
 0x118   :  { %v717_v18 = vsel %vm10326_vm0, %v699_v8, %v701_v57  ;;  %846 = vrot.lane.b32.xlu1 %v10421_v6, %s10323_s11 }
 0x119   :  { %732 = vst.msk [vmem:[#allocation2 + $0x168] sm:$0xff] %vm488_vm6, %v717_v18  ;;  %364 = vrot.lane.b32.xlu0 %v7236_v56, %s10309_s3  ;;  %s10338_s3 = smov 120  }
 0x11a   :  { %v670_v40 = vpop.permute.xlu1 %669 }
 0x11b   :  { %v255_v41 = vpop.permute.xlu0 %254  ;;  %v677_v48 = vsel %vm10325_vm10, %v668_v54, %v670_v40  ;;  %697 = vst.msk [vmem:[#allocation2 + $0x158] sm:$0xff] %vm491_vm7, %v670_v40  ;;  %vm298_vm10 = vcmask 1006592  }
 0x11c   :  { %v267_v35 = vsel %vm266_vm4, %v255_v41, %v257_v60  ;;  %848 = vrot.lane.b32.xlu1 %v10423_v50, %s10323_s11  ;;  %v996_v37 = vld [vmem:[#allocation2 + $0x148] sm:$0xff] }
 0x11d   :  { %850 = vrot.lane.b32.xlu0 %v10422_v2, %s10323_s11  ;;  %v1087_v47 = vpack.c.bf16 %v267_v35, %v240_v29 }
 0x11e   :  { %v261_v56 = vpop.permute.xlu1 %260 }
 0x11f   :  { %v703_v59 = vpop.permute.xlu0 %702  ;;  %279 = vst.msk [vmem:[#allocation2 + $0x188] sm:$0xff] %vm101_vm1, %v261_v56 }
 0x120   :  { %v718_v39 = vsel %vm10326_vm0, %v701_v57, %v703_v59  ;;  %734 = vst.msk [vmem:[#allocation2 + $0x178] sm:$0xff] %vm491_vm7, %v703_v59  ;;  %v1000_v20 = vld [vmem:[#allocation2 + $0x168] sm:$0xff]  ;;  %386 = vrot.lane.b32.xlu1 %v10424_v52, %s10338_s3 }
 0x121   :  { %852 = vrot.lane.b32.xlu0 %v7248_v63, %s10323_s11  ;;  %v1088_v53 = vpack.c.bf16 %v1000_v20, %v996_v37  ;;  %v6676_v20 = vld [vmem:[%s10408_s8 + $0x58] sm:$0x3f]  ;;  %s10425_s11 = sld [smem:[#allocation18_spill]] }
 0x122   :  { %v285_v45 = vpop.permute.xlu1 %284  ;;  %v998_v63 = vld [vmem:[#allocation2 + $0x158] sm:$0xff] }
 0x123   :  { %v265_v62 = vpop.permute.xlu0 %264  ;;  %1198 = vmatprep.subr.bf16.mxu0 %v1088_v53  ;;  %312 = vst.msk [vmem:[#allocation2 + $0x1a8] sm:$0xc0] %vm155_vm8, %v285_v45 }
 0x124   :  { %281 = vst.msk [vmem:[#allocation2 + $0x1a8] sm:$0x3f] %vm106_vm2, %v265_v62  ;;  %1199 = vmatpush1.bf16.msra.mxu0 %v1087_v47  ;;  %384 = vrot.lane.b32.xlu1 %v6669_v13, %s10338_s3 }
 0x125   :  { %390 = vrot.lane.b32.xlu0 %v6872_v0, %s10338_s3  ;;  %v1089_v0 = vpack.c.bf16 %v718_v39, %v677_v48 }
 0x126   :  { %v707_v3 = vpop.permute.xlu1 %706 }
 0x127   :  { %v705_v4 = vpop.permute.xlu0 %704  ;;  %v1002_v43 = vld [vmem:[#allocation2 + $0x178] sm:$0xff] }
 0x128   :  { %v719_v58 = vsel %vm10326_vm0, %v705_v4, %v707_v3  ;;  %v1090_v26 = vpack.c.bf16 %v1002_v43, %v998_v63  ;;  %876 = vrot.lane.b32.xlu1 %v6671_v36, %s10329_s2 }
 0x129   :  { %735 = vst.msk [vmem:[#allocation2 + $0x188] sm:$0xff] %vm488_vm6, %v719_v58  ;;  %388 = vrot.lane.b32.xlu0 %v6670_v1, %s10338_s3 }
 0x12a   :  { %1251 = vmatprep.subr.bf16.mxu1 %v1090_v26  ;;  %v713_v60 = vpop.permute.xlu1 %712  ;;  %v6415_v26 = vld [vmem:[%s10425_s11 + $0x4] ss:$8 sps:$4 sm:$0xff]  }
 0x12b   :  { %v711_v42 = vpop.permute.xlu0 %710  ;;  %1252 = vmatpush1.bf16.msra.mxu1 %v1089_v0 }
 0x12c   :  { %v721_v55 = vsel %vm10326_vm0, %v711_v42, %v713_v60  ;;  %878 = vrot.lane.b32.xlu1 %v6673_v61, %s10329_s2 }
 0x12d   :  { %738 = vst.msk [vmem:[#allocation2 + $0x1a8] sm:$0x3f] %vm496_vm9, %v721_v55  ;;  %880 = vrot.lane.b32.xlu0 %v6672_v38, %s10329_s2 }
 0x12e   :  { %v744_v54 = vpop.permute.xlu1 %743 }
 0x12f   :  { %v742_v10 = vpop.permute.xlu0 %741 }
 0x130   :  { %v766_v8 = vsel %vm10331_vm12, %v742_v10, %v744_v54  ;;  %394 = vrot.lane.b32.xlu1 %v6940_v12, %s10338_s3  ;;  %v1004_v44 = vld [vmem:[#allocation2 + $0x188] sm:$0xff] }
 0x131   :  { %786 = vst.msk [vmem:[#allocation2 + $0x1a8] sm:$0xc0] %vm556_vm11, %v766_v8  ;;  %882 = vrot.lane.b32.xlu0 %v6674_v15, %s10329_s2  ;;  %v1127_v15 = vld [vmem:[%s10427_s10] sm:$0xff] }
 0x132   :  { %v263_v5 = vpop.permute.xlu1 %262 }
 0x133   :  { %v259_v51 = vpop.permute.xlu0 %258  ;;  %v269_v33 = vsel %vm266_vm4, %v263_v5, %v265_v62  ;;  %v6719_v5 = vmov 0  }
 0x134   :  { %v268_v49 = vsel %vm266_vm4, %v259_v51, %v261_v56  ;;  %280 = vst [vmem:[#allocation2 + $0x1a0] sm:$0x3f] %v269_v33  ;;  %418 = vrot.lane.b32.xlu1 %v6935_v11, %s10327_s5  ;;  %vm1169_vm4 = vcmask 752640   ;;  %v1128_v51 = vld [vmem:[%s10427_s10 + $0x8] sm:$0xff]  ;;  %6347 = vset.pattern.permute.xlu0 %v6719_v5 }
 0x135   :  { %414 = vrot.lane.b32.xlu0 %v6925_v9, %s10327_s5  ;;  %5856 = vmatprep.mubr.msk.bf16.mxu0 %vm1169_vm4, %v6415_v26 }
 0x136   :  { %v709_v22 = vpop.permute.xlu1 %708  ;;  %5859 = vmatprep.mubr.msk.bf16.mxu1 %vm1169_vm4, %v6415_v26  ;;  %6346 = vset.pattern.permute.xlu1 %v6719_v5 }
 0x137   :  { %v283_v46 = vpop.permute.xlu0 %282  ;;  %v720_v12 = vsel %vm10326_vm0, %v707_v3, %v709_v22  ;;  %737 = vst.msk [vmem:[#allocation2 + $0x198] sm:$0xff] %vm491_vm7, %v709_v22 }
 0x138   :  { %v299_v57 = vsel %vm298_vm10, %v283_v46, %v285_v45  ;;  %v1008_v18 = vld [vmem:[#allocation2 + $0x1a8] sm:$0xff]  ;;  %412 = vrot.lane.b32.xlu1 %v6974_v17, %s10327_s5 }
 0x139   :  { %311 = vst [vmem:[#allocation2 + $0x1a0] sm:$0xc0] %v299_v57  ;;  %392 = vrot.lane.b32.xlu0 %v6917_v7, %s10338_s3  ;;  %v1092_v9 = vpack.c.bf16 %v1008_v18, %v1004_v44  ;;  %v6675_v7 = vld [vmem:[%s10408_s8 + $0x50] sm:$0x3f]  ;;  %v1130_v44 = vld [vmem:[%s10427_s10 + $0x18] sm:$0x1] }
 0x13a   :  { %v746_v29 = vpop.permute.xlu1 %745  ;;  %s10477_s3 = smov 112   ;;  %s10486_s8 = smov 111  }
 0x13b   :  { %v715_v11 = vpop.permute.xlu0 %714  ;;  %1200 = vmatprep.subr.bf16.mxu0 %v1092_v9  ;;  %v767_v41 = vsel %vm10331_vm12, %v744_v54, %v746_v29  ;;  %788 = vst.msk [vmem:[#allocation2 + $0x1b8] sm:$0xc0] %vm559_vm14, %v746_v29 }
 0x13c   :  { %v722_v6 = vsel %vm10326_vm0, %v713_v60, %v715_v11  ;;  %740 = vst.msk [vmem:[#allocation2 + $0x1b8] sm:$0x3f] %vm499_vm13, %v715_v11  ;;  %787 = vst [vmem:[#allocation2 + $0x1b0] sm:$0xc0] %v767_v41  ;;  %884 = vrot.lane.b32.xlu1 %v6675_v7, %s10329_s2  ;;  %vm335_vm0 = vcmask 998400  }
 0x13d   :  { %739 = vst [vmem:[#allocation2 + $0x1b0] sm:$0x3f] %v722_v6  ;;  %416 = vrot.lane.b32.xlu0 %v6983_v19, %s10327_s5 }
 0x13e   :  { %v293_v40 = vpop.permute.xlu1 %292  ;;  %v1006_v48 = vld [vmem:[#allocation2 + $0x198] sm:$0xff] }
 0x13f   :  { %v289_v17 = vpop.permute.xlu0 %288  ;;  %316 = vst.msk [vmem:[#allocation2 + $0x1e8] sm:$0xff] %vm101_vm1, %v293_v40 }
 0x140   :  { %314 = vst.msk [vmem:[#allocation2 + $0x1c8] sm:$0xff] %vm101_vm1, %v289_v17  ;;  %v1007_v35 = vld [vmem:[#allocation2 + $0x1a0] sm:$0xff]  ;;  %914 = vrot.lane.b32.xlu1 %v6971_v16, %s10332_s28 }
 0x141   :  { %910 = vrot.lane.b32.xlu0 %v6960_v14, %s10332_s28  ;;  %v1091_v19 = vpack.c.bf16 %v1007_v35, %v268_v49  ;;  %v1129_v49 = vld [vmem:[%s10427_s10 + $0x10] sm:$0xff]  ;;  %s10447_s10 = sld [smem:[#allocation20_spill]] }
 0x142   :  { %v750_v50 = vpop.permute.xlu1 %749 }
 0x143   :  { %v748_v2 = vpop.permute.xlu0 %747  ;;  %1201 = vmatpush1.bf16.msra.mxu0 %v1091_v19  ;;  %v1010_v59 = vld [vmem:[#allocation2 + $0x1b8] sm:$0xff] }
 0x144   :  { %v768_v56 = vsel %vm10331_vm12, %v748_v2, %v750_v50  ;;  %v1094_v39 = vpack.c.bf16 %v1010_v59, %v1006_v48  ;;  %v1009_v37 = vld [vmem:[#allocation2 + $0x1b0] sm:$0xff]  ;;  %912 = vrot.lane.b32.xlu1 %v6995_v21, %s10332_s28 }
 0x145   :  { %789 = vst.msk [vmem:[#allocation2 + $0x1c8] sm:$0xff] %vm488_vm6, %v768_v56  ;;  %886 = vrot.lane.b32.xlu0 %v6676_v20, %s10329_s2  ;;  %v1093_v14 = vpack.c.bf16 %v1009_v37, %v720_v12  ;;  %s10446_s2 = sld [smem:[#allocation22_spill]] }
 0x146   :  { %1253 = vmatprep.subr.bf16.mxu1 %v1094_v39  ;;  %v756_v52 = vpop.permute.xlu1 %755 }
 0x147   :  { %v754_v16 = vpop.permute.xlu0 %753  ;;  %1254 = vmatpush1.bf16.msra.mxu1 %v1093_v14 }
 0x148   :  { %v770_v53 = vsel %vm10331_vm12, %v754_v16, %v756_v52  ;;  %420 = vrot.lane.b32.xlu1 %v7051_v31, %s10327_s5 }
 0x149   :  { %792 = vst.msk [vmem:[#allocation2 + $0x1e8] sm:$0xff] %vm488_vm6, %v770_v53  ;;  %916 = vrot.lane.b32.xlu0 %v7007_v24, %s10332_s28 }
 0x14a   :  { %v291_v62 = vpop.permute.xlu1 %290 }
 0x14b   :  { %v287_v47 = vpop.permute.xlu0 %286  ;;  %v301_v21 = vsel %vm298_vm10, %v291_v62, %v293_v40 }
 0x14c   :  { %v300_v45 = vsel %vm298_vm10, %v287_v47, %v289_v17  ;;  %424 = vrot.lane.b32.xlu1 %v7043_v30, %s10327_s5  ;;  %v1012_v31 = vld [vmem:[#allocation2 + $0x1c8] sm:$0xff] }
 0x14d   :  { %422 = vrot.lane.b32.xlu0 %v7011_v25, %s10327_s5  ;;  %v1095_v30 = vpack.c.bf16 %v301_v21, %v300_v45 }
 0x14e   :  { %v758_v63 = vpop.permute.xlu1 %757 }
 0x14f   :  { %v752_v13 = vpop.permute.xlu0 %751  ;;  %v771_v24 = vsel %vm10331_vm12, %v756_v52, %v758_v63  ;;  %794 = vst.msk [vmem:[#allocation2 + $0x1f8] sm:$0xff] %vm491_vm7, %v758_v63 }
 0x150   :  { %v769_v4 = vsel %vm10331_vm12, %v750_v50, %v752_v13  ;;  %791 = vst.msk [vmem:[#allocation2 + $0x1d8] sm:$0xff] %vm491_vm7, %v752_v13  ;;  %v1016_v3 = vld [vmem:[#allocation2 + $0x1e8] sm:$0xff]  ;;  %918 = vrot.lane.b32.xlu1 %v7029_v28, %s10332_s28 }
 0x151   :  { %426 = vrot.lane.b32.xlu0 %v6999_v23, %s10327_s5  ;;  %v1096_v25 = vpack.c.bf16 %v1016_v3, %v1012_v31  ;;  %v1097_v42 = vpack.c.bf16 %v771_v24, %v769_v4  ;;  %s10482_s5 = smov 125  }
 0x152   :  { %v322_v58 = vpop.permute.xlu1 %321 }
 0x153   :  { %v297_v43 = vpop.permute.xlu0 %296  ;;  %1202 = vmatprep.subr.bf16.mxu0 %v1096_v25  ;;  %349 = vst.msk [vmem:[#allocation2 + $0x208] sm:$0xf0] %vm205_vm3, %v322_v58  ;;  %vm10426_vm3 = vcmask 1044360  }
 0x154   :  { %318 = vst.msk [vmem:[#allocation2 + $0x208] sm:$0xf] %vm162_vm15, %v297_v43  ;;  %1203 = vmatpush1.bf16.msra.mxu0 %v1095_v30  ;;  %922 = vrot.lane.b32.xlu1 %v7021_v27, %s10332_s28 }
 0x155   :  { %920 = vrot.lane.b32.xlu0 %v7065_v34, %s10332_s28 }
 0x156   :  { %v760_v28 = vpop.permute.xlu1 %759  ;;  %v1018_v36 = vld [vmem:[#allocation2 + $0x1f8] sm:$0xff] }
 0x157   :  { %v326_v23 = vpop.permute.xlu0 %325  ;;  %v1014_v1 = vld [vmem:[#allocation2 + $0x1d8] sm:$0xff] }
 0x158   :  { %351 = vst.msk [vmem:[#allocation2 + $0x228] sm:$0xff] %vm101_vm1, %v326_v23  ;;  %v1098_v0 = vpack.c.bf16 %v1018_v36, %v1014_v1  ;;  %1133 = vperm.xlu1 %6346, %v1127_v15  }
 0x159   :  { %924 = vrot.lane.b32.xlu0 %v7054_v32, %s10332_s28  ;;  %s10485_s28 = smov 113  }
 0x15a   :  { %1255 = vmatprep.subr.bf16.mxu1 %v1098_v0  ;;  %v295_v60 = vpop.permute.xlu1 %294 }
 0x15b   :  { %v762_v34 = vpop.permute.xlu0 %761  ;;  %1256 = vmatpush1.bf16.msra.mxu1 %v1097_v42  ;;  %v302_v55 = vsel %vm298_vm10, %v295_v60, %v297_v43  ;;  %vm10428_vm10 = vcmask 1048460  }
 0x15c   :  { %v772_v27 = vsel %vm10331_vm12, %v760_v28, %v762_v34  ;;  %317 = vst [vmem:[#allocation2 + $0x200] sm:$0xf] %v302_v55  ;;  %1143 = vperm.xlu1 %6346, %v1129_v49  }
 0x15d   :  { %795 = vst.msk [vmem:[#allocation2 + $0x208] sm:$0xf] %vm10426_vm3, %v772_v27  ;;  %1138 = vperm.xlu0 %6347, %v1128_v51   ;;  %vm10429_vm3 = vcmask 797696  }
 0x15e   :  { %v324_v61 = vpop.permute.xlu1 %323 }
 0x15f   :  { %v320_v38 = vpop.permute.xlu0 %319  ;;  %v337_v54 = vsel %vm335_vm0, %v324_v61, %v326_v23 }
 0x160   :  { %v336_v10 = vsel %vm335_vm0, %v320_v38, %v322_v58  ;;  %1148 = vperm.xlu1 %6346, %v1130_v44  }
 0x161   :  { %348 = vst [vmem:[#allocation2 + $0x200] sm:$0xf0] %v336_v10 }
 0x162   :  { %v803_v8 = vpop.permute.xlu1 %802 }
 0x163   :  { %v799_v32 = vpop.permute.xlu0 %798  ;;  %833 = vst.msk [vmem:[#allocation2 + $0x228] sm:$0xff] %vm488_vm6, %v803_v8 }
 0x164   :  { %830 = vst.msk [vmem:[#allocation2 + $0x208] sm:$0xf0] %vm10428_vm10, %v799_v32  ;;  %vm10430_vm10 = vcmask 801796  }
 0x166   :  { %v801_v46 = vpop.permute.xlu1 %800 }
 0x167   :  { %v764_v33 = vpop.permute.xlu0 %763  ;;  %v814_v57 = vsel %vm101_vm1, %v799_v32, %v801_v46  ;;  %832 = vst.msk [vmem:[#allocation2 + $0x218] sm:$0xf0] %vm10430_vm10, %v801_v46  ;;  %vm10432_vm10 = vcmask 924674  }
 0x168   :  { %v773_v22 = vsel %vm10331_vm12, %v762_v34, %v764_v33  ;;  %797 = vst.msk [vmem:[#allocation2 + $0x218] sm:$0xf] %vm10429_vm3, %v764_v33  ;;  %831 = vst [vmem:[#allocation2 + $0x210] sm:$0xf0] %v814_v57  ;;  %v1019_v12 = vld [vmem:[#allocation2 + $0x200] sm:$0xff]  ;;  %vm10431_vm3 = vcmask 918528  }
 0x169   :  { %796 = vst [vmem:[#allocation2 + $0x210] sm:$0xf] %v773_v22  ;;  %v1099_v7 = vpack.c.bf16 %v337_v54, %v1019_v12  ;;  %vm368_vm12 = vcmask 990208  }
 0x16a   :  { %v330_v9 = vpop.permute.xlu1 %329  ;;  %v1024_v29 = vld [vmem:[#allocation2 + $0x228] sm:$0xff] }
 0x16b   :  { %v805_v18 = vpop.permute.xlu0 %804  ;;  %v1020_v11 = vld [vmem:[#allocation2 + $0x208] sm:$0xff]  ;;  %353 = vst.msk [vmem:[#allocation2 + $0x248] sm:$0xff] %vm101_vm1, %v330_v9 }
 0x16c   :  { %v815_v6 = vsel %vm101_vm1, %v803_v8, %v805_v18  ;;  %835 = vst.msk [vmem:[#allocation2 + $0x238] sm:$0xff] %vm491_vm7, %v805_v18  ;;  %v1100_v41 = vpack.c.bf16 %v1024_v29, %v1020_v11 }
 0x16e   :  { %1204 = vmatprep.subr.bf16.mxu0 %v1100_v41  ;;  %v359_v40 = vpop.permute.xlu1 %358 }
 0x16f   :  { %v334_v17 = vpop.permute.xlu0 %333  ;;  %1205 = vmatpush1.bf16.msra.mxu0 %v1099_v7  ;;  %379 = vst.msk [vmem:[#allocation2 + $0x268] sm:$0xfc] %vm10432_vm10, %v359_v40  ;;  %v1022_v2 = vld [vmem:[#allocation2 + $0x218] sm:$0xff]  ;;  %vm10434_vm10 = vcmask 1048458  }
 0x170   :  { %355 = vst.msk [vmem:[#allocation2 + $0x268] sm:$0x3] %vm10431_vm3, %v334_v17  ;;  %v1021_v35 = vld [vmem:[#allocation2 + $0x210] sm:$0xff]  ;;  %vm10433_vm3 = vcmask 1042312  }
 0x171   :  { %v1101_v37 = vpack.c.bf16 %v815_v6, %v1021_v35 }
 0x172   :  { %v332_v48 = vpop.permute.xlu1 %331 }
 0x173   :  { %v328_v19 = vpop.permute.xlu0 %327  ;;  %v1026_v50 = vld [vmem:[#allocation2 + $0x238] sm:$0xff]  ;;  %v339_v56 = vsel %vm335_vm0, %v332_v48, %v334_v17 }
 0x174   :  { %v338_v59 = vsel %vm335_vm0, %v328_v19, %v330_v9  ;;  %v1102_v39 = vpack.c.bf16 %v1026_v50, %v1022_v2  ;;  %354 = vst [vmem:[#allocation2 + $0x260] sm:$0x3] %v339_v56  ;;  %vm854_vm0 = vcmask 916480  }
 0x176   :  { %1257 = vmatprep.subr.bf16.mxu1 %v1102_v39  ;;  %v807_v14 = vpop.permute.xlu1 %806 }
 0x177   :  { %v357_v20 = vpop.permute.xlu0 %356  ;;  %1258 = vmatpush1.bf16.msra.mxu1 %v1101_v37  ;;  %836 = vst.msk [vmem:[#allocation2 + $0x248] sm:$0xff] %vm488_vm6, %v807_v14 }
 0x178   :  { %v369_v16 = vsel %vm368_vm12, %v357_v20, %v359_v40 }
 0x179   :  { %378 = vst [vmem:[#allocation2 + $0x260] sm:$0xfc] %v369_v16 }
 0x17a   :  { %v843_v53 = vpop.permute.xlu1 %842 }
 0x17b   :  { %v811_v52 = vpop.permute.xlu0 %810  ;;  %867 = vst.msk [vmem:[#allocation2 + $0x268] sm:$0xfc] %vm10434_vm10, %v843_v53  ;;  %vm10436_vm10 = vcmask 973824  }
 0x17c   :  { %839 = vst.msk [vmem:[#allocation2 + $0x268] sm:$0x3] %vm10433_vm3, %v811_v52  ;;  %vm10435_vm3 = vcmask 801794  }
 0x17e   :  { %v813_v62 = vpop.permute.xlu1 %812  ;;  %v1028_v13 = vld [vmem:[#allocation2 + $0x248] sm:$0xff] }
 0x17f   :  { %v809_v47 = vpop.permute.xlu0 %808  ;;  %v817_v21 = vsel %vm101_vm1, %v811_v52, %v813_v62  ;;  %841 = vst.msk [vmem:[#allocation2 + $0x278] sm:$0x3] %vm641_vm5, %v813_v62  ;;  %vm396_vm5 = vcmask 982016  }
 0x180   :  { %v816_v45 = vsel %vm101_vm1, %v807_v14, %v809_v47  ;;  %838 = vst.msk [vmem:[#allocation2 + $0x258] sm:$0xff] %vm491_vm7, %v809_v47  ;;  %840 = vst [vmem:[#allocation2 + $0x270] sm:$0x3] %v817_v21  ;;  %v1031_v63 = vld [vmem:[#allocation2 + $0x260] sm:$0xff] }
 0x181   :  { %v1103_v30 = vpack.c.bf16 %v1031_v63, %v338_v59 }
 0x182   :  { %v363_v24 = vpop.permute.xlu1 %362 }
 0x183   :  { %v845_v4 = vpop.permute.xlu0 %844  ;;  %v1032_v31 = vld [vmem:[#allocation2 + $0x268] sm:$0xff]  ;;  %381 = vst.msk [vmem:[#allocation2 + $0x288] sm:$0xff] %vm101_vm1, %v363_v24 }
 0x184   :  { %v855_v3 = vsel %vm854_vm0, %v843_v53, %v845_v4  ;;  %869 = vst.msk [vmem:[#allocation2 + $0x278] sm:$0xfc] %vm10435_vm3, %v845_v4  ;;  %v1104_v25 = vpack.c.bf16 %v1032_v31, %v1028_v13 }
 0x185   :  { %868 = vst [vmem:[#allocation2 + $0x270] sm:$0xfc] %v855_v3 }
 0x186   :  { %1206 = vmatprep.subr.bf16.mxu0 %v1104_v25  ;;  %v361_v58 = vpop.permute.xlu1 %360 }
 0x187   :  { %v367_v43 = vpop.permute.xlu0 %366  ;;  %1207 = vmatpush1.bf16.msra.mxu0 %v1103_v30  ;;  %v370_v26 = vsel %vm368_vm12, %v361_v58, %v363_v24  ;;  %v1030_v1 = vld [vmem:[#allocation2 + $0x258] sm:$0xff] }
 0x188   :  { %383 = vst.msk [vmem:[#allocation2 + $0x2a8] sm:$0xff] %vm101_vm1, %v367_v43 }
 0x18a   :  { %v847_v28 = vpop.permute.xlu1 %846 }
 0x18b   :  { %v365_v23 = vpop.permute.xlu0 %364  ;;  %v1034_v36 = vld [vmem:[#allocation2 + $0x278] sm:$0xff]  ;;  %870 = vst.msk [vmem:[#allocation2 + $0x288] sm:$0xff] %vm488_vm6, %v847_v28 }
 0x18c   :  { %v371_v0 = vsel %vm368_vm12, %v365_v23, %v367_v43  ;;  %v1106_v42 = vpack.c.bf16 %v1034_v36, %v1030_v1  ;;  %v1033_v34 = vld [vmem:[#allocation2 + $0x270] sm:$0xff]  ;;  %vm888_vm12 = vcmask 908288  }
 0x18d   :  { %v1105_v60 = vpack.c.bf16 %v1033_v34, %v816_v45  ;;  %v1107_v46 = vpack.c.bf16 %v371_v0, %v370_v26 }
 0x18e   :  { %1259 = vmatprep.subr.bf16.mxu1 %v1106_v42  ;;  %v849_v55 = vpop.permute.xlu1 %848 }
 0x18f   :  { %v851_v27 = vpop.permute.xlu0 %850  ;;  %1260 = vmatpush1.bf16.msra.mxu1 %v1105_v60  ;;  %v856_v38 = vsel %vm854_vm0, %v847_v28, %v849_v55  ;;  %872 = vst.msk [vmem:[#allocation2 + $0x298] sm:$0xff] %vm491_vm7, %v849_v55 }
 0x190   :  { %873 = vst.msk [vmem:[#allocation2 + $0x2a8] sm:$0xff] %vm488_vm6, %v851_v27 }
 0x192   :  { %v387_v10 = vpop.permute.xlu1 %386  ;;  %v1036_v32 = vld [vmem:[#allocation2 + $0x288] sm:$0xff] }
 0x193   :  { %v853_v61 = vpop.permute.xlu0 %852  ;;  %407 = vst.msk [vmem:[#allocation2 + $0x2c8] sm:$0xff] %vm101_vm1, %v387_v10 }
 0x194   :  { %v857_v54 = vsel %vm854_vm0, %v851_v27, %v853_v61  ;;  %875 = vst.msk [vmem:[#allocation2 + $0x2b8] sm:$0xff] %vm491_vm7, %v853_v61 }
 0x195   :  { %v1109_v11 = vpack.c.bf16 %v857_v54, %v856_v38 }
 0x196   :  { %v385_v15 = vpop.permute.xlu1 %384  ;;  %v1038_v22 = vld [vmem:[#allocation2 + $0x298] sm:$0xff] }
 0x197   :  { %v391_v8 = vpop.permute.xlu0 %390  ;;  %v1040_v51 = vld [vmem:[#allocation2 + $0x2a8] sm:$0xff]  ;;  %v397_v49 = vsel %vm396_vm5, %v385_v15, %v387_v10 }
 0x198   :  { %409 = vst.msk [vmem:[#allocation2 + $0x2e8] sm:$0xff] %vm101_vm1, %v391_v8  ;;  %v1108_v33 = vpack.c.bf16 %v1040_v51, %v1036_v32 }
 0x19a   :  { %1208 = vmatprep.subr.bf16.mxu0 %v1108_v33  ;;  %v877_v12 = vpop.permute.xlu1 %876 }
 0x19b   :  { %v389_v57 = vpop.permute.xlu0 %388  ;;  %1209 = vmatpush1.bf16.msra.mxu0 %v1107_v46  ;;  %v1042_v44 = vld [vmem:[#allocation2 + $0x2b8] sm:$0xff]  ;;  %901 = vst.msk [vmem:[#allocation2 + $0x2c8] sm:$0xff] %vm488_vm6, %v877_v12 }
 0x19c   :  { %v398_v18 = vsel %vm396_vm5, %v389_v57, %v391_v8  ;;  %v1110_v9 = vpack.c.bf16 %v1042_v44, %v1038_v22  ;;  %v6413_v44 = vld [vmem:[%s10425_s11] ss:$8 sps:$4 sm:$0xff]  }
 0x19d   :  { %v1111_v59 = vpack.c.bf16 %v398_v18, %v397_v49 }
 0x19e   :  { %1261 = vmatprep.subr.bf16.mxu1 %v1110_v9  ;;  %v879_v6 = vpop.permute.xlu1 %878 }
 0x19f   :  { %v881_v29 = vpop.permute.xlu0 %880  ;;  %1262 = vmatpush1.bf16.msra.mxu1 %v1109_v11  ;;  %v889_v41 = vsel %vm888_vm12, %v877_v12, %v879_v6  ;;  %903 = vst.msk [vmem:[#allocation2 + $0x2d8] sm:$0xff] %vm491_vm7, %v879_v6  ;;  %v6416_v11 = vld [vmem:[%s10425_s11 + $0x14] ss:$8 sps:$4 sm:$0x1f]  }
 0x1a0   :  { %904 = vst.msk [vmem:[#allocation2 + $0x2e8] sm:$0xff] %vm488_vm6, %v881_v29 }
 0x1a2   :  { %v395_v17 = vpop.permute.xlu1 %394  ;;  %v1044_v35 = vld [vmem:[#allocation2 + $0x2c8] sm:$0xff] }
 0x1a3   :  { %v883_v7 = vpop.permute.xlu0 %882  ;;  %411 = vst.msk [vmem:[#allocation2 + $0x308] sm:$0x3f] %vm106_vm2, %v395_v17  ;;  %vm10437_vm2 = vmmov %vm10436_vm10 }
 0x1a4   :  { %v890_v40 = vsel %vm888_vm12, %v881_v29, %v883_v7  ;;  %906 = vst.msk [vmem:[#allocation2 + $0x2f8] sm:$0xff] %vm491_vm7, %v883_v7 }
 0x1a5   :  { %v1113_v53 = vpack.c.bf16 %v890_v40, %v889_v41  ;;  %v1559_v40 = vld [vmem:[%s10446_s2 + $0x8] sm:$0xff] }
 0x1a6   :  { %v419_v48 = vpop.permute.xlu1 %418  ;;  %v1046_v56 = vld [vmem:[#allocation2 + $0x2d8] sm:$0xff] }
 0x1a7   :  { %v415_v19 = vpop.permute.xlu0 %414  ;;  %v1048_v2 = vld [vmem:[#allocation2 + $0x2e8] sm:$0xff]  ;;  %444 = vst.msk [vmem:[#allocation2 + $0x328] sm:$0xff] %vm101_vm1, %v419_v48 }
 0x1a8   :  { %442 = vst.msk [vmem:[#allocation2 + $0x308] sm:$0xc0] %vm155_vm8, %v415_v19  ;;  %v1112_v50 = vpack.c.bf16 %v1048_v2, %v1044_v35  ;;  %vm10356_vm8 = vcmask 900096   ;;  %v1561_v35 = vld [vmem:[%s10446_s2 + $0x18] sm:$0xff]  ;;  %v1560_v2 = vld [vmem:[%s10446_s2 + $0x10] sm:$0xff] }
 0x1aa   :  { %1210 = vmatprep.subr.bf16.mxu0 %v1112_v50  ;;  %v413_v37 = vpop.permute.xlu1 %412  ;;  %v1563_v50 = vld [vmem:[%s10446_s2 + $0x28] sm:$0xff] }
 0x1ab   :  { %v393_v39 = vpop.permute.xlu0 %392  ;;  %1211 = vmatpush1.bf16.msra.mxu0 %v1111_v59  ;;  %v1050_v20 = vld [vmem:[#allocation2 + $0x2f8] sm:$0xff]  ;;  %v429_v16 = vsel %vm10436_vm10, %v413_v37, %v415_v19  ;;  %v1558_v19 = vld [vmem:[%s10446_s2] sm:$0xff] }
 0x1ac   :  { %v399_v14 = vsel %vm396_vm5, %v393_v39, %v395_v17  ;;  %v1114_v52 = vpack.c.bf16 %v1050_v20, %v1046_v56  ;;  %441 = vst [vmem:[#allocation2 + $0x300] sm:$0xc0] %v429_v16  ;;  %v6418_v17 = vld [vmem:[%s10425_s11 + $0x10] ss:$8 sps:$4 sm:$0x1f]   ;;  %v6136_v56 = vpack.c.bf16 %v1560_v2, %v1558_v19  ;;  %v1562_v37 = vld [vmem:[%s10446_s2 + $0x20] sm:$0xff] }
 0x1ad   :  { %410 = vst [vmem:[#allocation2 + $0x300] sm:$0x3f] %v399_v14  ;;  %v1565_v59 = vld [vmem:[%s10446_s2 + $0x38] sm:$0xff]  ;;  %v1564_v20 = vld [vmem:[%s10446_s2 + $0x30] sm:$0xff]  ;;  %v1567_v14 = vld [vmem:[%s10446_s2 + $0x48] sm:$0xff]  ;;  %s10476_s11 = smov 126  }
 0x1ae   :  { %1263 = vmatprep.subr.bf16.mxu1 %v1114_v52  ;;  %v885_v62 = vpop.permute.xlu1 %884  ;;  %v6138_v39 = vpack.c.bf16 %v1565_v59, %v1563_v50  ;;  %v1569_v16 = vld [vmem:[%s10446_s2 + $0x58] sm:$0xff]  ;;  %v6140_v52 = vpack.c.bf16 %v1564_v20, %v1562_v37  ;;  %v1603_v19 = vld [vmem:[%s10446_s2 + $0x168] sm:$0xff]  ;;  %v1602_v59 = vld [vmem:[%s10446_s2 + $0x160] sm:$0xff] }
 0x1af   :  { %v417_v47 = vpop.permute.xlu0 %416  ;;  %1264 = vmatpush1.bf16.msra.mxu1 %v1113_v53  ;;  %907 = vst.msk [vmem:[#allocation2 + $0x308] sm:$0x3f] %vm496_vm9, %v885_v62  ;;  %vm10438_vm9 = vmmov %vm10437_vm2  ;;  %v6142_v53 = vpack.c.bf16 %v1569_v16, %v1567_v14 }
 0x1b0   :  { %v430_v45 = vsel %vm10437_vm2, %v417_v47, %v419_v48  ;;  %v6134_v48 = vpack.c.bf16 %v1561_v35, %v1559_v40  ;;  %v1566_v47 = vld [vmem:[%s10446_s2 + $0x40] sm:$0xff]  ;;  %v1600_v35 = vld [vmem:[%s10446_s2 + $0x150] sm:$0xff] }
 0x1b1   :  { %v1598_v40 = vld [vmem:[%s10446_s2 + $0x140] sm:$0xff] }
 0x1b2   :  { %v915_v13 = vpop.permute.xlu1 %914  ;;  %v6176_v2 = vpack.c.bf16 %v1600_v35, %v1598_v40  ;;  %v1607_v40 = vld [vmem:[%s10446_s2 + $0x188] sm:$0xff] }
 0x1b3   :  { %v911_v21 = vpop.permute.xlu0 %910  ;;  %946 = vst.msk [vmem:[#allocation2 + $0x328] sm:$0xff] %vm488_vm6, %v915_v13 }
 0x1b4   :  { %943 = vst.msk [vmem:[#allocation2 + $0x308] sm:$0xc0] %vm556_vm11, %v911_v21  ;;  %v1051_v3 = vld [vmem:[#allocation2 + $0x300] sm:$0xff]  ;;  %vm10439_vm11 = vmmov %vm10437_vm2 }
 0x1b5   :  { %v1115_v28 = vpack.c.bf16 %v430_v45, %v1051_v3  ;;  %v1571_v45 = vld [vmem:[%s10446_s2 + $0x68] sm:$0xff]  ;;  %v1577_v3 = vld [vmem:[%s10446_s2 + $0x98] sm:$0xff] }
 0x1b6   :  { %v913_v4 = vpop.permute.xlu1 %912 }
 0x1b7   :  { %v887_v63 = vpop.permute.xlu0 %886  ;;  %v927_v31 = vsel %vm10356_vm8, %v911_v21, %v913_v4  ;;  %945 = vst.msk [vmem:[#allocation2 + $0x318] sm:$0xc0] %vm559_vm14, %v913_v4  ;;  %vm10441_vm14 = vcmask 797696   ;;  %v1573_v21 = vld [vmem:[%s10446_s2 + $0x78] sm:$0xff]  ;;  %v1570_v4 = vld [vmem:[%s10446_s2 + $0x60] sm:$0xff] }
 0x1b8   :  { %v891_v24 = vsel %vm888_vm12, %v885_v62, %v887_v63  ;;  %909 = vst.msk [vmem:[#allocation2 + $0x318] sm:$0x3f] %vm499_vm13, %v887_v63  ;;  %944 = vst [vmem:[#allocation2 + $0x310] sm:$0xc0] %v927_v31  ;;  %vm10440_vm13 = vcmask 1044360   ;;  %v1568_v62 = vld [vmem:[%s10446_s2 + $0x50] sm:$0xff]  ;;  %v6146_v63 = vpack.c.bf16 %v1573_v21, %v1571_v45 }
 0x1b9   :  { %908 = vst [vmem:[#allocation2 + $0x310] sm:$0x3f] %v891_v24  ;;  %v1572_v24 = vld [vmem:[%s10446_s2 + $0x70] sm:$0xff]  ;;  %v1575_v31 = vld [vmem:[%s10446_s2 + $0x88] sm:$0xff] }
 0x1ba   :  { %v421_v30 = vpop.permute.xlu1 %420  ;;  %v1056_v58 = vld [vmem:[#allocation2 + $0x328] sm:$0xff] }
 0x1bb   :  { %v917_v25 = vpop.permute.xlu0 %916  ;;  %v1052_v43 = vld [vmem:[#allocation2 + $0x308] sm:$0xff] }
 0x1bc   :  { %v928_v26 = vsel %vm10356_vm8, %v915_v13, %v917_v25  ;;  %948 = vst.msk [vmem:[#allocation2 + $0x338] sm:$0xff] %vm491_vm7, %v917_v25  ;;  %v1116_v23 = vpack.c.bf16 %v1056_v58, %v1052_v43  ;;  %v6144_v13 = vpack.c.bf16 %v1568_v62, %v1566_v47  ;;  %v6148_v25 = vpack.c.bf16 %v1572_v24, %v1570_v4  ;;  %v1574_v43 = vld [vmem:[%s10446_s2 + $0x80] sm:$0xff]  ;;  %v1576_v58 = vld [vmem:[%s10446_s2 + $0x90] sm:$0xff] }
 0x1be   :  { %1212 = vmatprep.subr.bf16.mxu0 %v1116_v23  ;;  %v425_v36 = vpop.permute.xlu1 %424  ;;  %v1581_v23 = vld [vmem:[%s10446_s2 + $0xb8] sm:$0xff] }
 0x1bf   :  { %v423_v1 = vpop.permute.xlu0 %422  ;;  %1213 = vmatpush1.bf16.msra.mxu0 %v1115_v28  ;;  %v1054_v27 = vld [vmem:[#allocation2 + $0x318] sm:$0xff]  ;;  %v6152_v28 = vpack.c.bf16 %v1576_v58, %v1574_v43 }
 0x1c0   :  { %v431_v0 = vsel %vm10438_vm9, %v421_v30, %v423_v1  ;;  %446 = vst.msk [vmem:[#allocation2 + $0x348] sm:$0xff] %vm101_vm1, %v423_v1  ;;  %v1053_v42 = vld [vmem:[#allocation2 + $0x310] sm:$0xff]  ;;  %v6150_v30 = vpack.c.bf16 %v1577_v3, %v1575_v31 }
 0x1c1   :  { %v1117_v10 = vpack.c.bf16 %v928_v26, %v1053_v42  ;;  %v1579_v26 = vld [vmem:[%s10446_s2 + $0xa8] sm:$0xff] }
 0x1c2   :  { %v919_v60 = vpop.permute.xlu1 %918  ;;  %v6154_v1 = vpack.c.bf16 %v1581_v23, %v1579_v26  ;;  %v1583_v42 = vld [vmem:[%s10446_s2 + $0xc8] sm:$0xff] }
 0x1c3   :  { %v427_v34 = vpop.permute.xlu0 %426  ;;  %v1058_v55 = vld [vmem:[#allocation2 + $0x338] sm:$0xff]  ;;  %949 = vst.msk [vmem:[#allocation2 + $0x348] sm:$0xff] %vm488_vm6, %v919_v60  ;;  %vm10442_vm6 = vcmask 1045504  }
 0x1c4   :  { %v432_v38 = vsel %vm10439_vm11, %v425_v36, %v427_v34  ;;  %448 = vst.msk [vmem:[#allocation2 + $0x368] sm:$0xf] %vm162_vm15, %v427_v34  ;;  %v1118_v61 = vpack.c.bf16 %v1058_v55, %v1054_v27  ;;  %vm10443_vm15 = vmmov %vm10442_vm6  ;;  %v1578_v36 = vld [vmem:[%s10446_s2 + $0xa0] sm:$0xff]  ;;  %v1585_v34 = vld [vmem:[%s10446_s2 + $0xd8] sm:$0xff] }
 0x1c5   :  { %447 = vst [vmem:[#allocation2 + $0x360] sm:$0xf] %v432_v38  ;;  %vm10445_vm3 = vmmov %vm10442_vm6  ;;  %v6158_v27 = vpack.c.bf16 %v1585_v34, %v1583_v42  ;;  %v1582_v55 = vld [vmem:[%s10446_s2 + $0xc0] sm:$0xff]  ;;  %v1584_v38 = vld [vmem:[%s10446_s2 + $0xd0] sm:$0xff] }
 0x1c6   :  { %1265 = vmatprep.subr.bf16.mxu1 %v1118_v61  ;;  %v923_v32 = vpop.permute.xlu1 %922  ;;  %v1587_v61 = vld [vmem:[%s10446_s2 + $0xe8] sm:$0xff] }
 0x1c7   :  { %v921_v54 = vpop.permute.xlu0 %920  ;;  %1266 = vmatpush1.bf16.msra.mxu1 %v1117_v10  ;;  %952 = vst.msk [vmem:[#allocation2 + $0x368] sm:$0xf] %vm10440_vm13, %v923_v32  ;;  %v1589_v10 = vld [vmem:[%s10446_s2 + $0xf8] sm:$0xff] }
 0x1c8   :  { %v929_v8 = vsel %vm10356_vm8, %v919_v60, %v921_v54  ;;  %951 = vst.msk [vmem:[#allocation2 + $0x358] sm:$0xff] %vm491_vm7, %v921_v54  ;;  %vm10444_vm7 = vmmov %vm10442_vm6  ;;  %v6160_v54 = vpack.c.bf16 %v1584_v38, %v1582_v55 }
 0x1ca   :  { %v1060_v33 = vld [vmem:[#allocation2 + $0x348] sm:$0xff] }
 0x1cb   :  { %v925_v15 = vpop.permute.xlu0 %924 }
 0x1cc   :  { %v930_v51 = vsel %vm10356_vm8, %v923_v32, %v925_v15  ;;  %954 = vst.msk [vmem:[#allocation2 + $0x378] sm:$0xf] %vm10441_vm14, %v925_v15  ;;  %v1063_v49 = vld [vmem:[#allocation2 + $0x360] sm:$0xf]  ;;  %v6162_v32 = vpack.c.bf16 %v1589_v10, %v1587_v61  ;;  %v1588_v15 = vld [vmem:[%s10446_s2 + $0xf0] sm:$0xff]  ;;  %vm10504_vm8 = vcmask 941056  }
 0x1cd   :  { %953 = vst [vmem:[#allocation2 + $0x370] sm:$0xf] %v930_v51  ;;  %v1119_v46 = vpack.c.bf16 %v1063_v49, %v431_v0  ;;  %v1580_v0 = vld [vmem:[%s10446_s2 + $0xb0] sm:$0xff]  ;;  %v1591_v51 = vld [vmem:[%s10446_s2 + $0x108] sm:$0xff]  ;;  %v1593_v49 = vld [vmem:[%s10446_s2 + $0x118] sm:$0xff] }
 0x1ce   :  { %v1064_v22 = vld [vmem:[#allocation2 + $0x368] sm:$0xf]  ;;  %v6156_v60 = vpack.c.bf16 %v1580_v0, %v1578_v36 }
 0x1cf   :  { %v1120_v57 = vpack.c.bf16 %v1064_v22, %v1060_v33  ;;  %v1177_v12 = vsel %vm10443_vm15, %v1119_v46, 0  ;;  %v1062_v18 = vld [vmem:[#allocation2 + $0x358] sm:$0xff]  ;;  %v6166_v46 = vpack.c.bf16 %v1593_v49, %v1591_v51  ;;  %v1590_v22 = vld [vmem:[%s10446_s2 + $0x100] sm:$0xff] }
 0x1d1   :  { %5855 = vmatprep.subr.msk.bf16.mxu0 %vm10442_vm6, %v1120_v57  ;;  %v1592_v57 = vld [vmem:[%s10446_s2 + $0x110] sm:$0xff] }
 0x1d2   :  { %1215 = vmatpush1.bf16.msra.mxu0 %v1177_v12  ;;  %v1595_v12 = vld [vmem:[%s10446_s2 + $0x128] sm:$0xff] }
 0x1d3   :  { %v1066_v9 = vld [vmem:[#allocation2 + $0x378] sm:$0xf]  ;;  %6135 = vmatprep.subr.bf16.mxu0 %v6134_v48 }
 0x1d4   :  { %v1122_v29 = vpack.c.bf16 %v1066_v9, %v1062_v18  ;;  %v1065_v6 = vld [vmem:[#allocation2 + $0x370] sm:$0xf]  ;;  %v6168_v18 = vpack.c.bf16 %v1592_v57, %v1590_v22  ;;  %v1605_v48 = vld [vmem:[%s10446_s2 + $0x178] sm:$0xff] }
 0x1d5   :  { %v1121_v41 = vpack.c.bf16 %v1065_v6, %v929_v8  ;;  %1221 = vmatmul.mubr.bf16.vlgmr.msra.gmra.mrb[0].mxu0 %v6413_v44  ;;  %v1586_v8 = vld [vmem:[%s10446_s2 + $0xe0] sm:$0xff]  ;;  %v1599_v6 = vld [vmem:[%s10446_s2 + $0x148] sm:$0xff]  ;;  %v6178_v50 = vpack.c.bf16 %v1605_v48, %v1603_v19  ;;  %v1609_v48 = vld [vmem:[%s10446_s2 + $0x198] sm:$0xff] }
 0x1d6   :  { %5858 = vmatprep.subr.msk.bf16.mxu1 %vm10444_vm7, %v1122_v29  ;;  %5857 = vmatprep.mubr.msk.bf16.mxu0 %vm1169_vm4, %v6416_v11  ;;  %v6164_v33 = vpack.c.bf16 %v1588_v15, %v1586_v8  ;;  %v1596_v29 = vld [vmem:[%s10446_s2 + $0x130] sm:$0xff] }
 0x1d7   :  { %v1183_v7 = vsel %vm10445_vm3, %v1121_v41, 0  ;;  %6137 = vmatpush1.bf16.msra.mxu0 %v6136_v56  ;;  %v1601_v41 = vld [vmem:[%s10446_s2 + $0x158] sm:$0xff]  ;;  %v1604_v56 = vld [vmem:[%s10446_s2 + $0x170] sm:$0xff] }
 0x1d8   :  { %1268 = vmatpush1.bf16.msra.mxu1 %v1183_v7  ;;  %6139 = vmatprep.subr.bf16.mxu0 %v6138_v39  ;;  %v7796_v39 = vpop.permute.xlu1 %1133  ;;  %v6180_v47 = vpack.c.bf16 %v1604_v56, %v1602_v59 }
 0x1db   :  { %1274 = vmatmul.mubr.bf16.vlgmr.msra.gmra.mrb[0].mxu1 %v6413_v44  ;;  %6141 = vmatpush1.bf16.msra.mxu0 %v6140_v52  ;;  %v1597_v44 = vld [vmem:[%s10446_s2 + $0x138] sm:$0xff] }
 0x1dc   :  { %5860 = vmatprep.mubr.msk.bf16.mxu1 %vm1169_vm4, %v6416_v11  ;;  %6143 = vmatprep.subr.bf16.mxu0 %v6142_v53  ;;  %v6170_v9 = vpack.c.bf16 %v1597_v44, %v1595_v12  ;;  %v1594_v11 = vld [vmem:[%s10446_s2 + $0x120] sm:$0xff]  ;;  %v7801_v16 = vpop.permute.xlu0 %1138  ;;  %v7818_v23 = vpop.permute.xlu1 %1143 }
 0x1dd   :  { %1231 = vmatmul.mubr.bf16.gmra.mrb[4].mxu0 %v6418_v17  ;;  %v6172_v7 = vpack.c.bf16 %v1596_v29, %v1594_v11 }
 0x1df   :  { %6145 = vmatpush1.bf16.msra.mxu0 %v6144_v13 }
 0x1e0   :  { %6147 = vmatprep.subr.bf16.mxu0 %v6146_v63  ;;  %v7838_v49 = vpop.permute.xlu1 %1148 }
 0x1e3   :  { %1284 = vmatmul.mubr.bf16.gmra.mrb[4].mxu1 %v6418_v17  ;;  %6149 = vmatpush1.bf16.msra.mxu0 %v6148_v25  ;;  %v6174_v17 = vpack.c.bf16 %v1601_v41, %v1599_v6 }
 0x1e4   :  { %6151 = vmatprep.subr.bf16.mxu0 %v6150_v30 }
 0x1e7   :  { %6153 = vmatpush1.bf16.msra.mxu0 %v6152_v28 }
 0x1e8   :  { %6155 = vmatprep.subr.bf16.mxu0 %v6154_v1 }
 0x1eb   :  { %6157 = vmatpush1.bf16.msra.mxu0 %v6156_v60 }
 0x1ec   :  { %6159 = vmatprep.subr.bf16.mxu0 %v6158_v27 }
 0x1ef   :  { %6161 = vmatpush1.bf16.msra.mxu0 %v6160_v54 }
 0x1f0   :  { %6163 = vmatprep.subr.bf16.mxu0 %v6162_v32 }
 0x1f3   :  { %6165 = vmatpush1.bf16.msra.mxu0 %v6164_v33 }
 0x1f4   :  { %6167 = vmatprep.subr.bf16.mxu0 %v6166_v46 }
 0x1f7   :  { %6169 = vmatpush1.bf16.msra.mxu0 %v6168_v18 }
 0x1f8   :  { %6171 = vmatprep.subr.bf16.mxu0 %v6170_v9 }
 0x1fb   :  { %6173 = vmatpush1.bf16.msra.mxu0 %v6172_v7 }
 0x1fc   :  { %6175 = vmatprep.subr.bf16.mxu0 %v6174_v17 }
 0x1ff   :  { %6177 = vmatpush1.bf16.msra.mxu0 %v6176_v2  ;;  %v1606_v2 = vld [vmem:[%s10446_s2 + $0x180] sm:$0xff] }
 0x200   :  { %6179 = vmatprep.subr.bf16.mxu0 %v6178_v50  ;;  %v1608_v50 = vld [vmem:[%s10446_s2 + $0x190] sm:$0xff] }
 0x203   :  { %6181 = vmatpush1.bf16.msra.mxu0 %v6180_v47 }
 0x2a8   :  { %v1222_v37 = vpop.f32.mrb[0].mxu0 }
 0x2a9   :  { %v7799_v20 = vadd.f32 %v1222_v37, %v7796_v39  ;;  %v1224_v14 = vpop.f32.mrb[1].mxu0  ;;  %v1611_v37 = vld [vmem:[%s10446_s2 + $0x1a8] sm:$0xff] }
 0x2aa   :  { %v7804_v52 = vadd.f32 %v1224_v14, %v7796_v39  ;;  %v1226_v53 = vpop.f32.mrb[2].mxu0  ;;  %v1613_v14 = vld [vmem:[%s10446_s2 + $0x1b8] sm:$0xff] }
 0x2ab   :  { %v1310_v62 = vmin.f32 %v7799_v20, 0.0  ;;  %v1228_v45 = vpop.f32.mrb[3].mxu0  ;;  %v7821_v28 = vadd.f32 %v1226_v53, %v7801_v16  ;;  %vm1294_vm10 = vcmp.gt.f32.partialorder %v7799_v20, 0.0 }
 0x2ac   :  { %v1311_v21 = vmin.f32 %v7804_v52, 0.0  ;;  %v7809_v13 = vadd.f32 %v1228_v45, %v7801_v16  ;;  %vm1295_vm4 = vcmp.gt.f32.partialorder %v7804_v52, 0.0 }
 0x2ad   :  { %v1326_v3 = vmul.f32 1.442695, %v1310_v62  ;;  %v1314_v10 = vmin.f32 %v7821_v28, 0.0  ;;  %vm1298_vm14 = vcmp.gt.f32.partialorder %v7821_v28, 0.0 }
 0x2ae   :  { %v1275_v63 = vpop.f32.mrb[0].mxu1  ;;  %v1328_v4 = vmul.f32 1.442695, %v1311_v21  ;;  %v1315_v30 = vmin.f32 %v7809_v13, 0.0  ;;  %vm1299_vm9 = vcmp.gt.f32.partialorder %v7809_v13, 0.0 }
 0x2af   :  { %v7812_v24 = vadd.f32 %v1275_v63, %v7796_v39  ;;  %v1277_v31 = vpop.f32.mrb[1].mxu1  ;;  %v1334_v44 = vmul.f32 1.442695, %v1314_v10 }
 0x2b0   :  { %v1279_v25 = vpop.f32.mrb[2].mxu1  ;;  %6511 = vpow2.f32 %v1328_v4  ;;  %v1232_v58 = vpop.f32.mrb[4].mxu0  ;;  %v1336_v38 = vmul.f32 1.442695, %v1315_v30  ;;  %v7872_v56 = vadd.f32 %v1277_v31, %v7796_v39  ;;  %v6182_v4 = vpack.c.bf16 %v1609_v48, %v1607_v40 }
 0x2b1   :  { %v1312_v43 = vmin.f32 %v7812_v24, 0.0  ;;  %v7816_v26 = vpop.f32.mrb[3].mxu1  ;;  %v7824_v1 = vadd.f32 %v1279_v25, %v7801_v16  ;;  %v1234_v36 = vpop.f32.mrb[5].mxu0  ;;  %v7827_v42 = vadd.f32 %v1232_v58, %v7818_v23  ;;  %6513 = vpow2.f32 %v1326_v3 }
 0x2b2   :  { %v1236_v34 = vpop.f32.mrb[6].mxu0  ;;  %v7831_v27 = vadd.f32 %v1234_v36, %v7818_v23  ;;  %vm1296_vm5 = vcmp.gt.f32.partialorder %v7812_v24, 0.0  ;;  %v6184_v31 = vpack.c.bf16 %v1608_v50, %v1606_v2  ;;  %v6186_v30 = vpack.c.bf16 %v1613_v14, %v1611_v37  ;;  %6183 = vmatprep.subr.bf16.mxu0 %v6182_v4  ;;  %v1615_v36 = vld [vmem:[%s10446_s2 + $0x1c8] sm:$0xff] }
 0x2b3   :  { %v1330_v0 = vmul.f32 1.442695, %v1312_v43  ;;  %v1316_v60 = vmin.f32 %v7824_v1, 0.0  ;;  %v1238_v55 = vpop.f32.mrb[7].mxu0  ;;  %v1318_v61 = vmin.f32 %v7827_v42, 0.0  ;;  %v7853_v29 = vadd.f32 %v1236_v34, %v7838_v49  ;;  %v1610_v43 = vld [vmem:[%s10446_s2 + $0x1a0] sm:$0xff] }
 0x2b4   :  { %v1319_v15 = vmin.f32 %v7831_v27, 0.0  ;;  %v7844_v57 = vadd.f32 %v1238_v55, %v7838_v49  ;;  %v7908_v55 = vadd.f32 %v7816_v26, %v7801_v16  ;;  %6185 = vmatpush1.bf16.msra.mxu0 %v6184_v31  ;;  %vm1300_vm2 = vcmp.gt.f32.partialorder %v7824_v1, 0.0  ;;  %v1614_v16 = vld [vmem:[%s10446_s2 + $0x1c0] sm:$0xff]  ;;  %v1616_v26 = vld [vmem:[%s10446_s2 + $0x1d0] sm:$0xff] }
 0x2b5   :  { %6515 = vpow2.f32 %v1330_v0  ;;  %v1338_v54 = vmul.f32 1.442695, %v1316_v60  ;;  %v1342_v8 = vmul.f32 1.442695, %v1318_v61  ;;  %v1322_v53 = vmin.f32 %v7853_v29, 0.0  ;;  %v1617_v0 = vld [vmem:[%s10446_s2 + $0x1d8] sm:$0xff]  ;;  %6187 = vmatprep.subr.bf16.mxu0 %v6186_v30 }
 0x2b6   :  { %v1285_v32 = vpop.f32.mrb[4].mxu1  ;;  %v1344_v22 = vmul.f32 1.442695, %v1319_v15  ;;  %v1323_v6 = vmin.f32 %v7844_v57, 0.0  ;;  %v1313_v60 = vmin.f32 %v7872_v56, 0.0  ;;  %vm1302_vm11 = vcmp.gt.f32.partialorder %v7827_v42, 0.0 }
 0x2b7   :  { %v7836_v51 = vpop.f32.mrb[5].mxu1  ;;  %6517 = vpow2.f32 %v1338_v54  ;;  %v7841_v33 = vadd.f32 %v1285_v32, %v7818_v23  ;;  %v6190_v54 = vpack.c.bf16 %v1617_v0, %v1615_v36  ;;  %vm1303_vm6 = vcmp.gt.f32.partialorder %v7831_v27, 0.0 }
 0x2b8   :  { %v1289_v46 = vpop.f32.mrb[6].mxu1  ;;  %6519 = vpow2.f32 %v1336_v38  ;;  %v1352_v47 = vmul.f32 1.442695, %v1323_v6  ;;  %v1350_v38 = vmul.f32 1.442695, %v1322_v53  ;;  %v7943_v40 = vadd.f32 %v7836_v51, %v7818_v23  ;;  %v1623_v23 = vld [vmem:[%s10446_s2 + $0x208] sm:$0xff] }
 0x2b9   :  { %v7846_v12 = vpop.f32.mrb[7].mxu1  ;;  %6521 = vpow2.f32 %v1342_v8  ;;  %v1320_v9 = vmin.f32 %v7841_v33, 0.0  ;;  %v7850_v11 = vadd.f32 %v1289_v46, %v7838_v49  ;;  %v1619_v46 = vld [vmem:[%s10446_s2 + $0x1e8] sm:$0xff]  ;;  %vm1304_vm13 = vcmp.gt.f32.partialorder %v7841_v33, 0.0  ;;  %v1625_v51 = vld [vmem:[%s10446_s2 + $0x218] sm:$0xff] }
 0x2ba   :  { %v6512_v18 = vpop.eup %6511  ;;  %6523 = vpow2.f32 %v1344_v22  ;;  %v1621_v22 = vld [vmem:[%s10446_s2 + $0x1f8] sm:$0xff]  ;;  %vm1307_vm7 = vcmp.gt.f32.partialorder %v7844_v57, 0.0  ;;  %vm1306_vm3 = vcmp.gt.f32.partialorder %v7853_v29, 0.0 }
 0x2bb   :  { %v1346_v41 = vmul.f32 1.442695, %v1320_v9  ;;  %v6514_v7 = vpop.eup %6513  ;;  %v5862_v17 = vadd.f32 -1.0, %v6512_v18  ;;  %6525 = vpow2.f32 %v1334_v44  ;;  %v1324_v19 = vmin.f32 %v7850_v11, 0.0 }
 0x2bc   :  { %v5861_v45 = vadd.f32 -1.0, %v6514_v7  ;;  %v1332_v18 = vmul.f32 1.442695, %v1313_v60  ;;  %v1317_v9 = vmin.f32 %v7908_v55, 0.0  ;;  %v6192_v7 = vpack.c.bf16 %v1616_v26, %v1614_v16  ;;  %v1901_v16 = vld [vmem:[%s10448_s9] sm:$0xff]  ;;  %v1902_v26 = vld [vmem:[%s10448_s9 + $0x8] sm:$0xff] }
 0x2bd   :  { %6527 = vpow2.f32 %v1346_v41  ;;  %v1354_v62 = vmul.f32 1.442695, %v1324_v19  ;;  %v7882_v63 = vsel %vm1295_vm4, %v7804_v52, %v5862_v17  ;;  %v1612_v52 = vld [vmem:[%s10446_s2 + $0x1b0] sm:$0xff]  ;;  %vm1308_vm15 = vcmp.gt.f32.partialorder %v7850_v11, 0.0 }
 0x2be   :  { %v7897_v58 = vsel %vm1294_vm10, %v7799_v20, %v5861_v45  ;;  %v6188_v61 = vpack.c.bf16 %v1612_v52, %v1610_v43  ;;  %v1620_v19 = vld [vmem:[%s10446_s2 + $0x1f0] sm:$0xff]  ;;  %v6198_v45 = vpack.c.bf16 %v1625_v51, %v1623_v23  ;;  %vm1297_vm4 = vcmp.gt.f32.partialorder %v7872_v56, 0.0 }
 0x2bf   :  { %v6516_v35 = vpop.eup %6515  ;;  %6529 = vpow2.f32 %v1354_v62  ;;  %1406 = vrot.lane.b32.xlu1 %v7897_v58, %s10342_s29  ;;  %v1292_v62 = vadd.f32 %v7846_v12, %v7838_v49  ;;  %vm1305_vm10 = vcmp.gt.f32.partialorder %v7943_v40, 0.0 }
 0x2c0   :  { %v5863_v59 = vadd.f32 -1.0, %v6516_v35  ;;  %6531 = vpow2.f32 %v1352_v47  ;;  %6189 = vmatpush1.bf16.msra.mxu0 %v6188_v61  ;;  %v6194_v35 = vpack.c.bf16 %v1621_v22, %v1619_v46  ;;  %v1321_v47 = vmin.f32 %v7943_v40, 0.0  ;;  %v1903_v46 = vld [vmem:[%s10448_s9 + $0x10] sm:$0xff]  ;;  %v1904_v22 = vld [vmem:[%s10448_s9 + $0x18] sm:$0x1]  ;;  %s10475_s9 = smov 114  }
 0x2c1   :  { %v6518_v21 = vpop.eup %6517  ;;  %6533 = vpow2.f32 %v1350_v38  ;;  %6191 = vmatprep.subr.bf16.mxu0 %v6190_v54  ;;  %v1325_v49 = vmin.f32 %v1292_v62, 0.0  ;;  %v1870_v54 = vld [vmem:[%s10447_s10 + $0x8] sm:$0xff] }
 0x2c2   :  { %v7885_v39 = vsel %vm1296_vm5, %v7812_v24, %v5863_v59  ;;  %v6520_v3 = vpop.eup %6519  ;;  %v5867_v24 = vadd.f32 -1.0, %v6518_v21  ;;  %6535 = vpow2.f32 %v1332_v18  ;;  %vm1301_vm5 = vcmp.gt.f32.partialorder %v7908_v55, 0.0 }
 0x2c3   :  { %v6348_v25 = vpack.i.bf16 %v7885_v39, %v7882_v63  ;;  %v6522_v34 = vpop.eup %6521  ;;  %v5866_v20 = vadd.f32 -1.0, %v6520_v3  ;;  %1482 = vrot.lane.b32.xlu1 %v7897_v58, %s10340_s7  ;;  %v1356_v52 = vmul.f32 1.442695, %v1325_v49  ;;  %v1633_v49 = vld [vmem:[%s10446_s2 + $0x258] sm:$0xff] }
 0x2c4   :  { %v6524_v10 = vpop.eup %6523  ;;  %v7922_v8 = vsel %vm1300_vm2, %v7824_v1, %v5867_v24  ;;  %v5869_v15 = vadd.f32 -1.0, %v6522_v34  ;;  %6193 = vmatpush1.bf16.msra.mxu0 %v6192_v7  ;;  %vm1309_vm2 = vcmp.gt.f32.partialorder %v1292_v62, 0.0 }
 0x2c5   :  { %6349 = vrot.lane.b32.xlu0 %v6348_v25, %s10342_s29  ;;  %v6526_v32 = vpop.eup %6525  ;;  %v7936_v1 = vsel %vm1299_vm9, %v7809_v13, %v5866_v20  ;;  %v5870_v6 = vadd.f32 -1.0, %v6524_v10  ;;  %v1618_v13 = vld [vmem:[%s10446_s2 + $0x1e0] sm:$0xff]  ;;  %6195 = vmatprep.subr.bf16.mxu0 %v6194_v35  ;;  %vm10449_vm9 = vcmask 1039360  }
 0x2c6   :  { %v6358_v17 = vpack.i.bf16 %v7922_v8, %v7936_v1  ;;  %v5865_v48 = vadd.f32 -1.0, %v6526_v32  ;;  %v7954_v2 = vsel %vm1302_vm11, %v7827_v42, %v5869_v15  ;;  %v6196_v14 = vpack.c.bf16 %v1620_v19, %v1618_v13  ;;  %v1869_v10 = vld [vmem:[%s10447_s10] sm:$0xff]  ;;  %v1871_v32 = vld [vmem:[%s10447_s10 + $0x10] sm:$0xff]  ;;  %v1872_v15 = vld [vmem:[%s10447_s10 + $0x18] sm:$0x1]  ;;  %s10474_s10 = smov 116  }
 0x2c7   :  { %v6528_v44 = vpop.eup %6527  ;;  %v7971_v37 = vsel %vm1303_vm6, %v7831_v27, %v5870_v6  ;;  %vm10450_vm11 = vmmov %vm10449_vm9  ;;  %v1622_v13 = vld [vmem:[%s10446_s2 + $0x200] sm:$0xff]  ;;  %v1624_v19 = vld [vmem:[%s10446_s2 + $0x210] sm:$0xff] }
 0x2c8   :  { %v5871_v41 = vadd.f32 -1.0, %v6528_v44  ;;  %v7978_v21 = vsel %vm1298_vm14, %v7821_v28, %v5865_v48  ;;  %6197 = vmatpush1.bf16.msra.mxu0 %v6196_v14  ;;  %vm10453_vm6 = vmmov %vm10449_vm9 }
 0x2c9   :  { %6354 = vrot.lane.b32.xlu0 %v6348_v25, %s10340_s7  ;;  %v6530_v59 = vpop.eup %6529  ;;  %v6378_v27 = vpack.i.bf16 %v7971_v37, %v7978_v21  ;;  %v1348_v25 = vmul.f32 1.442695, %v1321_v47  ;;  %6199 = vmatprep.subr.bf16.mxu0 %v6198_v45 }
 0x2ca   :  { %v7957_v50 = vsel %vm1304_vm13, %v7841_v33, %v5871_v41  ;;  %v1340_v33 = vmul.f32 1.442695, %v1317_v9  ;;  %v6532_v53 = vpop.eup %6531  ;;  %v5875_v4 = vadd.f32 -1.0, %v6530_v59  ;;  %v1627_v59 = vld [vmem:[%s10446_s2 + $0x228] sm:$0xff]  ;;  %vm10451_vm13 = vcmask 1031168  }
 0x2cb   :  { %v6373_v42 = vpack.i.bf16 %v7954_v2, %v7957_v50  ;;  %v5874_v31 = vadd.f32 -1.0, %v6532_v53  ;;  %v6534_v3 = vpop.eup %6533  ;;  %vm10452_vm14 = vmmov %vm10451_vm13 }
 0x2cc   :  { %6537 = vpow2.f32 %v1340_v33  ;;  %v7986_v28 = vsel %vm1308_vm15, %v7850_v11, %v5875_v4  ;;  %v5873_v30 = vadd.f32 -1.0, %v6534_v3  ;;  %v6536_v24 = vpop.eup %6535  ;;  %vm10454_vm15 = vmmov %vm10451_vm13 }
 0x2cd   :  { %6359 = vrot.lane.b32.xlu0 %v6358_v17, %s10342_s29  ;;  %6374 = vrot.lane.b32.xlu1 %v6373_v42, %s10340_s7  ;;  %v7991_v12 = vsel %vm1307_vm7, %v7844_v57, %v5874_v31  ;;  %6539 = vpow2.f32 %v1348_v25  ;;  %v5864_v36 = vadd.f32 -1.0, %v6536_v24  ;;  %v1628_v31 = vld [vmem:[%s10446_s2 + $0x230] sm:$0xff]  ;;  %v1631_v25 = vld [vmem:[%s10446_s2 + $0x248] sm:$0xff]  ;;  %vm10455_vm7 = vmmov %vm10453_vm6 }
 0x2ce   :  { %v6388_v43 = vpack.i.bf16 %v7986_v28, %v7991_v12  ;;  %v7999_v11 = vsel %vm1306_vm3, %v7853_v29, %v5873_v30  ;;  %6541 = vpow2.f32 %v1356_v52  ;;  %v1630_v24 = vld [vmem:[%s10446_s2 + $0x240] sm:$0xff]  ;;  %vm10456_vm3 = vmmov %vm10453_vm6 }
 0x2cf   :  { %v8008_v0 = vsel %vm1297_vm4, %v7872_v56, %v5864_v36  ;;  %vm10457_vm4 = vmmov %vm10456_vm3 }
 0x2d1   :  { %6364 = vrot.lane.b32.xlu0 %v6358_v17, %s10340_s7  ;;  %6379 = vrot.lane.b32.xlu1 %v6378_v27, %s10342_s29 }
 0x2d5   :  { %6369 = vrot.lane.b32.xlu0 %v6373_v42, %s10342_s29  ;;  %6384 = vrot.lane.b32.xlu1 %v6378_v27, %s10340_s7  ;;  %v1629_v42 = vld [vmem:[%s10446_s2 + $0x238] sm:$0xff]  ;;  %v1626_v27 = vld [vmem:[%s10446_s2 + $0x220] sm:$0xff] }
 0x2d6   :  { %v6538_v57 = vpop.eup %6537  ;;  %v6202_v4 = vpack.c.bf16 %v1629_v42, %v1627_v59  ;;  %v6204_v52 = vpack.c.bf16 %v1628_v31, %v1626_v27  ;;  %v1639_v59 = vld [vmem:[%s10446_s2 + $0x288] sm:$0xff]  ;;  %v1641_v42 = vld [vmem:[%s10446_s2 + $0x298] sm:$0xff] }
 0x2d7   :  { %v5868_v34 = vadd.f32 -1.0, %v6538_v57  ;;  %v6540_v60 = vpop.eup %6539 }
 0x2d8   :  { %v5872_v38 = vadd.f32 -1.0, %v6540_v60  ;;  %v6542_v20 = vpop.eup %6541  ;;  %v1632_v60 = vld [vmem:[%s10446_s2 + $0x250] sm:$0xff] }
 0x2d9   :  { %6389 = vrot.lane.b32.xlu0 %v6388_v43, %s10342_s29  ;;  %1430 = vrot.lane.b32.xlu1 %v7999_v11, %s10342_s29  ;;  %v8016_v29 = vsel %vm1301_vm5, %v7908_v55, %v5868_v34  ;;  %v5876_v61 = vadd.f32 -1.0, %v6542_v20  ;;  %v6206_v34 = vpack.c.bf16 %v1633_v49, %v1631_v25  ;;  %v1637_v20 = vld [vmem:[%s10446_s2 + $0x278] sm:$0xff]  ;;  %vm10458_vm5 = vmmov %vm10451_vm13 }
 0x2da   :  { %v8024_v56 = vsel %vm1305_vm10, %v7943_v40, %v5872_v38  ;;  %v1635_v38 = vld [vmem:[%s10446_s2 + $0x268] sm:$0xff]  ;;  %vm10459_vm10 = vmmov %vm10458_vm5 }
 0x2db   :  { %v8030_v55 = vsel %vm1309_vm2, %v1292_v62, %v5876_v61  ;;  %v6200_v62 = vpack.c.bf16 %v1624_v19, %v1622_v13  ;;  %vm10460_vm2 = vmmov %vm10456_vm3 }
 0x2dd   :  { %6394 = vrot.lane.b32.xlu0 %v6388_v43, %s10340_s7  ;;  %1506 = vrot.lane.b32.xlu1 %v7999_v11, %s10340_s7 }
 0x2e1   :  { %1412 = vrot.lane.b32.xlu0 %v8008_v0, %s10342_s29  ;;  %1488 = vrot.lane.b32.xlu1 %v8008_v0, %s10340_s7 }
 0x2e5   :  { %1420 = vrot.lane.b32.xlu0 %v8016_v29, %s10342_s29  ;;  %1496 = vrot.lane.b32.xlu1 %v8016_v29, %s10340_s7 }
 0x2e9   :  { %1428 = vrot.lane.b32.xlu0 %v8024_v56, %s10342_s29  ;;  %1504 = vrot.lane.b32.xlu1 %v8024_v56, %s10340_s7 }
 0x2ed   :  { %1436 = vrot.lane.b32.xlu0 %v8030_v55, %s10342_s29  ;;  %1512 = vrot.lane.b32.xlu1 %v8030_v55, %s10340_s7  ;;  %s10473_s7 = smov 120  }
 0x2f1   :  { %1875 = vperm.xlu0 %6347, %v1869_v10   ;;  %1880 = vperm.xlu1 %6346, %v1870_v54  }
 0x2f5   :  { %1907 = vperm.xlu0 %6347, %v1901_v16   ;;  %1912 = vperm.xlu1 %6346, %v1902_v26  }
 0x2f9   :  { %1885 = vperm.xlu0 %6347, %v1871_v32   ;;  %1890 = vperm.xlu1 %6346, %v1872_v15   ;;  %v6208_v15 = vpack.c.bf16 %v1632_v60, %v1630_v24  ;;  %v1645_v60 = vld [vmem:[%s10446_s2 + $0x2b8] sm:$0xff] }
 0x2fd   :  { %1917 = vperm.xlu0 %6347, %v1903_v46   ;;  %1922 = vperm.xlu1 %6346, %v1904_v22   ;;  %v6210_v46 = vpack.c.bf16 %v1637_v20, %v1635_v38 }
 0x331   :  { %v1407_v44 = vpop.permute.xlu1 %1406 }
 0x335   :  { %v1483_v48 = vpop.permute.xlu1 %1482 }
 0x337   :  { %v8060_v18 = vpop.permute.xlu0 %6349 }
 0x338   :  { %v6352_v9 = vunpack.i.h.bf16 %v8060_v18  ;;  %v6351_v6 = vunpack.i.l.bf16 %v8060_v18 }
 0x33a   :  { %v1438_v41 = vsel %vm10449_vm9, %v1407_v44, %v6351_v6  ;;  %v1439_v7 = vsel %vm10450_vm11, %v6351_v6, %v6352_v9  ;;  %vm10461_vm9 = vmmov %vm10460_vm2 }
 0x33b   :  { %v8068_v17 = vpop.permute.xlu0 %6354  ;;  %v1466_v23 = vmax.f32 %v7897_v58, %v1438_v41  ;;  %v1467_v51 = vmax.f32 %v7882_v63, %v1439_v7  ;;  %v1636_v7 = vld [vmem:[%s10446_s2 + $0x270] sm:$0xff]  ;;  %vm10462_vm11 = vmmov %vm10458_vm5 }
 0x33c   :  { %v6357_v40 = vunpack.i.h.bf16 %v8068_v17  ;;  %v6356_v35 = vunpack.i.l.bf16 %v8068_v17 }
 0x33e   :  { %v1514_v33 = vsel %vm10451_vm13, %v1483_v48, %v6356_v35  ;;  %v1515_v14 = vsel %vm10452_vm14, %v6356_v35, %v6357_v40  ;;  %vm10463_vm13 = vmmov %vm10458_vm5 }
 0x33f   :  { %v1542_v53 = vmax.f32 %v1466_v23, %v1514_v33  ;;  %v8090_v47 = vpop.permute.xlu0 %6359  ;;  %v1543_v58 = vmax.f32 %v1467_v51, %v1515_v14  ;;  %v8100_v3 = vpop.permute.xlu1 %6374  ;;  %vm10464_vm14 = vmmov %vm10458_vm5 }
 0x340   :  { %v6362_v63 = vunpack.i.h.bf16 %v8090_v47  ;;  %v6361_v45 = vunpack.i.l.bf16 %v8090_v47  ;;  %v6376_v35 = vunpack.i.l.bf16 %v8100_v3  ;;  %v6377_v24 = vunpack.i.h.bf16 %v8100_v3 }
 0x341   :  { %1755 = vmatprep.mubr.f32.mxu0 %v1543_v58 }
 0x342   :  { %1756 = vmatmul.mubr.f32.vlgmr.msra.gmra.mrb[8].mxu0 %v1542_v53  ;;  %v1442_v30 = vsel %vm10453_vm6, %v6361_v45, %v6362_v63  ;;  %vm1678_vm6 = vcmask 785408  }
 0x343   :  { %6201 = vmatpush1.bf16.msra.mxu0 %v6200_v62  ;;  %v8111_v43 = vpop.permute.xlu0 %6364  ;;  %v6380_v61 = vpop.permute.xlu1 %6379  ;;  %v1471_v10 = vmax.f32 %v7936_v1, %v1442_v30  ;;  %v1634_v1 = vld [vmem:[%s10446_s2 + $0x260] sm:$0xff] }
 0x344   :  { %v6367_v57 = vunpack.i.h.bf16 %v8111_v43  ;;  %v6366_v36 = vunpack.i.l.bf16 %v8111_v43  ;;  %6203 = vmatprep.subr.bf16.mxu0 %v6202_v4  ;;  %v6381_v54 = vunpack.i.l.bf16 %v6380_v61  ;;  %v6382_v22 = vunpack.i.h.bf16 %v6380_v61 }
 0x345   :  { %v6212_v53 = vpack.c.bf16 %v1636_v7, %v1634_v1  ;;  %v1647_v7 = vld [vmem:[%s10446_s2 + $0x2c8] sm:$0xff] }
 0x346   :  { %v1518_v16 = vsel %vm10454_vm15, %v6366_v36, %v6367_v57  ;;  %v1441_v41 = vsel %vm10455_vm7, %v6381_v54, %v6361_v45  ;;  %vm10465_vm15 = vmmov %vm10460_vm2 }
 0x347   :  { %6205 = vmatpush1.bf16.msra.mxu0 %v6204_v52  ;;  %v8131_v26 = vpop.permute.xlu0 %6369  ;;  %v1547_v32 = vmax.f32 %v1471_v10, %v1518_v16  ;;  %v6385_v13 = vpop.permute.xlu1 %6384  ;;  %v1470_v14 = vmax.f32 %v7978_v21, %v1441_v41  ;;  %v6214_v21 = vpack.c.bf16 %v1641_v42, %v1639_v59  ;;  %v1640_v52 = vld [vmem:[%s10446_s2 + $0x290] sm:$0xff]  ;;  %vm10466_vm7 = vmmov %vm10460_vm2 }
 0x348   :  { %v6372_v44 = vunpack.i.h.bf16 %v8131_v26  ;;  %v6371_v6 = vunpack.i.l.bf16 %v8131_v26  ;;  %6207 = vmatprep.subr.bf16.mxu0 %v6206_v34  ;;  %v6387_v19 = vunpack.i.h.bf16 %v6385_v13  ;;  %v6386_v48 = vunpack.i.l.bf16 %v6385_v13  ;;  %v1644_v41 = vld [vmem:[%s10446_s2 + $0x2b0] sm:$0xff] }
 0x349   :  { %1761 = vmatprep.mubr.f32.mxu0 %v1547_v32 }
 0x34a   :  { %v1445_v23 = vsel %vm10456_vm3, %v6382_v22, %v6371_v6  ;;  %v1444_v51 = vsel %vm10457_vm4, %v6372_v44, %v6382_v22  ;;  %v1517_v4 = vsel %vm10458_vm5, %v6386_v48, %v6366_v36  ;;  %v1521_v27 = vsel %vm10459_vm10, %v6387_v19, %v6376_v35  ;;  %v1642_v44 = vld [vmem:[%s10446_s2 + $0x2a0] sm:$0xff]  ;;  %vm10467_vm3 = vmmov %vm10458_vm5 }
 0x34b   :  { %6209 = vmatpush1.bf16.msra.mxu0 %v6208_v15  ;;  %v8153_v33 = vpop.permute.xlu0 %6389  ;;  %v1475_v58 = vmax.f32 %v7971_v37, %v1445_v23  ;;  %v1431_v31 = vpop.permute.xlu1 %1430  ;;  %v1546_v25 = vmax.f32 %v1470_v14, %v1517_v4  ;;  %v1474_v30 = vmax.f32 %v7954_v2, %v1444_v51  ;;  %v1638_v37 = vld [vmem:[%s10446_s2 + $0x280] sm:$0xff]  ;;  %v1643_v2 = vld [vmem:[%s10446_s2 + $0x2a8] sm:$0xff]  ;;  %v1520_v10 = vsel %vm10462_vm11, %v6377_v24, %v6387_v19  ;;  %v1656_v24 = vld [vmem:[%s10446_s2 + $0x310] sm:$0xff] }
 0x34c   :  { %v6392_v62 = vunpack.i.h.bf16 %v8153_v33  ;;  %v6391_v45 = vunpack.i.l.bf16 %v8153_v33  ;;  %6211 = vmatprep.subr.bf16.mxu0 %v6210_v46  ;;  %v6216_v54 = vpack.c.bf16 %v1640_v52, %v1638_v37  ;;  %v6218_v22 = vpack.c.bf16 %v1645_v60, %v1643_v2  ;;  %v1646_v14 = vld [vmem:[%s10446_s2 + $0x2c0] sm:$0xff]  ;;  %vm10468_vm4 = vmmov %vm10460_vm2 }
 0x34d   :  { %v1551_v49 = vmax.f32 %v1475_v58, %v1521_v27  ;;  %1762 = vmatmul.mubr.f32.gmra.mrb[10].mxu0 %v1546_v25  ;;  %v1550_v15 = vmax.f32 %v1474_v30, %v1520_v10  ;;  %v6220_v51 = vpack.c.bf16 %v1644_v41, %v1642_v44  ;;  %v1652_v25 = vld [vmem:[%s10446_s2 + $0x2f0] sm:$0xff]  ;;  %v1657_v30 = vld [vmem:[%s10446_s2 + $0x318] sm:$0xff]  ;;  %v1654_v52 = vld [vmem:[%s10446_s2 + $0x300] sm:$0xff]  ;;  %vm1933_vm11 = vcmask 564224  }
 0x34e   :  { %v1447_v36 = vsel %vm10460_vm2, %v1431_v31, %v6391_v45  ;;  %v1448_v34 = vsel %vm10461_vm9, %v6391_v45, %v6392_v62  ;;  %v1653_v45 = vld [vmem:[%s10446_s2 + $0x2f8] sm:$0xff]  ;;  %v1650_v31 = vld [vmem:[%s10446_s2 + $0x2e0] sm:$0xff]  ;;  %v6232_v2 = vpack.c.bf16 %v1656_v24, %v1654_v52  ;;  %v1660_v10 = vld [vmem:[%s10446_s2 + $0x330] sm:$0xff] }
 0x34f   :  { %v8181_v38 = vpop.permute.xlu0 %6394  ;;  %6213 = vmatpush1.bf16.msra.mxu0 %v6212_v53  ;;  %1767 = vmatprep.mubr.f32.mxu0 %v1551_v49  ;;  %v1478_v16 = vmax.f32 %v7999_v11, %v1447_v36  ;;  %v1507_v32 = vpop.permute.xlu1 %1506  ;;  %v1479_v46 = vmax.f32 %v7991_v12, %v1448_v34  ;;  %v1649_v12 = vld [vmem:[%s10446_s2 + $0x2d8] sm:$0xff]  ;;  %v1648_v53 = vld [vmem:[%s10446_s2 + $0x2d0] sm:$0xff]  ;;  %v1655_v49 = vld [vmem:[%s10446_s2 + $0x308] sm:$0xff] }
 0x350   :  { %v6397_v20 = vunpack.i.h.bf16 %v8181_v38  ;;  %v6396_v61 = vunpack.i.l.bf16 %v8181_v38  ;;  %6215 = vmatprep.subr.bf16.mxu0 %v6214_v21  ;;  %v6222_v42 = vpack.c.bf16 %v1649_v12, %v1647_v7  ;;  %v6224_v4 = vpack.c.bf16 %v1648_v53, %v1646_v14  ;;  %v1659_v36 = vld [vmem:[%s10446_s2 + $0x328] sm:$0xff]  ;;  %v1661_v34 = vld [vmem:[%s10446_s2 + $0x338] sm:$0xff]  ;;  %v1666_v7 = vld [vmem:[%s10446_s2 + $0x360] sm:$0xff] }
 0x351   :  { %1768 = vmatmul.mubr.f32.gmra.mrb[12].mxu0 %v1550_v15  ;;  %v6228_v21 = vpack.c.bf16 %v1652_v25, %v1650_v31  ;;  %v6230_v37 = vpack.c.bf16 %v1657_v30, %v1655_v49  ;;  %v6234_v60 = vpack.c.bf16 %v1661_v34, %v1659_v36  ;;  %v1667_v44 = vld [vmem:[%s10446_s2 + $0x368] sm:$0xff]  ;;  %v1669_v41 = vld [vmem:[%s10446_s2 + $0x378] sm:$0xff]  ;;  %v1668_v12 = vld [vmem:[%s10446_s2 + $0x370] sm:$0xff] }
 0x352   :  { %v1523_v1 = vsel %vm10463_vm13, %v1507_v32, %v6396_v61  ;;  %v1524_v11 = vsel %vm10464_vm14, %v6396_v61, %v6397_v20  ;;  %v1658_v61 = vld [vmem:[%s10446_s2 + $0x320] sm:$0xff]  ;;  %v1672_v14 = vld [vmem:[%s10446_s2 + $0x390] sm:$0xff]  ;;  %v1675_v53 = vld [vmem:[%s10446_s2 + $0x3a8] sm:$0xff]  ;;  %vm10353_vm13 = vcmask 557056   ;;  %vm1994_vm14 = vcmask 1042432  }
 0x353   :  { %v1554_v13 = vmax.f32 %v1478_v16, %v1523_v1  ;;  %v8204_v19 = vpop.permute.xlu0 %1412  ;;  %v1555_v48 = vmax.f32 %v1479_v46, %v1524_v11  ;;  %6217 = vmatpush1.bf16.msra.mxu0 %v6216_v54  ;;  %v8208_v59 = vpop.permute.xlu1 %1488  ;;  %v1663_v54 = vld [vmem:[%s10446_s2 + $0x348] sm:$0xff]  ;;  %v1665_v16 = vld [vmem:[%s10446_s2 + $0x358] sm:$0xff]  ;;  %v6236_v32 = vpack.c.bf16 %v1660_v10, %v1658_v61  ;;  %v1662_v46 = vld [vmem:[%s10446_s2 + $0x340] sm:$0xff]  ;;  %v6242_v11 = vpack.c.bf16 %v1669_v41, %v1667_v44 }
 0x354   :  { %v1469_v23 = vmax.f32 %v8008_v0, %v8204_v19  ;;  %6219 = vmatprep.subr.bf16.mxu0 %v6218_v22  ;;  %v1651_v0 = vld [vmem:[%s10446_s2 + $0x2e8] sm:$0xff]  ;;  %v6238_v15 = vpack.c.bf16 %v1665_v16, %v1663_v54  ;;  %v1664_v22 = vld [vmem:[%s10446_s2 + $0x350] sm:$0xff]  ;;  %v1440_v25 = vsel %vm10465_vm15, %v6352_v9, %v8204_v19  ;;  %v1516_v18 = vsel %vm10467_vm3, %v6357_v40, %v8208_v59  ;;  %vm10469_vm5 = vmmov %vm10467_vm3 }
 0x355   :  { %1773 = vmatprep.mubr.f32.mxu0 %v1555_v48  ;;  %v6226_v27 = vpack.c.bf16 %v1653_v45, %v1651_v0  ;;  %v6240_v1 = vpack.c.bf16 %v1664_v22, %v1662_v46  ;;  %v1673_v48 = vld [vmem:[%s10446_s2 + $0x398] sm:$0xff]  ;;  %v1676_v31 = vld [vmem:[%s10446_s2 + $0x3b0] sm:$0xff]  ;;  %v1468_v30 = vmax.f32 %v7885_v39, %v1440_v25  ;;  %vm10470_vm10 = vmmov %vm10460_vm2  ;;  %vm10480_vm15 = vcmask 1041408  }
 0x356   :  { %v1545_v58 = vmax.f32 %v1469_v23, %v8208_v59  ;;  %1774 = vmatmul.mubr.f32.gmra.mrb[14].mxu0 %v1554_v13  ;;  %v1671_v13 = vld [vmem:[%s10446_s2 + $0x388] sm:$0xff]  ;;  %v6244_v23 = vpack.c.bf16 %v1668_v12, %v1666_v7  ;;  %vm10471_vm2 = vmmov %vm10467_vm3  ;;  %vm2096_vm3 = vcmask 1046528  }
 0x357   :  { %6221 = vmatpush1.bf16.msra.mxu0 %v6220_v51  ;;  %v6246_v51 = vpack.c.bf16 %v1673_v48, %v1671_v13  ;;  %v1421_v0 = vpop.permute.xlu0 %1420  ;;  %v1544_v9 = vmax.f32 %v1468_v30, %v1516_v18  ;;  %vm10472_vm9 = vmmov %vm10471_vm2 }
 0x358   :  { %5877 = vmatprep.mubr.msk.f32.mxu0 %vm1678_vm6, %v1545_v58  ;;  %6223 = vmatprep.subr.bf16.mxu0 %v6222_v42  ;;  %v1670_v42 = vld [vmem:[%s10446_s2 + $0x380] sm:$0xff]  ;;  %v1677_v58 = vld [vmem:[%s10446_s2 + $0x3b8] sm:$0xff]  ;;  %v1443_v52 = vsel %vm10466_vm7, %v6362_v63, %v1421_v0  ;;  %v1473_v24 = vmax.f32 %v8016_v29, %v1421_v0  ;;  %vm10481_vm7 = vcmask 1043456  }
 0x359   :  { %v6248_v45 = vpack.c.bf16 %v1672_v14, %v1670_v42  ;;  %v1472_v19 = vmax.f32 %v7922_v8, %v1443_v52 }
 0x35b   :  { %6225 = vmatpush1.bf16.msra.mxu0 %v6224_v4  ;;  %v6250_v4 = vpack.c.bf16 %v1677_v58, %v1675_v53 }
 0x35c   :  { %6227 = vmatprep.subr.bf16.mxu0 %v6226_v27  ;;  %v1674_v27 = vld [vmem:[%s10446_s2 + $0x3a0] sm:$0xff]  ;;  %s10350_s2 = smov 109  }
 0x35d   :  { %v6252_v49 = vpack.c.bf16 %v1676_v31, %v1674_v27 }
 0x35f   :  { %6229 = vmatpush1.bf16.msra.mxu0 %v6228_v21  ;;  %v1497_v21 = vpop.permute.xlu1 %1496 }
 0x360   :  { %6231 = vmatprep.subr.bf16.mxu0 %v6230_v37  ;;  %v1429_v37 = vpop.permute.xlu0 %1428  ;;  %v1549_v36 = vmax.f32 %v1473_v24, %v1497_v21  ;;  %v1519_v29 = vsel %vm10469_vm5, %v6367_v57, %v1497_v21  ;;  %vm10368_vm5 = vcmask 1040384  }
 0x361   :  { %v1446_v39 = vsel %vm10468_vm4, %v6371_v6, %v1429_v37  ;;  %v1477_v47 = vmax.f32 %v8024_v56, %v1429_v37  ;;  %v1548_v40 = vmax.f32 %v1472_v19, %v1519_v29  ;;  %vm10483_vm4 = vcmask 1045504  }
 0x362   :  { %v1476_v17 = vmax.f32 %v7957_v50, %v1446_v39 }
 0x363   :  { %6233 = vmatpush1.bf16.msra.mxu0 %v6232_v2  ;;  %v1505_v34 = vpop.permute.xlu1 %1504 }
 0x364   :  { %6235 = vmatprep.subr.bf16.mxu0 %v6234_v60  ;;  %v1437_v63 = vpop.permute.xlu0 %1436  ;;  %v1553_v8 = vmax.f32 %v1477_v47, %v1505_v34  ;;  %v1522_v56 = vsel %vm10471_vm2, %v6376_v35, %v1505_v34  ;;  %vm10496_vm2 = vmmov %vm10481_vm7 }
 0x365   :  { %v1449_v26 = vsel %vm10470_vm10, %v6392_v62, %v1437_v63  ;;  %v1481_v6 = vmax.f32 %v8030_v55, %v1437_v63  ;;  %v1552_v59 = vmax.f32 %v1476_v17, %v1522_v56  ;;  %vm10494_vm10 = vmmov %vm10480_vm15 }
 0x366   :  { %v1480_v43 = vmax.f32 %v7986_v28, %v1449_v26 }
 0x367   :  { %6237 = vmatpush1.bf16.msra.mxu0 %v6236_v32  ;;  %v1513_v57 = vpop.permute.xlu1 %1512 }
 0x368   :  { %6239 = vmatprep.subr.bf16.mxu0 %v6238_v15  ;;  %v1557_v50 = vmax.f32 %v1481_v6, %v1513_v57  ;;  %v1525_v33 = vsel %vm10472_vm9, %v6397_v20, %v1513_v57  ;;  %vm10497_vm9 = vmmov %vm10483_vm4 }
 0x369   :  { %v1556_v55 = vmax.f32 %v1480_v43, %v1525_v33 }
 0x36b   :  { %6241 = vmatpush1.bf16.msra.mxu0 %v6240_v1 }
 0x36c   :  { %6243 = vmatprep.subr.bf16.mxu0 %v6242_v11 }
 0x36f   :  { %6245 = vmatpush1.bf16.msra.mxu0 %v6244_v23 }
 0x370   :  { %6247 = vmatprep.subr.bf16.mxu0 %v6246_v51  ;;  %v1876_v62 = vpop.permute.xlu0 %1875  ;;  %v1881_v3 = vpop.permute.xlu1 %1880 }
 0x373   :  { %6249 = vmatpush1.bf16.msra.mxu0 %v6248_v45 }
 0x374   :  { %6251 = vmatprep.subr.bf16.mxu0 %v6250_v4  ;;  %v1908_v2 = vpop.permute.xlu0 %1907  ;;  %v1913_v10 = vpop.permute.xlu1 %1912 }
 0x377   :  { %6253 = vmatpush1.bf16.msra.mxu0 %v6252_v49 }
 0x378   :  { %v1886_v16 = vpop.permute.xlu0 %1885  ;;  %v1891_v22 = vpop.permute.xlu1 %1890 }
 0x37a   :  { %1845 = vmatmul.mubr.f32.vlgmr.msra.gmra.mrb[8].mxu0 %v1544_v9 }
 0x37b   :  { %5878 = vmatprep.mubr.msk.f32.mxu0 %vm1678_vm6, %v1549_v36 }
 0x37c   :  { %v1918_v11 = vpop.permute.xlu0 %1917  ;;  %v1923_v51 = vpop.permute.xlu1 %1922 }
 0x37e   :  { %1851 = vmatmul.mubr.f32.gmra.mrb[10].mxu0 %v1548_v40 }
 0x37f   :  { %5879 = vmatprep.mubr.msk.f32.mxu0 %vm1678_vm6, %v1553_v8 }
 0x382   :  { %1857 = vmatmul.mubr.f32.gmra.mrb[12].mxu0 %v1552_v59 }
 0x383   :  { %5880 = vmatprep.mubr.msk.f32.mxu0 %vm1678_vm6, %v1557_v50  ;;  %vm10357_vm6 = vcmask 1044480  }
 0x386   :  { %1863 = vmatmul.mubr.f32.gmra.mrb[14].mxu0 %v1556_v55 }
 0x44d   :  { %v1846_v35 = vpop.f32.mrb[8].mxu0 }
 0x44e   :  { %v1893_v60 = vmul.f32 %v1876_v62, %v1846_v35  ;;  %v1848_v61 = vpop.f32.mrb[9].mxu0 }
 0x44f   :  { %v1894_v54 = vmul.f32 %v1876_v62, %v1848_v61 }
 0x450   :  { %v8338_v28 = vadd.f32 %v1908_v2, %v1893_v60 }
 0x451   :  { %v1852_v32 = vpop.f32.mrb[10].mxu0  ;;  %v8346_v15 = vadd.f32 %v1908_v2, %v1894_v54 }
 0x452   :  { %v1895_v38 = vmul.f32 %v1881_v3, %v1852_v32  ;;  %2556 = vrot.lane.b32.xlu1 %v8338_v28, %s10350_s2  ;;  %2189 = vrot.lane.b32.xlu0 %v8338_v28, %s10344_s4  ;;  %v1854_v20 = vpop.f32.mrb[11].mxu0  ;;  %1934 = vst.msk [vmem:[#allocation3] sm:$0xff] %vm1933_vm11, %v8338_v28  ;;  %v8359_v12 = vrot.slane %v8338_v28, 7  ;;  %v8370_v53 = vrot.slane %v8338_v28, 5  ;;  %v8383_v27 = vrot.slane %v8338_v28, 6 }
 0x453   :  { %v1896_v58 = vmul.f32 %v1881_v3, %v1854_v20  ;;  %v8386_v31 = vrot.slane %v8338_v28, 3  ;;  %v8404_v52 = vrot.slane %v8338_v28, 1  ;;  %v8422_v39 = vrot.slane %v8346_v15, 6 }
 0x454   :  { %v8348_v46 = vadd.f32 %v1913_v10, %v1895_v38  ;;  %v2020_v55 = vrot.slane %v8338_v28, 4  ;;  %v2370_v62 = vrot.slane %v8346_v15, 4  ;;  %v2464_v61 = vrot.slane %v8346_v15, 2 }
 0x455   :  { %v1858_v44 = vpop.f32.mrb[12].mxu0  ;;  %v8388_v25 = vadd.f32 %v1913_v10, %v1896_v58  ;;  %v2071_v32 = vrot.slane %v8338_v28, 2 }
 0x456   :  { %v1897_v41 = vmul.f32 %v1886_v16, %v1858_v44  ;;  %2121 = vrot.lane.b32.xlu0 %v8338_v28, %s10473_s7  ;;  %2191 = vrot.lane.b32.xlu1 %v8346_v15, %s10344_s4  ;;  %v1860_v1 = vpop.f32.mrb[13].mxu0  ;;  %1935 = vst.msk [vmem:[#allocation3 + $0x10] sm:$0xff] %vm1933_vm11, %v8348_v46  ;;  %v1996_v0 = vrot.slane %v8348_v46, 5  ;;  %v2047_v30 = vrot.slane %v8348_v46, 3  ;;  %s10488_s4 = smov 122   ;;  %v1945_v38 = vrot.slane %v8348_v46, 7 }
 0x457   :  { %v1898_v42 = vmul.f32 %v1886_v16, %v1860_v1  ;;  %v2277_v9 = vrot.slane %v8388_v25, 6  ;;  %v2324_v19 = vrot.slane %v8388_v25, 5  ;;  %v2371_v47 = vrot.slane %v8388_v25, 4 }
 0x458   :  { %v8356_v7 = vadd.f32 %v1918_v11, %v1897_v41  ;;  %v2418_v40 = vrot.slane %v8388_v25, 3  ;;  %v2465_v6 = vrot.slane %v8388_v25, 2  ;;  %v2512_v56 = vrot.slane %v8388_v25, 1 }
 0x459   :  { %v1864_v13 = vpop.f32.mrb[14].mxu0  ;;  %v8380_v4 = vadd.f32 %v1918_v11, %v1898_v42  ;;  %v2229_v16 = vrot.slane %v8346_v15, 7  ;;  %v1946_v28 = vsel %vm10368_vm5, %v8359_v12, %v1945_v38  ;;  %v1970_v20 = vrot.slane %v8348_v46, 6 }
 0x45a   :  { %v1899_v48 = vmul.f32 %v1891_v22, %v1864_v13  ;;  %2558 = vrot.lane.b32.xlu0 %v8346_v15, %s10350_s2  ;;  %2236 = vrot.lane.b32.xlu1 %v8359_v12, %s10474_s10  ;;  %v1866_v23 = vpop.f32.mrb[15].mxu0  ;;  %1936 = vst.msk [vmem:[#allocation3 + $0x20] sm:$0xff] %vm1933_vm11, %v8356_v7  ;;  %v1998_v45 = vrot.slane %v8356_v7, 5  ;;  %v2049_v21 = vrot.slane %v8356_v7, 3  ;;  %v8538_v44 = vsel %vm1994_vm14, %v8370_v53, %v1996_v0 }
 0x45b   :  { %v1900_v37 = vmul.f32 %v1891_v22, %v1866_v23  ;;  %v2279_v18 = vrot.slane %v8380_v4, 6  ;;  %v2326_v36 = vrot.slane %v8380_v4, 5  ;;  %v2373_v29 = vrot.slane %v8380_v4, 4 }
 0x45c   :  { %v8367_v14 = vadd.f32 %v1923_v51, %v1899_v48  ;;  %v8395_v49 = vsel %vm1994_vm14, %v1996_v0, %v1998_v45  ;;  %v8411_v24 = vsel %vm10357_vm6, %v2047_v30, %v2049_v21  ;;  %v2420_v8 = vrot.slane %v8380_v4, 3 }
 0x45d   :  { %v8430_v34 = vsel %vm10480_vm15, %v2277_v9, %v2279_v18  ;;  %v8435_v63 = vsel %vm1994_vm14, %v2324_v19, %v2326_v36  ;;  %v8438_v17 = vadd.f32 %v1923_v51, %v1900_v37  ;;  %v2467_v26 = vrot.slane %v8380_v4, 2  ;;  %vm10499_vm15 = vmmov %vm10494_vm10 }
 0x45e   :  { %1951 = vrot.lane.b32.xlu0 %v8359_v12, %s10342_s29  ;;  %2330 = vrot.lane.b32.xlu1 %v8370_v53, %s10475_s9  ;;  %1938 = vst.msk [vmem:[#allocation3 + $0x30] sm:$0x1] %vm10353_vm13, %v8367_v14  ;;  %v8450_v43 = vsel %vm10481_vm7, %v2371_v47, %v2373_v29  ;;  %v2514_v57 = vrot.slane %v8380_v4, 1  ;;  %v8460_v59 = vsel %vm10357_vm6, %v2418_v40, %v2420_v8  ;;  %s10347_s29 = smov 108   ;;  %v8544_v41 = vrot.slane %v8346_v15, 5  ;;  %vm10500_vm7 = vmmov %vm10496_vm2 }
 0x45f   :  { %v8467_v50 = vsel %vm10483_vm4, %v2465_v6, %v2467_v26  ;;  %v2328_v3 = vrot.slane %v8438_v17, 5  ;;  %v2422_v2 = vrot.slane %v8438_v17, 3  ;;  %v2516_v10 = vrot.slane %v8438_v17, 1 }
 0x460   :  { %v8472_v33 = vsel %vm2096_vm3, %v2512_v56, %v2514_v57  ;;  %v8528_v22 = vsel %vm10494_vm10, %v8383_v27, %v1970_v20  ;;  %v2021_v1 = vrot.slane %v8348_v46, 4  ;;  %v2417_v11 = vrot.slane %v8346_v15, 3 }
 0x461   :  { %v8483_v35 = vsel %vm1994_vm14, %v2326_v36, %v2328_v3  ;;  %v8486_v60 = vsel %vm10357_vm6, %v2420_v8, %v2422_v2  ;;  %v8495_v54 = vsel %vm2096_vm3, %v2514_v57, %v2516_v10  ;;  %v2511_v13 = vrot.slane %v8346_v15, 1 }
 0x462   :  { %1976 = vrot.lane.b32.xlu0 %v8383_v27, %s10476_s11  ;;  %2424 = vrot.lane.b32.xlu1 %v8386_v31, %s10477_s3  ;;  %v2048_v48 = vsel %vm10357_vm6, %v8386_v31, %v2047_v30  ;;  %v2072_v23 = vrot.slane %v8348_v46, 2  ;;  %v2098_v42 = vrot.slane %v8348_v46, 1  ;;  %v2230_v0 = vrot.slane %v8388_v25, 7 }
 0x463   :  { %v8597_v30 = vsel %vm10499_vm15, %v8422_v39, %v2277_v9  ;;  %v8606_v37 = vsel %vm1994_vm14, %v8544_v41, %v2324_v19  ;;  %v2419_v9 = vsel %vm10357_vm6, %v2417_v11, %v2418_v40  ;;  %v2466_v19 = vsel %vm10483_vm4, %v2464_v61, %v2465_v6 }
 0x464   :  { %v2073_v51 = vsel %vm10497_vm9, %v2071_v32, %v2072_v23  ;;  %v2099_v58 = vsel %vm2096_vm3, %v8404_v52, %v2098_v42  ;;  %v2513_v8 = vsel %vm2096_vm3, %v2511_v13, %v2512_v56  ;;  %vm2219_vm10 = vcmask 80896  }
 0x465   :  { %vm10501_vm9 = vcmask 957440   ;;  %v1947_v57 = vrot.slane %v8356_v7, 7  ;;  %vm10354_vm15 = vcmask 891904   ;;  %v1972_v2 = vrot.slane %v8356_v7, 6 }
 0x466   :  { %2283 = vrot.lane.b32.xlu0 %v8383_v27, %s10478_s30  ;;  %2518 = vrot.lane.b32.xlu1 %v8404_v52, %s10479_s0  ;;  %vm10502_vm4 = vcmask 1041408   ;;  %vm10358_vm13 = vcmask 564227   ;;  %vm2407_vm6 = vcmask 80900  }
 0x467   :  { %v8649_v3 = vsel %vm10368_vm5, %v1945_v38, %v1947_v57 }
 0x46a   :  { %2002 = vrot.lane.b32.xlu0 %v8370_v53, %s10482_s5  ;;  %2285 = vrot.lane.b32.xlu1 %v8422_v39, %s10478_s30 }
 0x46e   :  { %2027 = vrot.lane.b32.xlu0 %v2020_v55, %s10484_s1  ;;  %2379 = vrot.lane.b32.xlu1 %v2370_v62, %s10485_s28 }
 0x472   :  { %2377 = vrot.lane.b32.xlu0 %v2020_v55, %s10485_s28  ;;  %2473 = vrot.lane.b32.xlu1 %v2464_v61, %s10486_s8 }
 0x476   :  { %2053 = vrot.lane.b32.xlu0 %v8386_v31, %s10487_s6  ;;  %2595 = vrot.lane.b32.xlu1 %v2229_v16, %s10347_s29  ;;  %s10491_s29 = smov 119   ;;  %v2231_v31 = vsel %vm10368_vm5, %v2229_v16, %v2230_v0 }
 0x47a   :  { %2078 = vrot.lane.b32.xlu0 %v2071_v32, %s10488_s4  ;;  %2123 = vrot.lane.b32.xlu1 %v8348_v46, %s10473_s7 }
 0x47e   :  { %2471 = vrot.lane.b32.xlu0 %v2071_v32, %s10486_s8  ;;  %2560 = vrot.lane.b32.xlu1 %v8348_v46, %s10350_s2  ;;  %s10493_s2 = smov 108  }
 0x482   :  { %2104 = vrot.lane.b32.xlu0 %v8404_v52, %s10489_s27  ;;  %2195 = vrot.lane.b32.xlu1 %v8388_v25, %s10490_s26  ;;  %v2372_v52 = vsel %vm10500_vm7, %v2370_v62, %v2371_v47  ;;  %vm1963_vm7 = vcmask 564225  }
 0x486   :  { %2137 = vrot.lane.b32.xlu0 %v8359_v12, %s10491_s29  ;;  %1953 = vrot.lane.b32.xlu1 %v1946_v28, %s10492_s25 }
 0x48a   :  { %2593 = vrot.lane.b32.xlu0 %v8359_v12, %s10493_s2  ;;  %2240 = vrot.lane.b32.xlu1 %v1946_v28, %s10474_s10  ;;  %v2022_v12 = vsel %vm10496_vm2, %v2020_v55, %v2021_v1  ;;  %vm10355_vm2 = vcmask 1048104  }
 0x48e   :  { %2153 = vrot.lane.b32.xlu0 %v8383_v27, %s10495_s24  ;;  %1978 = vrot.lane.b32.xlu1 %v8528_v22, %s10476_s11 }
 0x492   :  { %2238 = vrot.lane.b32.xlu0 %v2229_v16, %s10474_s10  ;;  %2004 = vrot.lane.b32.xlu1 %v8538_v44, %s10482_s5  ;;  %v8665_v16 = vsel %vm10502_vm4, %v1970_v20, %v1972_v2  ;;  %vm10503_vm4 = vcmask 1043456  }
 0x496   :  { %2332 = vrot.lane.b32.xlu0 %v8544_v41, %s10475_s9  ;;  %2334 = vrot.lane.b32.xlu1 %v8538_v44, %s10475_s9 }
 0x49a   :  { %2426 = vrot.lane.b32.xlu0 %v2417_v11, %s10477_s3  ;;  %2029 = vrot.lane.b32.xlu1 %v2022_v12, %s10484_s1 }
 0x49e   :  { %2520 = vrot.lane.b32.xlu0 %v2511_v13, %s10479_s0  ;;  %2055 = vrot.lane.b32.xlu1 %v2048_v48, %s10487_s6 }
 0x4a2   :  { %2193 = vrot.lane.b32.xlu0 %v8348_v46, %s10490_s26  ;;  %2428 = vrot.lane.b32.xlu1 %v2048_v48, %s10477_s3 }
 0x4a6   :  { %2562 = vrot.lane.b32.xlu0 %v8388_v25, %s10498_s23  ;;  %2080 = vrot.lane.b32.xlu1 %v2073_v51, %s10488_s4 }
 0x4aa   :  { %2287 = vrot.lane.b32.xlu0 %v8528_v22, %s10478_s30  ;;  %2106 = vrot.lane.b32.xlu1 %v2099_v58, %s10489_s27 }
 0x4ae   :  { %2381 = vrot.lane.b32.xlu0 %v2022_v12, %s10485_s28  ;;  %2522 = vrot.lane.b32.xlu1 %v2099_v58, %s10479_s0  ;;  %v2074_v58 = vrot.slane %v8356_v7, 2 }
 0x4b2   :  { %2475 = vrot.lane.b32.xlu0 %v2073_v51, %s10486_s8  ;;  %2139 = vrot.lane.b32.xlu1 %v1946_v28, %s10491_s29 }
 0x4b6   :  { %2597 = vrot.lane.b32.xlu0 %v1946_v28, %s10493_s2  ;;  %2197 = vrot.lane.b32.xlu1 %v8356_v7, %s10490_s26  ;;  %v2023_v28 = vrot.slane %v8356_v7, 4 }
 0x4b8   :  { %v2024_v12 = vsel %vm10503_vm4, %v2021_v1, %v2023_v28  ;;  %vm2039_vm4 = vcmask 564228  }
 0x4ba   :  { %2242 = vrot.lane.b32.xlu0 %v2231_v31, %s10474_s10  ;;  %2289 = vrot.lane.b32.xlu1 %v8597_v30, %s10478_s30 }
 0x4be   :  { %2336 = vrot.lane.b32.xlu0 %v8606_v37, %s10475_s9  ;;  %2383 = vrot.lane.b32.xlu1 %v2372_v52, %s10485_s28 }
 0x4c2   :  { %2430 = vrot.lane.b32.xlu0 %v2419_v9, %s10477_s3  ;;  %2477 = vrot.lane.b32.xlu1 %v2466_v19, %s10486_s8  ;;  %v2100_v9 = vrot.slane %v8356_v7, 1 }
 0x4c4   :  { %v2557_v36 = vpop.permute.xlu1 %2556  ;;  %v2190_v47 = vpop.permute.xlu0 %2189 }
 0x4c6   :  { %2524 = vrot.lane.b32.xlu0 %v2513_v8, %s10479_s0  ;;  %2564 = vrot.lane.b32.xlu1 %v8356_v7, %s10498_s23  ;;  %v2101_v8 = vsel %vm2096_vm3, %v2098_v42, %v2100_v9 }
 0x4c8   :  { %v2122_v15 = vpop.permute.xlu0 %2121  ;;  %v2192_v40 = vpop.permute.xlu1 %2191 }
 0x4c9   :  { %2133 = vst.msk [vmem:[#allocation3 + $0x190] sm:$0xff] %vm1933_vm11, %v2122_v15  ;;  %v2205_v6 = vsel %vm10501_vm9, %v2190_v47, %v2192_v40  ;;  %vm1988_vm9 = vcmask 564226  }
 0x4ca   :  { %2220 = vst.msk [vmem:[#allocation3 + $0x8] sm:$0xff] %vm2219_vm10, %v2192_v40  ;;  %2125 = vrot.lane.b32.xlu0 %v8356_v7, %s10473_s7  ;;  %2599 = vrot.lane.b32.xlu1 %v2231_v31, %s10493_s2 }
 0x4cb   :  { %2218 = vst.msk [vmem:[#allocation3] sm:$0xff] %vm10355_vm2, %v2205_v6 }
 0x4cc   :  { %v2559_v56 = vpop.permute.xlu0 %2558  ;;  %v8640_v55 = vpop.permute.xlu1 %2236 }
 0x4cd   :  { %v2573_v62 = vsel %vm10354_vm15, %v2557_v36, %v2559_v56  ;;  %2586 = vst.msk [vmem:[#allocation3 + $0x198] sm:$0xff] %vm2219_vm10, %v2559_v56  ;;  %vm2313_vm15 = vcmask 80898   ;;  %v2232_v56 = vrot.slane %v8380_v4, 7 }
 0x4ce   :  { %2585 = vst.msk [vmem:[#allocation3 + $0x190] sm:$0xff] %vm10355_vm2, %v2573_v62  ;;  %2244 = vrot.lane.b32.xlu1 %v8649_v3, %s10474_s10  ;;  %2199 = vrot.lane.b32.xlu0 %v8380_v4, %s10490_s26  ;;  %vm10359_vm2 = vcmask 1048106   ;;  %v1949_v62 = vrot.slane %v8367_v14, 7 }
 0x4d0   :  { %v1952_v61 = vpop.permute.xlu0 %1951  ;;  %v8657_v10 = vpop.permute.xlu1 %2330 }
 0x4d1   :  { %1964 = vst.msk [vmem:[#allocation3 + $0x30] sm:$0xfe] %vm1963_vm7, %v1952_v61 }
 0x4d2   :  { %2291 = vrot.lane.b32.xlu1 %v8665_v16, %s10478_s30  ;;  %2566 = vrot.lane.b32.xlu0 %v8380_v4, %s10498_s23 }
 0x4d4   :  { %v1977_v32 = vpop.permute.xlu0 %1976  ;;  %v8671_v38 = vpop.permute.xlu1 %2424 }
 0x4d5   :  { %1989 = vst.msk [vmem:[#allocation3 + $0x60] sm:$0xfc] %vm1988_vm9, %v1977_v32 }
 0x4d6   :  { %2338 = vrot.lane.b32.xlu1 %v8395_v49, %s10475_s9  ;;  %1955 = vrot.lane.b32.xlu0 %v8649_v3, %s10492_s25 }
 0x4d8   :  { %v2284_v20 = vpop.permute.xlu0 %2283  ;;  %v8679_v11 = vpop.permute.xlu1 %2518 }
 0x4da   :  { %2385 = vrot.lane.b32.xlu1 %v2024_v12, %s10485_s28  ;;  %1980 = vrot.lane.b32.xlu0 %v8665_v16, %s10476_s11 }
 0x4dc   :  { %v2003_v13 = vpop.permute.xlu0 %2002  ;;  %v2286_v48 = vpop.permute.xlu1 %2285 }
 0x4dd   :  { %2015 = vst.msk [vmem:[#allocation3 + $0x90] sm:$0xf8] %vm10358_vm13, %v2003_v13  ;;  %v2299_v51 = vsel %vm10504_vm8, %v2284_v20, %v2286_v48  ;;  %vm10505_vm8 = vcmask 1045504   ;;  %vm2501_vm13 = vcmask 80902   ;;  %v8741_v20 = vsel %vm10368_vm5, %v2230_v0, %v2232_v56 }
 0x4de   :  { %2314 = vst.msk [vmem:[#allocation3 + $0x68] sm:$0xfc] %vm2313_vm15, %v2286_v48  ;;  %2432 = vrot.lane.b32.xlu1 %v8411_v24, %s10477_s3  ;;  %2006 = vrot.lane.b32.xlu0 %v8395_v49, %s10482_s5  ;;  %v2075_v52 = vsel %vm10505_vm8, %v2072_v23, %v2074_v58  ;;  %vm2116_vm8 = vcmask 564231   ;;  %v1974_v13 = vrot.slane %v8367_v14, 6 }
 0x4df   :  { %2312 = vst.msk [vmem:[#allocation3 + $0x60] sm:$0xfc] %vm10359_vm2, %v2299_v51  ;;  %vm2405_vm2 = vcmask 1048108  }
 0x4e0   :  { %v2028_v1 = vpop.permute.xlu0 %2027  ;;  %v2380_v31 = vpop.permute.xlu1 %2379 }
 0x4e1   :  { %2040 = vst.msk [vmem:[#allocation3 + $0xc0] sm:$0xf0] %vm2039_vm4, %v2028_v1  ;;  %vm2266_vm4 = vcmask 80897   ;;  %v2705_v1 = vld [vmem:[#allocation3 + $0x8] sm:$0xff] }
 0x4e2   :  { %2408 = vst.msk [vmem:[#allocation3 + $0xc8] sm:$0xf0] %vm2407_vm6, %v2380_v31  ;;  %2479 = vrot.lane.b32.xlu1 %v2075_v52, %s10486_s8  ;;  %2031 = vrot.lane.b32.xlu0 %v2024_v12, %s10484_s1  ;;  %vm2065_vm6 = vcmask 564229   ;;  %v8746_v12 = vsel %vm10368_vm5, %v1947_v57, %v1949_v62 }
 0x4e4   :  { %v2378_v19 = vpop.permute.xlu0 %2377  ;;  %v2474_v36 = vpop.permute.xlu1 %2473 }
 0x4e5   :  { %v2393_v47 = vsel %vm101_vm1, %v2378_v19, %v2380_v31  ;;  %2502 = vst.msk [vmem:[#allocation3 + $0x128] sm:$0xc0] %vm2501_vm13, %v2474_v36  ;;  %vm2090_vm13 = vcmask 564230  }
 0x4e6   :  { %2406 = vst.msk [vmem:[#allocation3 + $0xc0] sm:$0xf0] %vm2405_vm2, %v2393_v47  ;;  %2526 = vrot.lane.b32.xlu1 %v2101_v8, %s10479_s0  ;;  %2057 = vrot.lane.b32.xlu0 %v8411_v24, %s10487_s6  ;;  %vm2499_vm2 = vcmask 1048110  }
 0x4e8   :  { %v2054_v23 = vpop.permute.xlu0 %2053  ;;  %v2596_v15 = vpop.permute.xlu1 %2595 }
 0x4e9   :  { %2066 = vst.msk [vmem:[#allocation3 + $0xf0] sm:$0xe0] %vm2065_vm6, %v2054_v23  ;;  %vm10506_vm6 = vcmask 1041408   ;;  %v2025_v23 = vrot.slane %v8367_v14, 4 }
 0x4ea   :  { %2623 = vst.msk [vmem:[#allocation3 + $0x1c8] sm:$0xfe] %vm2266_vm4, %v2596_v15  ;;  %2082 = vrot.lane.b32.xlu0 %v2075_v52, %s10488_s4  ;;  %2201 = vrot.lane.b32.xlu1 %v8367_v14, %s10490_s26  ;;  %v8758_v25 = vsel %vm10506_vm6, %v1972_v2, %v1974_v13  ;;  %vm2454_vm6 = vcmask 80901  }
 0x4ec   :  { %v2079_v46 = vpop.permute.xlu0 %2078  ;;  %v2124_v42 = vpop.permute.xlu1 %2123 }
 0x4ed   :  { %2091 = vst.msk [vmem:[#allocation3 + $0x120] sm:$0xc0] %vm2090_vm13, %v2079_v46  ;;  %vm2609_vm13 = vcmask 883712  }
 0x4ee   :  { %2134 = vst.msk [vmem:[#allocation3 + $0x1a0] sm:$0xff] %vm1933_vm11, %v2124_v42  ;;  %2108 = vrot.lane.b32.xlu0 %v2101_v8, %s10489_s27  ;;  %2127 = vrot.lane.b32.xlu1 %v8367_v14, %s10473_s7  ;;  %s10578_s7 = smov 106  }
 0x4f0   :  { %v2472_v24 = vpop.permute.xlu0 %2471  ;;  %v8723_v40 = vpop.permute.xlu1 %2560 }
 0x4f1   :  { %v2487_v6 = vsel %vm888_vm12, %v2472_v24, %v2474_v36  ;;  %v2000_v36 = vrot.slane %v8367_v14, 5 }
 0x4f2   :  { %2500 = vst.msk [vmem:[#allocation3 + $0x120] sm:$0xc0] %vm2499_vm2, %v2487_v6  ;;  %2141 = vrot.lane.b32.xlu0 %v8649_v3, %s10491_s29  ;;  %2570 = vrot.lane.b32.xlu1 %v8438_v17, %s10498_s23  ;;  %vm2264_vm2 = vcmask 1048105   ;;  %v2051_v6 = vrot.slane %v8367_v14, 3 }
 0x4f3   :  { %v8778_v8 = vsel %vm1994_vm14, %v1998_v45, %v2000_v36  ;;  %vm10508_vm14 = vcmask 1043456   ;;  %v2234_v36 = vrot.slane %v8438_v17, 7 }
 0x4f4   :  { %v2105_v61 = vpop.permute.xlu0 %2104  ;;  %v8732_v32 = vpop.permute.xlu1 %2195  ;;  %v2026_v45 = vsel %vm10508_vm14, %v2023_v28, %v2025_v23  ;;  %vm2548_vm14 = vcmask 80903  }
 0x4f5   :  { %2117 = vst.msk [vmem:[#allocation3 + $0x150] sm:$0x80] %vm2116_vm8, %v2105_v61  ;;  %vm10369_vm8 = vcmask 1048107   ;;  %v2076_v61 = vrot.slane %v8367_v14, 2  ;;  %v8857_v23 = vsel %vm10368_vm5, %v2232_v56, %v2234_v36 }
 0x4f6   :  { %2222 = vst.msk [vmem:[#allocation3 + $0x18] sm:$0xff] %vm2219_vm10, %v8732_v32  ;;  %2246 = vrot.lane.b32.xlu0 %v8741_v20, %s10474_s10  ;;  %1957 = vrot.lane.b32.xlu1 %v8746_v12, %s10492_s25 }
 0x4f8   :  { %v2138_v48 = vpop.permute.xlu0 %2137  ;;  %v1954_v51 = vpop.permute.xlu1 %1953 }
 0x4f9   :  { %2149 = vst.msk [vmem:[#allocation3 + $0x1c0] sm:$0xfe] %vm1963_vm7, %v2138_v48  ;;  %vm10507_vm7 = vcmask 949248  }
 0x4fa   :  { %1965 = vst.msk [vmem:[#allocation3 + $0x40] sm:$0xff] %vm1933_vm11, %v1954_v51  ;;  %2293 = vrot.lane.b32.xlu0 %v8430_v34, %s10478_s30  ;;  %1982 = vrot.lane.b32.xlu1 %v8758_v25, %s10476_s11 }
 0x4fc   :  { %v2594_v0 = vpop.permute.xlu0 %2593  ;;  %v8764_v57 = vpop.permute.xlu1 %2240 }
 0x4fd   :  { %v2707_v31 = vld [vmem:[#allocation3 + $0x18] sm:$0xff]  ;;  %v2610_v52 = vsel %vm2609_vm13, %v2594_v0, %v2596_v15 }
 0x4fe   :  { %v2781_v19 = vpack.c.bf16 %v2707_v31, %v2705_v1  ;;  %2622 = vst.msk [vmem:[#allocation3 + $0x1c0] sm:$0xfe] %vm2264_vm2, %v2610_v52  ;;  %2340 = vrot.lane.b32.xlu0 %v8435_v63, %s10475_s9  ;;  %2295 = vrot.lane.b32.xlu1 %v8758_v25, %s10478_s30 }
 0x500   :  { %2893 = vmatprep.subr.bf16.mxu1 %v2781_v19  ;;  %v2154_v2 = vpop.permute.xlu0 %2153  ;;  %v1979_v47 = vpop.permute.xlu1 %1978 }
 0x501   :  { %2165 = vst.msk [vmem:[#allocation3 + $0x1f0] sm:$0xfc] %vm1988_vm9, %v2154_v2  ;;  %vm10371_vm9 = vcmask 80899  }
 0x502   :  { %1990 = vst.msk [vmem:[#allocation3 + $0x70] sm:$0xff] %vm1933_vm11, %v1979_v47  ;;  %2387 = vrot.lane.b32.xlu0 %v8450_v43, %s10485_s28  ;;  %2008 = vrot.lane.b32.xlu1 %v8778_v8, %s10482_s5 }
 0x504   :  { %v2239_v15 = vpop.permute.xlu0 %2238  ;;  %v2005_v46 = vpop.permute.xlu1 %2004 }
 0x505   :  { %v2252_v42 = vsel %vm10507_vm7, %v8640_v55, %v2239_v15  ;;  %2267 = vst.msk [vmem:[#allocation3 + $0x38] sm:$0xfe] %vm2266_vm4, %v2239_v15  ;;  %vm10509_vm4 = vcmask 932864   ;;  %vm10510_vm7 = vcmask 1044480   ;;  %v2281_v15 = vrot.slane %v8438_v17, 6 }
 0x506   :  { %2016 = vst.msk [vmem:[#allocation3 + $0xa0] sm:$0xff] %vm1933_vm11, %v2005_v46  ;;  %2434 = vrot.lane.b32.xlu0 %v8460_v59, %s10477_s3  ;;  %2033 = vrot.lane.b32.xlu1 %v2026_v45, %s10484_s1 }
 0x507   :  { %2265 = vst.msk [vmem:[#allocation3 + $0x30] sm:$0xfe] %vm2264_vm2, %v2252_v42  ;;  %vm2452_vm2 = vcmask 1048109  }
 0x508   :  { %v2333_v43 = vpop.permute.xlu0 %2332  ;;  %v8796_v24 = vpop.permute.xlu1 %2334 }
 0x509   :  { %v2346_v55 = vsel %vm10509_vm4, %v8657_v10, %v2333_v43  ;;  %2361 = vst.msk [vmem:[#allocation3 + $0x98] sm:$0xf8] %vm10371_vm9, %v2333_v43  ;;  %v2052_v10 = vsel %vm10510_vm7, %v2049_v21, %v2051_v6  ;;  %vm2546_vm4 = vcmask 1048111   ;;  %vm10512_vm7 = vcmask 1045504  }
 0x50a   :  { %2359 = vst.msk [vmem:[#allocation3 + $0x90] sm:$0xf8] %vm10369_vm8, %v2346_v55  ;;  %2481 = vrot.lane.b32.xlu0 %v8467_v50, %s10486_s8  ;;  %2389 = vrot.lane.b32.xlu1 %v2026_v45, %s10485_s28  ;;  %v2077_v21 = vsel %vm10512_vm7, %v2074_v58, %v2076_v61  ;;  %vm10518_vm7 = vcmask 949248   ;;  %vm10370_vm8 = vcmask 560128   ;;  %vm2225_vm9 = vcmask 1040936  }
 0x50c   :  { %v2427_v59 = vpop.permute.xlu0 %2426  ;;  %v2030_v28 = vpop.permute.xlu1 %2029 }
 0x50d   :  { %v2440_v62 = vsel %vm854_vm0, %v8671_v38, %v2427_v59  ;;  %2455 = vst.msk [vmem:[#allocation3 + $0xf8] sm:$0xe0] %vm2454_vm6, %v2427_v59  ;;  %vm10511_vm6 = vcmask 900096   ;;  %v2375_v59 = vrot.slane %v8438_v17, 4 }
 0x50e   :  { %2041 = vst.msk [vmem:[#allocation3 + $0xd0] sm:$0xff] %vm1933_vm11, %v2030_v28  ;;  %2528 = vrot.lane.b32.xlu0 %v8472_v33, %s10479_s0  ;;  %2059 = vrot.lane.b32.xlu1 %v2052_v10, %s10487_s6 }
 0x50f   :  { %2453 = vst.msk [vmem:[#allocation3 + $0xf0] sm:$0xe0] %vm2452_vm2, %v2440_v62  ;;  %vm10513_vm2 = vcmask 957440  }
 0x510   :  { %v2521_v50 = vpop.permute.xlu0 %2520  ;;  %v2056_v13 = vpop.permute.xlu1 %2055 }
 0x511   :  { %v2534_v38 = vsel %vm10511_vm6, %v8679_v11, %v2521_v50  ;;  %2549 = vst.msk [vmem:[#allocation3 + $0x158] sm:$0x80] %vm2548_vm14, %v2521_v50  ;;  %v2102_v11 = vrot.slane %v8367_v14, 1  ;;  %vm10514_vm14 = vcmask 1048104  }
 0x512   :  { %2067 = vst.msk [vmem:[#allocation3 + $0x100] sm:$0xff] %vm1933_vm11, %v2056_v13  ;;  %2568 = vrot.lane.b32.xlu0 %v8367_v14, %s10498_s23  ;;  %2084 = vrot.lane.b32.xlu1 %v2077_v21, %s10488_s4  ;;  %vm10516_vm6 = vmmov %vm10514_vm14 }
 0x513   :  { %2547 = vst.msk [vmem:[#allocation3 + $0x150] sm:$0x80] %vm2546_vm4, %v2534_v38  ;;  %vm10515_vm4 = vcmask 891904   ;;  %v2103_v14 = vsel %vm2096_vm3, %v2100_v9, %v2102_v11  ;;  %vm10517_vm3 = vcmask 1041408   ;;  %v2469_v38 = vrot.slane %v8438_v17, 2 }
 0x514   :  { %v2194_v33 = vpop.permute.xlu0 %2193  ;;  %v8825_v48 = vpop.permute.xlu1 %2428  ;;  %v8867_v45 = vsel %vm10517_vm3, %v2279_v18, %v2281_v15 }
 0x515   :  { %v2206_v51 = vsel %vm10513_vm2, %v2194_v33, %v8732_v32  ;;  %vm10519_vm2 = vcmask 941056  }
 0x516   :  { %2221 = vst.msk [vmem:[#allocation3 + $0x10] sm:$0xff] %vm10514_vm14, %v2206_v51  ;;  %2483 = vrot.lane.b32.xlu1 %v2077_v21, %s10486_s8  ;;  %2203 = vrot.lane.b32.xlu0 %v8438_v17, %s10490_s26  ;;  %vm10520_vm14 = vmmov %vm10516_vm6 }
 0x518   :  { %v2563_v58 = vpop.permute.xlu0 %2562  ;;  %v2081_v0 = vpop.permute.xlu1 %2080 }
 0x519   :  { %v2574_v1 = vsel %vm10515_vm4, %v8723_v40, %v2563_v58  ;;  %2588 = vst.msk [vmem:[#allocation3 + $0x1a8] sm:$0xff] %vm2219_vm10, %v2563_v58  ;;  %v2704_v40 = vld [vmem:[#allocation3] sm:$0xff]  ;;  %vm10521_vm4 = vmmov %vm10516_vm6 }
 0x51a   :  { %2092 = vst.msk [vmem:[#allocation3 + $0x130] sm:$0xff] %vm1933_vm11, %v2081_v0  ;;  %2110 = vrot.lane.b32.xlu1 %v2103_v14, %s10489_s27  ;;  %2248 = vrot.lane.b32.xlu0 %v8746_v12, %s10474_s10  ;;  %vm10523_vm3 = vmmov %vm10521_vm4 }
 0x51b   :  { %2587 = vst.msk [vmem:[#allocation3 + $0x1a0] sm:$0xff] %vm10516_vm6, %v2574_v1  ;;  %vm10522_vm6 = vcmask 932864  }
 0x51c   :  { %v2288_v32 = vpop.permute.xlu0 %2287  ;;  %v2107_v31 = vpop.permute.xlu1 %2106 }
 0x51d   :  { %2118 = vst.msk [vmem:[#allocation3 + $0x160] sm:$0xff] %vm1933_vm11, %v2107_v31  ;;  %v2706_v52 = vld [vmem:[#allocation3 + $0x10] sm:$0xff] }
 0x51e   :  { %2530 = vrot.lane.b32.xlu1 %v2103_v14, %s10479_s0  ;;  %2342 = vrot.lane.b32.xlu0 %v8778_v8, %s10475_s9  ;;  %v2780_v7 = vpack.c.bf16 %v2706_v52, %v2704_v40 }
 0x520   :  { %v2382_v9 = vpop.permute.xlu0 %2381  ;;  %2894 = vmatpush1.bf16.msra.mxu1 %v2780_v7  ;;  %v2523_v19 = vpop.permute.xlu1 %2522 }
 0x522   :  { %2143 = vrot.lane.b32.xlu1 %v8746_v12, %s10491_s29  ;;  %2436 = vrot.lane.b32.xlu0 %v2052_v10, %s10477_s3 }
 0x524   :  { %v2476_v2 = vpop.permute.xlu0 %2475  ;;  %v2140_v47 = vpop.permute.xlu1 %2139 }
 0x525   :  { %2150 = vst.msk [vmem:[#allocation3 + $0x1d0] sm:$0xff] %vm1933_vm11, %v2140_v47 }
 0x526   :  { %2603 = vrot.lane.b32.xlu0 %v8741_v20, %s10493_s2  ;;  %2250 = vrot.lane.b32.xlu1 %v8857_v23, %s10474_s10 }
 0x528   :  { %v2598_v46 = vpop.permute.xlu0 %2597  ;;  %v2198_v42 = vpop.permute.xlu1 %2197 }
 0x52a   :  { %2297 = vrot.lane.b32.xlu0 %v8867_v45, %s10478_s30  ;;  %2601 = vrot.lane.b32.xlu1 %v8649_v3, %s10493_s2 }
 0x52c   :  { %v2243_v56 = vpop.permute.xlu0 %2242  ;;  %v2290_v43 = vpop.permute.xlu1 %2289 }
 0x52d   :  { %v2253_v20 = vsel %vm10518_vm7, %v8764_v57, %v2243_v56  ;;  %2269 = vst.msk [vmem:[#allocation3 + $0x48] sm:$0xff] %vm2219_vm10, %v2243_v56  ;;  %v2300_v55 = vsel %vm10519_vm2, %v2288_v32, %v2290_v43  ;;  %2316 = vst.msk [vmem:[#allocation3 + $0x78] sm:$0xff] %vm2219_vm10, %v2290_v43  ;;  %vm10525_vm2 = vcmask 1043456  }
 0x52e   :  { %2268 = vst.msk [vmem:[#allocation3 + $0x40] sm:$0xff] %vm10520_vm14, %v2253_v20  ;;  %2632 = vrot.lane.b32.xlu0 %v8422_v39, %s10361_s22  ;;  %2605 = vrot.lane.b32.xlu1 %v8746_v12, %s10493_s2  ;;  %vm10524_vm7 = vmmov %vm10523_vm3  ;;  %v2376_v62 = vsel %vm10525_vm2, %v2373_v29, %v2375_v59  ;;  %vm10530_vm2 = vcmask 957440  }
 0x52f   :  { %2315 = vst.msk [vmem:[#allocation3 + $0x70] sm:$0xff] %vm10521_vm4, %v2300_v55  ;;  %vm10526_vm14 = vmmov %vm10523_vm3 }
 0x530   :  { %v2337_v18 = vpop.permute.xlu0 %2336  ;;  %v2384_v3 = vpop.permute.xlu1 %2383  ;;  %vm10527_vm4 = vmmov %vm10523_vm3 }
 0x531   :  { %v2347_v57 = vsel %vm10522_vm6, %v8796_v24, %v2337_v18  ;;  %2363 = vst.msk [vmem:[#allocation3 + $0xa8] sm:$0xff] %vm2219_vm10, %v2337_v18  ;;  %v2394_v6 = vsel %vm101_vm1, %v2382_v9, %v2384_v3  ;;  %2410 = vst.msk [vmem:[#allocation3 + $0xd8] sm:$0xff] %vm2219_vm10, %v2384_v3  ;;  %vm10528_vm6 = vcmask 900096  }
 0x532   :  { %2362 = vst.msk [vmem:[#allocation3 + $0xa0] sm:$0xff] %vm10523_vm3, %v2347_v57  ;;  %2157 = vrot.lane.b32.xlu0 %v8665_v16, %s10495_s24  ;;  %2344 = vrot.lane.b32.xlu1 %v8483_v35, %s10475_s9 }
 0x533   :  { %2409 = vst.msk [vmem:[#allocation3 + $0xd0] sm:$0xff] %vm10524_vm7, %v2394_v6  ;;  %vm10529_vm7 = vmmov %vm10523_vm3 }
 0x534   :  { %v2431_v39 = vpop.permute.xlu0 %2430  ;;  %v2478_v12 = vpop.permute.xlu1 %2477 }
 0x535   :  { %v2441_v24 = vsel %vm854_vm0, %v8825_v48, %v2431_v39  ;;  %2457 = vst.msk [vmem:[#allocation3 + $0x108] sm:$0xff] %vm2219_vm10, %v2431_v39  ;;  %v2488_v28 = vsel %vm888_vm12, %v2476_v2, %v2478_v12  ;;  %2504 = vst.msk [vmem:[#allocation3 + $0x138] sm:$0xff] %vm2219_vm10, %v2478_v12 }
 0x536   :  { %2456 = vst.msk [vmem:[#allocation3 + $0x100] sm:$0xff] %vm10526_vm14, %v2441_v24  ;;  %2391 = vrot.lane.b32.xlu0 %v2376_v62, %s10485_s28  ;;  %2630 = vrot.lane.b32.xlu1 %v8383_v27, %s10361_s22  ;;  %vm10531_vm14 = vcmask 1045504  }
 0x537   :  { %2503 = vst.msk [vmem:[#allocation3 + $0x130] sm:$0xff] %vm10527_vm4, %v2488_v28  ;;  %v2470_v48 = vsel %vm10531_vm14, %v2467_v26, %v2469_v38  ;;  %vm10532_vm4 = vmmov %vm10523_vm3  ;;  %vm1967_vm14 = vcmask 558080  }
 0x538   :  { %v2525_v10 = vpop.permute.xlu0 %2524  ;;  %v2565_v61 = vpop.permute.xlu1 %2564 }
 0x539   :  { %v2535_v50 = vsel %vm10528_vm6, %v2523_v19, %v2525_v10  ;;  %2551 = vst.msk [vmem:[#allocation3 + $0x168] sm:$0xff] %vm2219_vm10, %v2525_v10  ;;  %vm10533_vm6 = vcmask 891904  }
 0x53a   :  { %2550 = vst.msk [vmem:[#allocation3 + $0x160] sm:$0xff] %vm10523_vm3, %v2535_v50  ;;  %2636 = vrot.lane.b32.xlu0 %v8597_v30, %s10361_s22  ;;  %2155 = vrot.lane.b32.xlu1 %v8528_v22, %s10495_s24 }
 0x53c   :  { %v2126_v29 = vpop.permute.xlu0 %2125  ;;  %v2600_v13 = vpop.permute.xlu1 %2599 }
 0x53d   :  { %2135 = vst.msk [vmem:[#allocation3 + $0x1b0] sm:$0xff] %vm1933_vm11, %v2126_v29  ;;  %v2611_v27 = vsel %vm2609_vm13, %v2598_v46, %v2600_v13 }
 0x53e   :  { %2625 = vst.msk [vmem:[#allocation3 + $0x1d8] sm:$0xff] %vm2219_vm10, %v2600_v13  ;;  %2640 = vrot.lane.b32.xlu0 %v8430_v34, %s10361_s22  ;;  %2438 = vrot.lane.b32.xlu1 %v8486_v60, %s10477_s3 }
 0x53f   :  { %2624 = vst.msk [vmem:[#allocation3 + $0x1d0] sm:$0xff] %vm10529_vm7, %v2611_v27  ;;  %vm10535_vm7 = vcmask 557056  }
 0x540   :  { %v8925_v30 = vpop.permute.xlu1 %2244  ;;  %v2200_v21 = vpop.permute.xlu0 %2199 }
 0x541   :  { %v2207_v33 = vsel %vm10530_vm2, %v2198_v42, %v2200_v21  ;;  %2224 = vst.msk [vmem:[#allocation3 + $0x28] sm:$0xff] %vm2219_vm10, %v2200_v21  ;;  %vm2227_vm2 = vcmask 73728  }
 0x542   :  { %2223 = vst.msk [vmem:[#allocation3 + $0x20] sm:$0xff] %vm10532_vm4, %v2207_v33  ;;  %2485 = vrot.lane.b32.xlu0 %v2470_v48, %s10486_s8  ;;  %2634 = vrot.lane.b32.xlu1 %v8528_v22, %s10361_s22  ;;  %vm10538_vm4 = vcmask 949248   ;;  %v2713_v48 = vld [vmem:[#allocation3 + $0x48] sm:$0xff] }
 0x544   :  { %v8936_v34 = vpop.permute.xlu1 %2291  ;;  %v2567_v17 = vpop.permute.xlu0 %2566 }
 0x545   :  { %v2575_v60 = vsel %vm10533_vm6, %v2565_v61, %v2567_v17  ;;  %2590 = vst.msk [vmem:[#allocation3 + $0x1b8] sm:$0xff] %vm2219_vm10, %v2567_v17  ;;  %vm10539_vm6 = vmmov %vm10523_vm3 }
 0x546   :  { %2589 = vst.msk [vmem:[#allocation3 + $0x1b0] sm:$0xff] %vm10523_vm3, %v2575_v60  ;;  %2169 = vrot.lane.b32.xlu0 %v8370_v53, %s10490_s26  ;;  %2638 = vrot.lane.b32.xlu1 %v8665_v16, %s10361_s22  ;;  %vm10372_vm3 = vcmask 559104  }
 0x548   :  { %v8945_v4 = vpop.permute.xlu1 %2338  ;;  %v1956_v26 = vpop.permute.xlu0 %1955  ;;  %v2709_v29 = vld [vmem:[#allocation3 + $0x28] sm:$0xff] }
 0x549   :  { %1966 = vst.msk [vmem:[#allocation3 + $0x50] sm:$0xff] %vm1933_vm11, %v1956_v26  ;;  %v2712_v26 = vld [vmem:[#allocation3 + $0x40] sm:$0xff] }
 0x54a   :  { %2532 = vrot.lane.b32.xlu0 %v8495_v54, %s10479_s0  ;;  %2159 = vrot.lane.b32.xlu1 %v8758_v25, %s10495_s24 }
 0x54c   :  { %v8952_v22 = vpop.permute.xlu1 %2385  ;;  %v1981_v51 = vpop.permute.xlu0 %1980 }
 0x54d   :  { %1991 = vst.msk [vmem:[#allocation3 + $0x80] sm:$0xff] %vm1933_vm11, %v1981_v51 }
 0x54e   :  { %2642 = vrot.lane.b32.xlu0 %v8758_v25, %s10361_s22  ;;  %2171 = vrot.lane.b32.xlu1 %v8538_v44, %s10490_s26  ;;  %v6421_v25 = vld [vmem:[%s10534_s19 + $0x4] ss:$12 sps:$4 sm:$0xff]   ;;  %s10590_s22 = sld [smem:[#allocation34_spill]] }
 0x54f   :  { %2925 = vmatprep.mubr.bf16.mxu1 %v6421_v25 }
 0x550   :  { %v8959_v16 = vpop.permute.xlu1 %2432  ;;  %v2007_v11 = vpop.permute.xlu0 %2006 }
 0x551   :  { %2017 = vst.msk [vmem:[#allocation3 + $0xb0] sm:$0xff] %vm1933_vm11, %v2007_v11 }
 0x552   :  { %2667 = vrot.lane.b32.xlu0 %v8370_v53, %s10373_s21  ;;  %2669 = vrot.lane.b32.xlu1 %v8544_v41, %s10373_s21 }
 0x554   :  { %v8966_v54 = vpop.permute.xlu1 %2479  ;;  %v2032_v58 = vpop.permute.xlu0 %2031 }
 0x555   :  { %2042 = vst.msk [vmem:[#allocation3 + $0xe0] sm:$0xff] %vm1933_vm11, %v2032_v58 }
 0x556   :  { %2607 = vrot.lane.b32.xlu0 %v8857_v23, %s10493_s2  ;;  %2673 = vrot.lane.b32.xlu1 %v8606_v37, %s10373_s21 }
 0x558   :  { %v8976_v0 = vpop.permute.xlu1 %2526  ;;  %v2058_v53 = vpop.permute.xlu0 %2057 }
 0x559   :  { %2068 = vst.msk [vmem:[#allocation3 + $0x110] sm:$0xff] %vm1933_vm11, %v2058_v53 }
 0x55a   :  { %2671 = vrot.lane.b32.xlu0 %v8538_v44, %s10373_s21  ;;  %2175 = vrot.lane.b32.xlu1 %v8778_v8, %s10490_s26 }
 0x55c   :  { %v2083_v41 = vpop.permute.xlu0 %2082  ;;  %v8983_v1 = vpop.permute.xlu1 %2201 }
 0x55d   :  { %2093 = vst.msk [vmem:[#allocation3 + $0x140] sm:$0xff] %vm1933_vm11, %v2083_v41 }
 0x55e   :  { %2173 = vrot.lane.b32.xlu0 %v8395_v49, %s10490_s26  ;;  %2677 = vrot.lane.b32.xlu1 %v8435_v63, %s10373_s21  ;;  %v2827_v63 = vld [vmem:[%s10537_s17 + $0x8] sm:$0xff] }
 0x560   :  { %v2109_v37 = vpop.permute.xlu0 %2108  ;;  %v2128_v14 = vpop.permute.xlu1 %2127 }
 0x561   :  { %2119 = vst.msk [vmem:[#allocation3 + $0x170] sm:$0xff] %vm1933_vm11, %v2109_v37  ;;  %v2719_v37 = vld [vmem:[#allocation3 + $0x78] sm:$0xff] }
 0x562   :  { %2136 = vst.msk [vmem:[#allocation3 + $0x1c0] sm:$0x1] %vm10535_vm7, %v2128_v14  ;;  %2675 = vrot.lane.b32.xlu0 %v8395_v49, %s10373_s21  ;;  %2644 = vrot.lane.b32.xlu1 %v8867_v45, %s10536_s20  ;;  %v2826_v49 = vld [vmem:[%s10537_s17] sm:$0xff]  ;;  %vm10540_vm7 = vcmask 941056  }
 0x564   :  { %v2142_v44 = vpop.permute.xlu0 %2141  ;;  %v8996_v32 = vpop.permute.xlu1 %2570 }
 0x565   :  { %2151 = vst.msk [vmem:[#allocation3 + $0x1e0] sm:$0xff] %vm1933_vm11, %v2142_v44 }
 0x566   :  { %2592 = vst.msk [vmem:[#allocation3 + $0x1c8] sm:$0x1] %vm2227_vm2, %v8996_v32  ;;  %2679 = vrot.lane.b32.xlu0 %v8778_v8, %s10373_s21  ;;  %2681 = vrot.lane.b32.xlu1 %v8483_v35, %s10373_s21  ;;  %v2828_v35 = vld [vmem:[%s10537_s17 + $0x10] sm:$0xff]  ;;  %v2829_v8 = vld [vmem:[%s10537_s17 + $0x18] sm:$0x3f]  ;;  %s6727_s17 = smov 64  }
 0x567   :  { %s10595_s21 = sld [smem:[#allocation37_spill]] }
 0x568   :  { %v2247_v31 = vpop.permute.xlu0 %2246  ;;  %v1958_v40 = vpop.permute.xlu1 %1957 }
 0x569   :  { %v2254_v52 = vsel %vm10538_vm4, %v8925_v30, %v2247_v31  ;;  %2271 = vst.msk [vmem:[#allocation3 + $0x58] sm:$0xff] %vm2219_vm10, %v2247_v31  ;;  %vm10541_vm4 = vmmov %vm10539_vm6  ;;  %v2708_v30 = vld [vmem:[#allocation3 + $0x20] sm:$0xff] }
 0x56a   :  { %1968 = vst.msk [vmem:[#allocation3 + $0x60] sm:$0x3] %vm1967_vm14, %v1958_v40  ;;  %2832 = vperm.xlu0 %6347, %v2826_v49   ;;  %2837 = vperm.xlu1 %6346, %v2827_v63   ;;  %vm10543_vm5 = vmmov %vm10541_vm4 }
 0x56b   :  { %2270 = vst.msk [vmem:[#allocation3 + $0x50] sm:$0xff] %vm10539_vm6, %v2254_v52  ;;  %vm10542_vm6 = vcmask 932864  }
 0x56c   :  { %v2294_v7 = vpop.permute.xlu0 %2293  ;;  %v1983_v9 = vpop.permute.xlu1 %1982 }
 0x56d   :  { %v2301_v19 = vsel %vm10540_vm7, %v8936_v34, %v2294_v7  ;;  %2318 = vst.msk [vmem:[#allocation3 + $0x88] sm:$0xff] %vm2219_vm10, %v2294_v7  ;;  %vm10544_vm7 = vmmov %vm10541_vm4 }
 0x56e   :  { %1993 = vst.msk [vmem:[#allocation3 + $0x90] sm:$0x7] %vm10372_vm3, %v1983_v9  ;;  %2842 = vperm.xlu0 %6347, %v2828_v35   ;;  %2847 = vperm.xlu1 %6346, %v2829_v8   ;;  %vm10548_vm3 = vcmask 891904  }
 0x56f   :  { %2317 = vst.msk [vmem:[#allocation3 + $0x80] sm:$0xff] %vm10541_vm4, %v2301_v19  ;;  %vm2043_vm4 = vcmask 561152  }
 0x570   :  { %v2341_v36 = vpop.permute.xlu0 %2340  ;;  %v9027_v2 = vpop.permute.xlu1 %2295  ;;  %v2715_v27 = vld [vmem:[#allocation3 + $0x58] sm:$0xff] }
 0x571   :  { %v2348_v47 = vsel %vm10542_vm6, %v8945_v4, %v2341_v36  ;;  %2365 = vst.msk [vmem:[#allocation3 + $0xb8] sm:$0xff] %vm2219_vm10, %v2341_v36  ;;  %vm10545_vm6 = vmmov %vm10543_vm5  ;;  %v2785_v34 = vpack.c.bf16 %v2715_v27, %v2713_v48 }
 0x572   :  { %2364 = vst.msk [vmem:[#allocation3 + $0xb0] sm:$0xff] %vm10543_vm5, %v2348_v47  ;;  %v2714_v17 = vld [vmem:[#allocation3 + $0x50] sm:$0xff] }
 0x574   :  { %v2388_v23 = vpop.permute.xlu0 %2387  ;;  %v2009_v15 = vpop.permute.xlu1 %2008  ;;  %v2721_v40 = vld [vmem:[#allocation3 + $0x88] sm:$0xff] }
 0x575   :  { %v2395_v46 = vsel %vm101_vm1, %v8952_v22, %v2388_v23  ;;  %2412 = vst.msk [vmem:[#allocation3 + $0xe8] sm:$0xff] %vm2219_vm10, %v2388_v23  ;;  %v2784_v22 = vpack.c.bf16 %v2714_v17, %v2712_v26  ;;  %v2736_v26 = vld [vmem:[#allocation3 + $0x100] sm:$0xff] }
 0x576   :  { %2019 = vst.msk [vmem:[#allocation3 + $0xc0] sm:$0xf] %vm10370_vm8, %v2009_v15  ;;  %vm10546_vm8 = vcmask 900096   ;;  %v2720_v9 = vld [vmem:[#allocation3 + $0x80] sm:$0xff] }
 0x577   :  { %2411 = vst.msk [vmem:[#allocation3 + $0xe0] sm:$0xff] %vm10544_vm7, %v2395_v46  ;;  %vm2069_vm7 = vcmask 562176  }
 0x578   :  { %v2435_v42 = vpop.permute.xlu0 %2434  ;;  %v2034_v45 = vpop.permute.xlu1 %2033  ;;  %v2727_v35 = vld [vmem:[#allocation3 + $0xb8] sm:$0xff] }
 0x579   :  { %v2442_v56 = vsel %vm854_vm0, %v8959_v16, %v2435_v42  ;;  %2459 = vst.msk [vmem:[#allocation3 + $0x118] sm:$0xff] %vm2219_vm10, %v2435_v42  ;;  %v2726_v23 = vld [vmem:[#allocation3 + $0xb0] sm:$0xff] }
 0x57a   :  { %2044 = vst.msk [vmem:[#allocation3 + $0xf0] sm:$0x1f] %vm2043_vm4, %v2034_v45  ;;  %vm10547_vm4 = vmmov %vm10543_vm5 }
 0x57b   :  { %2458 = vst.msk [vmem:[#allocation3 + $0x110] sm:$0xff] %vm10543_vm5, %v2442_v56  ;;  %vm2094_vm5 = vcmask 563200   ;;  %v2724_v56 = vld [vmem:[#allocation3 + $0xa0] sm:$0xff] }
 0x57c   :  { %v2482_v43 = vpop.permute.xlu0 %2481  ;;  %v9042_v20 = vpop.permute.xlu1 %2389 }
 0x57d   :  { %v2489_v55 = vsel %vm888_vm12, %v8966_v54, %v2482_v43  ;;  %2506 = vst.msk [vmem:[#allocation3 + $0x148] sm:$0xff] %vm2219_vm10, %v2482_v43  ;;  %v2790_v43 = vpack.c.bf16 %v2726_v23, %v2724_v56 }
 0x57e   :  { %2505 = vst.msk [vmem:[#allocation3 + $0x140] sm:$0xff] %vm10545_vm6, %v2489_v55  ;;  %vm10549_vm6 = vcmask 957440   ;;  %v2732_v27 = vld [vmem:[#allocation3 + $0xe0] sm:$0xff] }
 0x580   :  { %v2529_v18 = vpop.permute.xlu0 %2528  ;;  %v2060_v3 = vpop.permute.xlu1 %2059 }
 0x581   :  { %v2536_v57 = vsel %vm10546_vm8, %v8976_v0, %v2529_v18  ;;  %2553 = vst.msk [vmem:[#allocation3 + $0x178] sm:$0xff] %vm2219_vm10, %v2529_v18  ;;  %vm2272_vm8 = vcmask 1041960  }
 0x582   :  { %2070 = vst.msk [vmem:[#allocation3 + $0x120] sm:$0x3f] %vm2069_vm7, %v2060_v3  ;;  %vm2319_vm7 = vcmask 1042984   ;;  %v2738_v48 = vld [vmem:[#allocation3 + $0x110] sm:$0xff] }
 0x583   :  { %2552 = vst.msk [vmem:[#allocation3 + $0x170] sm:$0xff] %vm10547_vm4, %v2536_v57  ;;  %v2731_v57 = vld [vmem:[#allocation3 + $0xd8] sm:$0xff] }
 0x584   :  { %v2569_v6 = vpop.permute.xlu0 %2568  ;;  %v2085_v59 = vpop.permute.xlu1 %2084 }
 0x585   :  { %v2576_v39 = vsel %vm10548_vm3, %v2569_v6, %v8996_v32  ;;  %2095 = vst.msk [vmem:[#allocation3 + $0x150] sm:$0x7f] %vm2094_vm5, %v2085_v59  ;;  %vm2321_vm3 = vcmask 75776   ;;  %v2718_v32 = vld [vmem:[#allocation3 + $0x70] sm:$0xff]  ;;  %vm2368_vm5 = vcmask 76800  }
 0x586   :  { %2591 = vst.msk [vmem:[#allocation3 + $0x1c0] sm:$0x1] %vm2225_vm9, %v2576_v39  ;;  %v2730_v59 = vld [vmem:[#allocation3 + $0xd0] sm:$0xff] }
 0x588   :  { %v9054_v12 = vpop.permute.xlu1 %2483  ;;  %v2204_v24 = vpop.permute.xlu0 %2203 }
 0x589   :  { %v2208_v28 = vsel %vm10549_vm6, %v8983_v1, %v2204_v24  ;;  %2228 = vst.msk [vmem:[#allocation3 + $0x38] sm:$0x1] %vm2227_vm2, %v2204_v24  ;;  %vm10550_vm2 = vcmask 949248   ;;  %vm2366_vm6 = vcmask 1044008  }
 0x58a   :  { %2226 = vst.msk [vmem:[#allocation3 + $0x30] sm:$0x1] %vm2225_vm9, %v2208_v28  ;;  %vm2274_vm9 = vcmask 74752  }
 0x58c   :  { %v2111_v62 = vpop.permute.xlu1 %2110  ;;  %v2249_v10 = vpop.permute.xlu0 %2248 }
 0x58d   :  { %2120 = vst.msk [vmem:[#allocation3 + $0x180] sm:$0xff] %vm1933_vm11, %v2111_v62  ;;  %v2733_v62 = vld [vmem:[#allocation3 + $0xe8] sm:$0xff] }
 0x590   :  { %v9060_v61 = vpop.permute.xlu1 %2530  ;;  %v2343_v50 = vpop.permute.xlu0 %2342  ;;  %v2711_v13 = vld [vmem:[#allocation3 + $0x38] sm:$0xff] }
 0x591   :  { %v2783_v38 = vpack.c.bf16 %v2711_v13, %v2709_v29  ;;  %v2710_v21 = vld [vmem:[#allocation3 + $0x30] sm:$0xff] }
 0x592   :  { %v2782_v33 = vpack.c.bf16 %v2710_v21, %v2708_v30  ;;  %v2737_v21 = vld [vmem:[#allocation3 + $0x108] sm:$0xff] }
 0x593   :  { %2895 = vmatprep.subr.bf16.mxu1 %v2783_v38 }
 0x594   :  { %v2144_v60 = vpop.permute.xlu1 %2143  ;;  %2896 = vmatpush1.bf16.msra.mxu1 %v2782_v33  ;;  %v9062_v4 = vpop.permute.xlu0 %2436 }
 0x595   :  { %2152 = vst.msk [vmem:[#allocation3 + $0x1f0] sm:$0x3] %vm1967_vm14, %v2144_v60  ;;  %2897 = vmatprep.subr.bf16.mxu1 %v2785_v34  ;;  %vm10551_vm14 = vcmask 941056  }
 0x598   :  { %2898 = vmatpush1.bf16.msra.mxu1 %v2784_v22  ;;  %v2604_v51 = vpop.permute.xlu0 %2603  ;;  %v2251_v16 = vpop.permute.xlu1 %2250  ;;  %v2796_v22 = vpack.c.bf16 %v2738_v48, %v2736_v26 }
 0x599   :  { %2627 = vst.msk [vmem:[#allocation3 + $0x1e8] sm:$0xff] %vm2219_vm10, %v2604_v51  ;;  %v2255_v11 = vsel %vm10550_vm2, %v2249_v10, %v2251_v16  ;;  %vm10552_vm2 = vcmask 932864  }
 0x59a   :  { %2275 = vst.msk [vmem:[#allocation3 + $0x68] sm:$0x3] %vm2274_vm9, %v2251_v16 }
 0x59b   :  { %2273 = vst.msk [vmem:[#allocation3 + $0x60] sm:$0x3] %vm2272_vm8, %v2255_v11 }
 0x59c   :  { %v2298_v54 = vpop.permute.xlu0 %2297  ;;  %v2602_v58 = vpop.permute.xlu1 %2601 }
 0x59d   :  { %v2302_v25 = vsel %vm10551_vm14, %v9027_v2, %v2298_v54  ;;  %2322 = vst.msk [vmem:[#allocation3 + $0x98] sm:$0x7] %vm2321_vm3, %v2298_v54  ;;  %v2612_v0 = vsel %vm2609_vm13, %v2602_v58, %v2604_v51  ;;  %vm2646_vm14 = vcmask 875520   ;;  %v2725_v2 = vld [vmem:[#allocation3 + $0xa8] sm:$0xff]  ;;  %v2743_v54 = vld [vmem:[#allocation3 + $0x138] sm:$0xff] }
 0x59e   :  { %2320 = vst.msk [vmem:[#allocation3 + $0x90] sm:$0x7] %vm2319_vm7, %v2302_v25  ;;  %v2791_v47 = vpack.c.bf16 %v2727_v35, %v2725_v2  ;;  %v2749_v35 = vld [vmem:[#allocation3 + $0x168] sm:$0xff] }
 0x59f   :  { %2626 = vst.msk [vmem:[#allocation3 + $0x1e0] sm:$0xff] %vm10547_vm4, %v2612_v0  ;;  %vm2413_vm4 = vcmask 1045032   ;;  %v2742_v0 = vld [vmem:[#allocation3 + $0x130] sm:$0xff] }
 0x5a0   :  { %v2633_v53 = vpop.permute.xlu0 %2632  ;;  %v9075_v41 = vpop.permute.xlu1 %2605 }
 0x5a1   :  { %v2717_v1 = vld [vmem:[#allocation3 + $0x68] sm:$0xff]  ;;  %2660 = vst.msk [vmem:[#allocation3 + $0x1f8] sm:$0xfc] %vm2313_vm15, %v2633_v53  ;;  %vm2415_vm15 = vcmask 77824  }
 0x5a2   :  { %v2787_v14 = vpack.c.bf16 %v2719_v37, %v2717_v1  ;;  %v2716_v44 = vld [vmem:[#allocation3 + $0x60] sm:$0xff] }
 0x5a3   :  { %v2786_v49 = vpack.c.bf16 %v2718_v32, %v2716_v44  ;;  %v2751_v32 = vld [vmem:[#allocation3 + $0x178] sm:$0xff] }
 0x5a4   :  { %2899 = vmatprep.subr.bf16.mxu1 %v2787_v14  ;;  %v2158_v63 = vpop.permute.xlu0 %2157  ;;  %v2345_v31 = vpop.permute.xlu1 %2344  ;;  %v2723_v52 = vld [vmem:[#allocation3 + $0x98] sm:$0xff]  ;;  %v2745_v14 = vld [vmem:[#allocation3 + $0x148] sm:$0xff] }
 0x5a5   :  { %2900 = vmatpush1.bf16.msra.mxu1 %v2786_v49  ;;  %2167 = vst.msk [vmem:[#allocation3 + $0x210] sm:$0xff] %vm1933_vm11, %v2158_v63  ;;  %v2349_v8 = vsel %vm10552_vm2, %v2343_v50, %v2345_v31  ;;  %v2789_v7 = vpack.c.bf16 %v2723_v52, %v2721_v40  ;;  %v2722_v19 = vld [vmem:[#allocation3 + $0x90] sm:$0xff]  ;;  %vm10553_vm2 = vcmask 1048106   ;;  %v2739_v50 = vld [vmem:[#allocation3 + $0x118] sm:$0xff] }
 0x5a6   :  { %2369 = vst.msk [vmem:[#allocation3 + $0xc8] sm:$0xf] %vm2368_vm5, %v2345_v31  ;;  %v2788_v36 = vpack.c.bf16 %v2722_v19, %v2720_v9  ;;  %v2797_v33 = vpack.c.bf16 %v2739_v50, %v2737_v21  ;;  %v2744_v31 = vld [vmem:[#allocation3 + $0x140] sm:$0xff] }
 0x5a7   :  { %2367 = vst.msk [vmem:[#allocation3 + $0xc0] sm:$0xf] %vm2366_vm6, %v2349_v8  ;;  %2901 = vmatprep.subr.bf16.mxu1 %v2789_v7  ;;  %v2803_v8 = vpack.c.bf16 %v2751_v32, %v2749_v35  ;;  %v2750_v7 = vld [vmem:[#allocation3 + $0x170] sm:$0xff]  ;;  %v2760_v50 = vld [vmem:[#allocation3 + $0x1c0] sm:$0xff] }
 0x5a8   :  { %v2392_v15 = vpop.permute.xlu0 %2391  ;;  %v2631_v46 = vpop.permute.xlu1 %2630  ;;  %v6424_v32 = vld [vmem:[%s10534_s19 + $0x18] ss:$12 sps:$4 sm:$0x7f]  }
 0x5a9   :  { %2902 = vmatpush1.bf16.msra.mxu1 %v2788_v36  ;;  %v2396_v42 = vsel %vm101_vm1, %v9042_v20, %v2392_v15  ;;  %2416 = vst.msk [vmem:[#allocation3 + $0xf8] sm:$0x1f] %vm2415_vm15, %v2392_v15  ;;  %v2647_v45 = vsel %vm2646_vm14, %v2631_v46, %v2633_v53  ;;  %vm2462_vm1 = vcmask 78848   ;;  %vm2460_vm15 = vcmask 1046056   ;;  %v2755_v15 = vld [vmem:[#allocation3 + $0x198] sm:$0xff] }
 0x5aa   :  { %2903 = vmatprep.subr.bf16.mxu1 %v2791_v47  ;;  %2414 = vst.msk [vmem:[#allocation3 + $0xf0] sm:$0x1f] %vm2413_vm4, %v2396_v42  ;;  %vm2509_vm4 = vcmask 79872   ;;  %v2759_v46 = vld [vmem:[#allocation3 + $0x1b8] sm:$0xff] }
 0x5ab   :  { %2659 = vst.msk [vmem:[#allocation3 + $0x1f0] sm:$0xfc] %vm10553_vm2, %v2647_v45  ;;  %vm2507_vm2 = vcmask 1047080  }
 0x5ac   :  { %v2637_v55 = vpop.permute.xlu0 %2636  ;;  %v2156_v18 = vpop.permute.xlu1 %2155 }
 0x5ad   :  { %2904 = vmatpush1.bf16.msra.mxu1 %v2790_v43  ;;  %v2729_v3 = vld [vmem:[#allocation3 + $0xc8] sm:$0xff]  ;;  %2662 = vst.msk [vmem:[#allocation3 + $0x208] sm:$0xff] %vm2219_vm10, %v2637_v55  ;;  %v2754_v43 = vld [vmem:[#allocation3 + $0x190] sm:$0xff] }
 0x5ae   :  { %2166 = vst.msk [vmem:[#allocation3 + $0x200] sm:$0xff] %vm1933_vm11, %v2156_v18  ;;  %v2793_v6 = vpack.c.bf16 %v2731_v57, %v2729_v3  ;;  %v2728_v20 = vld [vmem:[#allocation3 + $0xc0] sm:$0xff]  ;;  %v2757_v18 = vld [vmem:[#allocation3 + $0x1a8] sm:$0xff]  ;;  %v2758_v57 = vld [vmem:[#allocation3 + $0x1b0] sm:$0xff] }
 0x5af   :  { %v2792_v39 = vpack.c.bf16 %v2730_v59, %v2728_v20  ;;  %v2807_v3 = vpack.c.bf16 %v2759_v46, %v2757_v18  ;;  %v2761_v59 = vld [vmem:[#allocation3 + $0x1c8] sm:$0xff]  ;;  %v3131_v18 = vld [vmem:[%s10567_s13 + $0x20] sm:$0xff] }
 0x5b0   :  { %2905 = vmatprep.subr.bf16.mxu1 %v2793_v6  ;;  %v2641_v24 = vpop.permute.xlu0 %2640  ;;  %v2439_v28 = vpop.permute.xlu1 %2438  ;;  %v2735_v10 = vld [vmem:[#allocation3 + $0xf8] sm:$0xff]  ;;  %v3128_v46 = vld [vmem:[%s10567_s13 + $0x8] sm:$0xff] }
 0x5b1   :  { %2906 = vmatpush1.bf16.msra.mxu1 %v2792_v39  ;;  %2664 = vst.msk [vmem:[#allocation3 + $0x218] sm:$0xff] %vm2219_vm10, %v2641_v24  ;;  %v2443_v29 = vsel %vm854_vm0, %v9062_v4, %v2439_v28  ;;  %v2795_v13 = vpack.c.bf16 %v2735_v10, %v2733_v62  ;;  %v2734_v38 = vld [vmem:[#allocation3 + $0xf0] sm:$0xff]  ;;  %vm10554_vm0 = vcmask 1048104   ;;  %v2763_v62 = vld [vmem:[#allocation3 + $0x1d8] sm:$0xff] }
 0x5b2   :  { %2463 = vst.msk [vmem:[#allocation3 + $0x128] sm:$0x3f] %vm2462_vm1, %v2439_v28  ;;  %v2794_v30 = vpack.c.bf16 %v2734_v38, %v2732_v27  ;;  %vm10555_vm1 = vcmask 564227   ;;  %v2809_v10 = vpack.c.bf16 %v2763_v62, %v2761_v59  ;;  %v3137_v62 = vld [vmem:[%s10567_s13 + $0x50] sm:$0xff] }
 0x5b3   :  { %2461 = vst.msk [vmem:[#allocation3 + $0x120] sm:$0x3f] %vm2460_vm15, %v2443_v29  ;;  %2907 = vmatprep.subr.bf16.mxu1 %v2795_v13  ;;  %vm10557_vm15 = vcmask 900096  }
 0x5b4   :  { %v2486_v34 = vpop.permute.xlu0 %2485  ;;  %v2635_v17 = vpop.permute.xlu1 %2634 }
 0x5b5   :  { %2908 = vmatpush1.bf16.msra.mxu1 %v2794_v30  ;;  %v2490_v60 = vsel %vm888_vm12, %v9054_v12, %v2486_v34  ;;  %2510 = vst.msk [vmem:[#allocation3 + $0x158] sm:$0x7f] %vm2509_vm4, %v2486_v34  ;;  %v2648_v4 = vsel %vm2646_vm14, %v2635_v17, %v2637_v55  ;;  %vm10556_vm12 = vmmov %vm10554_vm0  ;;  %vm10558_vm4 = vcmask 559104  }
 0x5b6   :  { %2909 = vmatprep.subr.bf16.mxu1 %v2797_v33  ;;  %2508 = vst.msk [vmem:[#allocation3 + $0x150] sm:$0x7f] %vm2507_vm2, %v2490_v60  ;;  %vm10559_vm2 = vmmov %vm10554_vm0  ;;  %v2765_v33 = vld [vmem:[#allocation3 + $0x1e8] sm:$0xff]  ;;  %v2764_v60 = vld [vmem:[#allocation3 + $0x1e0] sm:$0xff] }
 0x5b7   :  { %2661 = vst.msk [vmem:[#allocation3 + $0x200] sm:$0xff] %vm10554_vm0, %v2648_v4  ;;  %vm2683_vm0 = vcmask 867328  }
 0x5b8   :  { %v2170_v51 = vpop.permute.xlu0 %2169  ;;  %v2639_v16 = vpop.permute.xlu1 %2638  ;;  %v2771_v34 = vld [vmem:[#allocation3 + $0x218] sm:$0xff] }
 0x5b9   :  { %2910 = vmatpush1.bf16.msra.mxu1 %v2796_v22  ;;  %v2741_v11 = vld [vmem:[#allocation3 + $0x128] sm:$0xff]  ;;  %2181 = vst.msk [vmem:[#allocation3 + $0x220] sm:$0xf8] %vm10555_vm1, %v2170_v51  ;;  %v2649_v58 = vsel %vm2646_vm14, %v2639_v16, %v2641_v24  ;;  %vm10560_vm1 = vcmask 80899   ;;  %v2756_v24 = vld [vmem:[#allocation3 + $0x1a0] sm:$0xff] }
 0x5ba   :  { %v2799_v25 = vpack.c.bf16 %v2743_v54, %v2741_v11  ;;  %v2740_v12 = vld [vmem:[#allocation3 + $0x120] sm:$0xff]  ;;  %2663 = vst.msk [vmem:[#allocation3 + $0x210] sm:$0xff] %vm10556_vm12, %v2649_v58  ;;  %vm10561_vm12 = vcmask 1048107   ;;  %v2806_v28 = vpack.c.bf16 %v2758_v57, %v2756_v24  ;;  %v2769_v22 = vld [vmem:[#allocation3 + $0x208] sm:$0xff] }
 0x5bb   :  { %v2798_v53 = vpack.c.bf16 %v2742_v0, %v2740_v12  ;;  %v2813_v51 = vpack.c.bf16 %v2771_v34, %v2769_v22  ;;  %v6419_v16 = vld [vmem:[%s10534_s19] ss:$12 sps:$4 sm:$0xff]  }
 0x5bc   :  { %2911 = vmatprep.subr.bf16.mxu1 %v2799_v25  ;;  %v2533_v1 = vpop.permute.xlu0 %2532  ;;  %v2160_v37 = vpop.permute.xlu1 %2159  ;;  %v2747_v44 = vld [vmem:[#allocation3 + $0x158] sm:$0xff]  ;;  %v3136_v24 = vld [vmem:[%s10567_s13 + $0x48] sm:$0xff] }
 0x5bd   :  { %2912 = vmatpush1.bf16.msra.mxu1 %v2798_v53  ;;  %v2537_v49 = vsel %vm10557_vm15, %v9060_v61, %v2533_v1  ;;  %2555 = vst.msk [vmem:[#allocation3 + $0x188] sm:$0xff] %vm2219_vm10, %v2533_v1  ;;  %v2801_v63 = vpack.c.bf16 %v2747_v44, %v2745_v14  ;;  %v2746_v40 = vld [vmem:[#allocation3 + $0x150] sm:$0xff]  ;;  %v2748_v61 = vld [vmem:[#allocation3 + $0x160] sm:$0xff]  ;;  %vm10562_vm15 = vcmask 560128  }
 0x5be   :  { %2168 = vst.msk [vmem:[#allocation3 + $0x220] sm:$0x7] %vm10558_vm4, %v2160_v37  ;;  %v2800_v52 = vpack.c.bf16 %v2746_v40, %v2744_v31  ;;  %v2802_v36 = vpack.c.bf16 %v2750_v7, %v2748_v61  ;;  %v6422_v25 = vld [vmem:[%s10534_s19 + $0x1c] ss:$12 sps:$4 sm:$0x7f]   ;;  %v2768_v53 = vld [vmem:[#allocation3 + $0x200] sm:$0xff] }
 0x5bf   :  { %2554 = vst.msk [vmem:[#allocation3 + $0x180] sm:$0xff] %vm10559_vm2, %v2537_v49  ;;  %2913 = vmatprep.subr.bf16.mxu1 %v2801_v63 }
 0x5c0   :  { %v9103_v9 = vpop.permute.xlu0 %2642  ;;  %v2172_v19 = vpop.permute.xlu1 %2171 }
 0x5c1   :  { %2914 = vmatpush1.bf16.msra.mxu1 %v2800_v52  ;;  %2182 = vst.msk [vmem:[#allocation3 + $0x230] sm:$0xff] %vm1933_vm11, %v2172_v19  ;;  %v2770_v11 = vld [vmem:[#allocation3 + $0x210] sm:$0xff] }
 0x5c2   :  { %2915 = vmatprep.subr.bf16.mxu1 %v2803_v8  ;;  %v2812_v1 = vpack.c.bf16 %v2770_v11, %v2768_v53 }
 0x5c4   :  { %v2668_v2 = vpop.permute.xlu0 %2667  ;;  %v2670_v47 = vpop.permute.xlu1 %2669  ;;  %v2753_v23 = vld [vmem:[#allocation3 + $0x188] sm:$0xff] }
 0x5c5   :  { %2916 = vmatpush1.bf16.msra.mxu1 %v2802_v36  ;;  %v2684_v42 = vsel %vm2683_vm0, %v2668_v2, %v2670_v47  ;;  %2697 = vst.msk [vmem:[#allocation3 + $0x228] sm:$0xf8] %vm10560_vm1, %v2670_v47  ;;  %v2805_v45 = vpack.c.bf16 %v2755_v15, %v2753_v23  ;;  %v6425_v47 = vld [vmem:[%s10534_s19 + $0x8] ss:$12 sps:$4 sm:$0xff]   ;;  %v3127_v15 = vld [vmem:[%s10567_s13] sm:$0xff]  ;;  %vm3144_vm1 = vcmask 64512  }
 0x5c6   :  { %v2752_v56 = vld [vmem:[#allocation3 + $0x180] sm:$0xff]  ;;  %2696 = vst.msk [vmem:[#allocation3 + $0x220] sm:$0xf8] %vm10561_vm12, %v2684_v42  ;;  %v3129_v42 = vld [vmem:[%s10567_s13 + $0x10] sm:$0xff]  ;;  %vm10570_vm12 = vcmask 1039360  }
 0x5c7   :  { %v2804_v55 = vpack.c.bf16 %v2754_v43, %v2752_v56  ;;  %2917 = vmatprep.subr.bf16.mxu1 %v2805_v45  ;;  %v6426_v23 = vld [vmem:[%s10534_s19 + $0x20] ss:$12 sps:$4 sm:$0x7f]   ;;  %v6724_v45 = vmov 0.0|0.0   ;;  %v6255_v56 = vpack.c.bf16 %v3128_v46, %v3127_v15  ;;  %v3130_v43 = vld [vmem:[%s10567_s13 + $0x18] sm:$0xff] }
 0x5c8   :  { %v2608_v6 = vpop.permute.xlu0 %2607  ;;  %v2674_v20 = vpop.permute.xlu1 %2673  ;;  %v3142_v15 = vld [vmem:[%s10567_s13 + $0x78] sm:$0xff] }
 0x5c9   :  { %2918 = vmatpush1.bf16.msra.mxu1 %v2804_v55  ;;  %v2613_v39 = vsel %vm2609_vm13, %v9075_v41, %v2608_v6  ;;  %2629 = vst.msk [vmem:[#allocation3 + $0x1f8] sm:$0x3] %vm2274_vm9, %v2608_v6  ;;  %v2762_v41 = vld [vmem:[#allocation3 + $0x1d0] sm:$0xff]  ;;  %vm10563_vm13 = vmmov %vm10559_vm2  ;;  %v6258_v55 = vpack.c.bf16 %v3130_v43, %v3129_v42 }
 0x5ca   :  { %2699 = vst.msk [vmem:[#allocation3 + $0x238] sm:$0xff] %vm2219_vm10, %v2674_v20  ;;  %2919 = vmatprep.subr.bf16.mxu1 %v2807_v3  ;;  %v2808_v38 = vpack.c.bf16 %v2762_v41, %v2760_v50  ;;  %v3132_v3 = vld [vmem:[%s10567_s13 + $0x28] sm:$0xff]  ;;  %v3133_v6 = vld [vmem:[%s10567_s13 + $0x30] sm:$0xff] }
 0x5cb   :  { %2628 = vst.msk [vmem:[#allocation3 + $0x1f0] sm:$0x3] %vm2272_vm8, %v2613_v39  ;;  %vm2880_vm8 = vcmask 359424   ;;  %v6261_v57 = vpack.c.bf16 %v3132_v3, %v3131_v18  ;;  %v3135_v39 = vld [vmem:[%s10567_s13 + $0x40] sm:$0xff] }
 0x5cc   :  { %v2672_v29 = vpop.permute.xlu0 %2671  ;;  %v2176_v13 = vpop.permute.xlu1 %2175 }
 0x5cd   :  { %2920 = vmatpush1.bf16.msra.mxu1 %v2806_v28  ;;  %v2685_v27 = vsel %vm2683_vm0, %v2672_v29, %v2674_v20  ;;  %2184 = vst.msk [vmem:[#allocation3 + $0x250] sm:$0xf] %vm10562_vm15, %v2176_v13  ;;  %v3134_v20 = vld [vmem:[%s10567_s13 + $0x38] sm:$0xff]  ;;  %v6267_v28 = vpack.c.bf16 %v3136_v24, %v3135_v39  ;;  %vm10571_vm15 = vcmask 1031168  }
 0x5ce   :  { %2921 = vmatprep.subr.bf16.mxu1 %v2809_v10  ;;  %2698 = vst.msk [vmem:[#allocation3 + $0x230] sm:$0xff] %vm10563_vm13, %v2685_v27  ;;  %v6264_v59 = vpack.c.bf16 %v3134_v20, %v3133_v6  ;;  %v3138_v10 = vld [vmem:[%s10567_s13 + $0x58] sm:$0xff]  ;;  %v6725_v6 = vmov 0.0   ;;  %v3143_v20 = vld [vmem:[%s10567_s13 + $0x80] sm:$0xff]  ;;  %vm10572_vm13 = vmmov %vm10570_vm12 }
 0x5cf   :  { %v6270_v50 = vpack.c.bf16 %v3138_v10, %v3137_v62 }
 0x5d0   :  { %v2174_v30 = vpop.permute.xlu0 %2173  ;;  %v2678_v21 = vpop.permute.xlu1 %2677  ;;  %v2767_v48 = vld [vmem:[#allocation3 + $0x1f8] sm:$0xff] }
 0x5d1   :  { %2922 = vmatpush1.bf16.msra.mxu1 %v2808_v38  ;;  %2183 = vst.msk [vmem:[#allocation3 + $0x240] sm:$0xff] %vm1933_vm11, %v2174_v30  ;;  %v2811_v17 = vpack.c.bf16 %v2767_v48, %v2765_v33  ;;  %vm10564_vm11 = vmmov %vm10559_vm2  ;;  %v2775_v63 = vld [vmem:[#allocation3 + $0x238] sm:$0xff] }
 0x5d2   :  { %2701 = vst.msk [vmem:[#allocation3 + $0x248] sm:$0xff] %vm2219_vm10, %v2678_v21  ;;  %v2766_v4 = vld [vmem:[#allocation3 + $0x1f0] sm:$0xff]  ;;  %vm10565_vm10 = vcmask 1045504  }
 0x5d3   :  { %v2810_v26 = vpack.c.bf16 %v2766_v4, %v2764_v60  ;;  %2923 = vmatprep.subr.bf16.mxu1 %v2811_v17  ;;  %vm10566_vm9 = vmmov %vm10565_vm10 }
 0x5d4   :  { %v2676_v54 = vpop.permute.xlu0 %2675  ;;  %v2645_v58 = vpop.permute.xlu1 %2644 }
 0x5d5   :  { %2924 = vmatpush1.bf16.msra.mxu1 %v2810_v26  ;;  %v2686_v12 = vsel %vm2683_vm0, %v2676_v54, %v2678_v21  ;;  %v2650_v0 = vsel %vm2646_vm14, %v9103_v9, %v2645_v58  ;;  %2666 = vst.msk [vmem:[#allocation3 + $0x228] sm:$0x7] %vm2321_vm3, %v2645_v58  ;;  %v2774_v52 = vld [vmem:[#allocation3 + $0x230] sm:$0xff] }
 0x5d6   :  { %2946 = vmatprep.subr.bf16.mxu1 %v2813_v51  ;;  %2700 = vst.msk [vmem:[#allocation3 + $0x240] sm:$0xff] %vm10564_vm11, %v2686_v12  ;;  %vm10573_vm11 = vmmov %vm10571_vm15 }
 0x5d7   :  { %2665 = vst.msk [vmem:[#allocation3 + $0x220] sm:$0x7] %vm2319_vm7, %v2650_v0 }
 0x5d8   :  { %2926 = vmatmul.mubr.bf16.vlgmr.msra.gmra.mrb[8].mxu1 %v6419_v16  ;;  %v2680_v37 = vpop.permute.xlu0 %2679  ;;  %v2682_v14 = vpop.permute.xlu1 %2681 }
 0x5d9   :  { %2947 = vmatpush1.bf16.msra.mxu1 %v2812_v1  ;;  %2935 = vmatprep.mubr.bf16.mxu1 %v6422_v25  ;;  %v2687_v44 = vsel %vm2683_vm0, %v2680_v37, %v2682_v14  ;;  %2703 = vst.msk [vmem:[#allocation3 + $0x258] sm:$0xf] %vm2368_vm5, %v2682_v14  ;;  %v2777_v8 = vld [vmem:[#allocation3 + $0x248] sm:$0xff] }
 0x5da   :  { %2702 = vst.msk [vmem:[#allocation3 + $0x250] sm:$0xf] %vm2366_vm6, %v2687_v44 }
 0x5dc   :  { %v2773_v49 = vld [vmem:[#allocation3 + $0x228] sm:$0xff] }
 0x5dd   :  { %v2815_v31 = vpack.c.bf16 %v2775_v63, %v2773_v49  ;;  %v2776_v19 = vld [vmem:[#allocation3 + $0x240] sm:$0xff] }
 0x5de   :  { %v2772_v40 = vld [vmem:[#allocation3 + $0x220] sm:$0xff] }
 0x5df   :  { %v2814_v35 = vpack.c.bf16 %v2774_v52, %v2772_v40  ;;  %2948 = vmatprep.subr.bf16.mxu1 %v2815_v31 }
 0x5e0   :  { %2936 = vmatmul.mubr.bf16.gmra.mrb[12].mxu1 %v6424_v32  ;;  %v2779_v7 = vld [vmem:[#allocation3 + $0x258] sm:$0xf] }
 0x5e1   :  { %2949 = vmatpush1.bf16.msra.mxu1 %v2814_v35  ;;  %2978 = vmatprep.mubr.bf16.mxu1 %v6719_v5  ;;  %v2817_v9 = vpack.c.bf16 %v2779_v7, %v2777_v8  ;;  %v2778_v61 = vld [vmem:[#allocation3 + $0x250] sm:$0xf]  ;;  %v3139_v35 = vld [vmem:[%s10567_s13 + $0x60] sm:$0xff]  ;;  %v3140_v8 = vld [vmem:[%s10567_s13 + $0x68] sm:$0xff] }
 0x5e2   :  { %v2816_v36 = vpack.c.bf16 %v2778_v61, %v2776_v19  ;;  %v6273_v7 = vpack.c.bf16 %v3140_v8, %v3139_v35 }
 0x5e3   :  { %5887 = vmatprep.subr.msk.bf16.mxu1 %vm10565_vm10, %v2817_v9  ;;  %vm10574_vm10 = vmmov %vm10570_vm12 }
 0x5e4   :  { %v2888_v2 = vsel %vm10566_vm9, %v2816_v36, 0  ;;  %vm10575_vm9 = vmmov %vm10573_vm11 }
 0x5e5   :  { %2951 = vmatpush1.bf16.msra.mxu1 %v2888_v2 }
 0x5e6   :  { %6254 = vmatprep.subr.bf16.mxu1 %v6724_v45 }
 0x5e8   :  { %5888 = vmatmul.mubr.msk.bf16.vlgmr.msra.gmra.mrb[8].mxu1 %vm2880_vm8, %v6425_v47 }
 0x5e9   :  { %2988 = vmatprep.mubr.bf16.mxu1 %v6719_v5  ;;  %6256 = vmatpush1.bf16.msra.mxu1 %v6255_v56  ;;  %v2833_v29 = vpop.permute.xlu0 %2832  ;;  %v2838_v38 = vpop.permute.xlu1 %2837 }
 0x5ea   :  { %6257 = vmatprep.subr.bf16.mxu1 %v6724_v45 }
 0x5ed   :  { %6259 = vmatpush1.bf16.msra.mxu1 %v6258_v55  ;;  %v2843_v11 = vpop.permute.xlu0 %2842  ;;  %v2848_v0 = vpop.permute.xlu1 %2847 }
 0x5ee   :  { %6260 = vmatprep.subr.bf16.mxu1 %v6724_v45 }
 0x5f0   :  { %5889 = vmatmul.mubr.msk.bf16.gmra.mrb[12].mxu1 %vm2880_vm8, %v6426_v23  ;;  %v3141_v23 = vld [vmem:[%s10567_s13 + $0x70] sm:$0xff]  ;;  %vm10576_vm8 = vmmov %vm10574_vm10 }
 0x5f1   :  { %6262 = vmatpush1.bf16.msra.mxu1 %v6261_v57  ;;  %v6276_v42 = vpack.c.bf16 %v3142_v15, %v3141_v23 }
 0x5f2   :  { %6263 = vmatprep.subr.bf16.mxu1 %v6724_v45 }
 0x5f5   :  { %6265 = vmatpush1.bf16.msra.mxu1 %v6264_v59 }
 0x5f6   :  { %6266 = vmatprep.subr.bf16.mxu1 %v6724_v45 }
 0x5f9   :  { %6268 = vmatpush1.bf16.msra.mxu1 %v6267_v28 }
 0x5fa   :  { %6269 = vmatprep.subr.bf16.mxu1 %v6724_v45 }
 0x5fd   :  { %6271 = vmatpush1.bf16.msra.mxu1 %v6270_v50 }
 0x5fe   :  { %6272 = vmatprep.subr.bf16.mxu1 %v6724_v45 }
 0x601   :  { %6274 = vmatpush1.bf16.msra.mxu1 %v6273_v7 }
 0x602   :  { %6275 = vmatprep.subr.bf16.mxu1 %v6724_v45 }
 0x605   :  { %6277 = vmatpush1.bf16.msra.mxu1 %v6276_v42 }
 0x606   :  { %3189 = vmatprep.subr.mxu1 %v6725_v6 }
 0x609   :  { %3190 = vmatpush1.msra.mxu1 %v3143_v20 }
 0x6bb   :  { %v2980_v13 = vpop.f32.mrb[8].mxu1 }
 0x6bc   :  { %v6293_v27 = vadd.f32 %v2980_v13, %v2833_v29  ;;  %v2982_v41 = vpop.f32.mrb[9].mxu1 }
 0x6bd   :  { %v6294_v30 = vadd.f32 %v2982_v41, %v2833_v29  ;;  %v2984_v21 = vpop.f32.mrb[10].mxu1 }
 0x6be   :  { %v3007_v33 = vmin.f32 %v6293_v27, 0.0  ;;  %v6295_v48 = vadd.f32 %v2984_v21, %v2838_v38  ;;  %v2986_v34 = vpop.f32.mrb[11].mxu1  ;;  %vm2999_vm7 = vcmp.gt.f32.partialorder %v6293_v27, 0.0 }
 0x6bf   :  { %v3008_v17 = vmin.f32 %v6294_v30, 0.0  ;;  %v9190_v60 = vadd.f32 %v2986_v34, %v2838_v38  ;;  %vm3000_vm3 = vcmp.gt.f32.partialorder %v6294_v30, 0.0  ;;  %v3242_v34 = vld [vmem:[%s10568_s18] sm:$0xff] }
 0x6c0   :  { %v3015_v4 = vmul.f32 1.442695, %v3007_v33  ;;  %v3009_v26 = vmin.f32 %v6295_v48, 0.0  ;;  %vm3001_vm5 = vcmp.gt.f32.partialorder %v6295_v48, 0.0  ;;  %v3243_v33 = vld [vmem:[%s10568_s18 + $0x8] sm:$0xff] }
 0x6c1   :  { %v3017_v22 = vmul.f32 1.442695, %v3008_v17  ;;  %v3010_v51 = vmin.f32 %v9190_v60, 0.0  ;;  %vm3002_vm6 = vcmp.gt.f32.partialorder %v9190_v60, 0.0  ;;  %v3244_v17 = vld [vmem:[%s10568_s18 + $0x10] sm:$0xff] }
 0x6c2   :  { %6543 = vpow2.f32 %v3015_v4  ;;  %v3019_v16 = vmul.f32 1.442695, %v3009_v26  ;;  %v3271_v4 = vld [vmem:[%s10569_s16 + $0x8] sm:$0xff]  ;;  %v3270_v26 = vld [vmem:[%s10569_s16] sm:$0xff] }
 0x6c3   :  { %6545 = vpow2.f32 %v3017_v22  ;;  %v3021_v54 = vmul.f32 1.442695, %v3010_v51  ;;  %v2990_v58 = vpop.f32.mrb[12].mxu1  ;;  %v3245_v22 = vld [vmem:[%s10568_s18 + $0x18] sm:$0x3f]  ;;  %s10579_s18 = smov 120  }
 0x6c4   :  { %6547 = vpow2.f32 %v3019_v16  ;;  %v9193_v25 = vadd.f32 %v2990_v58, %v2843_v11  ;;  %v2992_v12 = vpop.f32.mrb[13].mxu1  ;;  %v3273_v51 = vld [vmem:[%s10569_s16 + $0x18] sm:$0x3f] }
 0x6c5   :  { %v6298_v53 = vadd.f32 %v2992_v12, %v2843_v11  ;;  %v2994_v1 = vpop.f32.mrb[14].mxu1  ;;  %6549 = vpow2.f32 %v3021_v54 }
 0x6c6   :  { %v3011_v37 = vmin.f32 %v9193_v25, 0.0  ;;  %v9196_v14 = vadd.f32 %v2994_v1, %v2848_v0  ;;  %v2996_v44 = vpop.f32.mrb[15].mxu1  ;;  %vm3003_vm4 = vcmp.gt.f32.partialorder %v9193_v25, 0.0 }
 0x6c7   :  { %v3012_v32 = vmin.f32 %v6298_v53, 0.0  ;;  %v9199_v52 = vadd.f32 %v2996_v44, %v2848_v0  ;;  %vm3004_vm14 = vcmp.gt.f32.partialorder %v6298_v53, 0.0 }
 0x6c8   :  { %v3013_v49 = vmin.f32 %v9196_v14, 0.0  ;;  %v3023_v63 = vmul.f32 1.442695, %v3011_v37  ;;  %vm3005_vm2 = vcmp.gt.f32.partialorder %v9196_v14, 0.0 }
 0x6c9   :  { %v3025_v31 = vmul.f32 1.442695, %v3012_v32  ;;  %v3014_v2 = vmin.f32 %v9199_v52, 0.0  ;;  %vm3006_vm0 = vcmp.gt.f32.partialorder %v9199_v52, 0.0 }
 0x6ca   :  { %v3027_v40 = vmul.f32 1.442695, %v3013_v49 }
 0x6cb   :  { %6551 = vpow2.f32 %v3025_v31  ;;  %v3029_v57 = vmul.f32 1.442695, %v3014_v2 }
 0x6cc   :  { %v6544_v9 = vpop.eup %6543  ;;  %6553 = vpow2.f32 %v3023_v63 }
 0x6cd   :  { %v6546_v19 = vpop.eup %6545  ;;  %v5890_v61 = vadd.f32 -1.0, %v6544_v9  ;;  %6555 = vpow2.f32 %v3027_v40 }
 0x6ce   :  { %v6548_v36 = vpop.eup %6547  ;;  %v5891_v47 = vadd.f32 -1.0, %v6546_v19  ;;  %6557 = vpow2.f32 %v3029_v57 }
 0x6cf   :  { %v5892_v46 = vadd.f32 -1.0, %v6548_v36  ;;  %v6550_v43 = vpop.eup %6549  ;;  %v9217_v55 = vsel %vm2999_vm7, %v6293_v27, %v5890_v61  ;;  %vm3298_vm7 = vcmask 97280  }
 0x6d0   :  { %v9215_v56 = vsel %vm3000_vm3, %v6294_v30, %v5891_v47  ;;  %v5893_v59 = vadd.f32 -1.0, %v6550_v43  ;;  %vm10577_vm3 = vmmov %vm10575_vm9 }
 0x6d1   :  { %v9219_v18 = vsel %vm3001_vm5, %v6295_v48, %v5892_v46  ;;  %3057 = vrot.lane.b32.xlu1 %v9215_v56, %s10492_s25  ;;  %vm3302_vm5 = vcmask 95232  }
 0x6d2   :  { %v6398_v3 = vpack.i.bf16 %v9219_v18, %v9217_v55  ;;  %v9235_v62 = vsel %vm3002_vm6, %v9190_v60, %v5893_v59  ;;  %v3272_v60 = vld [vmem:[%s10569_s16 + $0x10] sm:$0xff]  ;;  %vm3484_vm6 = vcmask 195680   ;;  %s10587_s16 = sld [smem:[#allocation30_spill]] }
 0x6d4   :  { %6399 = vrot.lane.b32.xlu0 %v6398_v3, %s10492_s25 }
 0x6d5   :  { %v6552_v39 = vpop.eup %6551  ;;  %3093 = vrot.lane.b32.xlu1 %v9215_v56, %s10476_s11 }
 0x6d6   :  { %v6554_v24 = vpop.eup %6553  ;;  %v5895_v10 = vadd.f32 -1.0, %v6552_v39 }
 0x6d7   :  { %v6556_v28 = vpop.eup %6555  ;;  %v5894_v29 = vadd.f32 -1.0, %v6554_v24 }
 0x6d8   :  { %6404 = vrot.lane.b32.xlu0 %v6398_v3, %s10476_s11  ;;  %v5896_v50 = vadd.f32 -1.0, %v6556_v28  ;;  %v9241_v13 = vsel %vm3004_vm14, %v6298_v53, %v5895_v10  ;;  %v6558_v38 = vpop.eup %6557  ;;  %vm3845_vm14 = vcmask 850944  }
 0x6d9   :  { %3097 = vrot.lane.b32.xlu1 %v9235_v62, %s10476_s11  ;;  %v9251_v41 = vsel %vm3003_vm4, %v9193_v25, %v5894_v29  ;;  %v5897_v21 = vadd.f32 -1.0, %v6558_v38  ;;  %vm3488_vm4 = vcmask 193632  }
 0x6da   :  { %v9248_v27 = vsel %vm3005_vm2, %v9196_v14, %v5896_v50  ;;  %vm10583_vm2 = vcmask 1043456  }
 0x6db   :  { %v6408_v30 = vpack.i.bf16 %v9248_v27, %v9251_v41  ;;  %v9267_v48 = vsel %vm3006_vm0, %v9199_v52, %v5897_v21  ;;  %vm10584_vm0 = vmmov %vm10583_vm2 }
 0x6dc   :  { %3061 = vrot.lane.b32.xlu0 %v9235_v62, %s10492_s25 }
 0x6dd   :  { %3065 = vrot.lane.b32.xlu1 %v9241_v13, %s10492_s25 }
 0x6e0   :  { %3099 = vrot.lane.b32.xlu0 %v9251_v41, %s10476_s11 }
 0x6e1   :  { %3101 = vrot.lane.b32.xlu1 %v9241_v13, %s10476_s11 }
 0x6e4   :  { %6409 = vrot.lane.b32.xlu0 %v6408_v30, %s10492_s25 }
 0x6e5   :  { %3103 = vrot.lane.b32.xlu1 %v9248_v27, %s10476_s11 }
 0x6e8   :  { %3069 = vrot.lane.b32.xlu0 %v9267_v48, %s10492_s25 }
 0x6e9   :  { %3253 = vperm.xlu1 %6346, %v3243_v33  }
 0x6ec   :  { %3105 = vrot.lane.b32.xlu0 %v9267_v48, %s10476_s11 }
 0x6ed   :  { %3248 = vperm.xlu1 %6346, %v3242_v34  }
 0x6f0   :  { %3258 = vperm.xlu0 %6347, %v3244_v17  }
 0x6f1   :  { %3286 = vperm.xlu1 %6346, %v3272_v60  }
 0x6f4   :  { %3281 = vperm.xlu0 %6347, %v3271_v4  }
 0x6f5   :  { %3276 = vperm.xlu1 %6346, %v3270_v26  }
 0x6f8   :  { %3263 = vperm.xlu0 %6347, %v3245_v22  }
 0x6fc   :  { %3291 = vperm.xlu0 %6347, %v3273_v51  }
 0x743   :  { %v3058_v16 = vpop.permute.xlu1 %3057 }
 0x744   :  { %v3084_v11 = vmax.f32 %v9215_v56, %v3058_v16 }
 0x746   :  { %v6400_v54 = vpop.permute.xlu0 %6399 }
 0x747   :  { %v6401_v58 = vunpack.i.l.bf16 %v6400_v54  ;;  %v3094_v25 = vpop.permute.xlu1 %3093  ;;  %v6402_v44 = vunpack.i.h.bf16 %v6400_v54 }
 0x748   :  { %v3120_v12 = vmax.f32 %v3084_v11, %v3094_v25 }
 0x749   :  { %v3071_v0 = vsel %vm10570_vm12, %v6401_v58, %v3058_v16  ;;  %vm6726_vm12 = vmmov 0  }
 0x74a   :  { %v6405_v53 = vpop.permute.xlu0 %6404  ;;  %5898 = vmatprep.mubr.msk.f32.mxu1 %vm3144_vm1, %v3120_v12  ;;  %v3083_v14 = vmax.f32 %v9217_v55, %v3071_v0 }
 0x74b   :  { %v6406_v1 = vunpack.i.l.bf16 %v6405_v53  ;;  %v3098_v37 = vpop.permute.xlu1 %3097  ;;  %v6407_v32 = vunpack.i.h.bf16 %v6405_v53 }
 0x74d   :  { %v3107_v49 = vsel %vm10571_vm15, %v6406_v1, %v3094_v25  ;;  %v3108_v7 = vsel %vm10573_vm11, %v6407_v32, %v3098_v37 }
 0x74e   :  { %v3119_v63 = vmax.f32 %v3083_v14, %v3107_v49  ;;  %v3062_v31 = vpop.permute.xlu0 %3061 }
 0x74f   :  { %v3072_v40 = vsel %vm10572_vm13, %v6402_v44, %v3062_v31  ;;  %v3086_v52 = vmax.f32 %v9235_v62, %v3062_v31  ;;  %v3066_v35 = vpop.permute.xlu1 %3065 }
 0x750   :  { %v3085_v8 = vmax.f32 %v9219_v18, %v3072_v40  ;;  %3222 = vmatmul.mubr.f32.vlgmr.msra.gmra.mrb[16].mxu1 %v3119_v63  ;;  %v3088_v19 = vmax.f32 %v9241_v13, %v3066_v35 }
 0x751   :  { %v3122_v9 = vmax.f32 %v3086_v52, %v3098_v37 }
 0x752   :  { %v3100_v61 = vpop.permute.xlu0 %3099  ;;  %v3121_v36 = vmax.f32 %v3085_v8, %v3108_v7 }
 0x753   :  { %5899 = vmatprep.mubr.msk.f32.mxu1 %vm3144_vm1, %v3122_v9  ;;  %v3102_v2 = vpop.permute.xlu1 %3101 }
 0x754   :  { %v3124_v47 = vmax.f32 %v3088_v19, %v3102_v2  ;;  %3227 = vmatmul.mubr.f32.gmra.mrb[18].mxu1 %v3121_v36  ;;  %v3109_v55 = vsel %vm10575_vm9, %v3100_v61, %v3102_v2 }
 0x756   :  { %v6410_v23 = vpop.permute.xlu0 %6409  ;;  %5900 = vmatprep.mubr.msk.f32.mxu1 %vm3144_vm1, %v3124_v47 }
 0x757   :  { %v6411_v15 = vunpack.i.l.bf16 %v6410_v23  ;;  %v6412_v46 = vunpack.i.h.bf16 %v6410_v23  ;;  %v3104_v20 = vpop.permute.xlu1 %3103 }
 0x759   :  { %v3073_v42 = vsel %vm10574_vm10, %v6411_v15, %v3066_v35 }
 0x75a   :  { %v3070_v56 = vpop.permute.xlu0 %3069  ;;  %v3087_v43 = vmax.f32 %v9251_v41, %v3073_v42 }
 0x75b   :  { %v3074_v18 = vsel %vm10576_vm8, %v6412_v46, %v3070_v56  ;;  %v3090_v57 = vmax.f32 %v9267_v48, %v3070_v56 }
 0x75c   :  { %v3123_v3 = vmax.f32 %v3087_v43, %v3109_v55  ;;  %v3089_v59 = vmax.f32 %v9248_v27, %v3074_v18 }
 0x75e   :  { %v3106_v39 = vpop.permute.xlu0 %3105  ;;  %3232 = vmatmul.mubr.f32.gmra.mrb[20].mxu1 %v3123_v3 }
 0x75f   :  { %v3110_v24 = vsel %vm10577_vm3, %v3104_v20, %v3106_v39  ;;  %v3126_v28 = vmax.f32 %v3090_v57, %v3106_v39 }
 0x760   :  { %v3125_v62 = vmax.f32 %v3089_v59, %v3110_v24 }
 0x761   :  { %5901 = vmatprep.mubr.msk.f32.mxu1 %vm3144_vm1, %v3126_v28  ;;  %vm10586_vm1 = vcmask 1045504  }
 0x762   :  { %3237 = vmatmul.mubr.f32.gmra.mrb[22].mxu1 %v3125_v62 }
 0x768   :  { %v3254_v10 = vpop.permute.xlu1 %3253 }
 0x76c   :  { %v3249_v50 = vpop.permute.xlu1 %3248 }
 0x76f   :  { %v3259_v13 = vpop.permute.xlu0 %3258 }
 0x770   :  { %v3287_v29 = vpop.permute.xlu1 %3286 }
 0x773   :  { %v3282_v17 = vpop.permute.xlu0 %3281 }
 0x774   :  { %v3277_v21 = vpop.permute.xlu1 %3276 }
 0x777   :  { %v3264_v4 = vpop.permute.xlu0 %3263 }
 0x77b   :  { %v3292_v25 = vpop.permute.xlu0 %3291 }
 0x823   :  { %v3223_v41 = vpop.f32.mrb[16].mxu1 }
 0x824   :  { %v3266_v38 = vmul.f32 %v3249_v50, %v3223_v41  ;;  %v3225_v30 = vpop.f32.mrb[17].mxu1 }
 0x826   :  { %v9314_v33 = vadd.f32 %v3277_v21, %v3266_v38 }
 0x827   :  { %v3228_v27 = vpop.f32.mrb[18].mxu1 }
 0x828   :  { %v3267_v48 = vmul.f32 %v3254_v10, %v3228_v27  ;;  %v3230_v34 = vpop.f32.mrb[19].mxu1  ;;  %3372 = vrot.lane.b32.xlu0 %v9314_v33, %s10487_s6  ;;  %3468 = vrot.lane.b32.xlu1 %v9314_v33, %s10490_s26  ;;  %3299 = vst.msk [vmem:[#allocation4] sm:$0xff] %vm3298_vm7, %v9314_v33 }
 0x82a   :  { %v3295_v60 = vadd.f32 %v3282_v17, %v3267_v48 }
 0x82c   :  { %3308 = vrot.lane.b32.xlu0 %v9314_v33, %s10492_s25  ;;  %3436 = vrot.lane.b32.xlu1 %v9314_v33, %s10491_s29  ;;  %3300 = vst.msk [vmem:[#allocation4 + $0x8] sm:$0xff] %vm3298_vm7, %v3295_v60 }
 0x830   :  { %3554 = vrot.lane.b32.xlu0 %v9314_v33, %s10477_s3  ;;  %3388 = vrot.lane.b32.xlu1 %v9314_v33, %s10488_s4 }
 0x831   :  { %v3233_v26 = vpop.f32.mrb[20].mxu1 }
 0x832   :  { %v3268_v22 = vmul.f32 %v3259_v13, %v3233_v26  ;;  %v3235_v51 = vpop.f32.mrb[21].mxu1 }
 0x834   :  { %v9331_v16 = vadd.f32 %v3287_v29, %v3268_v22  ;;  %3490 = vrot.lane.b32.xlu0 %v9314_v33, %s10474_s10  ;;  %3570 = vrot.lane.b32.xlu1 %v9314_v33, %s10486_s8 }
 0x835   :  { %v3238_v11 = vpop.f32.mrb[22].mxu1 }
 0x836   :  { %v3269_v54 = vmul.f32 %v3264_v4, %v3238_v11  ;;  %v3240_v58 = vpop.f32.mrb[23].mxu1  ;;  %3301 = vst.msk [vmem:[#allocation4 + $0x10] sm:$0xff] %vm3298_vm7, %v9331_v16 }
 0x838   :  { %v9339_v12 = vadd.f32 %v3292_v25, %v3269_v54  ;;  %3618 = vrot.lane.b32.xlu0 %v9314_v33, %s10493_s2  ;;  %3404 = vrot.lane.b32.xlu1 %v9314_v33, %s10489_s27 }
 0x83a   :  { %3303 = vst.msk [vmem:[#allocation4 + $0x18] sm:$0x3f] %vm3302_vm5, %v9339_v12 }
 0x83c   :  { %3324 = vrot.lane.b32.xlu0 %v9314_v33, %s10476_s11  ;;  %3586 = vrot.lane.b32.xlu1 %v9314_v33, %s10479_s0 }
 0x840   :  { %3506 = vrot.lane.b32.xlu0 %v9314_v33, %s10478_s30  ;;  %3650 = vrot.lane.b32.xlu1 %v9314_v33, %s10578_s7 }
 0x844   :  { %3452 = vrot.lane.b32.xlu0 %v9314_v33, %s10495_s24  ;;  %3356 = vrot.lane.b32.xlu1 %v9314_v33, %s10484_s1 }
 0x848   :  { %3634 = vrot.lane.b32.xlu0 %v9314_v33, %s10536_s20  ;;  %3358 = vrot.lane.b32.xlu1 %v3295_v60, %s10484_s1 }
 0x84c   :  { %3340 = vrot.lane.b32.xlu0 %v9314_v33, %s10482_s5  ;;  %3540 = vrot.lane.b32.xlu1 %v3295_v60, %s10485_s28 }
 0x850   :  { %3522 = vrot.lane.b32.xlu0 %v9314_v33, %s10475_s9  ;;  %3374 = vrot.lane.b32.xlu1 %v3295_v60, %s10487_s6 }
 0x854   :  { %3420 = vrot.lane.b32.xlu0 %v9314_v33, %s10579_s18  ;;  %3556 = vrot.lane.b32.xlu1 %v3295_v60, %s10477_s3 }
 0x858   :  { %3602 = vrot.lane.b32.xlu0 %v9314_v33, %s10580_s12  ;;  %3492 = vrot.lane.b32.xlu1 %v3295_v60, %s10474_s10 }
 0x85c   :  { %3470 = vrot.lane.b32.xlu0 %v3295_v60, %s10490_s26  ;;  %3438 = vrot.lane.b32.xlu1 %v3295_v60, %s10491_s29 }
 0x860   :  { %3310 = vrot.lane.b32.xlu0 %v3295_v60, %s10492_s25  ;;  %3620 = vrot.lane.b32.xlu1 %v3295_v60, %s10493_s2 }
 0x864   :  { %3390 = vrot.lane.b32.xlu0 %v3295_v60, %s10488_s4  ;;  %3326 = vrot.lane.b32.xlu1 %v3295_v60, %s10476_s11 }
 0x868   :  { %3572 = vrot.lane.b32.xlu0 %v3295_v60, %s10486_s8  ;;  %3508 = vrot.lane.b32.xlu1 %v3295_v60, %s10478_s30 }
 0x86c   :  { %3406 = vrot.lane.b32.xlu0 %v3295_v60, %s10489_s27  ;;  %3454 = vrot.lane.b32.xlu1 %v3295_v60, %s10495_s24 }
 0x870   :  { %3588 = vrot.lane.b32.xlu0 %v3295_v60, %s10479_s0  ;;  %3636 = vrot.lane.b32.xlu1 %v3295_v60, %s10536_s20 }
 0x874   :  { %3342 = vrot.lane.b32.xlu0 %v3295_v60, %s10482_s5  ;;  %3422 = vrot.lane.b32.xlu1 %v3295_v60, %s10579_s18 }
 0x878   :  { %3524 = vrot.lane.b32.xlu0 %v3295_v60, %s10475_s9  ;;  %3604 = vrot.lane.b32.xlu1 %v3295_v60, %s10580_s12 }
 0x87c   :  { %3652 = vrot.lane.b32.xlu0 %v3295_v60, %s10578_s7  ;;  %3376 = vrot.lane.b32.xlu1 %v9331_v16, %s10487_s6 }
 0x880   :  { %3360 = vrot.lane.b32.xlu0 %v9331_v16, %s10484_s1  ;;  %3424 = vrot.lane.b32.xlu1 %v9331_v16, %s10579_s18 }
 0x884   :  { %3542 = vrot.lane.b32.xlu0 %v9331_v16, %s10485_s28  ;;  %3312 = vrot.lane.b32.xlu1 %v9331_v16, %s10492_s25 }
 0x888   :  { %3472 = vrot.lane.b32.xlu0 %v9331_v16, %s10490_s26  ;;  %3392 = vrot.lane.b32.xlu1 %v9331_v16, %s10488_s4 }
 0x88c   :  { %3558 = vrot.lane.b32.xlu0 %v9331_v16, %s10477_s3  ;;  %3574 = vrot.lane.b32.xlu1 %v9331_v16, %s10486_s8 }
 0x890   :  { %3606 = vrot.lane.b32.xlu0 %v9331_v16, %s10580_s12  ;;  %3408 = vrot.lane.b32.xlu1 %v9331_v16, %s10489_s27 }
 0x894   :  { %3494 = vrot.lane.b32.xlu0 %v9331_v16, %s10474_s10  ;;  %3344 = vrot.lane.b32.xlu1 %v9331_v16, %s10482_s5 }
 0x898   :  { %3440 = vrot.lane.b32.xlu0 %v9331_v16, %s10491_s29  ;;  %3526 = vrot.lane.b32.xlu1 %v9331_v16, %s10475_s9 }
 0x89a   :  { %v3373_v0 = vpop.permute.xlu0 %3372  ;;  %v3469_v53 = vpop.permute.xlu1 %3468 }
 0x89b   :  { %3384 = vst.msk [vmem:[#allocation4 + $0x96] sm:$0xff] %vm3298_vm7, %v3373_v0  ;;  %3480 = vst.msk [vmem:[#allocation4 + $0x14a] sm:$0xff] %vm3298_vm7, %v3469_v53 }
 0x89c   :  { %3485 = vst.msk [vmem:[#allocation4] sm:$0xff] %vm3484_vm6, %v3469_v53  ;;  %3622 = vrot.lane.b32.xlu0 %v9331_v16, %s10493_s2  ;;  %3362 = vrot.lane.b32.xlu1 %v9339_v12, %s10484_s1  ;;  %s10585_s1 = sld [smem:[#allocation32_spill]] }
 0x89e   :  { %v3309_v1 = vpop.permute.xlu0 %3308  ;;  %v3437_v37 = vpop.permute.xlu1 %3436 }
 0x89f   :  { %3320 = vst.msk [vmem:[#allocation4 + $0x1e] sm:$0xff] %vm3298_vm7, %v3309_v1  ;;  %3448 = vst.msk [vmem:[#allocation4 + $0x10e] sm:$0xff] %vm3298_vm7, %v3437_v37 }
 0x8a0   :  { %3328 = vrot.lane.b32.xlu0 %v9331_v16, %s10476_s11  ;;  %3544 = vrot.lane.b32.xlu1 %v9339_v12, %s10485_s28 }
 0x8a2   :  { %v3555_v14 = vpop.permute.xlu0 %3554  ;;  %v3389_v44 = vpop.permute.xlu1 %3388 }
 0x8a3   :  { %3566 = vst.msk [vmem:[#allocation4 + $0x96] sm:$0xff] %vm3484_vm6, %v3555_v14  ;;  %v3666_v14 = vld [vmem:[#allocation4] sm:$0xff] }
 0x8a4   :  { %3400 = vst.msk [vmem:[#allocation4 + $0xb4] sm:$0xff] %vm3298_vm7, %v3389_v44  ;;  %3510 = vrot.lane.b32.xlu0 %v9331_v16, %s10478_s30  ;;  %3474 = vrot.lane.b32.xlu1 %v9339_v12, %s10490_s26 }
 0x8a6   :  { %v3491_v32 = vpop.permute.xlu0 %3490  ;;  %v3571_v49 = vpop.permute.xlu1 %3570 }
 0x8a7   :  { %3502 = vst.msk [vmem:[#allocation4 + $0x1e] sm:$0xff] %vm3484_vm6, %v3491_v32  ;;  %3582 = vst.msk [vmem:[#allocation4 + $0xb4] sm:$0xff] %vm3484_vm6, %v3571_v49 }
 0x8a8   :  { %3456 = vrot.lane.b32.xlu0 %v9331_v16, %s10495_s24  ;;  %3560 = vrot.lane.b32.xlu1 %v9339_v12, %s10477_s3 }
 0x8aa   :  { %v3619_v63 = vpop.permute.xlu0 %3618  ;;  %v3405_v31 = vpop.permute.xlu1 %3404 }
 0x8ab   :  { %3630 = vst.msk [vmem:[#allocation4 + $0x10e] sm:$0xff] %vm3484_vm6, %v3619_v63 }
 0x8ac   :  { %3416 = vst.msk [vmem:[#allocation4 + $0xd2] sm:$0xff] %vm3298_vm7, %v3405_v31  ;;  %3638 = vrot.lane.b32.xlu0 %v9331_v16, %s10536_s20  ;;  %3608 = vrot.lane.b32.xlu1 %v9339_v12, %s10580_s12 }
 0x8ae   :  { %v3325_v40 = vpop.permute.xlu0 %3324  ;;  %v3587_v52 = vpop.permute.xlu1 %3586 }
 0x8af   :  { %3336 = vst.msk [vmem:[#allocation4 + $0x3c] sm:$0xff] %vm3298_vm7, %v3325_v40 }
 0x8b0   :  { %3598 = vst.msk [vmem:[#allocation4 + $0xd2] sm:$0xff] %vm3484_vm6, %v3587_v52  ;;  %3590 = vrot.lane.b32.xlu0 %v9331_v16, %s10479_s0  ;;  %3314 = vrot.lane.b32.xlu1 %v9339_v12, %s10492_s25 }
 0x8b2   :  { %v3507_v35 = vpop.permute.xlu0 %3506  ;;  %v3651_v8 = vpop.permute.xlu1 %3650 }
 0x8b3   :  { %3518 = vst.msk [vmem:[#allocation4 + $0x3c] sm:$0xff] %vm3484_vm6, %v3507_v35  ;;  %3662 = vst.msk [vmem:[#allocation4 + $0x14a] sm:$0xff] %vm3484_vm6, %v3651_v8 }
 0x8b4   :  { %3378 = vrot.lane.b32.xlu0 %v9339_v12, %s10487_s6  ;;  %3496 = vrot.lane.b32.xlu1 %v9339_v12, %s10474_s10  ;;  %s10598_s10 = sld [smem:[#allocation40_spill]] }
 0x8b6   :  { %v3453_v7 = vpop.permute.xlu0 %3452  ;;  %v3357_v9 = vpop.permute.xlu1 %3356 }
 0x8b7   :  { %3464 = vst.msk [vmem:[#allocation4 + $0x12c] sm:$0xff] %vm3298_vm7, %v3453_v7  ;;  %3368 = vst.msk [vmem:[#allocation4 + $0x78] sm:$0xff] %vm3298_vm7, %v3357_v9 }
 0x8b8   :  { %3426 = vrot.lane.b32.xlu0 %v9339_v12, %s10579_s18  ;;  %3442 = vrot.lane.b32.xlu1 %v9339_v12, %s10491_s29 }
 0x8ba   :  { %v3635_v19 = vpop.permute.xlu0 %3634  ;;  %v3359_v61 = vpop.permute.xlu1 %3358 }
 0x8bb   :  { %3646 = vst.msk [vmem:[#allocation4 + $0x12c] sm:$0xff] %vm3484_vm6, %v3635_v19 }
 0x8bc   :  { %3369 = vst.msk [vmem:[#allocation4 + $0x80] sm:$0xff] %vm3298_vm7, %v3359_v61  ;;  %3394 = vrot.lane.b32.xlu0 %v9339_v12, %s10488_s4  ;;  %3624 = vrot.lane.b32.xlu1 %v9339_v12, %s10493_s2 }
 0x8be   :  { %v3341_v36 = vpop.permute.xlu0 %3340  ;;  %v3541_v2 = vpop.permute.xlu1 %3540 }
 0x8bf   :  { %3352 = vst.msk [vmem:[#allocation4 + $0x5a] sm:$0xff] %vm3298_vm7, %v3341_v36 }
 0x8c0   :  { %3551 = vst.msk [vmem:[#allocation4 + $0x80] sm:$0xff] %vm3484_vm6, %v3541_v2  ;;  %3576 = vrot.lane.b32.xlu0 %v9339_v12, %s10486_s8  ;;  %3330 = vrot.lane.b32.xlu1 %v9339_v12, %s10476_s11 }
 0x8c2   :  { %v3523_v47 = vpop.permute.xlu0 %3522  ;;  %v3375_v23 = vpop.permute.xlu1 %3374 }
 0x8c3   :  { %3534 = vst.msk [vmem:[#allocation4 + $0x5a] sm:$0xff] %vm3484_vm6, %v3523_v47 }
 0x8c4   :  { %3385 = vst.msk [vmem:[#allocation4 + $0x9e] sm:$0xff] %vm3298_vm7, %v3375_v23  ;;  %3410 = vrot.lane.b32.xlu0 %v9339_v12, %s10489_s27  ;;  %3512 = vrot.lane.b32.xlu1 %v9339_v12, %s10478_s30  ;;  %s10581_s27 = sld [smem:[#allocation28_spill]] }
 0x8c6   :  { %v3421_v15 = vpop.permute.xlu0 %3420  ;;  %v3557_v46 = vpop.permute.xlu1 %3556 }
 0x8c7   :  { %3432 = vst.msk [vmem:[#allocation4 + $0xf0] sm:$0xff] %vm3298_vm7, %v3421_v15  ;;  %v3682_v53 = vld [vmem:[#allocation4 + $0x80] sm:$0xff] }
 0x8c8   :  { %3567 = vst.msk [vmem:[#allocation4 + $0x9e] sm:$0xff] %vm3484_vm6, %v3557_v46  ;;  %3640 = vrot.lane.b32.xlu0 %v9339_v12, %s10536_s20  ;;  %3458 = vrot.lane.b32.xlu1 %v9339_v12, %s10495_s24  ;;  %s10597_s24 = sld [smem:[#allocation39_spill]] }
 0x8ca   :  { %v3603_v42 = vpop.permute.xlu0 %3602  ;;  %v3493_v56 = vpop.permute.xlu1 %3492  ;;  %v6429_v57 = vld [vmem:[%s10581_s27 + $0x4] ss:$12 sps:$4 sm:$0xff]   ;;  %v6430_v20 = vld [vmem:[%s10581_s27 + $0x8] ss:$12 sps:$4 sm:$0xff]  }
 0x8cb   :  { %3614 = vst.msk [vmem:[#allocation4 + $0xf0] sm:$0xff] %vm3484_vm6, %v3603_v42  ;;  %3893 = vmatprep.mubr.bf16.mxu1 %v6429_v57  ;;  %6080 = vmatprep.mubr.msk.bf16.mxu0 %vm3845_vm14, %v6430_v20 }
 0x8cc   :  { %3346 = vrot.lane.b32.xlu0 %v9339_v12, %s10482_s5  ;;  %3592 = vrot.lane.b32.xlu1 %v9339_v12, %s10479_s0  ;;  %s10600_s0 = sld [smem:[#allocation42_spill]] }
 0x8ce   :  { %v3471_v43 = vpop.permute.xlu0 %3470  ;;  %v3439_v55 = vpop.permute.xlu1 %3438 }
 0x8cf   :  { %3481 = vst.msk [vmem:[#allocation4 + $0x152] sm:$0xff] %vm3298_vm7, %v3471_v43  ;;  %3449 = vst.msk [vmem:[#allocation4 + $0x116] sm:$0xff] %vm3298_vm7, %v3439_v55  ;;  %v3685_v23 = vld [vmem:[#allocation4 + $0x98] sm:$0xff] }
 0x8d0   :  { %3486 = vst.msk [vmem:[#allocation4 + $0x8] sm:$0xff] %vm3484_vm6, %v3471_v43  ;;  %3528 = vrot.lane.b32.xlu0 %v9339_v12, %s10475_s9  ;;  %3654 = vrot.lane.b32.xlu1 %v9331_v16, %s10578_s7  ;;  %s10582_s9 = sld [smem:[#allocation29_spill]] }
 0x8d2   :  { %v3311_v18 = vpop.permute.xlu0 %3310  ;;  %v3621_v3 = vpop.permute.xlu1 %3620 }
 0x8d3   :  { %3321 = vst.msk [vmem:[#allocation4 + $0x26] sm:$0xff] %vm3298_vm7, %v3311_v18 }
 0x8d4   :  { %3631 = vst.msk [vmem:[#allocation4 + $0x116] sm:$0xff] %vm3484_vm6, %v3621_v3  ;;  %3503 = vst.msk [vmem:[#allocation4 + $0x26] sm:$0xff] %vm3484_vm6, %v3493_v56  ;;  %3656 = vrot.lane.b32.xlu0 %v9339_v12, %s10578_s7  ;;  %3538 = vrot.lane.b32.xlu1 %v9314_v33, %s10485_s28  ;;  %s10596_s7 = sld [smem:[#allocation38_spill]] }
 0x8d6   :  { %v3749_v59 = vld [vmem:[%s10582_s9 + $0x8] sm:$0xff]  ;;  %v3748_v39 = vld [vmem:[%s10582_s9] sm:$0xff]  ;;  %v3391_v24 = vpop.permute.xlu0 %3390  ;;  %v3327_v28 = vpop.permute.xlu1 %3326  ;;  %v3751_v62 = vld [vmem:[%s10582_s9 + $0x18] sm:$0xff] }
 0x8d7   :  { %3401 = vst.msk [vmem:[#allocation4 + $0xbc] sm:$0xff] %vm3298_vm7, %v3391_v24  ;;  %3337 = vst.msk [vmem:[#allocation4 + $0x44] sm:$0xff] %vm3298_vm7, %v3327_v28  ;;  %v3750_v10 = vld [vmem:[%s10582_s9 + $0x10] sm:$0xff]  ;;  %v3753_v13 = vld [vmem:[%s10582_s9 + $0x28] sm:$0xff] }
 0x8d8   :  { %3762 = vperm.xlu0 %6347, %v3749_v59   ;;  %3757 = vperm.xlu1 %6346, %v3748_v39   ;;  %v3752_v41 = vld [vmem:[%s10582_s9 + $0x20] sm:$0xff]  ;;  %v3754_v21 = vld [vmem:[%s10582_s9 + $0x30] sm:$0x3]  ;;  %v3667_v25 = vld [vmem:[#allocation4 + $0x8] sm:$0xff]  ;;  %s10599_s9 = sld [smem:[#allocation41_spill]] }
 0x8d9   :  { %v3711_v44 = vpack.c.bf16 %v3667_v25, %v3666_v14 }
 0x8da   :  { %v3573_v50 = vpop.permute.xlu0 %3572  ;;  %v3509_v29 = vpop.permute.xlu1 %3508 }
 0x8db   :  { %3583 = vst.msk [vmem:[#allocation4 + $0xbc] sm:$0xff] %vm3484_vm6, %v3573_v50  ;;  %3519 = vst.msk [vmem:[#allocation4 + $0x44] sm:$0xff] %vm3484_vm6, %v3509_v29 }
 0x8dc   :  { %3772 = vperm.xlu0 %6347, %v3751_v62   ;;  %3767 = vperm.xlu1 %6346, %v3750_v10  }
 0x8de   :  { %v3407_v38 = vpop.permute.xlu0 %3406  ;;  %v3455_v30 = vpop.permute.xlu1 %3454 }
 0x8df   :  { %3417 = vst.msk [vmem:[#allocation4 + $0xda] sm:$0xff] %vm3298_vm7, %v3407_v38  ;;  %3465 = vst.msk [vmem:[#allocation4 + $0x134] sm:$0xff] %vm3298_vm7, %v3455_v30 }
 0x8e0   :  { %3782 = vperm.xlu0 %6347, %v3753_v13   ;;  %3777 = vperm.xlu1 %6346, %v3752_v41   ;;  %v3670_v41 = vld [vmem:[#allocation4 + $0x20] sm:$0xff] }
 0x8e2   :  { %v3589_v33 = vpop.permute.xlu0 %3588  ;;  %v3637_v27 = vpop.permute.xlu1 %3636  ;;  %v3689_v30 = vld [vmem:[#allocation4 + $0xb8] sm:$0xff] }
 0x8e3   :  { %3599 = vst.msk [vmem:[#allocation4 + $0xda] sm:$0xff] %vm3484_vm6, %v3589_v33  ;;  %3647 = vst.msk [vmem:[#allocation4 + $0x134] sm:$0xff] %vm3484_vm6, %v3637_v27 }
 0x8e4   :  { %3787 = vperm.xlu1 %6346, %v3754_v21  }
 0x8e6   :  { %v3343_v48 = vpop.permute.xlu0 %3342  ;;  %v3423_v34 = vpop.permute.xlu1 %3422 }
 0x8e7   :  { %3353 = vst.msk [vmem:[#allocation4 + $0x62] sm:$0xff] %vm3298_vm7, %v3343_v48  ;;  %3433 = vst.msk [vmem:[#allocation4 + $0xf8] sm:$0xff] %vm3298_vm7, %v3423_v34 }
 0x8ea   :  { %v3525_v17 = vpop.permute.xlu0 %3524  ;;  %v3605_v60 = vpop.permute.xlu1 %3604 }
 0x8eb   :  { %3535 = vst.msk [vmem:[#allocation4 + $0x62] sm:$0xff] %vm3484_vm6, %v3525_v17  ;;  %3615 = vst.msk [vmem:[#allocation4 + $0xf8] sm:$0xff] %vm3484_vm6, %v3605_v60 }
 0x8ee   :  { %v3653_v4 = vpop.permute.xlu0 %3652  ;;  %v3377_v26 = vpop.permute.xlu1 %3376 }
 0x8ef   :  { %3663 = vst.msk [vmem:[#allocation4 + $0x152] sm:$0xff] %vm3484_vm6, %v3653_v4 }
 0x8f0   :  { %3386 = vst.msk [vmem:[#allocation4 + $0xa6] sm:$0xff] %vm3298_vm7, %v3377_v26 }
 0x8f2   :  { %v3361_v22 = vpop.permute.xlu0 %3360  ;;  %v3425_v51 = vpop.permute.xlu1 %3424 }
 0x8f3   :  { %3370 = vst.msk [vmem:[#allocation4 + $0x88] sm:$0xff] %vm3298_vm7, %v3361_v22  ;;  %3434 = vst.msk [vmem:[#allocation4 + $0x100] sm:$0xff] %vm3298_vm7, %v3425_v51  ;;  %v3700_v51 = vld [vmem:[#allocation4 + $0x110] sm:$0xff] }
 0x8f6   :  { %v3543_v16 = vpop.permute.xlu0 %3542  ;;  %v3313_v11 = vpop.permute.xlu1 %3312 }
 0x8f7   :  { %3552 = vst.msk [vmem:[#allocation4 + $0x88] sm:$0xff] %vm3484_vm6, %v3543_v16 }
 0x8f8   :  { %3322 = vst.msk [vmem:[#allocation4 + $0x2e] sm:$0xff] %vm3298_vm7, %v3313_v11 }
 0x8fa   :  { %v3473_v54 = vpop.permute.xlu0 %3472  ;;  %v3393_v58 = vpop.permute.xlu1 %3392 }
 0x8fb   :  { %3482 = vst.msk [vmem:[#allocation4 + $0x15a] sm:$0xff] %vm3298_vm7, %v3473_v54  ;;  %3402 = vst.msk [vmem:[#allocation4 + $0xc4] sm:$0xff] %vm3298_vm7, %v3393_v58 }
 0x8fc   :  { %3487 = vst.msk [vmem:[#allocation4 + $0x10] sm:$0xff] %vm3484_vm6, %v3473_v54 }
 0x8fe   :  { %v3559_v12 = vpop.permute.xlu0 %3558  ;;  %v3575_v0 = vpop.permute.xlu1 %3574  ;;  %v3683_v1 = vld [vmem:[#allocation4 + $0x88] sm:$0xff] }
 0x8ff   :  { %3568 = vst.msk [vmem:[#allocation4 + $0xa6] sm:$0xff] %vm3484_vm6, %v3559_v12  ;;  %3584 = vst.msk [vmem:[#allocation4 + $0xc4] sm:$0xff] %vm3484_vm6, %v3575_v0  ;;  %v3719_v37 = vpack.c.bf16 %v3683_v1, %v3682_v53 }
 0x901   :  { %5996 = vmatprep.subr.bf16.mxu1 %v3719_v37 }
 0x902   :  { %v3607_v32 = vpop.permute.xlu0 %3606  ;;  %v3409_v49 = vpop.permute.xlu1 %3408  ;;  %5997 = vmatpush3.bf16.msra.mxu1 %v3711_v44 }
 0x903   :  { %3616 = vst.msk [vmem:[#allocation4 + $0x100] sm:$0xff] %vm3484_vm6, %v3607_v32  ;;  %v3668_v56 = vld [vmem:[#allocation4 + $0x10] sm:$0xff] }
 0x904   :  { %3418 = vst.msk [vmem:[#allocation4 + $0xe2] sm:$0xff] %vm3298_vm7, %v3409_v49  ;;  %v3674_v49 = vld [vmem:[#allocation4 + $0x40] sm:$0xff] }
 0x906   :  { %v3495_v63 = vpop.permute.xlu0 %3494  ;;  %v3345_v31 = vpop.permute.xlu1 %3344  ;;  %v3686_v10 = vld [vmem:[#allocation4 + $0xa0] sm:$0xff] }
 0x907   :  { %3504 = vst.msk [vmem:[#allocation4 + $0x2e] sm:$0xff] %vm3484_vm6, %v3495_v63  ;;  %v3690_v37 = vld [vmem:[#allocation4 + $0xc0] sm:$0xff] }
 0x908   :  { %3354 = vst.msk [vmem:[#allocation4 + $0x6a] sm:$0xff] %vm3298_vm7, %v3345_v31 }
 0x90a   :  { %v3441_v40 = vpop.permute.xlu0 %3440  ;;  %v3527_v52 = vpop.permute.xlu1 %3526  ;;  %v3698_v17 = vld [vmem:[#allocation4 + $0x100] sm:$0xff] }
 0x90b   :  { %3450 = vst.msk [vmem:[#allocation4 + $0x11e] sm:$0xff] %vm3298_vm7, %v3441_v40  ;;  %v3693_v40 = vld [vmem:[#allocation4 + $0xd8] sm:$0xff] }
 0x90c   :  { %3536 = vst.msk [vmem:[#allocation4 + $0x6a] sm:$0xff] %vm3484_vm6, %v3527_v52 }
 0x90e   :  { %v3623_v35 = vpop.permute.xlu0 %3622  ;;  %v3363_v8 = vpop.permute.xlu1 %3362  ;;  %v3671_v62 = vld [vmem:[#allocation4 + $0x28] sm:$0xff] }
 0x90f   :  { %3632 = vst.msk [vmem:[#allocation4 + $0x11e] sm:$0xff] %vm3484_vm6, %v3623_v35  ;;  %v3713_v38 = vpack.c.bf16 %v3671_v62, %v3670_v41  ;;  %v3704_v35 = vld [vmem:[#allocation4 + $0x130] sm:$0xff] }
 0x910   :  { %3371 = vst.msk [vmem:[#allocation4 + $0x90] sm:$0x3f] %vm3302_vm5, %v3363_v8 }
 0x912   :  { %v3329_v7 = vpop.permute.xlu0 %3328  ;;  %v3545_v9 = vpop.permute.xlu1 %3544 }
 0x913   :  { %3338 = vst.msk [vmem:[#allocation4 + $0x4c] sm:$0xff] %vm3298_vm7, %v3329_v7 }
 0x914   :  { %3553 = vst.msk [vmem:[#allocation4 + $0x90] sm:$0x3f] %vm3488_vm4, %v3545_v9 }
 0x916   :  { %v3511_v19 = vpop.permute.xlu0 %3510  ;;  %v3475_v61 = vpop.permute.xlu1 %3474  ;;  %v3701_v4 = vld [vmem:[#allocation4 + $0x118] sm:$0xff] }
 0x917   :  { %3520 = vst.msk [vmem:[#allocation4 + $0x4c] sm:$0xff] %vm3484_vm6, %v3511_v19  ;;  %v3728_v54 = vpack.c.bf16 %v3701_v4, %v3700_v51  ;;  %v3746_v4 = vld [vmem:[%s10581_s27 + $0x48] sm:$0x11] }
 0x918   :  { %3483 = vst.msk [vmem:[#allocation4 + $0x162] sm:$0x3f] %vm3302_vm5, %v3475_v61  ;;  %v5911_v51 = vcombine.low %v3746_v4, %v3746_v4 }
 0x919   :  { %3489 = vst.msk [vmem:[#allocation4 + $0x18] sm:$0x3f] %vm3488_vm4, %v3475_v61 }
 0x91a   :  { %v3457_v36 = vpop.permute.xlu0 %3456  ;;  %v3561_v2 = vpop.permute.xlu1 %3560 }
 0x91b   :  { %v3684_v47 = vld [vmem:[#allocation4 + $0x90] sm:$0xff]  ;;  %3466 = vst.msk [vmem:[#allocation4 + $0x13c] sm:$0xff] %vm3298_vm7, %v3457_v36  ;;  %vm4097_vm7 = vcmask 179200  }
 0x91c   :  { %v3720_v15 = vpack.c.bf16 %v3685_v23, %v3684_v47 }
 0x91e   :  { %5998 = vmatprep.subr.bf16.mxu1 %v3720_v15  ;;  %v3639_v46 = vpop.permute.xlu0 %3638  ;;  %v3609_v42 = vpop.permute.xlu1 %3608  ;;  %v3675_v12 = vld [vmem:[#allocation4 + $0x48] sm:$0xff] }
 0x91f   :  { %3648 = vst.msk [vmem:[#allocation4 + $0x13c] sm:$0xff] %vm3484_vm6, %v3639_v46  ;;  %v3715_v31 = vpack.c.bf16 %v3675_v12, %v3674_v49 }
 0x920   :  { %v3669_v43 = vld [vmem:[#allocation4 + $0x18] sm:$0xff] }
 0x921   :  { %v3712_v55 = vpack.c.bf16 %v3669_v43, %v3668_v56 }
 0x922   :  { %v3591_v18 = vpop.permute.xlu0 %3590  ;;  %v3315_v3 = vpop.permute.xlu1 %3314 }
 0x923   :  { %5999 = vmatpush3.bf16.msra.mxu1 %v3712_v55  ;;  %3600 = vst.msk [vmem:[#allocation4 + $0xe2] sm:$0xff] %vm3484_vm6, %v3591_v18 }
 0x924   :  { %3323 = vst.msk [vmem:[#allocation4 + $0x36] sm:$0x3f] %vm3302_vm5, %v3315_v3  ;;  %v3697_v3 = vld [vmem:[#allocation4 + $0xf8] sm:$0xff] }
 0x926   :  { %v3379_v57 = vpop.permute.xlu0 %3378  ;;  %v3497_v20 = vpop.permute.xlu1 %3496  ;;  %v3705_v63 = vld [vmem:[#allocation4 + $0x138] sm:$0xff] }
 0x927   :  { %3387 = vst.msk [vmem:[#allocation4 + $0xae] sm:$0x3f] %vm3302_vm5, %v3379_v57  ;;  %v3730_v9 = vpack.c.bf16 %v3705_v63, %v3704_v35 }
 0x928   :  { %3505 = vst.msk [vmem:[#allocation4 + $0x36] sm:$0x3f] %vm3488_vm4, %v3497_v20  ;;  %3569 = vst.msk [vmem:[#allocation4 + $0xae] sm:$0x3f] %vm3488_vm4, %v3561_v2  ;;  %v3678_v20 = vld [vmem:[#allocation4 + $0x60] sm:$0xff] }
 0x92a   :  { %v3427_v59 = vpop.permute.xlu0 %3426  ;;  %v3443_v39 = vpop.permute.xlu1 %3442  ;;  %v3694_v55 = vld [vmem:[#allocation4 + $0xe0] sm:$0xff] }
 0x92b   :  { %3435 = vst.msk [vmem:[#allocation4 + $0x108] sm:$0x3f] %vm3302_vm5, %v3427_v59  ;;  %3451 = vst.msk [vmem:[#allocation4 + $0x126] sm:$0x3f] %vm3302_vm5, %v3443_v39  ;;  %v3696_v39 = vld [vmem:[#allocation4 + $0xf0] sm:$0xff] }
 0x92c   :  { %3617 = vst.msk [vmem:[#allocation4 + $0x108] sm:$0x3f] %vm3488_vm4, %v3609_v42  ;;  %v3679_v42 = vld [vmem:[#allocation4 + $0x68] sm:$0xff] }
 0x92d   :  { %v3717_v59 = vpack.c.bf16 %v3679_v42, %v3678_v20 }
 0x92e   :  { %v3395_v24 = vpop.permute.xlu0 %3394  ;;  %v3625_v28 = vpop.permute.xlu1 %3624 }
 0x92f   :  { %3403 = vst.msk [vmem:[#allocation4 + $0xcc] sm:$0x3f] %vm3302_vm5, %v3395_v24  ;;  %v3687_v50 = vld [vmem:[#allocation4 + $0xa8] sm:$0xff]  ;;  %v3688_v29 = vld [vmem:[#allocation4 + $0xb0] sm:$0xff]  ;;  %v3673_v34 = vld [vmem:[#allocation4 + $0x38] sm:$0xff]  ;;  %v3726_v24 = vpack.c.bf16 %v3697_v3, %v3696_v39 }
 0x930   :  { %3633 = vst.msk [vmem:[#allocation4 + $0x126] sm:$0x3f] %vm3488_vm4, %v3625_v28  ;;  %v3721_v13 = vpack.c.bf16 %v3687_v50, %v3686_v10  ;;  %v3722_v27 = vpack.c.bf16 %v3689_v30, %v3688_v29  ;;  %v3672_v48 = vld [vmem:[#allocation4 + $0x30] sm:$0xff]  ;;  %v6427_v30 = vld [vmem:[%s10581_s27] ss:$12 sps:$4 sm:$0xff]  }
 0x931   :  { %v3714_v22 = vpack.c.bf16 %v3673_v34, %v3672_v48  ;;  %v3708_v28 = vld [vmem:[#allocation4 + $0x150] sm:$0xff]  ;;  %v6438_v48 = vld [vmem:[%s10581_s27 + $0x38] ss:$12 sps:$4 sm:$0xff]  }
 0x932   :  { %v3577_v21 = vpop.permute.xlu0 %3576  ;;  %v3331_v33 = vpop.permute.xlu1 %3330  ;;  %6000 = vmatprep.subr.bf16.mxu1 %v3721_v13  ;;  %v6434_v34 = vld [vmem:[%s10581_s27 + $0x18] ss:$12 sps:$4 sm:$0xff]  }
 0x933   :  { %3585 = vst.msk [vmem:[#allocation4 + $0xcc] sm:$0x3f] %vm3488_vm4, %v3577_v21  ;;  %6001 = vmatpush3.bf16.msra.mxu1 %v3713_v38  ;;  %v3699_v60 = vld [vmem:[#allocation4 + $0x108] sm:$0xff] }
 0x934   :  { %3339 = vst.msk [vmem:[#allocation4 + $0x54] sm:$0x3f] %vm3302_vm5, %v3331_v33  ;;  %6002 = vmatprep.subr.bf16.mxu1 %v3722_v27  ;;  %v3727_v26 = vpack.c.bf16 %v3699_v60, %v3698_v17  ;;  %v6431_v33 = vld [vmem:[%s10581_s27 + $0x20] ss:$12 sps:$4 sm:$0xff]   ;;  %v6432_v27 = vld [vmem:[%s10581_s27 + $0x1c] ss:$12 sps:$4 sm:$0xff]  }
 0x935   :  { %v6435_v17 = vld [vmem:[%s10581_s27 + $0x34] ss:$12 sps:$4 sm:$0xff]   ;;  %v6439_v60 = vld [vmem:[%s10581_s27 + $0x50] ss:$0 sps:$4 sm:$0x11]  }
 0x936   :  { %v3411_v16 = vpop.permute.xlu0 %3410  ;;  %6066 = vmatprep.subr.bf16.mxu0 %v3727_v26  ;;  %v3513_v11 = vpop.permute.xlu1 %3512 }
 0x937   :  { %3419 = vst.msk [vmem:[#allocation4 + $0xea] sm:$0x3f] %vm3302_vm5, %v3411_v16  ;;  %6003 = vmatpush3.bf16.msra.mxu1 %v3714_v22  ;;  %6067 = vmatpush3.bf16.msra.mxu0 %v3727_v26  ;;  %v3702_v58 = vld [vmem:[#allocation4 + $0x120] sm:$0xff]  ;;  %v3703_v25 = vld [vmem:[#allocation4 + $0x128] sm:$0xff]  ;;  %v6437_v26 = vld [vmem:[%s10581_s27 + $0x30] ss:$12 sps:$4 sm:$0xff]   ;;  %v5912_v22 = vcombine.high %v3746_v4, %v3746_v4 }
 0x938   :  { %3521 = vst.msk [vmem:[#allocation4 + $0x54] sm:$0x3f] %vm3488_vm4, %v3513_v11  ;;  %6068 = vmatprep.subr.bf16.mxu0 %v3728_v54  ;;  %v3729_v1 = vpack.c.bf16 %v3703_v25, %v3702_v58  ;;  %v4094_v16 = vld [vmem:[%s10585_s1] sm:$0xff]  ;;  %v4095_v11 = vld [vmem:[%s10585_s1 + $0x8] sm:$0xff]  ;;  %v4096_v58 = vld [vmem:[%s10585_s1 + $0x10] sm:$0x3f] }
 0x93a   :  { %v3641_v0 = vpop.permute.xlu0 %3640  ;;  %v3459_v53 = vpop.permute.xlu1 %3458  ;;  %v3691_v14 = vld [vmem:[#allocation4 + $0xc8] sm:$0xff]  ;;  %v3692_v44 = vld [vmem:[#allocation4 + $0xd0] sm:$0xff] }
 0x93b   :  { %3467 = vst.msk [vmem:[#allocation4 + $0x144] sm:$0x3f] %vm3302_vm5, %v3459_v53  ;;  %6069 = vmatpush3.bf16.msra.mxu0 %v3728_v54  ;;  %v3723_v32 = vpack.c.bf16 %v3691_v14, %v3690_v37  ;;  %v3724_v52 = vpack.c.bf16 %v3693_v40, %v3692_v44  ;;  %v6279_v54 = vpack.c.bf16 %v4095_v11, %v4094_v16 }
 0x93c   :  { %3649 = vst.msk [vmem:[#allocation4 + $0x144] sm:$0x3f] %vm3488_vm4, %v3641_v0  ;;  %6070 = vmatprep.subr.bf16.mxu0 %v3729_v1 }
 0x93d   :  { %6004 = vmatprep.subr.bf16.mxu1 %v3723_v32 }
 0x93e   :  { %v3347_v8 = vpop.permute.xlu0 %3346  ;;  %v3593_v7 = vpop.permute.xlu1 %3592  ;;  %6005 = vmatpush3.bf16.msra.mxu1 %v3715_v31 }
 0x93f   :  { %v3676_v19 = vld [vmem:[#allocation4 + $0x50] sm:$0xff]  ;;  %v3677_v61 = vld [vmem:[#allocation4 + $0x58] sm:$0xff]  ;;  %3355 = vst.msk [vmem:[#allocation4 + $0x72] sm:$0x3f] %vm3302_vm5, %v3347_v8  ;;  %6006 = vmatprep.subr.bf16.mxu1 %v3724_v52  ;;  %6071 = vmatpush3.bf16.msra.mxu0 %v3729_v1  ;;  %vm10591_vm5 = vcmask 1040384  }
 0x940   :  { %3601 = vst.msk [vmem:[#allocation4 + $0xea] sm:$0x3f] %vm3488_vm4, %v3593_v7  ;;  %v3716_v36 = vpack.c.bf16 %v3677_v61, %v3676_v19  ;;  %6072 = vmatprep.subr.bf16.mxu0 %v3730_v9 }
 0x942   :  { %v3529_v2 = vpop.permute.xlu0 %3528  ;;  %v3655_v47 = vpop.permute.xlu1 %3654  ;;  %6007 = vmatpush3.bf16.msra.mxu1 %v3716_v36 }
 0x943   :  { %3537 = vst.msk [vmem:[#allocation4 + $0x72] sm:$0x3f] %vm3488_vm4, %v3529_v2  ;;  %6073 = vmatpush3.bf16.msra.mxu0 %v3730_v9  ;;  %v3706_v23 = vld [vmem:[#allocation4 + $0x140] sm:$0xff]  ;;  %v3707_v15 = vld [vmem:[#allocation4 + $0x148] sm:$0xff] }
 0x944   :  { %3664 = vst.msk [vmem:[#allocation4 + $0x15a] sm:$0xff] %vm3484_vm6, %v3655_v47  ;;  %v3731_v46 = vpack.c.bf16 %v3707_v15, %v3706_v23 }
 0x946   :  { %v3657_v56 = vpop.permute.xlu0 %3656  ;;  %6074 = vmatprep.subr.bf16.mxu0 %v3731_v46  ;;  %v3539_v43 = vpop.permute.xlu1 %3538 }
 0x947   :  { %v3695_v18 = vld [vmem:[#allocation4 + $0xe8] sm:$0xff]  ;;  %3665 = vst.msk [vmem:[#allocation4 + $0x162] sm:$0x3f] %vm3488_vm4, %v3657_v56  ;;  %6075 = vmatpush3.bf16.msra.mxu0 %v3731_v46  ;;  %vm4506_vm4 = vcmask 523264  }
 0x948   :  { %3550 = vst.msk [vmem:[#allocation4 + $0x78] sm:$0xff] %vm3484_vm6, %v3539_v43  ;;  %v3725_v57 = vpack.c.bf16 %v3695_v18, %v3694_v55  ;;  %vm10592_vm6 = vmmov %vm10591_vm5 }
 0x94a   :  { %6008 = vmatprep.subr.bf16.mxu1 %v3725_v57  ;;  %v3680_v50 = vld [vmem:[#allocation4 + $0x70] sm:$0xff] }
 0x94b   :  { %6009 = vmatpush3.bf16.msra.mxu1 %v3717_v59  ;;  %v3709_v62 = vld [vmem:[#allocation4 + $0x158] sm:$0xff] }
 0x94c   :  { %6010 = vmatprep.subr.bf16.mxu1 %v3726_v24  ;;  %v3732_v10 = vpack.c.bf16 %v3709_v62, %v3708_v28 }
 0x94e   :  { %6076 = vmatprep.subr.bf16.mxu0 %v3732_v10  ;;  %v3710_v13 = vld [vmem:[#allocation4 + $0x160] sm:$0xff] }
 0x94f   :  { %6077 = vmatpush3.bf16.msra.mxu0 %v3732_v10  ;;  %v3681_v29 = vld [vmem:[#allocation4 + $0x78] sm:$0xff]  ;;  %v3733_v38 = vpack.c.bf16 %v3710_v13, %v3710_v13 }
 0x950   :  { %v3718_v41 = vpack.c.bf16 %v3681_v29, %v3680_v50 }
 0x951   :  { %6317 = vmatprep.subr.msk.bf16.mxu0 %vm10583_vm2, %v3733_v38  ;;  %v3859_v21 = vsel %vm10584_vm0, %v3733_v38, 0  ;;  %vm4575_vm2 = vcmask 517120   ;;  %vm4658_vm0 = vcmask 519170  }
 0x952   :  { %6011 = vmatpush3.bf16.msra.mxu1 %v3718_v41 }
 0x953   :  { %6079 = vmatpush3.bf16.msra.mxu0 %v3859_v21 }
 0x954   :  { %6278 = vmatprep.subr.bf16.mxu0 %v6724_v45 }
 0x955   :  { %3894 = vmatmul.mubr.bf16.vlgmr.msra.gmra.mrb[24].mxu1 %v6427_v30 }
 0x956   :  { %6081 = vmatmul.mubr.msk.bf16.vlgmr.msra.gmra.mrb[16].mxu0 %vm3845_vm14, %v6431_v33  ;;  %3901 = vmatprep.mubr.bf16.mxu1 %v6432_v27 }
 0x957   :  { %6084 = vmatprep.mubr.msk.bf16.mxu0 %vm3845_vm14, %v6438_v48  ;;  %6280 = vmatpush3.bf16.msra.mxu0 %v6279_v54  ;;  %v3758_v25 = vpop.permute.xlu1 %3757  ;;  %v3763_v40 = vpop.permute.xlu0 %3762 }
 0x958   :  { %6092 = vmatprep.subr.mxu0 %v6725_v6 }
 0x95b   :  { %6093 = vmatpush3.msk.msra.mxu0 %vm10586_vm1, %v4096_v58  ;;  %v3768_v8 = vpop.permute.xlu1 %3767  ;;  %v3773_v57 = vpop.permute.xlu0 %3772  ;;  %vm4742_vm1 = vcmask 521220  }
 0x95d   :  { %3902 = vmatmul.mubr.bf16.gmra.mrb[28].mxu1 %v6434_v34 }
 0x95e   :  { %3909 = vmatprep.mubr.bf16.mxu1 %v6435_v17  ;;  %6085 = vmatmul.mubr.msk.bf16.gmra.mrb[20].mxu0 %vm3845_vm14, %v6439_v60  ;;  %vm4407_vm14 = vcmask 408576  }
 0x95f   :  { %6094 = vmatprep.mubr.msk.f32.mxu0 %vm6726_vm12, %v6725_v6  ;;  %v3778_v41 = vpop.permute.xlu1 %3777  ;;  %v3783_v27 = vpop.permute.xlu0 %3782 }
 0x965   :  { %3910 = vmatmul.mubr.bf16.gmra.mrb[32].mxu1 %v6437_v26 }
 0x966   :  { %3917 = vmatprep.mubr.bf16.mxu1 %v5912_v22 }
 0x96d   :  { %3918 = vmatmul.mubr.bf16.gmra.mrb[36].mxu1 %v5911_v51 }
 0x96e   :  { %4449 = vmatprep.mubr.bf16.mxu1 %v6719_v5 }
 0xa28   :  { %v6012_v12 = vpop.f32.mrb[24].mxu1 }
 0xa29   :  { %v6013_v0 = vpop.f32.mrb[25].mxu1  ;;  %v6082_v53 = vpop.f32.mrb[16].mxu0 }
 0xa2a   :  { %v6014_v1 = vadd.f32 %v6013_v0, %v6012_v12  ;;  %v6015_v37 = vpop.f32.mrb[26].mxu1  ;;  %v3959_v14 = vpop.f32.mrb[17].mxu0 }
 0xa2b   :  { %v6016_v44 = vpop.f32.mrb[27].mxu1  ;;  %v6083_v32 = vpop.f32.mrb[18].mxu0 }
 0xa2c   :  { %v6017_v49 = vadd.f32 %v6016_v44, %v6015_v37  ;;  %v3896_v63 = vadd.f32 %v6014_v1, %v3758_v25  ;;  %v3962_v31 = vpop.f32.mrb[19].mxu0 }
 0xa2e   :  { %v3960_v52 = vadd.f32 %v3959_v14, %v3896_v63  ;;  %v3899_v35 = vadd.f32 %v6017_v49, %v3763_v40 }
 0xa30   :  { %v3996_v7 = vmin.f32 %v3960_v52, 0.0  ;;  %v9646_v9 = vadd.f32 %v3962_v31, %v3899_v35  ;;  %v6018_v19 = vpop.f32.mrb[28].mxu1  ;;  %vm3989_vm15 = vcmp.gt.f32.partialorder %v3960_v52, 0.0 }
 0xa31   :  { %v6019_v61 = vpop.f32.mrb[29].mxu1  ;;  %v6086_v36 = vpop.f32.mrb[20].mxu0 }
 0xa32   :  { %v4003_v2 = vmul.f32 1.442695, %v3996_v7  ;;  %v3997_v47 = vmin.f32 %v9646_v9, 0.0  ;;  %v6020_v23 = vadd.f32 %v6019_v61, %v6018_v19  ;;  %v6021_v15 = vpop.f32.mrb[30].mxu1  ;;  %v3975_v46 = vpop.f32.mrb[21].mxu0  ;;  %vm3990_vm13 = vcmp.gt.f32.partialorder %v9646_v9, 0.0 }
 0xa33   :  { %v6022_v42 = vpop.f32.mrb[31].mxu1  ;;  %v6087_v56 = vpop.f32.mrb[22].mxu0 }
 0xa34   :  { %6559 = vpow2.f32 %v4003_v2  ;;  %v4005_v43 = vmul.f32 1.442695, %v3997_v47  ;;  %v3904_v55 = vadd.f32 %v6020_v23, %v3768_v8  ;;  %v6023_v18 = vadd.f32 %v6022_v42, %v6021_v15  ;;  %v3978_v3 = vpop.f32.mrb[23].mxu0  ;;  %v4223_v42 = vld [vmem:[%s10587_s16 + $0x8] sm:$0xff]  ;;  %v4222_v56 = vld [vmem:[%s10587_s16] sm:$0xff] }
 0xa36   :  { %6561 = vpow2.f32 %v4005_v43  ;;  %v3968_v20 = vadd.f32 %v6082_v53, %v3904_v55  ;;  %v3907_v59 = vadd.f32 %v6023_v18, %v3773_v57  ;;  %v3788_v53 = vpop.permute.xlu1 %3787  ;;  %v4224_v43 = vld [vmem:[%s10587_s16 + $0x10] sm:$0xff]  ;;  %v4225_v18 = vld [vmem:[%s10587_s16 + $0x18] sm:$0xff]  ;;  %v4226_v57 = vld [vmem:[%s10587_s16 + $0x20] sm:$0xff] }
 0xa38   :  { %v3998_v39 = vmin.f32 %v3968_v20, 0.0  ;;  %v3971_v24 = vadd.f32 %v6083_v32, %v3907_v59  ;;  %v6024_v28 = vpop.f32.mrb[32].mxu1  ;;  %vm3991_vm11 = vcmp.gt.f32.partialorder %v3968_v20, 0.0  ;;  %v4227_v59 = vld [vmem:[%s10587_s16 + $0x28] sm:$0xff] }
 0xa39   :  { %v6025_v62 = vpop.f32.mrb[33].mxu1 }
 0xa3a   :  { %v4007_v10 = vmul.f32 1.442695, %v3998_v39  ;;  %v3999_v50 = vmin.f32 %v3971_v24, 0.0  ;;  %v6026_v29 = vadd.f32 %v6025_v62, %v6024_v28  ;;  %v6027_v13 = vpop.f32.mrb[34].mxu1  ;;  %vm3992_vm10 = vcmp.gt.f32.partialorder %v3971_v24, 0.0 }
 0xa3b   :  { %v6028_v38 = vpop.f32.mrb[35].mxu1 }
 0xa3c   :  { %6563 = vpow2.f32 %v4007_v10  ;;  %v4009_v30 = vmul.f32 1.442695, %v3999_v50  ;;  %v6029_v21 = vadd.f32 %v6028_v38, %v6027_v13  ;;  %v3912_v33 = vadd.f32 %v6026_v29, %v3778_v41 }
 0xa3e   :  { %v6560_v48 = vpop.eup %6559  ;;  %6565 = vpow2.f32 %v4009_v30  ;;  %v3976_v34 = vadd.f32 %v3975_v46, %v3912_v33  ;;  %v3915_v17 = vadd.f32 %v6029_v21, %v3783_v27 }
 0xa3f   :  { %v5918_v60 = vadd.f32 -1.0, %v6560_v48 }
 0xa40   :  { %v6562_v4 = vpop.eup %6561  ;;  %v4000_v26 = vmin.f32 %v3976_v34, 0.0  ;;  %v3979_v22 = vadd.f32 %v3978_v3, %v3915_v17  ;;  %v6030_v51 = vpop.f32.mrb[36].mxu1  ;;  %vm3993_vm9 = vcmp.gt.f32.partialorder %v3976_v34, 0.0 }
 0xa41   :  { %v6031_v16 = vpop.f32.mrb[37].mxu1  ;;  %v9651_v11 = vsel %vm3989_vm15, %v3960_v52, %v5918_v60  ;;  %v5919_v54 = vadd.f32 -1.0, %v6562_v4  ;;  %vm4826_vm15 = vcmask 523270  }
 0xa42   :  { %v4011_v58 = vmul.f32 1.442695, %v4000_v26  ;;  %v4001_v25 = vmin.f32 %v3979_v22, 0.0  ;;  %v6032_v12 = vadd.f32 %v6031_v16, %v6030_v51  ;;  %v6033_v0 = vpop.f32.mrb[38].mxu1  ;;  %4066 = vrot.lane.b32.xlu1 %v9651_v11, %s10476_s11  ;;  %4038 = vrot.lane.b32.xlu0 %v9651_v11, %s10492_s25  ;;  %vm3994_vm8 = vcmp.gt.f32.partialorder %v3979_v22, 0.0 }
 0xa43   :  { %v6034_v1 = vpop.f32.mrb[39].mxu1  ;;  %v9659_v44 = vsel %vm3990_vm13, %v9646_v9, %v5919_v54 }
 0xa44   :  { %6567 = vpow2.f32 %v4011_v58  ;;  %v4013_v37 = vmul.f32 1.442695, %v4001_v25  ;;  %v3920_v14 = vadd.f32 %v6032_v12, %v3788_v53 }
 0xa46   :  { %v6564_v32 = vpop.eup %6563  ;;  %6569 = vpow2.f32 %v4013_v37  ;;  %v3984_v49 = vadd.f32 %v6086_v36, %v3920_v14  ;;  %4068 = vrot.lane.b32.xlu1 %v9659_v44, %s10476_s11  ;;  %4040 = vrot.lane.b32.xlu0 %v9659_v44, %s10492_s25 }
 0xa47   :  { %v5920_v63 = vadd.f32 -1.0, %v6564_v32  ;;  %v6444_v32 = vld [vmem:[%s10589_s15 + $0x4] ss:$8 sps:$4 sm:$0xff]  }
 0xa48   :  { %v6566_v31 = vpop.eup %6565  ;;  %v4002_v40 = vmin.f32 %v3984_v49, 0.0  ;;  %vm3995_vm3 = vcmp.gt.f32.partialorder %v3984_v49, 0.0  ;;  %4417 = vmatprep.subr.bf16.mxu1 %v6444_v32 }
 0xa49   :  { %v9665_v52 = vsel %vm3991_vm11, %v3968_v20, %v5920_v63  ;;  %v5921_v35 = vadd.f32 -1.0, %v6566_v31  ;;  %v9778_v63 = vld [vmem:[%s10590_s22] ss:$8 sps:$4 sm:$0xff]   ;;  %v6450_v31 = vld [vmem:[%s10589_s15 + $0x14] ss:$8 sps:$4 sm:$0xff]  }
 0xa4a   :  { %v4015_v8 = vmul.f32 1.442695, %v4002_v40  ;;  %4070 = vrot.lane.b32.xlu1 %v9665_v52, %s10476_s11  ;;  %4042 = vrot.lane.b32.xlu0 %v9665_v52, %s10492_s25  ;;  %v9787_v40 = vld [vmem:[%s10590_s22 + $0x14] ss:$8 sps:$4 sm:$0xff]  }
 0xa4b   :  { %v9671_v7 = vsel %vm3992_vm10, %v3971_v24, %v5921_v35  ;;  %v4228_v24 = vld [vmem:[%s10587_s16 + $0x30] sm:$0x3]  ;;  %s10593_s16 = sld [smem:[#allocation35_spill]] }
 0xa4c   :  { %6571 = vpow2.f32 %v4015_v8  ;;  %v9796_v35 = vld [vmem:[%s10590_s22 + $0x10] ss:$8 sps:$4 sm:$0xff]   ;;  %v6456_v8 = vld [vmem:[%s10589_s15 + $0x24] ss:$8 sps:$4 sm:$0xff]  }
 0xa4e   :  { %v6568_v9 = vpop.eup %6567  ;;  %4072 = vrot.lane.b32.xlu1 %v9671_v7, %s10476_s11  ;;  %4044 = vrot.lane.b32.xlu0 %v9671_v7, %s10492_s25 }
 0xa4f   :  { %v5922_v19 = vadd.f32 -1.0, %v6568_v9  ;;  %v4359_v9 = vld [vmem:[%s10589_s15 + $0x30] sm:$0x11] }
 0xa50   :  { %v6570_v61 = vpop.eup %6569 }
 0xa51   :  { %v9677_v36 = vsel %vm3993_vm9, %v3976_v34, %v5922_v19  ;;  %v5923_v2 = vadd.f32 -1.0, %v6570_v61  ;;  %v6454_v19 = vld [vmem:[%s10589_s15 + $0x20] ss:$8 sps:$4 sm:$0xff]  }
 0xa52   :  { %4074 = vrot.lane.b32.xlu1 %v9677_v36, %s10476_s11  ;;  %4046 = vrot.lane.b32.xlu0 %v9677_v36, %s10492_s25  ;;  %v9817_v61 = vld [vmem:[%s10590_s22 + $0x20] ss:$8 sps:$4 sm:$0xff]  }
 0xa53   :  { %v9683_v47 = vsel %vm3994_vm8, %v3979_v22, %v5923_v2  ;;  %v5939_v2 = vcombine.low %v4359_v9, %v4359_v9 }
 0xa56   :  { %v6572_v23 = vpop.eup %6571  ;;  %4076 = vrot.lane.b32.xlu1 %v9683_v47, %s10476_s11  ;;  %4048 = vrot.lane.b32.xlu0 %v9683_v47, %s10492_s25 }
 0xa57   :  { %v5924_v15 = vadd.f32 -1.0, %v6572_v23  ;;  %v9829_v23 = vld [vmem:[%s10590_s22 + $0x30] ss:$8 sps:$4 sm:$0xff]  }
 0xa59   :  { %v9689_v46 = vsel %vm3995_vm3, %v3984_v49, %v5924_v15  ;;  %v9773_v49 = vld [vmem:[%s10590_s22 + $0x4] ss:$8 sps:$4 sm:$0xff]   ;;  %v4412_v15 = vsel %vm10592_vm6, %v5939_v2, 0  ;;  %v4360_v2 = vld [vmem:[%s10593_s16] sm:$0x3] }
 0xa5a   :  { %4078 = vrot.lane.b32.xlu1 %v9689_v46, %s10476_s11  ;;  %4050 = vrot.lane.b32.xlu0 %v9689_v46, %s10492_s25  ;;  %s10588_s11 = sld [smem:[#allocation31_spill]] }
 0xa5b   :  { %4510 = vmatprep.subr.bf16.mxu0 %v9773_v49 }
 0xa5e   :  { %4236 = vperm.xlu1 %6346, %v4223_v42   ;;  %4231 = vperm.xlu0 %6347, %v4222_v56  }
 0xa60   :  { %v4271_v55 = vld [vmem:[%s10588_s11] sm:$0xff]  ;;  %v4272_v3 = vld [vmem:[%s10588_s11 + $0x8] sm:$0xff]  ;;  %v4273_v20 = vld [vmem:[%s10588_s11 + $0x10] sm:$0xff] }
 0xa61   :  { %v4274_v39 = vld [vmem:[%s10588_s11 + $0x18] sm:$0xff]  ;;  %v4275_v28 = vld [vmem:[%s10588_s11 + $0x20] sm:$0xff]  ;;  %v4277_v62 = vld [vmem:[%s10588_s11 + $0x30] sm:$0x3] }
 0xa62   :  { %4241 = vperm.xlu1 %6346, %v4224_v43   ;;  %4280 = vperm.xlu0 %6347, %v4271_v55   ;;  %v4276_v10 = vld [vmem:[%s10588_s11 + $0x28] sm:$0xff] }
 0xa66   :  { %4246 = vperm.xlu1 %6346, %v4225_v18   ;;  %4285 = vperm.xlu0 %6347, %v4272_v3  }
 0xa6a   :  { %4251 = vperm.xlu1 %6346, %v4226_v57   ;;  %4290 = vperm.xlu0 %6347, %v4273_v20  }
 0xa6e   :  { %4256 = vperm.xlu1 %6346, %v4227_v59   ;;  %4295 = vperm.xlu0 %6347, %v4274_v39  }
 0xa72   :  { %4261 = vperm.xlu1 %6346, %v4228_v24   ;;  %4300 = vperm.xlu0 %6347, %v4275_v28  }
 0xa76   :  { %4310 = vperm.xlu1 %6346, %v4277_v62   ;;  %4305 = vperm.xlu0 %6347, %v4276_v10  }
 0xab4   :  { %v4067_v50 = vpop.permute.xlu1 %4066  ;;  %v4039_v29 = vpop.permute.xlu0 %4038 }
 0xab5   :  { %v4059_v13 = vmax.f32 %v9651_v11, %v4039_v29 }
 0xab7   :  { %v4087_v41 = vmax.f32 %v4059_v13, %v4067_v50 }
 0xab8   :  { %v4069_v38 = vpop.permute.xlu1 %4068  ;;  %v4041_v30 = vpop.permute.xlu0 %4040 }
 0xab9   :  { %v4060_v21 = vmax.f32 %v9659_v44, %v4041_v30  ;;  %6095 = vmatmul.mubr.msk.f32.vlgmr.msra.gmra.mrb[24].mxu0 %vm4097_vm7, %v4087_v41  ;;  %v6442_v44 = vld [vmem:[%s10589_s15] ss:$8 sps:$4 sm:$0xff]  }
 0xaba   :  { %6097 = vmatprep.mubr.msk.f32.mxu0 %vm6726_vm12, %v6725_v6  ;;  %4418 = vmatpush1.bf16.msra.mxu1 %v6442_v44 }
 0xabb   :  { %v4088_v33 = vmax.f32 %v4060_v21, %v4069_v38  ;;  %4511 = vmatpush1.bf16.msra.mxu0 %v9778_v63  ;;  %4419 = vmatprep.subr.bf16.mxu1 %v6450_v31 }
 0xabc   :  { %v4071_v27 = vpop.permute.xlu1 %4070  ;;  %v4043_v48 = vpop.permute.xlu0 %4042  ;;  %4512 = vmatprep.subr.bf16.mxu0 %v9787_v40 }
 0xabd   :  { %v4061_v34 = vmax.f32 %v9665_v52, %v4043_v48  ;;  %6098 = vmatmul.mubr.msk.f32.gmra.mrb[26].mxu0 %vm4097_vm7, %v4088_v33  ;;  %v6448_v52 = vld [vmem:[%s10589_s15 + $0x10] ss:$8 sps:$4 sm:$0xff]  }
 0xabe   :  { %6100 = vmatprep.mubr.msk.f32.mxu0 %vm6726_vm12, %v6725_v6  ;;  %4420 = vmatpush1.bf16.msra.mxu1 %v6448_v52 }
 0xabf   :  { %v4089_v17 = vmax.f32 %v4061_v34, %v4071_v27  ;;  %4513 = vmatpush1.bf16.msra.mxu0 %v9796_v35  ;;  %4421 = vmatprep.subr.bf16.mxu1 %v6456_v8 }
 0xac0   :  { %v4073_v60 = vpop.permute.xlu1 %4072  ;;  %v4045_v4 = vpop.permute.xlu0 %4044 }
 0xac1   :  { %v4062_v26 = vmax.f32 %v9671_v7, %v4045_v4  ;;  %6101 = vmatmul.mubr.msk.f32.gmra.mrb[28].mxu0 %vm4097_vm7, %v4089_v17  ;;  %v9805_v7 = vld [vmem:[%s10590_s22 + $0x24] ss:$8 sps:$4 sm:$0xff]  }
 0xac2   :  { %6103 = vmatprep.mubr.msk.f32.mxu0 %vm6726_vm12, %v6725_v6  ;;  %4514 = vmatprep.subr.bf16.mxu0 %v9805_v7 }
 0xac3   :  { %v4090_v22 = vmax.f32 %v4062_v26, %v4073_v60  ;;  %4422 = vmatpush1.bf16.msra.mxu1 %v6454_v19  ;;  %4515 = vmatpush1.bf16.msra.mxu0 %v9817_v61 }
 0xac4   :  { %v4075_v51 = vpop.permute.xlu1 %4074  ;;  %v4047_v16 = vpop.permute.xlu0 %4046 }
 0xac5   :  { %v4063_v11 = vmax.f32 %v9677_v36, %v4047_v16  ;;  %6104 = vmatmul.mubr.msk.f32.gmra.mrb[30].mxu0 %vm4097_vm7, %v4090_v22  ;;  %v5940_v36 = vcombine.high %v4359_v9, %v4359_v9  ;;  %v4362_v9 = vlaneseq }
 0xac6   :  { %6106 = vmatprep.mubr.msk.f32.mxu0 %vm6726_vm12, %v6725_v6 }
 0xac7   :  { %v4091_v54 = vmax.f32 %v4063_v11, %v4075_v51  ;;  %5941 = vmatprep.subr.msk.bf16.mxu1 %vm10591_vm5, %v5940_v36  ;;  %v4363_v19 = vshrl.u32 %v4362_v9, 7 }
 0xac8   :  { %v4077_v58 = vpop.permute.xlu1 %4076  ;;  %v4049_v25 = vpop.permute.xlu0 %4048  ;;  %4424 = vmatpush1.bf16.msra.mxu1 %v4412_v15 }
 0xac9   :  { %v4064_v12 = vmax.f32 %v9683_v47, %v4049_v25  ;;  %6107 = vmatmul.mubr.msk.f32.gmra.mrb[32].mxu0 %vm4097_vm7, %v4091_v54  ;;  %v9823_v47 = vld [vmem:[%s10590_s22 + $0x34] ss:$8 sps:$4 sm:$0xff]   ;;  %4584 = vmatprep.subr.bf16.mxu1 %v9773_v49  ;;  %v9855_v36 = vsub.s32 0, %v4363_v19  ;;  %v9860_v15 = vsub.s32 1, %v4363_v19  ;;  %s10594_s22 = sld [smem:[#allocation36_spill]] }
 0xaca   :  { %6109 = vmatprep.mubr.msk.f32.mxu0 %vm6726_vm12, %v6725_v6  ;;  %4516 = vmatprep.subr.bf16.mxu0 %v9823_v47 }
 0xacb   :  { %v4092_v0 = vmax.f32 %v4064_v12, %v4077_v58  ;;  %4517 = vmatpush1.bf16.msra.mxu0 %v9829_v23 }
 0xacc   :  { %v4051_v53 = vpop.permute.xlu0 %4050  ;;  %v4079_v37 = vpop.permute.xlu1 %4078  ;;  %4668 = vmatprep.subr.bf16.mxu0 %v9773_v49 }
 0xacd   :  { %v4065_v1 = vmax.f32 %v9689_v46, %v4051_v53  ;;  %6110 = vmatmul.mubr.msk.f32.gmra.mrb[34].mxu0 %vm4097_vm7, %v4092_v0 }
 0xace   :  { %6112 = vmatprep.mubr.msk.f32.mxu0 %vm6726_vm12, %v6725_v6 }
 0xacf   :  { %v4093_v14 = vmax.f32 %v4065_v1, %v4079_v37 }
 0xad1   :  { %6113 = vmatmul.mubr.msk.f32.gmra.mrb[36].mxu0 %vm4097_vm7, %v4093_v14 }
 0xad2   :  { %4542 = vmatprep.mubr.bf16.mxu0 %v6719_v5 }
 0xad5   :  { %4543 = vmatmul.mubr.bf16.vlgmr.msra.gmra.mrb[40].mxu0 %v6719_v5 }
 0xad6   :  { %4669 = vmatpush1.bf16.msra.mxu0 %v9778_v63  ;;  %4700 = vmatprep.mubr.bf16.mxu0 %v6719_v5 }
 0xad7   :  { %4670 = vmatprep.subr.bf16.mxu0 %v9787_v40 }
 0xada   :  { %4671 = vmatpush1.bf16.msra.mxu0 %v9796_v35 }
 0xadb   :  { %4672 = vmatprep.subr.bf16.mxu0 %v9805_v7 }
 0xadd   :  { %v4232_v46 = vpop.permute.xlu0 %4231  ;;  %v4237_v42 = vpop.permute.xlu1 %4236 }
 0xade   :  { %4673 = vmatpush1.bf16.msra.mxu0 %v9817_v61 }
 0xadf   :  { %4674 = vmatprep.subr.bf16.mxu0 %v9823_v47 }
 0xae1   :  { %v4281_v56 = vpop.permute.xlu0 %4280  ;;  %v4242_v43 = vpop.permute.xlu1 %4241 }
 0xae2   :  { %4675 = vmatpush1.bf16.msra.mxu0 %v9829_v23 }
 0xae5   :  { %v4286_v55 = vpop.permute.xlu0 %4285  ;;  %v4247_v20 = vpop.permute.xlu1 %4246 }
 0xae9   :  { %v4291_v39 = vpop.permute.xlu0 %4290  ;;  %v4252_v50 = vpop.permute.xlu1 %4251 }
 0xaed   :  { %v4296_v38 = vpop.permute.xlu0 %4295  ;;  %v4257_v48 = vpop.permute.xlu1 %4256 }
 0xaf1   :  { %v4301_v17 = vpop.permute.xlu0 %4300  ;;  %v4262_v51 = vpop.permute.xlu1 %4261 }
 0xaf5   :  { %v4306_v58 = vpop.permute.xlu0 %4305  ;;  %v4311_v1 = vpop.permute.xlu1 %4310 }
 0xb8c   :  { %v4188_v18 = vpop.f32.mrb[24].mxu0 }
 0xb8d   :  { %v4264_v3 = vmul.f32 %v4232_v46, %v4188_v18  ;;  %v6096_v57 = vpop.f32.mrb[25].mxu0  ;;  %v4365_v46 = vrot.slane %v4360_v2, %v9855_v36 }
 0xb8f   :  { %v4313_v59 = vadd.f32 %v4281_v56, %v4264_v3 }
 0xb90   :  { %v4193_v24 = vpop.f32.mrb[26].mxu0 }
 0xb91   :  { %v4265_v28 = vmul.f32 %v4237_v42, %v4193_v24  ;;  %v6099_v62 = vpop.f32.mrb[27].mxu0  ;;  %4320 = vxpose.xlu0.b32.start [1/7] (short) (narrow) %v4313_v59, 8  ;;  %v4369_v42 = vrot.slane %v4360_v2, %v9860_v15 }
 0xb93   :  { %v4314_v10 = vadd.f32 %v4286_v55, %v4265_v28 }
 0xb94   :  { %v4198_v29 = vpop.f32.mrb[28].mxu0 }
 0xb95   :  { %v4266_v13 = vmul.f32 %v4242_v43, %v4198_v29  ;;  %v6102_v41 = vpop.f32.mrb[29].mxu0  ;;  %4321 = vxpose.xlu0.b32.cont [2/7] (short) (narrow) %v4314_v10, 8 }
 0xb97   :  { %v4315_v30 = vadd.f32 %v4291_v39, %v4266_v13 }
 0xb98   :  { %v4203_v21 = vpop.f32.mrb[30].mxu0 }
 0xb99   :  { %v4267_v33 = vmul.f32 %v4247_v20, %v4203_v21  ;;  %v6105_v27 = vpop.f32.mrb[31].mxu0  ;;  %4322 = vxpose.xlu0.b32.cont [3/7] (short) (narrow) %v4315_v30, 8 }
 0xb9b   :  { %v4316_v34 = vadd.f32 %v4296_v38, %v4267_v33 }
 0xb9c   :  { %v4208_v60 = vpop.f32.mrb[32].mxu0 }
 0xb9d   :  { %v4268_v4 = vmul.f32 %v4252_v50, %v4208_v60  ;;  %v6108_v26 = vpop.f32.mrb[33].mxu0  ;;  %4323 = vxpose.xlu0.b32.cont [4/7] (short) (narrow) %v4316_v34, 8 }
 0xb9f   :  { %v4317_v22 = vadd.f32 %v4301_v17, %v4268_v4 }
 0xba0   :  { %v4213_v16 = vpop.f32.mrb[34].mxu0 }
 0xba1   :  { %v4269_v11 = vmul.f32 %v4257_v48, %v4213_v16  ;;  %v6111_v54 = vpop.f32.mrb[35].mxu0  ;;  %4324 = vxpose.xlu0.b32.cont [5/7] (short) (narrow) %v4317_v22, 8 }
 0xba3   :  { %v4318_v25 = vadd.f32 %v4306_v58, %v4269_v11 }
 0xba4   :  { %v4218_v12 = vpop.f32.mrb[36].mxu0 }
 0xba5   :  { %v4270_v0 = vmul.f32 %v4262_v51, %v4218_v12  ;;  %v6114_v53 = vpop.f32.mrb[37].mxu0  ;;  %4325 = vxpose.xlu0.b32.cont [6/7] (short) (narrow) %v4318_v25, 8 }
 0xba7   :  { %v4319_v37 = vadd.f32 %v4311_v1, %v4270_v0 }
 0xba8   :  { %v4544_v32 = vpop.f32.mrb[40].mxu0 }
 0xba9   :  { %4326 = vxpose.xlu0.b32.end [7/7] (short) (narrow) %v4319_v37, 8  ;;  %v4546_v31 = vpop.f32.mrb[41].mxu0 }
 0xbaa   :  { %v4548_v52 = vpop.f32.mrb[42].mxu0 }
 0xbab   :  { %v4549_v8 = vpop.f32.mrb[43].mxu0 }
 0xc11   :  { %v4336_v14 = vpop.trf.xlu0 }
 0xc12   :  { %v4352_v44 = vpack.c.bf16 %v4336_v14, %v4336_v14 }
 0xc14   :  { %5942 = vmatmul.mubr.msk.bf16.vlgmr.msra.gmra.mrb[40].mxu1 %vm4407_vm14, %v4352_v44 }
 0xc15   :  { %4585 = vmatpush1.bf16.msra.mxu1 %v9778_v63  ;;  %4616 = vmatprep.mubr.bf16.mxu1 %v6719_v5 }
 0xc16   :  { %4586 = vmatprep.subr.bf16.mxu1 %v9787_v40 }
 0xc19   :  { %4587 = vmatpush1.bf16.msra.mxu1 %v9796_v35 }
 0xc1a   :  { %4588 = vmatprep.subr.bf16.mxu1 %v9805_v7 }
 0xc1d   :  { %4589 = vmatpush1.bf16.msra.mxu1 %v9817_v61 }
 0xc1e   :  { %4590 = vmatprep.subr.bf16.mxu1 %v9823_v47 }
 0xc21   :  { %4591 = vmatpush1.bf16.msra.mxu1 %v9829_v23 }
 0xc22   :  { %4752 = vmatprep.subr.bf16.mxu1 %v9773_v49 }
 0xce7   :  { %v4451_v56 = vpop.f32.mrb[40].mxu1 }
 0xce8   :  { %v9864_v49 = vadd.f32 %v4451_v56, %v4365_v46  ;;  %v4453_v43 = vpop.f32.mrb[41].mxu1 }
 0xce9   :  { %v4455_v55 = vpop.f32.mrb[42].mxu1  ;;  %v9866_v18 = vadd.f32 %v4453_v43, %v4369_v42 }
 0xcea   :  { %v4551_v3 = vadd.f32 %v4544_v32, %v9864_v49  ;;  %v4456_v57 = vpop.f32.mrb[43].mxu1 }
 0xceb   :  { %v4552_v59 = vadd.f32 %v4546_v31, %v9866_v18 }
 0xcec   :  { %v4553_v20 = vmul.f32 0.5, %v4551_v3 }
 0xced   :  { %v4558_v50 = vmul.f32 0.5, %v4552_v59 }
 0xcee   :  { %6573 = vtanh.f32 %v4553_v20 }
 0xcef   :  { %6575 = vtanh.f32 %v4552_v59 }
 0xcf0   :  { %6577 = vtanh.f32 %v4558_v50 }
 0xcf8   :  { %v6574_v39 = vpop.eup %6573 }
 0xcf9   :  { %v4555_v24 = vmul.f32 0.5, %v6574_v39  ;;  %v6576_v62 = vpop.eup %6575 }
 0xcfa   :  { %v6578_v38 = vpop.eup %6577 }
 0xcfb   :  { %v4556_v28 = vadd.f32 0.5, %v4555_v24  ;;  %v4560_v30 = vmul.f32 0.5, %v6578_v38 }
 0xcfd   :  { %v4563_v10 = vmul.f32 %v6576_v62, %v4556_v28  ;;  %v4562_v29 = vmul.f32 0.0, %v4556_v28  ;;  %v4561_v21 = vadd.f32 0.5, %v4560_v30 }
 0xcff   :  { %4565 = vrot.lane.b32.xlu1 %v4563_v10, %s6727_s17 }
 0xd71   :  { %v4566_v13 = vpop.permute.xlu1 %4565 }
 0xd72   :  { %v4568_v41 = vadd.f32 %v4566_v13, %v4562_v29 }
 0xd74   :  { %6579 = vtanh.f32 %v4568_v41 }
 0xd7e   :  { %v6580_v33 = vpop.eup %6579 }
 0xd7f   :  { %v9871_v27 = vmul.f32 %v6580_v33, %v4561_v21 }
 0xd81   :  { %v4577_v48 = vpack.c.bf16 %v9871_v27, %v9871_v27 }
 0xd83   :  { %4579 = vrot.lane.b32.xlu1 %v4577_v48, %s6727_s17 }
 0xdf5   :  { %v4580_v34 = vpop.permute.xlu1 %4579 }
 0xdf6   :  { %5951 = vmatmul.mubr.msk.bf16.vlgmr.msra.gmra.mrb[44].mxu1 %vm4506_vm4, %v4580_v34 }
 0xdf7   :  { %4753 = vmatpush1.bf16.msra.mxu1 %v9778_v63  ;;  %4784 = vmatprep.mubr.bf16.mxu1 %v6719_v5 }
 0xdf8   :  { %4754 = vmatprep.subr.bf16.mxu1 %v9787_v40 }
 0xdfb   :  { %4755 = vmatpush1.bf16.msra.mxu1 %v9796_v35 }
 0xdfc   :  { %4756 = vmatprep.subr.bf16.mxu1 %v9805_v7 }
 0xdff   :  { %4757 = vmatpush1.bf16.msra.mxu1 %v9817_v61  ;;  %v4643_v61 = vrot.slane %v4568_v41, 6 }
 0xe00   :  { %4758 = vmatprep.subr.bf16.mxu1 %v9823_v47 }
 0xe03   :  { %4759 = vmatpush1.bf16.msra.mxu1 %v9829_v23 }
 0xec9   :  { %v4618_v17 = vpop.f32.mrb[44].mxu1 }
 0xeca   :  { %v4627_v60 = vrot.slane %v4618_v17, 6  ;;  %v4620_v4 = vpop.f32.mrb[45].mxu1 }
 0xecb   :  { %v4622_v26 = vpop.f32.mrb[46].mxu1  ;;  %v4628_v22 = vrot.slane %v4620_v4, 6 }
 0xecc   :  { %v4631_v63 = vadd.f32 %v4627_v60, %v9864_v49  ;;  %v4623_v51 = vpop.f32.mrb[47].mxu1 }
 0xecd   :  { %v4632_v40 = vadd.f32 %v4628_v22, %v9866_v18 }
 0xece   :  { %v4633_v16 = vmul.f32 0.5, %v4631_v63 }
 0xecf   :  { %v4638_v58 = vmul.f32 0.5, %v4632_v40 }
 0xed0   :  { %6581 = vtanh.f32 %v4633_v16 }
 0xed1   :  { %6583 = vtanh.f32 %v4632_v40 }
 0xed2   :  { %6585 = vtanh.f32 %v4638_v58  ;;  %v6473_v58 = vld [vmem:[%s10594_s22 + $0x14] ss:$8 sps:$4 sm:$0xff]  }
 0xeda   :  { %v6582_v35 = vpop.eup %6581 }
 0xedb   :  { %v4635_v7 = vmul.f32 0.5, %v6582_v35  ;;  %v6584_v47 = vpop.eup %6583 }
 0xedc   :  { %v6586_v0 = vpop.eup %6585 }
 0xedd   :  { %v4636_v11 = vadd.f32 0.5, %v4635_v7  ;;  %v4640_v53 = vmul.f32 0.5, %v6586_v0 }
 0xedf   :  { %v4646_v54 = vmul.f32 %v6584_v47, %v4636_v11  ;;  %v4645_v23 = vmul.f32 %v4643_v61, %v4636_v11  ;;  %v4641_v1 = vadd.f32 0.5, %v4640_v53  ;;  %v4936_v53 = vld [vmem:[%s10595_s21 + $0x10] sm:$0xff] }
 0xee1   :  { %4648 = vrot.lane.b32.xlu1 %v4646_v54, %s6727_s17  ;;  %v6467_v54 = vld [vmem:[%s10594_s22 + $0x4] ss:$8 sps:$4 sm:$0xff]  }
 0xee2   :  { %4893 = vmatprep.subr.bf16.mxu0 %v6467_v54 }
 0xf53   :  { %v4649_v25 = vpop.permute.xlu1 %4648 }
 0xf54   :  { %v4651_v12 = vadd.f32 %v4649_v25, %v4645_v23  ;;  %v9918_v23 = vld [vmem:[%s10595_s21] ss:$8 sps:$4 sm:$0xff]   ;;  %v9928_v25 = vld [vmem:[%s10595_s21 + $0x14] ss:$8 sps:$4 sm:$0xff]  }
 0xf56   :  { %6587 = vtanh.f32 %v4651_v12  ;;  %v4727_v57 = vrot.slane %v4651_v12, 6  ;;  %v6471_v12 = vld [vmem:[%s10594_s22 + $0x10] ss:$8 sps:$4 sm:$0xff]  }
 0xf60   :  { %v6588_v37 = vpop.eup %6587 }
 0xf61   :  { %v9888_v14 = vmul.f32 %v6588_v37, %v4641_v1  ;;  %v4937_v1 = vld [vmem:[%s10595_s21 + $0x18] sm:$0xff] }
 0xf63   :  { %v4660_v44 = vpack.c.bf16 %v9888_v14, %v9888_v14 }
 0xf65   :  { %v4662_v32 = vrot.slane %v4660_v44, 1  ;;  %v9945_v44 = vcombine.low %v4936_v53, %v4937_v1 }
 0xf67   :  { %4663 = vrot.lane.b32.xlu1 %v4662_v32, %s6727_s17  ;;  %v6478_v32 = vld [vmem:[%s10594_s22 + $0x24] ss:$8 sps:$4 sm:$0xff]  }
 0xfd9   :  { %v4664_v31 = vpop.permute.xlu1 %4663 }
 0xfda   :  { %5952 = vmatmul.mubr.msk.bf16.vlgmr.msra.gmra.mrb[44].mxu0 %vm4506_vm4, %v4664_v31  ;;  %v9956_v31 = vld [vmem:[%s10595_s21 + $0x24] ss:$8 sps:$4 sm:$0xff]  }
 0xfdb   :  { %4925 = vmatprep.mubr.bf16.mxu0 %v6719_v5 }
0x10ad   :  { %v4702_v52 = vpop.f32.mrb[44].mxu0 }
0x10ae   :  { %v4711_v8 = vrot.slane %v4702_v52, 4  ;;  %v4704_v9 = vpop.f32.mrb[45].mxu0 }
0x10af   :  { %v4706_v19 = vpop.f32.mrb[46].mxu0  ;;  %v4712_v46 = vrot.slane %v4704_v9, 4 }
0x10b0   :  { %v4715_v2 = vadd.f32 %v4711_v8, %v9864_v49  ;;  %v4707_v42 = vpop.f32.mrb[47].mxu0  ;;  %v6484_v8 = vld [vmem:[%s10594_s22 + $0x34] ss:$8 sps:$4 sm:$0xff]   ;;  %v9966_v19 = vld [vmem:[%s10595_s21 + $0x20] ss:$8 sps:$4 sm:$0xff]  }
0x10b1   :  { %v4716_v43 = vadd.f32 %v4712_v46, %v9866_v18  ;;  %v9975_v46 = vld [vmem:[%s10595_s21 + $0x34] ss:$8 sps:$4 sm:$0xff]  }
0x10b2   :  { %v4717_v56 = vmul.f32 0.5, %v4715_v2  ;;  %v6482_v2 = vld [vmem:[%s10594_s22 + $0x30] ss:$8 sps:$4 sm:$0xff]  }
0x10b3   :  { %v4722_v28 = vmul.f32 0.5, %v4716_v43 }
0x10b4   :  { %6589 = vtanh.f32 %v4717_v56 }
0x10b5   :  { %6591 = vtanh.f32 %v4716_v43  ;;  %v9982_v43 = vld [vmem:[%s10595_s21 + $0x30] ss:$8 sps:$4 sm:$0xff]  }
0x10b6   :  { %6593 = vtanh.f32 %v4722_v28 }
0x10be   :  { %v6590_v55 = vpop.eup %6589 }
0x10bf   :  { %v4719_v3 = vmul.f32 0.5, %v6590_v55  ;;  %v6592_v59 = vpop.eup %6591 }
0x10c0   :  { %v6594_v50 = vpop.eup %6593 }
0x10c1   :  { %v4720_v20 = vadd.f32 0.5, %v4719_v3  ;;  %v4724_v29 = vmul.f32 0.5, %v6594_v50 }
0x10c3   :  { %v4730_v39 = vmul.f32 %v6592_v59, %v4720_v20  ;;  %v4729_v24 = vmul.f32 %v4727_v57, %v4720_v20  ;;  %v4725_v13 = vadd.f32 0.5, %v4724_v29  ;;  %v4838_v29 = vld [vmem:[%s10596_s7] sm:$0x3]  ;;  %s6728_s7 = smov [#allocation6]  }
0x10c4   :  { %s5843_s18 = sshll.u32 %s6728_s7, 4  ;;  %s5844_s18 = int_to_ptr.vmem [resolvable:$true] %s5843_s18 }
0x10c5   :  { %4732 = vrot.lane.b32.xlu1 %v4730_v39, %s6727_s17  ;;  %s6677_s12 = scalar_lea.vmem %s5844_s18, 32  ;;  %p6682_p1 = scmp.lt.s32.totalorder %s5844_s18, %s5844_s18 }
0x10c6   :  { %p6678_p0 = scmp.ne.s32.totalorder %s5844_s18, %s6677_s12  ;;  %p6683_p2 = scmp.lt.s32.totalorder %s6677_s12, %s6677_s12 }
0x10c8   :  { %p6684_p3 = por %p6683_p2, %p6682_p1 }
0x10ca   :  { %p6685_p4 = pnand %p6684_p3, %p6678_p0 }
0x1137   :  { %v4733_v62 = vpop.permute.xlu1 %4732 }
0x1138   :  { %v4735_v10 = vadd.f32 %v4733_v62, %v4729_v24 }
0x113a   :  { %6595 = vtanh.f32 %v4735_v10  ;;  %v4811_v35 = vrot.slane %v4735_v10, 6 }
0x1144   :  { %v6596_v41 = vpop.eup %6595 }
0x1145   :  { %v4737_v38 = vmul.f32 %v6596_v41, %v4725_v13  ;;  %v4843_v13 = vrot.slane %v4838_v29, %v9855_v36  ;;  %v4847_v41 = vrot.slane %v4838_v29, %v9860_v15 }
0x1147   :  { %v4744_v30 = vpack.c.bf16 %v4737_v38, %v4737_v38 }
0x1149   :  { %v4746_v21 = vrot.slane %v4744_v30, 2 }
0x114b   :  { %4747 = vrot.lane.b32.xlu1 %v4746_v21, %s6727_s17 }
0x11bd   :  { %v4748_v33 = vpop.permute.xlu1 %4747 }
0x11be   :  { %5953 = vmatmul.mubr.msk.bf16.vlgmr.msra.gmra.mrb[48].mxu1 %vm4506_vm4, %v4748_v33 }
0x11bf   :  { %5014 = vmatprep.mubr.bf16.mxu1 %v6719_v5 }
0x1291   :  { %v4786_v48 = vpop.f32.mrb[48].mxu1 }
0x1292   :  { %v4795_v34 = vrot.slane %v4786_v48, 2  ;;  %v4788_v17 = vpop.f32.mrb[49].mxu1 }
0x1293   :  { %v4790_v60 = vpop.f32.mrb[50].mxu1  ;;  %v4796_v26 = vrot.slane %v4788_v17, 2 }
0x1294   :  { %v4799_v4 = vadd.f32 %v4795_v34, %v9864_v49  ;;  %v4791_v63 = vpop.f32.mrb[51].mxu1  ;;  %v6465_v49 = vld [vmem:[%s10594_s22] ss:$8 sps:$4 sm:$0xff]  }
0x1295   :  { %v4800_v51 = vadd.f32 %v4796_v26, %v9866_v18  ;;  %v9913_v18 = vld [vmem:[%s10595_s21 + $0x4] ss:$8 sps:$4 sm:$0xff]   ;;  %4894 = vmatpush1.bf16.msra.mxu0 %v6465_v49  ;;  %s10601_s21 = sld [smem:[#allocation43_spill]] }
0x1296   :  { %v4801_v22 = vmul.f32 0.5, %v4799_v4  ;;  %4982 = vmatprep.subr.bf16.mxu1 %v9913_v18  ;;  %4895 = vmatprep.subr.bf16.mxu0 %v6473_v58 }
0x1297   :  { %4983 = vmatpush1.bf16.msra.mxu1 %v9918_v23 }
0x1298   :  { %6597 = vtanh.f32 %v4801_v22  ;;  %4984 = vmatprep.subr.bf16.mxu1 %v9928_v25 }
0x1299   :  { %6599 = vtanh.f32 %v4800_v51  ;;  %4896 = vmatpush1.bf16.msra.mxu0 %v6471_v12 }
0x129a   :  { %4897 = vmatprep.subr.bf16.mxu0 %v6478_v32 }
0x129b   :  { %4985 = vmatpush1.bf16.msra.mxu1 %v9945_v44 }
0x129c   :  { %4986 = vmatprep.subr.bf16.mxu1 %v9956_v31 }
0x129f   :  { %4987 = vmatpush1.bf16.msra.mxu1 %v9966_v19 }
0x12a0   :  { %4988 = vmatprep.subr.bf16.mxu1 %v9975_v46 }
0x12a2   :  { %v6598_v16 = vpop.eup %6597 }
0x12a3   :  { %v4803_v40 = vmul.f32 0.5, %v6598_v16  ;;  %v6600_v61 = vpop.eup %6599  ;;  %4989 = vmatpush1.bf16.msra.mxu1 %v9982_v43 }
0x12a4   :  { %5138 = vmatprep.subr.bf16.mxu1 %v9913_v18 }
0x12a5   :  { %v4804_v7 = vadd.f32 0.5, %v4803_v40 }
0x12a6   :  { %5015 = vmatmul.mubr.bf16.vlgmr.msra.gmra.mrb[52].mxu1 %v6719_v5 }
0x12a7   :  { %v4814_v11 = vmul.f32 %v6600_v61, %v4804_v7  ;;  %v4813_v47 = vmul.f32 %v4811_v35, %v4804_v7  ;;  %5139 = vmatpush1.bf16.msra.mxu1 %v9918_v23  ;;  %5170 = vmatprep.mubr.bf16.mxu1 %v6719_v5 }
0x12a8   :  { %5140 = vmatprep.subr.bf16.mxu1 %v9928_v25 }
0x12a9   :  { %4816 = vrot.lane.b32.xlu1 %v4814_v11, %s6727_s17 }
0x12ab   :  { %5141 = vmatpush1.bf16.msra.mxu1 %v9945_v44 }
0x12ac   :  { %5142 = vmatprep.subr.bf16.mxu1 %v9956_v31 }
0x12ad   :  { %4572 = vrot.lane.b32.xlu1 %v9871_v27, %s6727_s17  ;;  %v4806_v27 = vmul.f32 0.5, %v4800_v51 }
0x12af   :  { %6601 = vtanh.f32 %v4806_v27  ;;  %5143 = vmatpush1.bf16.msra.mxu1 %v9966_v19 }
0x12b0   :  { %5144 = vmatprep.subr.bf16.mxu1 %v9975_v46 }
0x12b1   :  { %4655 = vrot.lane.b32.xlu1 %v9888_v14, %s6727_s17  ;;  %v6476_v14 = vld [vmem:[%s10594_s22 + $0x20] ss:$8 sps:$4 sm:$0xff]  }
0x12b2   :  { %4898 = vmatpush1.bf16.msra.mxu0 %v6476_v14 }
0x12b3   :  { %4899 = vmatprep.subr.bf16.mxu0 %v6484_v8  ;;  %5145 = vmatpush1.bf16.msra.mxu1 %v9982_v43 }
0x12b5   :  { %4739 = vrot.lane.b32.xlu1 %v4737_v38, %s6727_s17 }
0x12b6   :  { %4900 = vmatpush1.bf16.msra.mxu0 %v6482_v2 }
0x12b7   :  { %5055 = vmatprep.subr.bf16.mxu0 %v9913_v18 }
0x12b9   :  { %v6602_v9 = vpop.eup %6601 }
0x12ba   :  { %v4808_v42 = vmul.f32 0.5, %v6602_v9 }
0x12bc   :  { %v4809_v55 = vadd.f32 0.5, %v4808_v42 }
0x131b   :  { %v4817_v0 = vpop.permute.xlu1 %4816 }
0x131c   :  { %v4819_v37 = vadd.f32 %v4817_v0, %v4813_v47 }
0x131e   :  { %6603 = vtanh.f32 %v4819_v37 }
0x131f   :  { %v4573_v52 = vpop.permute.xlu1 %4572 }
0x1320   :  { %4576 = vst.msk [vmem:[#allocation5] sm:$0x3] %vm4575_vm2, %v4573_v52 }
0x1323   :  { %v4656_v56 = vpop.permute.xlu1 %4655 }
0x1324   :  { %4659 = vst.msk [vmem:[#allocation5] sm:$0xc] %vm4658_vm0, %v4656_v56 }
0x1327   :  { %v4740_v3 = vpop.permute.xlu1 %4739 }
0x1328   :  { %v6604_v57 = vpop.eup %6603  ;;  %4743 = vst.msk [vmem:[#allocation5] sm:$0x30] %vm4742_vm1, %v4740_v3 }
0x1329   :  { %v4821_v20 = vmul.f32 %v6604_v57, %v4809_v55 }
0x132b   :  { %4823 = vrot.lane.b32.xlu1 %v4821_v20, %s6727_s17 }
0x1379   :  { %v5016_v28 = vpop.f32.mrb[52].mxu1 }
0x137a   :  { %v5018_v62 = vpop.f32.mrb[53].mxu1 }
0x137b   :  { %v5020_v10 = vpop.f32.mrb[54].mxu1 }
0x137c   :  { %v5021_v50 = vpop.f32.mrb[55].mxu1 }
0x139d   :  { %v4824_v59 = vpop.permute.xlu1 %4823 }
0x139e   :  { %4827 = vst.msk [vmem:[#allocation5] sm:$0xc0] %vm4826_vm15, %v4824_v59 }
0x13a5   :  { %v4828_v39 = vld [vmem:[#allocation5] sm:$0xff] }
0x13a6   :  { %v4829_v24 = vpack.c.bf16 %v4828_v39, %v4828_v39 }
0x13a8   :  { %5962 = vmatmul.mubr.msk.bf16.vlgmr.msra.gmra.mrb[48].mxu0 %vm4506_vm4, %v4829_v24 }
0x13a9   :  { %5056 = vmatpush1.bf16.msra.mxu0 %v9918_v23  ;;  %5087 = vmatprep.mubr.bf16.mxu0 %v6719_v5 }
0x13aa   :  { %5057 = vmatprep.subr.bf16.mxu0 %v9928_v25 }
0x13ad   :  { %5058 = vmatpush1.bf16.msra.mxu0 %v9945_v44 }
0x13ae   :  { %5059 = vmatprep.subr.bf16.mxu0 %v9956_v31 }
0x13b1   :  { %5060 = vmatpush1.bf16.msra.mxu0 %v9966_v19 }
0x13b2   :  { %5061 = vmatprep.subr.bf16.mxu0 %v9975_v46 }
0x13b5   :  { %5062 = vmatpush1.bf16.msra.mxu0 %v9982_v43 }
0x13b6   :  { %5221 = vmatprep.subr.bf16.mxu0 %v9913_v18 }
0x147b   :  { %v4927_v38 = vpop.f32.mrb[48].mxu0 }
0x147c   :  { %v10015_v30 = vadd.f32 %v4927_v38, %v4843_v13  ;;  %v4929_v21 = vpop.f32.mrb[49].mxu0 }
0x147d   :  { %v4931_v33 = vpop.f32.mrb[50].mxu0  ;;  %v10017_v48 = vadd.f32 %v4929_v21, %v4847_v41 }
0x147e   :  { %v5023_v34 = vadd.f32 %v5016_v28, %v10015_v30  ;;  %v4932_v17 = vpop.f32.mrb[51].mxu0 }
0x147f   :  { %v5024_v4 = vadd.f32 %v5018_v62, %v10017_v48 }
0x1480   :  { %v5025_v60 = vmul.f32 0.5, %v5023_v34 }
0x1481   :  { %v5030_v40 = vmul.f32 0.5, %v5024_v4 }
0x1482   :  { %6605 = vtanh.f32 %v5025_v60 }
0x1483   :  { %6607 = vtanh.f32 %v5024_v4 }
0x1484   :  { %6609 = vtanh.f32 %v5030_v40 }
0x148c   :  { %v6606_v26 = vpop.eup %6605 }
0x148d   :  { %v5027_v63 = vmul.f32 0.5, %v6606_v26  ;;  %v6608_v51 = vpop.eup %6607 }
0x148e   :  { %v6610_v11 = vpop.eup %6609 }
0x148f   :  { %v5028_v22 = vadd.f32 0.5, %v5027_v63  ;;  %v5032_v47 = vmul.f32 0.5, %v6610_v11 }
0x1491   :  { %v5035_v16 = vmul.f32 %v6608_v51, %v5028_v22  ;;  %v5034_v35 = vmul.f32 0.0, %v5028_v22  ;;  %v5033_v49 = vadd.f32 0.5, %v5032_v47 }
0x1493   :  { %5037 = vrot.lane.b32.xlu1 %v5035_v16, %s6727_s17 }
0x1505   :  { %v5038_v7 = vpop.permute.xlu1 %5037 }
0x1506   :  { %v5040_v61 = vadd.f32 %v5038_v7, %v5034_v35 }
0x1508   :  { %6611 = vtanh.f32 %v5040_v61  ;;  %v5114_v52 = vrot.slane %v5040_v61, 6 }
0x1512   :  { %v6612_v54 = vpop.eup %6611 }
0x1513   :  { %v10022_v18 = vmul.f32 %v6612_v54, %v5033_v49 }
0x1515   :  { %v5048_v58 = vpack.c.bf16 %v10022_v18, %v10022_v18 }
0x1517   :  { %5050 = vrot.lane.b32.xlu1 %v5048_v58, %s6727_s17 }
0x1589   :  { %v5051_v12 = vpop.permute.xlu1 %5050 }
0x158a   :  { %5971 = vmatmul.mubr.msk.bf16.vlgmr.msra.gmra.mrb[52].mxu0 %vm4506_vm4, %v5051_v12 }
0x158b   :  { %5222 = vmatpush1.bf16.msra.mxu0 %v9918_v23  ;;  %5253 = vmatprep.mubr.bf16.mxu0 %v6719_v5 }
0x158c   :  { %5223 = vmatprep.subr.bf16.mxu0 %v9928_v25 }
0x158f   :  { %5224 = vmatpush1.bf16.msra.mxu0 %v9945_v44 }
0x1590   :  { %5225 = vmatprep.subr.bf16.mxu0 %v9956_v31 }
0x1593   :  { %5226 = vmatpush1.bf16.msra.mxu0 %v9966_v19 }
0x1594   :  { %5227 = vmatprep.subr.bf16.mxu0 %v9975_v46 }
0x1597   :  { %5228 = vmatpush1.bf16.msra.mxu0 %v9982_v43 }
0x165d   :  { %v5089_v27 = vpop.f32.mrb[52].mxu0 }
0x165e   :  { %v5098_v0 = vrot.slane %v5089_v27, 6  ;;  %v5091_v53 = vpop.f32.mrb[53].mxu0 }
0x165f   :  { %v5093_v1 = vpop.f32.mrb[54].mxu0  ;;  %v5099_v37 = vrot.slane %v5091_v53, 6 }
0x1660   :  { %v5102_v23 = vadd.f32 %v5098_v0, %v10015_v30  ;;  %v5094_v14 = vpop.f32.mrb[55].mxu0 }
0x1661   :  { %v5103_v25 = vadd.f32 %v5099_v37, %v10017_v48 }
0x1662   :  { %v5104_v32 = vmul.f32 0.5, %v5102_v23 }
0x1663   :  { %v5109_v46 = vmul.f32 0.5, %v5103_v25 }
0x1664   :  { %6613 = vtanh.f32 %v5104_v32 }
0x1665   :  { %6615 = vtanh.f32 %v5103_v25 }
0x1666   :  { %6617 = vtanh.f32 %v5109_v46  ;;  %v6496_v46 = vld [vmem:[%s10597_s24 + $0x14] ss:$8 sps:$4 sm:$0xff]  }
0x166e   :  { %v6614_v44 = vpop.eup %6613 }
0x166f   :  { %v5106_v31 = vmul.f32 0.5, %v6614_v44  ;;  %v6616_v9 = vpop.eup %6615 }
0x1670   :  { %v6618_v43 = vpop.eup %6617 }
0x1671   :  { %v5107_v8 = vadd.f32 0.5, %v5106_v31  ;;  %v5111_v55 = vmul.f32 0.5, %v6618_v43 }
0x1673   :  { %v5117_v19 = vmul.f32 %v6616_v9, %v5107_v8  ;;  %v5116_v2 = vmul.f32 %v5114_v52, %v5107_v8  ;;  %v5112_v3 = vadd.f32 0.5, %v5111_v55  ;;  %v5404_v55 = vld [vmem:[%s10598_s10 + $0x10] sm:$0xff] }
0x1675   :  { %5119 = vrot.lane.b32.xlu1 %v5117_v19, %s6727_s17  ;;  %v6490_v19 = vld [vmem:[%s10597_s24 + $0x4] ss:$8 sps:$4 sm:$0xff]  }
0x1676   :  { %5361 = vmatprep.subr.bf16.mxu1 %v6490_v19 }
0x16e7   :  { %v5120_v42 = vpop.permute.xlu1 %5119 }
0x16e8   :  { %v5122_v56 = vadd.f32 %v5120_v42, %v5116_v2  ;;  %v10069_v2 = vld [vmem:[%s10598_s10] ss:$8 sps:$4 sm:$0xff]   ;;  %v10079_v42 = vld [vmem:[%s10598_s10 + $0x14] ss:$8 sps:$4 sm:$0xff]  }
0x16ea   :  { %6619 = vtanh.f32 %v5122_v56  ;;  %v5197_v17 = vrot.slane %v5122_v56, 6  ;;  %v6494_v56 = vld [vmem:[%s10597_s24 + $0x10] ss:$8 sps:$4 sm:$0xff]  }
0x16f4   :  { %v6620_v57 = vpop.eup %6619 }
0x16f5   :  { %v10039_v20 = vmul.f32 %v6620_v57, %v5112_v3  ;;  %v5405_v3 = vld [vmem:[%s10598_s10 + $0x18] sm:$0xff] }
0x16f7   :  { %v5130_v59 = vpack.c.bf16 %v10039_v20, %v10039_v20 }
0x16f9   :  { %v5132_v39 = vrot.slane %v5130_v59, 1  ;;  %v10096_v59 = vcombine.low %v5404_v55, %v5405_v3 }
0x16fb   :  { %5133 = vrot.lane.b32.xlu0 %v5132_v39, %s6727_s17  ;;  %v6501_v39 = vld [vmem:[%s10597_s24 + $0x24] ss:$8 sps:$4 sm:$0xff]  }
0x176d   :  { %v5134_v24 = vpop.permute.xlu0 %5133 }
0x176e   :  { %5972 = vmatmul.mubr.msk.bf16.vlgmr.msra.gmra.mrb[56].mxu1 %vm4506_vm4, %v5134_v24  ;;  %v10107_v24 = vld [vmem:[%s10598_s10 + $0x24] ss:$8 sps:$4 sm:$0xff]  }
0x176f   :  { %5393 = vmatprep.mubr.bf16.mxu1 %v6719_v5 }
0x1841   :  { %v5172_v28 = vpop.f32.mrb[56].mxu1 }
0x1842   :  { %v5181_v62 = vrot.slane %v5172_v28, 4  ;;  %v5174_v10 = vpop.f32.mrb[57].mxu1 }
0x1843   :  { %v5176_v50 = vpop.f32.mrb[58].mxu1  ;;  %v5182_v13 = vrot.slane %v5174_v10, 4 }
0x1844   :  { %v5185_v29 = vadd.f32 %v5181_v62, %v10015_v30  ;;  %v5177_v41 = vpop.f32.mrb[59].mxu1  ;;  %v6507_v62 = vld [vmem:[%s10597_s24 + $0x34] ss:$8 sps:$4 sm:$0xff]   ;;  %v10117_v50 = vld [vmem:[%s10598_s10 + $0x20] ss:$8 sps:$4 sm:$0xff]  }
0x1845   :  { %v5186_v21 = vadd.f32 %v5182_v13, %v10017_v48  ;;  %v10126_v13 = vld [vmem:[%s10598_s10 + $0x34] ss:$8 sps:$4 sm:$0xff]  }
0x1846   :  { %v5187_v38 = vmul.f32 0.5, %v5185_v29  ;;  %v6505_v29 = vld [vmem:[%s10597_s24 + $0x30] ss:$8 sps:$4 sm:$0xff]  }
0x1847   :  { %v5192_v22 = vmul.f32 0.5, %v5186_v21 }
0x1848   :  { %6621 = vtanh.f32 %v5187_v38 }
0x1849   :  { %6623 = vtanh.f32 %v5186_v21  ;;  %v10133_v21 = vld [vmem:[%s10598_s10 + $0x30] ss:$8 sps:$4 sm:$0xff]  }
0x184a   :  { %6625 = vtanh.f32 %v5192_v22 }
0x1852   :  { %v6622_v33 = vpop.eup %6621 }
0x1853   :  { %v5189_v34 = vmul.f32 0.5, %v6622_v33  ;;  %v6624_v4 = vpop.eup %6623 }
0x1854   :  { %v6626_v40 = vpop.eup %6625 }
0x1855   :  { %v5190_v60 = vadd.f32 0.5, %v5189_v34  ;;  %v5194_v35 = vmul.f32 0.5, %v6626_v40 }
0x1857   :  { %v5200_v26 = vmul.f32 %v6624_v4, %v5190_v60  ;;  %v5199_v63 = vmul.f32 %v5197_v17, %v5190_v60  ;;  %v5195_v7 = vadd.f32 0.5, %v5194_v35  ;;  %v5306_v35 = vld [vmem:[%s10599_s9] sm:$0x3] }
0x1859   :  { %5202 = vrot.lane.b32.xlu1 %v5200_v26, %s6727_s17 }
0x18cb   :  { %v5203_v51 = vpop.permute.xlu1 %5202 }
0x18cc   :  { %v5205_v16 = vadd.f32 %v5203_v51, %v5199_v63 }
0x18ce   :  { %6627 = vtanh.f32 %v5205_v16  ;;  %v5280_v44 = vrot.slane %v5205_v16, 6 }
0x18d8   :  { %v6628_v61 = vpop.eup %6627 }
0x18d9   :  { %v5207_v11 = vmul.f32 %v6628_v61, %v5195_v7  ;;  %v5311_v7 = vrot.slane %v5306_v35, %v9855_v36  ;;  %v5315_v61 = vrot.slane %v5306_v35, %v9860_v15 }
0x18db   :  { %v5213_v47 = vpack.c.bf16 %v5207_v11, %v5207_v11 }
0x18dd   :  { %v5215_v49 = vrot.slane %v5213_v47, 2 }
0x18df   :  { %5216 = vrot.lane.b32.xlu1 %v5215_v49, %s6727_s17 }
0x1951   :  { %v5217_v54 = vpop.permute.xlu1 %5216 }
0x1952   :  { %5973 = vmatmul.mubr.msk.bf16.vlgmr.msra.gmra.mrb[56].mxu0 %vm4506_vm4, %v5217_v54 }
0x1953   :  { %5482 = vmatprep.mubr.bf16.mxu0 %v6719_v5 }
0x1a25   :  { %v5255_v58 = vpop.f32.mrb[56].mxu0 }
0x1a26   :  { %v5264_v12 = vrot.slane %v5255_v58, 2  ;;  %v5257_v27 = vpop.f32.mrb[57].mxu0 }
0x1a27   :  { %v5259_v0 = vpop.f32.mrb[58].mxu0  ;;  %v5265_v1 = vrot.slane %v5257_v27, 2 }
0x1a28   :  { %v5268_v53 = vadd.f32 %v5264_v12, %v10015_v30  ;;  %v5260_v23 = vpop.f32.mrb[59].mxu0  ;;  %v6488_v30 = vld [vmem:[%s10597_s24] ss:$8 sps:$4 sm:$0xff]  }
0x1a29   :  { %v5269_v14 = vadd.f32 %v5265_v1, %v10017_v48  ;;  %v10064_v48 = vld [vmem:[%s10598_s10 + $0x4] ss:$8 sps:$4 sm:$0xff]   ;;  %5362 = vmatpush1.bf16.msra.mxu1 %v6488_v30 }
0x1a2a   :  { %v5270_v37 = vmul.f32 0.5, %v5268_v53  ;;  %5450 = vmatprep.subr.bf16.mxu0 %v10064_v48  ;;  %5363 = vmatprep.subr.bf16.mxu1 %v6496_v46 }
0x1a2b   :  { %5451 = vmatpush1.bf16.msra.mxu0 %v10069_v2 }
0x1a2c   :  { %6629 = vtanh.f32 %v5270_v37  ;;  %5452 = vmatprep.subr.bf16.mxu0 %v10079_v42 }
0x1a2d   :  { %6631 = vtanh.f32 %v5269_v14  ;;  %5364 = vmatpush1.bf16.msra.mxu1 %v6494_v56 }
0x1a2e   :  { %5365 = vmatprep.subr.bf16.mxu1 %v6501_v39 }
0x1a2f   :  { %5453 = vmatpush1.bf16.msra.mxu0 %v10096_v59 }
0x1a30   :  { %5454 = vmatprep.subr.bf16.mxu0 %v10107_v24 }
0x1a33   :  { %5455 = vmatpush1.bf16.msra.mxu0 %v10117_v50 }
0x1a34   :  { %5456 = vmatprep.subr.bf16.mxu0 %v10126_v13 }
0x1a36   :  { %v6630_v32 = vpop.eup %6629 }
0x1a37   :  { %v5272_v25 = vmul.f32 0.5, %v6630_v32  ;;  %v6632_v52 = vpop.eup %6631  ;;  %5457 = vmatpush1.bf16.msra.mxu0 %v10133_v21 }
0x1a38   :  { %5596 = vmatprep.subr.bf16.mxu0 %v10064_v48 }
0x1a39   :  { %v5273_v31 = vadd.f32 0.5, %v5272_v25 }
0x1a3a   :  { %5483 = vmatmul.mubr.bf16.vlgmr.msra.gmra.mrb[60].mxu0 %v6719_v5 }
0x1a3b   :  { %v5283_v8 = vmul.f32 %v6632_v52, %v5273_v31  ;;  %v5282_v9 = vmul.f32 %v5280_v44, %v5273_v31  ;;  %5597 = vmatpush1.bf16.msra.mxu0 %v10069_v2  ;;  %5628 = vmatprep.mubr.bf16.mxu0 %v6719_v5 }
0x1a3c   :  { %5598 = vmatprep.subr.bf16.mxu0 %v10079_v42 }
0x1a3d   :  { %5285 = vrot.lane.b32.xlu1 %v5283_v8, %s6727_s17 }
0x1a3f   :  { %5599 = vmatpush1.bf16.msra.mxu0 %v10096_v59 }
0x1a40   :  { %5600 = vmatprep.subr.bf16.mxu0 %v10107_v24 }
0x1a41   :  { %5044 = vrot.lane.b32.xlu1 %v10022_v18, %s6727_s17  ;;  %v5275_v18 = vmul.f32 0.5, %v5269_v14 }
0x1a43   :  { %6633 = vtanh.f32 %v5275_v18  ;;  %5601 = vmatpush1.bf16.msra.mxu0 %v10117_v50 }
0x1a44   :  { %5602 = vmatprep.subr.bf16.mxu0 %v10126_v13 }
0x1a45   :  { %5126 = vrot.lane.b32.xlu1 %v10039_v20, %s6727_s17  ;;  %v6499_v20 = vld [vmem:[%s10597_s24 + $0x20] ss:$8 sps:$4 sm:$0xff]  }
0x1a46   :  { %5366 = vmatpush1.bf16.msra.mxu1 %v6499_v20 }
0x1a47   :  { %5367 = vmatprep.subr.bf16.mxu1 %v6507_v62  ;;  %5603 = vmatpush1.bf16.msra.mxu0 %v10133_v21 }
0x1a48   :  { %6281 = vmatprep.subr.bf16.mxu0 %v6724_v45 }
0x1a49   :  { %5209 = vrot.lane.b32.xlu1 %v5207_v11, %s6727_s17 }
0x1a4a   :  { %5368 = vmatpush1.bf16.msra.mxu1 %v6505_v29 }
0x1a4b   :  { %5518 = vmatprep.subr.bf16.mxu1 %v10064_v48 }
0x1a4d   :  { %v6634_v10 = vpop.eup %6633 }
0x1a4e   :  { %v5277_v41 = vmul.f32 0.5, %v6634_v10 }
0x1a50   :  { %v5278_v33 = vadd.f32 0.5, %v5277_v41 }
0x1aaf   :  { %v5286_v43 = vpop.permute.xlu1 %5285 }
0x1ab0   :  { %v5288_v57 = vadd.f32 %v5286_v43, %v5282_v9 }
0x1ab2   :  { %6635 = vtanh.f32 %v5288_v57 }
0x1ab3   :  { %v5045_v28 = vpop.permute.xlu1 %5044 }
0x1ab4   :  { %5047 = vst.msk [vmem:[#allocation5] sm:$0x3] %vm4575_vm2, %v5045_v28 }
0x1ab7   :  { %v5127_v38 = vpop.permute.xlu1 %5126 }
0x1ab8   :  { %5129 = vst.msk [vmem:[#allocation5] sm:$0xc] %vm4658_vm0, %v5127_v38 }
0x1abb   :  { %v5210_v34 = vpop.permute.xlu1 %5209 }
0x1abc   :  { %v6636_v17 = vpop.eup %6635  ;;  %5212 = vst.msk [vmem:[#allocation5] sm:$0x30] %vm4742_vm1, %v5210_v34 }
0x1abd   :  { %v5290_v60 = vmul.f32 %v6636_v17, %v5278_v33 }
0x1abf   :  { %5292 = vrot.lane.b32.xlu1 %v5290_v60, %s6727_s17 }
0x1b0d   :  { %v5484_v22 = vpop.f32.mrb[60].mxu0 }
0x1b0e   :  { %v5486_v51 = vpop.f32.mrb[61].mxu0 }
0x1b0f   :  { %v5488_v16 = vpop.f32.mrb[62].mxu0 }
0x1b10   :  { %v5489_v40 = vpop.f32.mrb[63].mxu0 }
0x1b31   :  { %v5293_v4 = vpop.permute.xlu1 %5292 }
0x1b32   :  { %5295 = vst.msk [vmem:[#allocation5] sm:$0xc0] %vm4826_vm15, %v5293_v4 }
0x1b39   :  { %v5296_v26 = vld [vmem:[#allocation5] sm:$0xff] }
0x1b3a   :  { %v5297_v63 = vpack.c.bf16 %v5296_v26, %v5296_v26 }
0x1b3c   :  { %5982 = vmatmul.mubr.msk.bf16.vlgmr.msra.gmra.mrb[60].mxu1 %vm4506_vm4, %v5297_v63 }
0x1b3d   :  { %5519 = vmatpush1.bf16.msra.mxu1 %v10069_v2  ;;  %5550 = vmatprep.mubr.bf16.mxu1 %v6719_v5 }
0x1b3e   :  { %5520 = vmatprep.subr.bf16.mxu1 %v10079_v42 }
0x1b41   :  { %5521 = vmatpush1.bf16.msra.mxu1 %v10096_v59 }
0x1b42   :  { %5522 = vmatprep.subr.bf16.mxu1 %v10107_v24 }
0x1b45   :  { %5523 = vmatpush1.bf16.msra.mxu1 %v10117_v50 }
0x1b46   :  { %5524 = vmatprep.subr.bf16.mxu1 %v10126_v13 }
0x1b49   :  { %5525 = vmatpush1.bf16.msra.mxu1 %v10133_v21 }
0x1b4a   :  { %5674 = vmatprep.subr.bf16.mxu1 %v10064_v48 }
0x1c0f   :  { %v5395_v11 = vpop.f32.mrb[60].mxu1 }
0x1c10   :  { %v10167_v47 = vadd.f32 %v5395_v11, %v5311_v7  ;;  %v5397_v49 = vpop.f32.mrb[61].mxu1 }
0x1c11   :  { %v5399_v54 = vpop.f32.mrb[62].mxu1  ;;  %v10169_v58 = vadd.f32 %v5397_v49, %v5315_v61 }
0x1c12   :  { %v5491_v12 = vadd.f32 %v5484_v22, %v10167_v47  ;;  %v5400_v27 = vpop.f32.mrb[63].mxu1 }
0x1c13   :  { %v5492_v53 = vadd.f32 %v5486_v51, %v10169_v58 }
0x1c14   :  { %v5493_v0 = vmul.f32 0.5, %v5491_v12 }
0x1c15   :  { %v5498_v14 = vmul.f32 0.5, %v5492_v53 }
0x1c16   :  { %6637 = vtanh.f32 %v5493_v0 }
0x1c17   :  { %6639 = vtanh.f32 %v5492_v53 }
0x1c18   :  { %6641 = vtanh.f32 %v5498_v14 }
0x1c20   :  { %v6638_v1 = vpop.eup %6637 }
0x1c21   :  { %v5495_v23 = vmul.f32 0.5, %v6638_v1  ;;  %v6640_v37 = vpop.eup %6639 }
0x1c22   :  { %v6642_v31 = vpop.eup %6641 }
0x1c23   :  { %v5496_v36 = vadd.f32 0.5, %v5495_v23  ;;  %v5500_v52 = vmul.f32 0.5, %v6642_v31 }
0x1c25   :  { %v5503_v15 = vmul.f32 %v6640_v37, %v5496_v36  ;;  %v5502_v32 = vmul.f32 0.0, %v5496_v36  ;;  %v5501_v8 = vadd.f32 0.5, %v5500_v52 }
0x1c27   :  { %5505 = vrot.lane.b32.xlu1 %v5503_v15, %s6727_s17 }
0x1c99   :  { %v5506_v25 = vpop.permute.xlu1 %5505 }
0x1c9a   :  { %v5508_v44 = vadd.f32 %v5506_v25, %v5502_v32 }
0x1c9c   :  { %6643 = vtanh.f32 %v5508_v44  ;;  %v5577_v20 = vrot.slane %v5508_v44, 6 }
0x1ca6   :  { %v6644_v9 = vpop.eup %6643 }
0x1ca7   :  { %v5510_v30 = vmul.f32 %v6644_v9, %v5501_v8 }
0x1ca9   :  { %v5511_v19 = vpack.c.bf16 %v5510_v30, %v5510_v30 }
0x1cab   :  { %5513 = vrot.lane.b32.xlu1 %v5511_v19, %s6727_s17 }
0x1d1d   :  { %v5514_v48 = vpop.permute.xlu1 %5513 }
0x1d1e   :  { %5991 = vmatmul.mubr.msk.bf16.vlgmr.msra.gmra.mrb[64].mxu1 %vm4506_vm4, %v5514_v48 }
0x1d1f   :  { %5675 = vmatpush1.bf16.msra.mxu1 %v10069_v2  ;;  %5706 = vmatprep.mubr.bf16.mxu1 %v6719_v5 }
0x1d20   :  { %5676 = vmatprep.subr.bf16.mxu1 %v10079_v42 }
0x1d23   :  { %5677 = vmatpush1.bf16.msra.mxu1 %v10096_v59 }
0x1d24   :  { %5678 = vmatprep.subr.bf16.mxu1 %v10107_v24 }
0x1d27   :  { %5679 = vmatpush1.bf16.msra.mxu1 %v10117_v50 }
0x1d28   :  { %5680 = vmatprep.subr.bf16.mxu1 %v10126_v13 }
0x1d2b   :  { %5681 = vmatpush1.bf16.msra.mxu1 %v10133_v21 }
0x1df1   :  { %v5552_v46 = vpop.f32.mrb[64].mxu1 }
0x1df2   :  { %v5561_v56 = vrot.slane %v5552_v46, 6  ;;  %v5554_v18 = vpop.f32.mrb[65].mxu1 }
0x1df3   :  { %v5556_v43 = vpop.f32.mrb[66].mxu1  ;;  %v5562_v55 = vrot.slane %v5554_v18, 6 }
0x1df4   :  { %v5565_v2 = vadd.f32 %v5561_v56, %v10167_v47  ;;  %v5557_v5 = vpop.f32.mrb[67].mxu1 }
0x1df5   :  { %v5566_v42 = vadd.f32 %v5562_v55, %v10169_v58 }
0x1df6   :  { %v5567_v3 = vmul.f32 0.5, %v5565_v2 }
0x1df7   :  { %v5572_v10 = vmul.f32 0.5, %v5566_v42 }
0x1df8   :  { %6645 = vtanh.f32 %v5567_v3 }
0x1df9   :  { %6647 = vtanh.f32 %v5566_v42 }
0x1dfa   :  { %6649 = vtanh.f32 %v5572_v10  ;;  %v5750_v10 = vld [vmem:[%s10600_s0 + $0x30] sm:$0xff] }
0x1e02   :  { %v6646_v57 = vpop.eup %6645 }
0x1e03   :  { %v5569_v59 = vmul.f32 0.5, %v6646_v57  ;;  %v6648_v24 = vpop.eup %6647  ;;  %v5745_v57 = vld [vmem:[%s10600_s0 + $0x8] sm:$0xff] }
0x1e04   :  { %v6650_v13 = vpop.eup %6649 }
0x1e05   :  { %v5570_v39 = vadd.f32 0.5, %v5569_v59  ;;  %v5574_v41 = vmul.f32 0.5, %v6650_v13 }
0x1e07   :  { %v5580_v28 = vmul.f32 %v6648_v24, %v5570_v39  ;;  %v5579_v62 = vmul.f32 %v5577_v20, %v5570_v39  ;;  %v5575_v38 = vadd.f32 0.5, %v5574_v41  ;;  %v5747_v20 = vld [vmem:[%s10600_s0 + $0x18] sm:$0xff]  ;;  %v5748_v24 = vld [vmem:[%s10600_s0 + $0x20] sm:$0xff] }
0x1e09   :  { %5582 = vrot.lane.b32.xlu1 %v5580_v28, %s6727_s17  ;;  %v5749_v28 = vld [vmem:[%s10600_s0 + $0x28] sm:$0xff] }
0x1e7b   :  { %v5583_v50 = vpop.permute.xlu1 %5582 }
0x1e7c   :  { %v5585_v29 = vadd.f32 %v5583_v50, %v5579_v62  ;;  %v6288_v62 = vpack.c.bf16 %v5749_v28, %v5748_v24  ;;  %v5751_v50 = vld [vmem:[%s10600_s0 + $0x38] sm:$0xff] }
0x1e7e   :  { %6651 = vtanh.f32 %v5585_v29  ;;  %v5655_v49 = vrot.slane %v5585_v29, 6  ;;  %v6291_v29 = vpack.c.bf16 %v5751_v50, %v5750_v10 }
0x1e88   :  { %v6652_v21 = vpop.eup %6651 }
0x1e89   :  { %v5587_v33 = vmul.f32 %v6652_v21, %v5575_v38 }
0x1e8b   :  { %v5588_v34 = vpack.c.bf16 %v5587_v33, %v5587_v33 }
0x1e8d   :  { %v5590_v17 = vrot.slane %v5588_v34, 1 }
0x1e8f   :  { %5591 = vrot.lane.b32.xlu0 %v5590_v17, %s6727_s17 }
0x1f01   :  { %v5592_v60 = vpop.permute.xlu0 %5591 }
0x1f02   :  { %5992 = vmatmul.mubr.msk.bf16.vlgmr.msra.gmra.mrb[64].mxu0 %vm4506_vm4, %v5592_v60 }
0x1f03   :  { %6131 = vmatprep.mubr.msk.f32.mxu0 %vm6726_vm12, %v6725_v6  ;;  %vm5835_vm12 = vcmask 25600  }
0x1fd5   :  { %v5630_v4 = vpop.f32.mrb[64].mxu0 }
0x1fd6   :  { %v5639_v26 = vrot.slane %v5630_v4, 4  ;;  %v5632_v63 = vpop.f32.mrb[65].mxu0 }
0x1fd7   :  { %v5634_v22 = vpop.f32.mrb[66].mxu0  ;;  %v5640_v16 = vrot.slane %v5632_v63, 4 }
0x1fd8   :  { %v5643_v51 = vadd.f32 %v5639_v26, %v10167_v47  ;;  %v5635_v40 = vpop.f32.mrb[67].mxu0 }
0x1fd9   :  { %v5644_v7 = vadd.f32 %v5640_v16, %v10169_v58 }
0x1fda   :  { %v5645_v35 = vmul.f32 0.5, %v5643_v51 }
0x1fdb   :  { %v5650_v0 = vmul.f32 0.5, %v5644_v7 }
0x1fdc   :  { %6653 = vtanh.f32 %v5645_v35 }
0x1fdd   :  { %6655 = vtanh.f32 %v5644_v7 }
0x1fde   :  { %6657 = vtanh.f32 %v5650_v0 }
0x1fe6   :  { %v6654_v61 = vpop.eup %6653 }
0x1fe7   :  { %v5647_v11 = vmul.f32 0.5, %v6654_v61  ;;  %v6656_v12 = vpop.eup %6655 }
0x1fe8   :  { %v6658_v23 = vpop.eup %6657 }
0x1fe9   :  { %v5648_v54 = vadd.f32 0.5, %v5647_v11  ;;  %v5652_v36 = vmul.f32 0.5, %v6658_v23 }
0x1feb   :  { %v5658_v27 = vmul.f32 %v6656_v12, %v5648_v54  ;;  %v5657_v6 = vmul.f32 %v5655_v49, %v5648_v54  ;;  %v5653_v37 = vadd.f32 0.5, %v5652_v36 }
0x1fed   :  { %5660 = vrot.lane.b32.xlu1 %v5658_v27, %s6727_s17 }
0x205f   :  { %v5661_v53 = vpop.permute.xlu1 %5660 }
0x2060   :  { %v5663_v1 = vadd.f32 %v5661_v53, %v5657_v6 }
0x2062   :  { %6659 = vtanh.f32 %v5663_v1  ;;  %v5733_v2 = vrot.slane %v5663_v1, 6 }
0x206c   :  { %v6660_v15 = vpop.eup %6659 }
0x206d   :  { %v5665_v14 = vmul.f32 %v6660_v15, %v5653_v37 }
0x206f   :  { %v5666_v32 = vpack.c.bf16 %v5665_v14, %v5665_v14 }
0x2071   :  { %v5668_v25 = vrot.slane %v5666_v32, 2 }
0x2073   :  { %5669 = vrot.lane.b32.xlu0 %v5668_v25, %s6727_s17 }
0x20e5   :  { %v5670_v44 = vpop.permute.xlu0 %5669 }
0x20e6   :  { %5993 = vmatmul.mubr.msk.bf16.vlgmr.msra.gmra.mrb[68].mxu1 %vm4506_vm4, %v5670_v44 }
0x21b9   :  { %v5708_v31 = vpop.f32.mrb[68].mxu1 }
0x21ba   :  { %v5717_v52 = vrot.slane %v5708_v31, 2  ;;  %v5710_v8 = vpop.f32.mrb[69].mxu1 }
0x21bb   :  { %v5712_v9 = vpop.f32.mrb[70].mxu1  ;;  %v5718_v19 = vrot.slane %v5710_v8, 2 }
0x21bc   :  { %v5721_v30 = vadd.f32 %v5717_v52, %v10167_v47  ;;  %v5713_v48 = vpop.f32.mrb[71].mxu1  ;;  %v5744_v47 = vld [vmem:[%s10600_s0] sm:$0xff] }
0x21bd   :  { %v5722_v56 = vadd.f32 %v5718_v19, %v10169_v58  ;;  %v5746_v58 = vld [vmem:[%s10600_s0 + $0x10] sm:$0xff]  ;;  %v6282_v59 = vpack.c.bf16 %v5745_v57, %v5744_v47 }
0x21be   :  { %v5723_v46 = vmul.f32 0.5, %v5721_v30  ;;  %v6285_v39 = vpack.c.bf16 %v5747_v20, %v5746_v58 }
0x21bf   :  { %6283 = vmatpush3.bf16.msra.mxu0 %v6282_v59  ;;  %v5728_v13 = vmul.f32 0.5, %v5722_v56 }
0x21c0   :  { %6661 = vtanh.f32 %v5723_v46  ;;  %6284 = vmatprep.subr.bf16.mxu0 %v6724_v45 }
0x21c1   :  { %6663 = vtanh.f32 %v5722_v56 }
0x21c2   :  { %6665 = vtanh.f32 %v5728_v13 }
0x21c3   :  { %6286 = vmatpush3.bf16.msra.mxu0 %v6285_v39 }
0x21c4   :  { %6287 = vmatprep.subr.bf16.mxu0 %v6724_v45 }
0x21c7   :  { %6289 = vmatpush3.bf16.msra.mxu0 %v6288_v62 }
0x21c8   :  { %6290 = vmatprep.subr.bf16.mxu0 %v6724_v45  ;;  %v5994_v45 = vld [vmem:[%s10601_s21] ss:$0 sm:$0xff] }
0x21ca   :  { %v6662_v18 = vpop.eup %6661 }
0x21cb   :  { %v5725_v43 = vmul.f32 0.5, %v6662_v18  ;;  %v6664_v5 = vpop.eup %6663  ;;  %6292 = vmatpush3.bf16.msra.mxu0 %v6291_v29 }
0x21cc   :  { %v6666_v21 = vpop.eup %6665 }
0x21cd   :  { %v5726_v55 = vadd.f32 0.5, %v5725_v43  ;;  %v5730_v33 = vmul.f32 0.5, %v6666_v21 }
0x21cf   :  { %v5736_v3 = vmul.f32 %v6664_v5, %v5726_v55  ;;  %v5735_v42 = vmul.f32 %v5733_v2, %v5726_v55  ;;  %v5731_v34 = vadd.f32 0.5, %v5730_v33 }
0x21d1   :  { %5738 = vrot.lane.b32.xlu1 %v5736_v3, %s6727_s17 }
0x2243   :  { %v5739_v41 = vpop.permute.xlu1 %5738 }
0x2244   :  { %v5741_v38 = vadd.f32 %v5739_v41, %v5735_v42 }
0x2246   :  { %6667 = vtanh.f32 %v5741_v38 }
0x2250   :  { %v6668_v17 = vpop.eup %6667 }
0x2251   :  { %v5743_v60 = vmul.f32 %v6668_v17, %v5731_v34 }
0x2253   :  { %v5760_v4 = vrot.slane %v5743_v60, 6 }
0x2255   :  { %5761 = vrot.lane.b32.xlu0 %v5760_v4, %s6727_s17 }
0x22c7   :  { %v5762_v26 = vpop.permute.xlu0 %5761 }
0x22c8   :  { %6132 = vmatmul.mubr.msk.f32.vlgmr.msra.gmra.mrb[38].mxu0 %vm4506_vm4, %v5762_v26 }
0x239b   :  { %v5831_v63 = vpop.f32.mrb[38].mxu0 }
0x239c   :  { %v5832_v22 = vadd.f32 %v5994_v45, %v5831_v63  ;;  %v6133_v51 = vpop.f32.mrb[39].mxu0 }
0x239e   :  { %5836 = vst.msk [vmem:[#allocation6] sm:$0x3] %vm5835_vm12, %v5832_v22 }
0x239f   :  { %6688 = shalt.err (!%p6685_p4)
}
0x23a0   :  { %s10602_s29 = sld [smem:[#allocation44_spill]] }
0x23a6   :  { %s6689_s4 = scalar_lea.hbm %s10602_s29, 32 }
0x23a7   :  { %p6690_p5 = scmp.ne.s32.totalorder %s10602_s29, %s6689_s4  ;;  %p6693_p6 = scmp.lt.u32.totalorder %s6689_s4, %s10602_s29 }
0x23a9   :  { %p6695_p7 = pnand %p6693_p6, %p6690_p5 }
0x23ab   :  { %6698 = shalt.err (!%p6695_p7)
}
0x23ac   :  { %5846 = dma.vmem_to_hbm [thread:$0]  %s5844_s18, 32, %s10602_s29, [#allocation7]  }
0x23ad   :  { %6699 = dma.done.wait [#allocation7], 32  }
0x23ae   :  { %6700 = vsyncadd [#allocation7], 4294967264 }
0x23af   :  { %5850 = vsyncpa [#allocation7], 1 }

</bundles_post_ra>
